<compile_context>
chip_gen: v7x
topology: tpu7x:2x2x1
jax: 0.10.0
libtpu: 0.0.40
codegen_flags: <defaults>
</compile_context>

<pallas_src>
from functools import partial

import jax
import jax.numpy as jnp
from jax import lax
from jax.experimental import pallas as pl
from jax.experimental.pallas import tpu as pltpu


# ----------------------------- Pallas kernels ------------------------------

def _head_kernel(x_ref, w1_ref, b1_ref, w2_ref, a_ref, y2_ref):
    """Fused cv1 (1x1 conv + folded BN + SiLU) and cv2 (plain 1x1 conv, BN-scale folded)."""
    x = x_ref[...]
    t = jnp.dot(x, w1_ref[...], preferred_element_type=jnp.float32) + b1_ref[...]
    a_ref[...] = (t * jax.nn.sigmoid(t)).astype(a_ref.dtype)
    y2_ref[...] = jnp.dot(x, w2_ref[...],
                          preferred_element_type=jnp.float32).astype(y2_ref.dtype)


def _tail_kernel(z_ref, y2_ref, w3_ref, bbn1_ref, bbn2_ref,
                 w4a_ref, w4b_ref, b4_ref, o_ref):
    """Fused cv3 + post-concat BN + SiLU + cv4 (+BN+SiLU).

    The channel concat is implicit: cat([u1,u2]) @ W4 == u1 @ W4a + u2 @ W4b,
    so the 2*c_ activation never touches HBM.
    """
    u1 = jnp.dot(z_ref[...], w3_ref[...],
                 preferred_element_type=jnp.float32) + bbn1_ref[...]
    u1 = u1 * jax.nn.sigmoid(u1)
    u2 = y2_ref[...].astype(jnp.float32) + bbn2_ref[...]
    u2 = u2 * jax.nn.sigmoid(u2)
    t = (jnp.dot(u1, w4a_ref[...], preferred_element_type=jnp.float32)
         + jnp.dot(u2, w4b_ref[...], preferred_element_type=jnp.float32)
         + b4_ref[...])
    o_ref[...] = (t * jax.nn.sigmoid(t)).astype(o_ref.dtype)


def _conv3x3_body(x_ref, w_ref, b_ref, r_ref, o_ref, xp_ref):
    """3x3 conv (pad=1, stride=1) + folded-BN bias + SiLU [+ residual].

    x_ref : (1, H, W, C)         input image (one batch element)
    w_ref : (3, 3, C, Cout)      HWIO weights with BN scale folded in
    b_ref : (1, Cout)            folded BN bias
    r_ref : (1, H*W, Cout)|None  residual (added after SiLU, torch: x + cv2(cv1(x)))
    o_ref : (1, H*W, Cout)       lane-dense flattened output
    xp_ref: VMEM scratch (H+2, W+2, C) -- zero padding done in VMEM, not in HBM.
    """
    H, W, C = x_ref.shape[1], x_ref.shape[2], x_ref.shape[3]
    Cout = o_ref.shape[2]

    xp_ref[...] = jnp.zeros_like(xp_ref)
    xp_ref[1:H + 1, 1:W + 1, :] = x_ref[0]

    acc = jnp.zeros((H * W, Cout), jnp.float32)
    for dy in range(3):
        for dx in range(3):
            patch = xp_ref[dy:dy + H, dx:dx + W, :].reshape(H * W, C)
            acc = acc + jnp.dot(patch, w_ref[dy, dx],
                                preferred_element_type=jnp.float32)
    y = acc + b_ref[...]
    y = y * jax.nn.sigmoid(y)
    if r_ref is not None:
        y = y + r_ref[0].astype(jnp.float32)
    o_ref[0] = y.astype(o_ref.dtype)


def _conv3x3_kernel(x_ref, w_ref, b_ref, o_ref, xp_ref):
    _conv3x3_body(x_ref, w_ref, b_ref, None, o_ref, xp_ref)


def _conv3x3_res_kernel(x_ref, w_ref, b_ref, r_ref, o_ref, xp_ref):
    _conv3x3_body(x_ref, w_ref, b_ref, r_ref, o_ref, xp_ref)


# ----------------------------- pallas_call wrappers -------------------------

def _csp_head(x2d, w1, b1, w2, tm=256):
    """x2d: (M, c1) -> (a, y2_scaled), each (M, c_)."""
    M, c1 = x2d.shape
    c_ = w1.shape[1]
    tm = min(tm, M)
    return pl.pallas_call(
        _head_kernel,
        out_shape=(jax.ShapeDtypeStruct((M, c_), x2d.dtype),
                   jax.ShapeDtypeStruct((M, c_), x2d.dtype)),
        grid=(pl.cdiv(M, tm),),
        in_specs=[
            pl.BlockSpec((tm, c1), lambda i: (i, 0)),
            pl.BlockSpec((c1, c_), lambda i: (0, 0)),
            pl.BlockSpec((1, c_), lambda i: (0, 0)),
            pl.BlockSpec((c1, c_), lambda i: (0, 0)),
        ],
        out_specs=(pl.BlockSpec((tm, c_), lambda i: (i, 0)),
                   pl.BlockSpec((tm, c_), lambda i: (i, 0))),
        compiler_params=pltpu.CompilerParams(dimension_semantics=("parallel",)),
    )(x2d, w1, b1, w2)


def _csp_tail(z2d, y2s, w3, bbn1, bbn2, w4a, w4b, b4, tm=256):
    """z2d, y2s: (M, c_) -> out: (M, c2)."""
    M, c_ = z2d.shape
    c2 = b4.shape[1]
    tm = min(tm, M)
    return pl.pallas_call(
        _tail_kernel,
        out_shape=jax.ShapeDtypeStruct((M, c2), z2d.dtype),
        grid=(pl.cdiv(M, tm),),
        in_specs=[
            pl.BlockSpec((tm, c_), lambda i: (i, 0)),
            pl.BlockSpec((tm, c_), lambda i: (i, 0)),
            pl.BlockSpec((c_, c_), lambda i: (0, 0)),
            pl.BlockSpec((1, c_), lambda i: (0, 0)),
            pl.BlockSpec((1, c_), lambda i: (0, 0)),
            pl.BlockSpec((c_, c2), lambda i: (0, 0)),
            pl.BlockSpec((c_, c2), lambda i: (0, 0)),
            pl.BlockSpec((1, c2), lambda i: (0, 0)),
        ],
        out_specs=pl.BlockSpec((tm, c2), lambda i: (i, 0)),
        compiler_params=pltpu.CompilerParams(dimension_semantics=("parallel",)),
    )(z2d, y2s, w3, bbn1, bbn2, w4a, w4b, b4)


def _conv3x3_bn_silu(x_nhwc, w_hwio, b, residual=None):
    """x: (N, H, W, C); w: (3,3,C,Cout); b: (1,Cout); residual: (N, H*W, Cout) or None.

    Returns flattened (N, H*W, Cout).
    """
    N, H, W, C = x_nhwc.shape
    Cout = w_hwio.shape[-1]
    kernel = _conv3x3_res_kernel if residual is not None else _conv3x3_kernel
    in_specs = [
        pl.BlockSpec((1, H, W, C), lambda n: (n, 0, 0, 0)),
        pl.BlockSpec((3, 3, C, Cout), lambda n: (0, 0, 0, 0)),
        pl.BlockSpec((1, Cout), lambda n: (0, 0)),
    ]
    args = [x_nhwc, w_hwio, b]
    if residual is not None:
        in_specs.append(pl.BlockSpec((1, H * W, Cout), lambda n: (n, 0, 0)))
        args.append(residual)
    return pl.pallas_call(
        kernel,
        out_shape=jax.ShapeDtypeStruct((N, H * W, Cout), x_nhwc.dtype),
        grid=(N,),
        in_specs=in_specs,
        out_specs=pl.BlockSpec((1, H * W, Cout), lambda n: (n, 0, 0)),
        scratch_shapes=[pltpu.VMEM((H + 2, W + 2, C), x_nhwc.dtype)],
        compiler_params=pltpu.CompilerParams(dimension_semantics=("parallel",)),
    )(*args)


# ----------------------------- Module wrapper --------------------------------

@partial(jax.jit, static_argnames=("shortcut", "tm"))
def bottleneck_csp_forward(x_nchw, folded, shortcut=True, tm=256):
    """BottleneckCSP forward. Input/output are NCHW (PyTorch convention)."""
    N, c1, H, W = x_nchw.shape
    c_ = folded["w1"].shape[1]
    c2 = folded["b4"].shape[1]
    M = N * H * W

    x2d = x_nchw.transpose(0, 2, 3, 1).reshape(M, c1)          # NHWC, flattened
    a2d, y2s = _csp_head(x2d, folded["w1"], folded["b1"], folded["w2"], tm=tm)

    # Bottleneck chain m (3x3 conv + BN + SiLU twice, residual add)
    z_flat = a2d.reshape(N, H * W, c_)
    z_img = a2d.reshape(N, H, W, c_)
    for blk in folded["m"]:
        t = _conv3x3_bn_silu(z_img, blk["w1"], blk["b1"], residual=None)
        z_flat = _conv3x3_bn_silu(t.reshape(N, H, W, c_), blk["w2"], blk["b2"],
                                  residual=z_flat if shortcut else None)
        z_img = z_flat.reshape(N, H, W, c_)

    out2d = _csp_tail(z_flat.reshape(M, c_), y2s, folded["w3"], folded["bbn1"],
                      folded["bbn2"], folded["w4a"], folded["w4b"], folded["b4"], tm=tm)
    return out2d.reshape(N, H, W, c2).transpose(0, 3, 1, 2)


# ----------------------------- Param init / folding --------------------------

def init_params(key, c1, c2, n=1, e=0.5):
    """Raw (unfolded) parameters, PyTorch layouts: conv weights OIHW, BN (g,b,mean,var)."""
    c_ = int(c2 * e)
    keys = iter(jax.random.split(key, 16 + 10 * n))

    def bn_params(c):
        g = 1.0 + 0.1 * jax.random.normal(next(keys), (c,), jnp.float32)
        b = 0.1 * jax.random.normal(next(keys), (c,), jnp.float32)
        m = 0.1 * jax.random.normal(next(keys), (c,), jnp.float32)
        v = jax.random.uniform(next(keys), (c,), jnp.float32, minval=0.5, maxval=1.5)
        return (g, b, m, v)

    p = {}
    p["cv1_w"] = 0.3 * jax.random.normal(next(keys), (c_, c1, 1, 1), jnp.float32)
    p["cv1_bn"] = bn_params(c_)
    p["cv2_w"] = 0.3 * jax.random.normal(next(keys), (c_, c1, 1, 1), jnp.float32)
    p["cv3_w"] = 0.3 * jax.random.normal(next(keys), (c_, c_, 1, 1), jnp.float32)
    p["cv4_w"] = 0.2 * jax.random.normal(next(keys), (c2, 2 * c_, 1, 1), jnp.float32)
    p["cv4_bn"] = bn_params(c2)
    p["bn"] = bn_params(2 * c_)
    p["m"] = []
    for _ in range(n):
        blk = {
            "cv1_w": 0.2 * jax.random.normal(next(keys), (c_, c_, 3, 3), jnp.float32),
            "cv1_bn": bn_params(c_),
            "cv2_w": 0.2 * jax.random.normal(next(keys), (c_, c_, 3, 3), jnp.float32),
            "cv2_bn": bn_params(c_),
        }
        p["m"].append(blk)
    return p


def fold_params(p, eps=1e-5):
    """Fold all BN scales into conv weights (eval mode); keep only per-channel biases."""
    def fold(g, b, m, v):
        s = g / jnp.sqrt(v + eps)
        return s, b - m * s

    c_ = p["cv3_w"].shape[0]
    out = {}

    s1, b1 = fold(*p["cv1_bn"])
    out["w1"] = p["cv1_w"][:, :, 0, 0].T * s1[None, :]                  # (c1, c_)
    out["b1"] = b1.reshape(1, -1)

    sbn, bbn = fold(*p["bn"])                                           # post-concat BN
    out["w3"] = p["cv3_w"][:, :, 0, 0].T * sbn[None, :c_]               # y1 half
    out["bbn1"] = bbn[:c_].reshape(1, -1)
    out["w2"] = p["cv2_w"][:, :, 0, 0].T * sbn[None, c_:]               # y2 half
    out["bbn2"] = bbn[c_:].reshape(1, -1)

    s4, b4 = fold(*p["cv4_bn"])
    w4 = p["cv4_w"][:, :, 0, 0].T * s4[None, :]                         # (2c_, c2)
    out["w4a"] = w4[:c_]
    out["w4b"] = w4[c_:]
    out["b4"] = b4.reshape(1, -1)

    out["m"] = []
    for blk in p["m"]:
        sa, ba = fold(*blk["cv1_bn"])
        sb, bb = fold(*blk["cv2_bn"])
        out["m"].append(dict(
            w1=blk["cv1_w"].transpose(2, 3, 1, 0) * sa,                 # (3,3,Cin,Cout)
            b1=ba.reshape(1, -1),
            w2=blk["cv2_w"].transpose(2, 3, 1, 0) * sb,
            b2=bb.reshape(1, -1),
        ))
    return out


# ----------------------------- Pure-JAX reference ----------------------------

def _silu(x):
    return x * jax.nn.sigmoid(x)


def _conv2d_nchw(x, w, padding=0):
    return lax.conv_general_dilated(
        x, w, window_strides=(1, 1),
        padding=((padding, padding), (padding, padding)),
        dimension_numbers=("NCHW", "OIHW", "NCHW"))


def _bn_nchw(x, bn, eps):
    g, b, m, v = bn
    inv = g / jnp.sqrt(v + eps)
    return (x - m[None, :, None, None]) * inv[None, :, None, None] + b[None, :, None, None]


def bottleneck_csp_reference(x, p, shortcut=True, eps=1e-5):
    def conv_bn_silu(h, w, bn, pad):
        return _silu(_bn_nchw(_conv2d_nchw(h, w, pad), bn, eps))

    a = conv_bn_silu(x, p["cv1_w"], p["cv1_bn"], 0)
    z = a
    for blk in p["m"]:
        t = conv_bn_silu(z, blk["cv1_w"], blk["cv1_bn"], 1)
        t = conv_bn_silu(t, blk["cv2_w"], blk["cv2_bn"], 1)
        z = z + t if shortcut else t
    y1 = _conv2d_nchw(z, p["cv3_w"], 0)
    y2 = _conv2d_nchw(x, p["cv2_w"], 0)
    cat = jnp.concatenate([y1, y2], axis=1)
    cat = _silu(_bn_nchw(cat, p["bn"], eps))
    return conv_bn_silu(cat, p["cv4_w"], p["cv4_bn"], 0)


# ----------------------------- Test ------------------------------------------

if __name__ == "__main__":
    key = jax.random.PRNGKey(0)
    kx, kp = jax.random.split(key)
    N, C1, H, W = 2, 8, 16, 16     # c1=8, e=0.5 -> c_ = 4
    C2 = 8
    n_rep = 1

    x = jax.random.normal(kx, (N, C1, H, W), jnp.float32)
    raw = init_params(kp, C1, C2, n=n_rep)
    folded = fold_params(raw)

    out = jax.block_until_ready(bottleneck_csp_forward(x, folded, shortcut=True))
    ref = jax.block_until_ready(bottleneck_csp_reference(x, raw, shortcut=True))

    assert out.shape == (N, C2, H, W), out.shape
    max_err = float(jnp.max(jnp.abs(out - ref)))
    assert jnp.allclose(out, ref, atol=2e-4, rtol=2e-4), max_err
    print("KERNEL_OK")
</pallas_src>

<mosaic_0001>
module attributes {stable_mosaic.version = 11 : i64} {
  func.func @_conv3x3_kernel(%arg0: i32, %arg1: memref<1x16x16x4xf32, #tpu.memory_space<vmem>>, %arg2: memref<3x3x4x4xf32, #tpu.memory_space<vmem>>, %arg3: memref<1x4xf32, #tpu.memory_space<vmem>>, %arg4: memref<1x256x4xf32, #tpu.memory_space<vmem>>, %arg5: memref<18x18x4xf32, #tpu.memory_space<vmem>>) attributes {dimension_semantics = [#tpu.dimension_semantics<parallel>], iteration_bounds = array<i64: 2>, scalar_prefetch = 0 : i64, scratch_operands = 1 : i64, tpu.core_type = #tpu.core_type<tc>, window_params = [{transform_indices = @transform_0, window_bounds = array<i64: 1, 16, 16, 4>}, {pipeline_mode = #tpu.pipeline_mode<synchronous>, transform_indices = @transform_1, window_bounds = array<i64: 3, 3, 4, 4>}, {pipeline_mode = #tpu.pipeline_mode<synchronous>, transform_indices = @transform_2, window_bounds = array<i64: 1, 4>}, {transform_indices = @transform_3, window_bounds = array<i64: 1, 256, 4>}]} {
    %cst = arith.constant 0.000000e+00 : f32
    %0 = vector.broadcast %cst : f32 to vector<18x18x4xf32>
    %c0 = arith.constant 0 : index
    %c0_0 = arith.constant 0 : index
    %c0_1 = arith.constant 0 : index
    %1 = vector.load %arg5[%c0, %c0_0, %c0_1] : memref<18x18x4xf32, #tpu.memory_space<vmem>>, vector<18x18x4xf32>
    tpu.vector_store %arg5[%c0, %c0_0, %c0_1], %0 {strides = array<i32>} : memref<18x18x4xf32, #tpu.memory_space<vmem>>, vector<18x18x4xf32>,
    %c0_2 = arith.constant 0 : index
    %c0_3 = arith.constant 0 : index
    %c0_4 = arith.constant 0 : index
    %c0_5 = arith.constant 0 : index
    %2 = vector.load %arg1[%c0_2, %c0_3, %c0_4, %c0_5] : memref<1x16x16x4xf32, #tpu.memory_space<vmem>>, vector<1x16x16x4xf32>
    %3 = vector.shape_cast %2 : vector<1x16x16x4xf32> to vector<16x16x4xf32>
    %c1 = arith.constant 1 : index
    %c1_6 = arith.constant 1 : index
    %c0_7 = arith.constant 0 : index
    %4 = vector.load %arg5[%c1, %c1_6, %c0_7] : memref<18x18x4xf32, #tpu.memory_space<vmem>>, vector<16x16x4xf32>
    tpu.vector_store %arg5[%c1, %c1_6, %c0_7], %3 {strides = array<i32>} : memref<18x18x4xf32, #tpu.memory_space<vmem>>, vector<16x16x4xf32>,
    %cst_8 = arith.constant 0.000000e+00 : f32
    %5 = vector.broadcast %cst_8 : f32 to vector<256x4xf32>
    %c0_9 = arith.constant 0 : index
    %c0_10 = arith.constant 0 : index
    %c0_11 = arith.constant 0 : index
    %6 = vector.load %arg5[%c0_9, %c0_10, %c0_11] : memref<18x18x4xf32, #tpu.memory_space<vmem>>, vector<16x16x4xf32>
    %7 = vector.shape_cast %6 : vector<16x16x4xf32> to vector<256x4xf32>
    %c0_12 = arith.constant 0 : index
    %c0_13 = arith.constant 0 : index
    %c0_14 = arith.constant 0 : index
    %c0_15 = arith.constant 0 : index
    %8 = vector.load %arg2[%c0_12, %c0_13, %c0_14, %c0_15] : memref<3x3x4x4xf32, #tpu.memory_space<vmem>>, vector<1x1x4x4xf32>
    %9 = vector.shape_cast %8 : vector<1x1x4x4xf32> to vector<4x4xf32>
    %cst_16 = arith.constant dense<0.000000e+00> : vector<256x4xf32>
    %10 = tpu.matmul %7, %9, %cst_16 {dimension_numbers = #tpu.dot_dimension_numbers<[1], [0], [0], [1], [0, 0, 1, 1], [], []>} : vector<256x4xf32>, vector<4x4xf32>, vector<256x4xf32> -> vector<256x4xf32>
    %11 = arith.addf %5, %10 : vector<256x4xf32>
    %c0_17 = arith.constant 0 : index
    %c1_18 = arith.constant 1 : index
    %c0_19 = arith.constant 0 : index
    %12 = vector.load %arg5[%c0_17, %c1_18, %c0_19] : memref<18x18x4xf32, #tpu.memory_space<vmem>>, vector<16x16x4xf32>
    %13 = vector.shape_cast %12 : vector<16x16x4xf32> to vector<256x4xf32>
    %c0_20 = arith.constant 0 : index
    %c1_21 = arith.constant 1 : index
    %c0_22 = arith.constant 0 : index
    %c0_23 = arith.constant 0 : index
    %14 = vector.load %arg2[%c0_20, %c1_21, %c0_22, %c0_23] : memref<3x3x4x4xf32, #tpu.memory_space<vmem>>, vector<1x1x4x4xf32>
    %15 = vector.shape_cast %14 : vector<1x1x4x4xf32> to vector<4x4xf32>
    %cst_24 = arith.constant dense<0.000000e+00> : vector<256x4xf32>
    %16 = tpu.matmul %13, %15, %cst_24 {dimension_numbers = #tpu.dot_dimension_numbers<[1], [0], [0], [1], [0, 0, 1, 1], [], []>} : vector<256x4xf32>, vector<4x4xf32>, vector<256x4xf32> -> vector<256x4xf32>
    %17 = arith.addf %11, %16 : vector<256x4xf32>
    %c0_25 = arith.constant 0 : index
    %c2 = arith.constant 2 : index
    %c0_26 = arith.constant 0 : index
    %18 = vector.load %arg5[%c0_25, %c2, %c0_26] : memref<18x18x4xf32, #tpu.memory_space<vmem>>, vector<16x16x4xf32>
    %19 = vector.shape_cast %18 : vector<16x16x4xf32> to vector<256x4xf32>
    %c0_27 = arith.constant 0 : index
    %c2_28 = arith.constant 2 : index
    %c0_29 = arith.constant 0 : index
    %c0_30 = arith.constant 0 : index
    %20 = vector.load %arg2[%c0_27, %c2_28, %c0_29, %c0_30] : memref<3x3x4x4xf32, #tpu.memory_space<vmem>>, vector<1x1x4x4xf32>
    %21 = vector.shape_cast %20 : vector<1x1x4x4xf32> to vector<4x4xf32>
    %cst_31 = arith.constant dense<0.000000e+00> : vector<256x4xf32>
    %22 = tpu.matmul %19, %21, %cst_31 {dimension_numbers = #tpu.dot_dimension_numbers<[1], [0], [0], [1], [0, 0, 1, 1], [], []>} : vector<256x4xf32>, vector<4x4xf32>, vector<256x4xf32> -> vector<256x4xf32>
    %23 = arith.addf %17, %22 : vector<256x4xf32>
    %c1_32 = arith.constant 1 : index
    %c0_33 = arith.constant 0 : index
    %c0_34 = arith.constant 0 : index
    %24 = vector.load %arg5[%c1_32, %c0_33, %c0_34] : memref<18x18x4xf32, #tpu.memory_space<vmem>>, vector<16x16x4xf32>
    %25 = vector.shape_cast %24 : vector<16x16x4xf32> to vector<256x4xf32>
    %c1_35 = arith.constant 1 : index
    %c0_36 = arith.constant 0 : index
    %c0_37 = arith.constant 0 : index
    %c0_38 = arith.constant 0 : index
    %26 = vector.load %arg2[%c1_35, %c0_36, %c0_37, %c0_38] : memref<3x3x4x4xf32, #tpu.memory_space<vmem>>, vector<1x1x4x4xf32>
    %27 = vector.shape_cast %26 : vector<1x1x4x4xf32> to vector<4x4xf32>
    %cst_39 = arith.constant dense<0.000000e+00> : vector<256x4xf32>
    %28 = tpu.matmul %25, %27, %cst_39 {dimension_numbers = #tpu.dot_dimension_numbers<[1], [0], [0], [1], [0, 0, 1, 1], [], []>} : vector<256x4xf32>, vector<4x4xf32>, vector<256x4xf32> -> vector<256x4xf32>
    %29 = arith.addf %23, %28 : vector<256x4xf32>
    %c1_40 = arith.constant 1 : index
    %c1_41 = arith.constant 1 : index
    %c0_42 = arith.constant 0 : index
    %30 = vector.load %arg5[%c1_40, %c1_41, %c0_42] : memref<18x18x4xf32, #tpu.memory_space<vmem>>, vector<16x16x4xf32>
    %31 = vector.shape_cast %30 : vector<16x16x4xf32> to vector<256x4xf32>
    %c1_43 = arith.constant 1 : index
    %c1_44 = arith.constant 1 : index
    %c0_45 = arith.constant 0 : index
    %c0_46 = arith.constant 0 : index
    %32 = vector.load %arg2[%c1_43, %c1_44, %c0_45, %c0_46] : memref<3x3x4x4xf32, #tpu.memory_space<vmem>>, vector<1x1x4x4xf32>
    %33 = vector.shape_cast %32 : vector<1x1x4x4xf32> to vector<4x4xf32>
    %cst_47 = arith.constant dense<0.000000e+00> : vector<256x4xf32>
    %34 = tpu.matmul %31, %33, %cst_47 {dimension_numbers = #tpu.dot_dimension_numbers<[1], [0], [0], [1], [0, 0, 1, 1], [], []>} : vector<256x4xf32>, vector<4x4xf32>, vector<256x4xf32> -> vector<256x4xf32>
    %35 = arith.addf %29, %34 : vector<256x4xf32>
    %c1_48 = arith.constant 1 : index
    %c2_49 = arith.constant 2 : index
    %c0_50 = arith.constant 0 : index
    %36 = vector.load %arg5[%c1_48, %c2_49, %c0_50] : memref<18x18x4xf32, #tpu.memory_space<vmem>>, vector<16x16x4xf32>
    %37 = vector.shape_cast %36 : vector<16x16x4xf32> to vector<256x4xf32>
    %c1_51 = arith.constant 1 : index
    %c2_52 = arith.constant 2 : index
    %c0_53 = arith.constant 0 : index
    %c0_54 = arith.constant 0 : index
    %38 = vector.load %arg2[%c1_51, %c2_52, %c0_53, %c0_54] : memref<3x3x4x4xf32, #tpu.memory_space<vmem>>, vector<1x1x4x4xf32>
    %39 = vector.shape_cast %38 : vector<1x1x4x4xf32> to vector<4x4xf32>
    %cst_55 = arith.constant dense<0.000000e+00> : vector<256x4xf32>
    %40 = tpu.matmul %37, %39, %cst_55 {dimension_numbers = #tpu.dot_dimension_numbers<[1], [0], [0], [1], [0, 0, 1, 1], [], []>} : vector<256x4xf32>, vector<4x4xf32>, vector<256x4xf32> -> vector<256x4xf32>
    %41 = arith.addf %35, %40 : vector<256x4xf32>
    %c2_56 = arith.constant 2 : index
    %c0_57 = arith.constant 0 : index
    %c0_58 = arith.constant 0 : index
    %42 = vector.load %arg5[%c2_56, %c0_57, %c0_58] : memref<18x18x4xf32, #tpu.memory_space<vmem>>, vector<16x16x4xf32>
    %43 = vector.shape_cast %42 : vector<16x16x4xf32> to vector<256x4xf32>
    %c2_59 = arith.constant 2 : index
    %c0_60 = arith.constant 0 : index
    %c0_61 = arith.constant 0 : index
    %c0_62 = arith.constant 0 : index
    %44 = vector.load %arg2[%c2_59, %c0_60, %c0_61, %c0_62] : memref<3x3x4x4xf32, #tpu.memory_space<vmem>>, vector<1x1x4x4xf32>
    %45 = vector.shape_cast %44 : vector<1x1x4x4xf32> to vector<4x4xf32>
    %cst_63 = arith.constant dense<0.000000e+00> : vector<256x4xf32>
    %46 = tpu.matmul %43, %45, %cst_63 {dimension_numbers = #tpu.dot_dimension_numbers<[1], [0], [0], [1], [0, 0, 1, 1], [], []>} : vector<256x4xf32>, vector<4x4xf32>, vector<256x4xf32> -> vector<256x4xf32>
    %47 = arith.addf %41, %46 : vector<256x4xf32>
    %c2_64 = arith.constant 2 : index
    %c1_65 = arith.constant 1 : index
    %c0_66 = arith.constant 0 : index
    %48 = vector.load %arg5[%c2_64, %c1_65, %c0_66] : memref<18x18x4xf32, #tpu.memory_space<vmem>>, vector<16x16x4xf32>
    %49 = vector.shape_cast %48 : vector<16x16x4xf32> to vector<256x4xf32>
    %c2_67 = arith.constant 2 : index
    %c1_68 = arith.constant 1 : index
    %c0_69 = arith.constant 0 : index
    %c0_70 = arith.constant 0 : index
    %50 = vector.load %arg2[%c2_67, %c1_68, %c0_69, %c0_70] : memref<3x3x4x4xf32, #tpu.memory_space<vmem>>, vector<1x1x4x4xf32>
    %51 = vector.shape_cast %50 : vector<1x1x4x4xf32> to vector<4x4xf32>
    %cst_71 = arith.constant dense<0.000000e+00> : vector<256x4xf32>
    %52 = tpu.matmul %49, %51, %cst_71 {dimension_numbers = #tpu.dot_dimension_numbers<[1], [0], [0], [1], [0, 0, 1, 1], [], []>} : vector<256x4xf32>, vector<4x4xf32>, vector<256x4xf32> -> vector<256x4xf32>
    %53 = arith.addf %47, %52 : vector<256x4xf32>
    %c2_72 = arith.constant 2 : index
    %c2_73 = arith.constant 2 : index
    %c0_74 = arith.constant 0 : index
    %54 = vector.load %arg5[%c2_72, %c2_73, %c0_74] : memref<18x18x4xf32, #tpu.memory_space<vmem>>, vector<16x16x4xf32>
    %55 = vector.shape_cast %54 : vector<16x16x4xf32> to vector<256x4xf32>
    %c2_75 = arith.constant 2 : index
    %c2_76 = arith.constant 2 : index
    %c0_77 = arith.constant 0 : index
    %c0_78 = arith.constant 0 : index
    %56 = vector.load %arg2[%c2_75, %c2_76, %c0_77, %c0_78] : memref<3x3x4x4xf32, #tpu.memory_space<vmem>>, vector<1x1x4x4xf32>
    %57 = vector.shape_cast %56 : vector<1x1x4x4xf32> to vector<4x4xf32>
    %cst_79 = arith.constant dense<0.000000e+00> : vector<256x4xf32>
    %58 = tpu.matmul %55, %57, %cst_79 {dimension_numbers = #tpu.dot_dimension_numbers<[1], [0], [0], [1], [0, 0, 1, 1], [], []>} : vector<256x4xf32>, vector<4x4xf32>, vector<256x4xf32> -> vector<256x4xf32>
    %59 = arith.addf %53, %58 : vector<256x4xf32>
    %c0_80 = arith.constant 0 : index
    %c0_81 = arith.constant 0 : index
    %60 = vector.load %arg3[%c0_80, %c0_81] : memref<1x4xf32, #tpu.memory_space<vmem>>, vector<1x4xf32>
    %61 = vector.broadcast %60 : vector<1x4xf32> to vector<256x4xf32>
    %62 = arith.addf %59, %61 : vector<256x4xf32>
    %63 = arith.negf %62 : vector<256x4xf32>
    %64 = math.exp %63 : vector<256x4xf32>
    %cst_82 = arith.constant 1.000000e+00 : f32
    %65 = vector.broadcast %cst_82 : f32 to vector<256x4xf32>
    %66 = arith.addf %65, %64 : vector<256x4xf32>
    %67 = arith.divf %65, %66 : vector<256x4xf32>
    %68 = arith.mulf %62, %67 : vector<256x4xf32>
    %c0_83 = arith.constant 0 : index
    %c0_84 = arith.constant 0 : index
    %c0_85 = arith.constant 0 : index
    %69 = vector.load %arg4[%c0_83, %c0_84, %c0_85] : memref<1x256x4xf32, #tpu.memory_space<vmem>>, vector<1x256x4xf32>
    %70 = vector.shape_cast %69 : vector<1x256x4xf32> to vector<256x4xf32>
    %71 = vector.shape_cast %68 : vector<256x4xf32> to vector<1x256x4xf32>
    tpu.vector_store %arg4[%c0_83, %c0_84, %c0_85], %71 {strides = array<i32>} : memref<1x256x4xf32, #tpu.memory_space<vmem>>, vector<1x256x4xf32>,
    return
  }
  func.func @transform_0(%arg0: i32) -> (i32, i32, i32, i32) {
    %c0_i32 = arith.constant 0 : i32
    %c0_i32_0 = arith.constant 0 : i32
    %c0_i32_1 = arith.constant 0 : i32
    %c0_i32_2 = arith.constant 0 : i32
    return %arg0, %c0_i32, %c0_i32_0, %c0_i32_1 : i32, i32, i32, i32
  }
  func.func @transform_1(%arg0: i32) -> (i32, i32, i32, i32) {
    %c0_i32 = arith.constant 0 : i32
    %c0_i32_0 = arith.constant 0 : i32
    %c0_i32_1 = arith.constant 0 : i32
    %c0_i32_2 = arith.constant 0 : i32
    %c0_i32_3 = arith.constant 0 : i32
    return %c0_i32, %c0_i32_0, %c0_i32_1, %c0_i32_2 : i32, i32, i32, i32
  }
  func.func @transform_2(%arg0: i32) -> (i32, i32) {
    %c0_i32 = arith.constant 0 : i32
    %c0_i32_0 = arith.constant 0 : i32
    %c0_i32_1 = arith.constant 0 : i32
    return %c0_i32, %c0_i32_0 : i32, i32
  }
  func.func @transform_3(%arg0: i32) -> (i32, i32, i32) {
    %c0_i32 = arith.constant 0 : i32
    %c0_i32_0 = arith.constant 0 : i32
    %c0_i32_1 = arith.constant 0 : i32
    return %arg0, %c0_i32, %c0_i32_0 : i32, i32, i32
  }
}

module attributes {stable_mosaic.version = 11 : i64} {
  func.func @_head_kernel(%arg0: i32, %arg1: memref<256x8xf32, #tpu.memory_space<vmem>>, %arg2: memref<8x4xf32, #tpu.memory_space<vmem>>, %arg3: memref<1x4xf32, #tpu.memory_space<vmem>>, %arg4: memref<8x4xf32, #tpu.memory_space<vmem>>, %arg5: memref<256x4xf32, #tpu.memory_space<vmem>>, %arg6: memref<256x4xf32, #tpu.memory_space<vmem>>) attributes {dimension_semantics = [#tpu.dimension_semantics<parallel>], iteration_bounds = array<i64: 2>, scalar_prefetch = 0 : i64, scratch_operands = 0 : i64, tpu.core_type = #tpu.core_type<tc>, window_params = [{transform_indices = @transform_0, window_bounds = array<i64: 256, 8>}, {pipeline_mode = #tpu.pipeline_mode<synchronous>, transform_indices = @transform_1, window_bounds = array<i64: 8, 4>}, {pipeline_mode = #tpu.pipeline_mode<synchronous>, transform_indices = @transform_2, window_bounds = array<i64: 1, 4>}, {pipeline_mode = #tpu.pipeline_mode<synchronous>, transform_indices = @transform_3, window_bounds = array<i64: 8, 4>}, {transform_indices = @transform_4, window_bounds = array<i64: 256, 4>}, {transform_indices = @transform_5, window_bounds = array<i64: 256, 4>}]} {
    %c0 = arith.constant 0 : index
    %c0_0 = arith.constant 0 : index
    %0 = vector.load %arg1[%c0, %c0_0] : memref<256x8xf32, #tpu.memory_space<vmem>>, vector<256x8xf32>
    %c0_1 = arith.constant 0 : index
    %c0_2 = arith.constant 0 : index
    %1 = vector.load %arg2[%c0_1, %c0_2] : memref<8x4xf32, #tpu.memory_space<vmem>>, vector<8x4xf32>
    %cst = arith.constant dense<0.000000e+00> : vector<256x4xf32>
    %2 = tpu.matmul %0, %1, %cst {dimension_numbers = #tpu.dot_dimension_numbers<[1], [0], [0], [1], [0, 0, 1, 1], [], []>} : vector<256x8xf32>, vector<8x4xf32>, vector<256x4xf32> -> vector<256x4xf32>
    %c0_3 = arith.constant 0 : index
    %c0_4 = arith.constant 0 : index
    %3 = vector.load %arg3[%c0_3, %c0_4] : memref<1x4xf32, #tpu.memory_space<vmem>>, vector<1x4xf32>
    %4 = vector.broadcast %3 : vector<1x4xf32> to vector<256x4xf32>
    %5 = arith.addf %2, %4 : vector<256x4xf32>
    %6 = arith.negf %5 : vector<256x4xf32>
    %7 = math.exp %6 : vector<256x4xf32>
    %cst_5 = arith.constant 1.000000e+00 : f32
    %8 = vector.broadcast %cst_5 : f32 to vector<256x4xf32>
    %9 = arith.addf %8, %7 : vector<256x4xf32>
    %10 = arith.divf %8, %9 : vector<256x4xf32>
    %11 = arith.mulf %5, %10 : vector<256x4xf32>
    %c0_6 = arith.constant 0 : index
    %c0_7 = arith.constant 0 : index
    %12 = vector.load %arg5[%c0_6, %c0_7] : memref<256x4xf32, #tpu.memory_space<vmem>>, vector<256x4xf32>
    tpu.vector_store %arg5[%c0_6, %c0_7], %11 {strides = array<i32>} : memref<256x4xf32, #tpu.memory_space<vmem>>, vector<256x4xf32>,
    %c0_8 = arith.constant 0 : index
    %c0_9 = arith.constant 0 : index
    %13 = vector.load %arg4[%c0_8, %c0_9] : memref<8x4xf32, #tpu.memory_space<vmem>>, vector<8x4xf32>
    %cst_10 = arith.constant dense<0.000000e+00> : vector<256x4xf32>
    %14 = tpu.matmul %0, %13, %cst_10 {dimension_numbers = #tpu.dot_dimension_numbers<[1], [0], [0], [1], [0, 0, 1, 1], [], []>} : vector<256x8xf32>, vector<8x4xf32>, vector<256x4xf32> -> vector<256x4xf32>
    %c0_11 = arith.constant 0 : index
    %c0_12 = arith.constant 0 : index
    %15 = vector.load %arg6[%c0_11, %c0_12] : memref<256x4xf32, #tpu.memory_space<vmem>>, vector<256x4xf32>
    tpu.vector_store %arg6[%c0_11, %c0_12], %14 {strides = array<i32>} : memref<256x4xf32, #tpu.memory_space<vmem>>, vector<256x4xf32>,
    return
  }
  func.func @transform_0(%arg0: i32) -> (i32, i32) {
    %c0_i32 = arith.constant 0 : i32
    %c0_i32_0 = arith.constant 0 : i32
    return %arg0, %c0_i32 : i32, i32
  }
  func.func @transform_1(%arg0: i32) -> (i32, i32) {
    %c0_i32 = arith.constant 0 : i32
    %c0_i32_0 = arith.constant 0 : i32
    %c0_i32_1 = arith.constant 0 : i32
    return %c0_i32, %c0_i32_0 : i32, i32
  }
  func.func @transform_2(%arg0: i32) -> (i32, i32) {
    %c0_i32 = arith.constant 0 : i32
    %c0_i32_0 = arith.constant 0 : i32
    %c0_i32_1 = arith.constant 0 : i32
    return %c0_i32, %c0_i32_0 : i32, i32
  }
  func.func @transform_3(%arg0: i32) -> (i32, i32) {
    %c0_i32 = arith.constant 0 : i32
    %c0_i32_0 = arith.constant 0 : i32
    %c0_i32_1 = arith.constant 0 : i32
    return %c0_i32, %c0_i32_0 : i32, i32
  }
  func.func @transform_4(%arg0: i32) -> (i32, i32) {
    %c0_i32 = arith.constant 0 : i32
    %c0_i32_0 = arith.constant 0 : i32
    return %arg0, %c0_i32 : i32, i32
  }
  func.func @transform_5(%arg0: i32) -> (i32, i32) {
    %c0_i32 = arith.constant 0 : i32
    %c0_i32_0 = arith.constant 0 : i32
    return %arg0, %c0_i32 : i32, i32
  }
}

module attributes {stable_mosaic.version = 11 : i64} {
  func.func @_conv3x3_res_kernel(%arg0: i32, %arg1: memref<1x16x16x4xf32, #tpu.memory_space<vmem>>, %arg2: memref<3x3x4x4xf32, #tpu.memory_space<vmem>>, %arg3: memref<1x4xf32, #tpu.memory_space<vmem>>, %arg4: memref<1x256x4xf32, #tpu.memory_space<vmem>>, %arg5: memref<1x256x4xf32, #tpu.memory_space<vmem>>, %arg6: memref<18x18x4xf32, #tpu.memory_space<vmem>>) attributes {dimension_semantics = [#tpu.dimension_semantics<parallel>], iteration_bounds = array<i64: 2>, scalar_prefetch = 0 : i64, scratch_operands = 1 : i64, tpu.core_type = #tpu.core_type<tc>, window_params = [{transform_indices = @transform_0, window_bounds = array<i64: 1, 16, 16, 4>}, {pipeline_mode = #tpu.pipeline_mode<synchronous>, transform_indices = @transform_1, window_bounds = array<i64: 3, 3, 4, 4>}, {pipeline_mode = #tpu.pipeline_mode<synchronous>, transform_indices = @transform_2, window_bounds = array<i64: 1, 4>}, {transform_indices = @transform_3, window_bounds = array<i64: 1, 256, 4>}, {transform_indices = @transform_4, window_bounds = array<i64: 1, 256, 4>}]} {
    %cst = arith.constant 0.000000e+00 : f32
    %0 = vector.broadcast %cst : f32 to vector<18x18x4xf32>
    %c0 = arith.constant 0 : index
    %c0_0 = arith.constant 0 : index
    %c0_1 = arith.constant 0 : index
    %1 = vector.load %arg6[%c0, %c0_0, %c0_1] : memref<18x18x4xf32, #tpu.memory_space<vmem>>, vector<18x18x4xf32>
    tpu.vector_store %arg6[%c0, %c0_0, %c0_1], %0 {strides = array<i32>} : memref<18x18x4xf32, #tpu.memory_space<vmem>>, vector<18x18x4xf32>,
    %c0_2 = arith.constant 0 : index
    %c0_3 = arith.constant 0 : index
    %c0_4 = arith.constant 0 : index
    %c0_5 = arith.constant 0 : index
    %2 = vector.load %arg1[%c0_2, %c0_3, %c0_4, %c0_5] : memref<1x16x16x4xf32, #tpu.memory_space<vmem>>, vector<1x16x16x4xf32>
    %3 = vector.shape_cast %2 : vector<1x16x16x4xf32> to vector<16x16x4xf32>
    %c1 = arith.constant 1 : index
    %c1_6 = arith.constant 1 : index
    %c0_7 = arith.constant 0 : index
    %4 = vector.load %arg6[%c1, %c1_6, %c0_7] : memref<18x18x4xf32, #tpu.memory_space<vmem>>, vector<16x16x4xf32>
    tpu.vector_store %arg6[%c1, %c1_6, %c0_7], %3 {strides = array<i32>} : memref<18x18x4xf32, #tpu.memory_space<vmem>>, vector<16x16x4xf32>,
    %cst_8 = arith.constant 0.000000e+00 : f32
    %5 = vector.broadcast %cst_8 : f32 to vector<256x4xf32>
    %c0_9 = arith.constant 0 : index
    %c0_10 = arith.constant 0 : index
    %c0_11 = arith.constant 0 : index
    %6 = vector.load %arg6[%c0_9, %c0_10, %c0_11] : memref<18x18x4xf32, #tpu.memory_space<vmem>>, vector<16x16x4xf32>
    %7 = vector.shape_cast %6 : vector<16x16x4xf32> to vector<256x4xf32>
    %c0_12 = arith.constant 0 : index
    %c0_13 = arith.constant 0 : index
    %c0_14 = arith.constant 0 : index
    %c0_15 = arith.constant 0 : index
    %8 = vector.load %arg2[%c0_12, %c0_13, %c0_14, %c0_15] : memref<3x3x4x4xf32, #tpu.memory_space<vmem>>, vector<1x1x4x4xf32>
    %9 = vector.shape_cast %8 : vector<1x1x4x4xf32> to vector<4x4xf32>
    %cst_16 = arith.constant dense<0.000000e+00> : vector<256x4xf32>
    %10 = tpu.matmul %7, %9, %cst_16 {dimension_numbers = #tpu.dot_dimension_numbers<[1], [0], [0], [1], [0, 0, 1, 1], [], []>} : vector<256x4xf32>, vector<4x4xf32>, vector<256x4xf32> -> vector<256x4xf32>
    %11 = arith.addf %5, %10 : vector<256x4xf32>
    %c0_17 = arith.constant 0 : index
    %c1_18 = arith.constant 1 : index
    %c0_19 = arith.constant 0 : index
    %12 = vector.load %arg6[%c0_17, %c1_18, %c0_19] : memref<18x18x4xf32, #tpu.memory_space<vmem>>, vector<16x16x4xf32>
    %13 = vector.shape_cast %12 : vector<16x16x4xf32> to vector<256x4xf32>
    %c0_20 = arith.constant 0 : index
    %c1_21 = arith.constant 1 : index
    %c0_22 = arith.constant 0 : index
    %c0_23 = arith.constant 0 : index
    %14 = vector.load %arg2[%c0_20, %c1_21, %c0_22, %c0_23] : memref<3x3x4x4xf32, #tpu.memory_space<vmem>>, vector<1x1x4x4xf32>
    %15 = vector.shape_cast %14 : vector<1x1x4x4xf32> to vector<4x4xf32>
    %cst_24 = arith.constant dense<0.000000e+00> : vector<256x4xf32>
    %16 = tpu.matmul %13, %15, %cst_24 {dimension_numbers = #tpu.dot_dimension_numbers<[1], [0], [0], [1], [0, 0, 1, 1], [], []>} : vector<256x4xf32>, vector<4x4xf32>, vector<256x4xf32> -> vector<256x4xf32>
    %17 = arith.addf %11, %16 : vector<256x4xf32>
    %c0_25 = arith.constant 0 : index
    %c2 = arith.constant 2 : index
    %c0_26 = arith.constant 0 : index
    %18 = vector.load %arg6[%c0_25, %c2, %c0_26] : memref<18x18x4xf32, #tpu.memory_space<vmem>>, vector<16x16x4xf32>
    %19 = vector.shape_cast %18 : vector<16x16x4xf32> to vector<256x4xf32>
    %c0_27 = arith.constant 0 : index
    %c2_28 = arith.constant 2 : index
    %c0_29 = arith.constant 0 : index
    %c0_30 = arith.constant 0 : index
    %20 = vector.load %arg2[%c0_27, %c2_28, %c0_29, %c0_30] : memref<3x3x4x4xf32, #tpu.memory_space<vmem>>, vector<1x1x4x4xf32>
    %21 = vector.shape_cast %20 : vector<1x1x4x4xf32> to vector<4x4xf32>
    %cst_31 = arith.constant dense<0.000000e+00> : vector<256x4xf32>
    %22 = tpu.matmul %19, %21, %cst_31 {dimension_numbers = #tpu.dot_dimension_numbers<[1], [0], [0], [1], [0, 0, 1, 1], [], []>} : vector<256x4xf32>, vector<4x4xf32>, vector<256x4xf32> -> vector<256x4xf32>
    %23 = arith.addf %17, %22 : vector<256x4xf32>
    %c1_32 = arith.constant 1 : index
    %c0_33 = arith.constant 0 : index
    %c0_34 = arith.constant 0 : index
    %24 = vector.load %arg6[%c1_32, %c0_33, %c0_34] : memref<18x18x4xf32, #tpu.memory_space<vmem>>, vector<16x16x4xf32>
    %25 = vector.shape_cast %24 : vector<16x16x4xf32> to vector<256x4xf32>
    %c1_35 = arith.constant 1 : index
    %c0_36 = arith.constant 0 : index
    %c0_37 = arith.constant 0 : index
    %c0_38 = arith.constant 0 : index
    %26 = vector.load %arg2[%c1_35, %c0_36, %c0_37, %c0_38] : memref<3x3x4x4xf32, #tpu.memory_space<vmem>>, vector<1x1x4x4xf32>
    %27 = vector.shape_cast %26 : vector<1x1x4x4xf32> to vector<4x4xf32>
    %cst_39 = arith.constant dense<0.000000e+00> : vector<256x4xf32>
    %28 = tpu.matmul %25, %27, %cst_39 {dimension_numbers = #tpu.dot_dimension_numbers<[1], [0], [0], [1], [0, 0, 1, 1], [], []>} : vector<256x4xf32>, vector<4x4xf32>, vector<256x4xf32> -> vector<256x4xf32>
    %29 = arith.addf %23, %28 : vector<256x4xf32>
    %c1_40 = arith.constant 1 : index
    %c1_41 = arith.constant 1 : index
    %c0_42 = arith.constant 0 : index
    %30 = vector.load %arg6[%c1_40, %c1_41, %c0_42] : memref<18x18x4xf32, #tpu.memory_space<vmem>>, vector<16x16x4xf32>
    %31 = vector.shape_cast %30 : vector<16x16x4xf32> to vector<256x4xf32>
    %c1_43 = arith.constant 1 : index
    %c1_44 = arith.constant 1 : index
    %c0_45 = arith.constant 0 : index
    %c0_46 = arith.constant 0 : index
    %32 = vector.load %arg2[%c1_43, %c1_44, %c0_45, %c0_46] : memref<3x3x4x4xf32, #tpu.memory_space<vmem>>, vector<1x1x4x4xf32>
    %33 = vector.shape_cast %32 : vector<1x1x4x4xf32> to vector<4x4xf32>
    %cst_47 = arith.constant dense<0.000000e+00> : vector<256x4xf32>
    %34 = tpu.matmul %31, %33, %cst_47 {dimension_numbers = #tpu.dot_dimension_numbers<[1], [0], [0], [1], [0, 0, 1, 1], [], []>} : vector<256x4xf32>, vector<4x4xf32>, vector<256x4xf32> -> vector<256x4xf32>
    %35 = arith.addf %29, %34 : vector<256x4xf32>
    %c1_48 = arith.constant 1 : index
    %c2_49 = arith.constant 2 : index
    %c0_50 = arith.constant 0 : index
    %36 = vector.load %arg6[%c1_48, %c2_49, %c0_50] : memref<18x18x4xf32, #tpu.memory_space<vmem>>, vector<16x16x4xf32>
    %37 = vector.shape_cast %36 : vector<16x16x4xf32> to vector<256x4xf32>
    %c1_51 = arith.constant 1 : index
    %c2_52 = arith.constant 2 : index
    %c0_53 = arith.constant 0 : index
    %c0_54 = arith.constant 0 : index
    %38 = vector.load %arg2[%c1_51, %c2_52, %c0_53, %c0_54] : memref<3x3x4x4xf32, #tpu.memory_space<vmem>>, vector<1x1x4x4xf32>
    %39 = vector.shape_cast %38 : vector<1x1x4x4xf32> to vector<4x4xf32>
    %cst_55 = arith.constant dense<0.000000e+00> : vector<256x4xf32>
    %40 = tpu.matmul %37, %39, %cst_55 {dimension_numbers = #tpu.dot_dimension_numbers<[1], [0], [0], [1], [0, 0, 1, 1], [], []>} : vector<256x4xf32>, vector<4x4xf32>, vector<256x4xf32> -> vector<256x4xf32>
    %41 = arith.addf %35, %40 : vector<256x4xf32>
    %c2_56 = arith.constant 2 : index
    %c0_57 = arith.constant 0 : index
    %c0_58 = arith.constant 0 : index
    %42 = vector.load %arg6[%c2_56, %c0_57, %c0_58] : memref<18x18x4xf32, #tpu.memory_space<vmem>>, vector<16x16x4xf32>
    %43 = vector.shape_cast %42 : vector<16x16x4xf32> to vector<256x4xf32>
    %c2_59 = arith.constant 2 : index
    %c0_60 = arith.constant 0 : index
    %c0_61 = arith.constant 0 : index
    %c0_62 = arith.constant 0 : index
    %44 = vector.load %arg2[%c2_59, %c0_60, %c0_61, %c0_62] : memref<3x3x4x4xf32, #tpu.memory_space<vmem>>, vector<1x1x4x4xf32>
    %45 = vector.shape_cast %44 : vector<1x1x4x4xf32> to vector<4x4xf32>
    %cst_63 = arith.constant dense<0.000000e+00> : vector<256x4xf32>
    %46 = tpu.matmul %43, %45, %cst_63 {dimension_numbers = #tpu.dot_dimension_numbers<[1], [0], [0], [1], [0, 0, 1, 1], [], []>} : vector<256x4xf32>, vector<4x4xf32>, vector<256x4xf32> -> vector<256x4xf32>
    %47 = arith.addf %41, %46 : vector<256x4xf32>
    %c2_64 = arith.constant 2 : index
    %c1_65 = arith.constant 1 : index
    %c0_66 = arith.constant 0 : index
    %48 = vector.load %arg6[%c2_64, %c1_65, %c0_66] : memref<18x18x4xf32, #tpu.memory_space<vmem>>, vector<16x16x4xf32>
    %49 = vector.shape_cast %48 : vector<16x16x4xf32> to vector<256x4xf32>
    %c2_67 = arith.constant 2 : index
    %c1_68 = arith.constant 1 : index
    %c0_69 = arith.constant 0 : index
    %c0_70 = arith.constant 0 : index
    %50 = vector.load %arg2[%c2_67, %c1_68, %c0_69, %c0_70] : memref<3x3x4x4xf32, #tpu.memory_space<vmem>>, vector<1x1x4x4xf32>
    %51 = vector.shape_cast %50 : vector<1x1x4x4xf32> to vector<4x4xf32>
    %cst_71 = arith.constant dense<0.000000e+00> : vector<256x4xf32>
    %52 = tpu.matmul %49, %51, %cst_71 {dimension_numbers = #tpu.dot_dimension_numbers<[1], [0], [0], [1], [0, 0, 1, 1], [], []>} : vector<256x4xf32>, vector<4x4xf32>, vector<256x4xf32> -> vector<256x4xf32>
    %53 = arith.addf %47, %52 : vector<256x4xf32>
    %c2_72 = arith.constant 2 : index
    %c2_73 = arith.constant 2 : index
    %c0_74 = arith.constant 0 : index
    %54 = vector.load %arg6[%c2_72, %c2_73, %c0_74] : memref<18x18x4xf32, #tpu.memory_space<vmem>>, vector<16x16x4xf32>
    %55 = vector.shape_cast %54 : vector<16x16x4xf32> to vector<256x4xf32>
    %c2_75 = arith.constant 2 : index
    %c2_76 = arith.constant 2 : index
    %c0_77 = arith.constant 0 : index
    %c0_78 = arith.constant 0 : index
    %56 = vector.load %arg2[%c2_75, %c2_76, %c0_77, %c0_78] : memref<3x3x4x4xf32, #tpu.memory_space<vmem>>, vector<1x1x4x4xf32>
    %57 = vector.shape_cast %56 : vector<1x1x4x4xf32> to vector<4x4xf32>
    %cst_79 = arith.constant dense<0.000000e+00> : vector<256x4xf32>
    %58 = tpu.matmul %55, %57, %cst_79 {dimension_numbers = #tpu.dot_dimension_numbers<[1], [0], [0], [1], [0, 0, 1, 1], [], []>} : vector<256x4xf32>, vector<4x4xf32>, vector<256x4xf32> -> vector<256x4xf32>
    %59 = arith.addf %53, %58 : vector<256x4xf32>
    %c0_80 = arith.constant 0 : index
    %c0_81 = arith.constant 0 : index
    %60 = vector.load %arg3[%c0_80, %c0_81] : memref<1x4xf32, #tpu.memory_space<vmem>>, vector<1x4xf32>
    %61 = vector.broadcast %60 : vector<1x4xf32> to vector<256x4xf32>
    %62 = arith.addf %59, %61 : vector<256x4xf32>
    %63 = arith.negf %62 : vector<256x4xf32>
    %64 = math.exp %63 : vector<256x4xf32>
    %cst_82 = arith.constant 1.000000e+00 : f32
    %65 = vector.broadcast %cst_82 : f32 to vector<256x4xf32>
    %66 = arith.addf %65, %64 : vector<256x4xf32>
    %67 = arith.divf %65, %66 : vector<256x4xf32>
    %68 = arith.mulf %62, %67 : vector<256x4xf32>
    %c0_83 = arith.constant 0 : index
    %c0_84 = arith.constant 0 : index
    %c0_85 = arith.constant 0 : index
    %69 = vector.load %arg4[%c0_83, %c0_84, %c0_85] : memref<1x256x4xf32, #tpu.memory_space<vmem>>, vector<1x256x4xf32>
    %70 = vector.shape_cast %69 : vector<1x256x4xf32> to vector<256x4xf32>
    %71 = arith.addf %68, %70 : vector<256x4xf32>
    %c0_86 = arith.constant 0 : index
    %c0_87 = arith.constant 0 : index
    %c0_88 = arith.constant 0 : index
    %72 = vector.load %arg5[%c0_86, %c0_87, %c0_88] : memref<1x256x4xf32, #tpu.memory_space<vmem>>, vector<1x256x4xf32>
    %73 = vector.shape_cast %72 : vector<1x256x4xf32> to vector<256x4xf32>
    %74 = vector.shape_cast %71 : vector<256x4xf32> to vector<1x256x4xf32>
    tpu.vector_store %arg5[%c0_86, %c0_87, %c0_88], %74 {strides = array<i32>} : memref<1x256x4xf32, #tpu.memory_space<vmem>>, vector<1x256x4xf32>,
    return
  }
  func.func @transform_0(%arg0: i32) -> (i32, i32, i32, i32) {
    %c0_i32 = arith.constant 0 : i32
    %c0_i32_0 = arith.constant 0 : i32
    %c0_i32_1 = arith.constant 0 : i32
    %c0_i32_2 = arith.constant 0 : i32
    return %arg0, %c0_i32, %c0_i32_0, %c0_i32_1 : i32, i32, i32, i32
  }
  func.func @transform_1(%arg0: i32) -> (i32, i32, i32, i32) {
    %c0_i32 = arith.constant 0 : i32
    %c0_i32_0 = arith.constant 0 : i32
    %c0_i32_1 = arith.constant 0 : i32
    %c0_i32_2 = arith.constant 0 : i32
    %c0_i32_3 = arith.constant 0 : i32
    return %c0_i32, %c0_i32_0, %c0_i32_1, %c0_i32_2 : i32, i32, i32, i32
  }
  func.func @transform_2(%arg0: i32) -> (i32, i32) {
    %c0_i32 = arith.constant 0 : i32
    %c0_i32_0 = arith.constant 0 : i32
    %c0_i32_1 = arith.constant 0 : i32
    return %c0_i32, %c0_i32_0 : i32, i32
  }
  func.func @transform_3(%arg0: i32) -> (i32, i32, i32) {
    %c0_i32 = arith.constant 0 : i32
    %c0_i32_0 = arith.constant 0 : i32
    %c0_i32_1 = arith.constant 0 : i32
    return %arg0, %c0_i32, %c0_i32_0 : i32, i32, i32
  }
  func.func @transform_4(%arg0: i32) -> (i32, i32, i32) {
    %c0_i32 = arith.constant 0 : i32
    %c0_i32_0 = arith.constant 0 : i32
    %c0_i32_1 = arith.constant 0 : i32
    return %arg0, %c0_i32, %c0_i32_0 : i32, i32, i32
  }
}

module attributes {stable_mosaic.version = 11 : i64} {
  func.func @_tail_kernel(%arg0: i32, %arg1: memref<256x4xf32, #tpu.memory_space<vmem>>, %arg2: memref<256x4xf32, #tpu.memory_space<vmem>>, %arg3: memref<4x4xf32, #tpu.memory_space<vmem>>, %arg4: memref<1x4xf32, #tpu.memory_space<vmem>>, %arg5: memref<1x4xf32, #tpu.memory_space<vmem>>, %arg6: memref<4x8xf32, #tpu.memory_space<vmem>>, %arg7: memref<4x8xf32, #tpu.memory_space<vmem>>, %arg8: memref<1x8xf32, #tpu.memory_space<vmem>>, %arg9: memref<256x8xf32, #tpu.memory_space<vmem>>) attributes {dimension_semantics = [#tpu.dimension_semantics<parallel>], iteration_bounds = array<i64: 2>, scalar_prefetch = 0 : i64, scratch_operands = 0 : i64, tpu.core_type = #tpu.core_type<tc>, window_params = [{transform_indices = @transform_0, window_bounds = array<i64: 256, 4>}, {transform_indices = @transform_1, window_bounds = array<i64: 256, 4>}, {pipeline_mode = #tpu.pipeline_mode<synchronous>, transform_indices = @transform_2, window_bounds = array<i64: 4, 4>}, {pipeline_mode = #tpu.pipeline_mode<synchronous>, transform_indices = @transform_3, window_bounds = array<i64: 1, 4>}, {pipeline_mode = #tpu.pipeline_mode<synchronous>, transform_indices = @transform_4, window_bounds = array<i64: 1, 4>}, {pipeline_mode = #tpu.pipeline_mode<synchronous>, transform_indices = @transform_5, window_bounds = array<i64: 4, 8>}, {pipeline_mode = #tpu.pipeline_mode<synchronous>, transform_indices = @transform_6, window_bounds = array<i64: 4, 8>}, {pipeline_mode = #tpu.pipeline_mode<synchronous>, transform_indices = @transform_7, window_bounds = array<i64: 1, 8>}, {transform_indices = @transform_8, window_bounds = array<i64: 256, 8>}]} {
    %c0 = arith.constant 0 : index
    %c0_0 = arith.constant 0 : index
    %0 = vector.load %arg1[%c0, %c0_0] : memref<256x4xf32, #tpu.memory_space<vmem>>, vector<256x4xf32>
    %c0_1 = arith.constant 0 : index
    %c0_2 = arith.constant 0 : index
    %1 = vector.load %arg3[%c0_1, %c0_2] : memref<4x4xf32, #tpu.memory_space<vmem>>, vector<4x4xf32>
    %cst = arith.constant dense<0.000000e+00> : vector<256x4xf32>
    %2 = tpu.matmul %0, %1, %cst {dimension_numbers = #tpu.dot_dimension_numbers<[1], [0], [0], [1], [0, 0, 1, 1], [], []>} : vector<256x4xf32>, vector<4x4xf32>, vector<256x4xf32> -> vector<256x4xf32>
    %c0_3 = arith.constant 0 : index
    %c0_4 = arith.constant 0 : index
    %3 = vector.load %arg4[%c0_3, %c0_4] : memref<1x4xf32, #tpu.memory_space<vmem>>, vector<1x4xf32>
    %4 = vector.broadcast %3 : vector<1x4xf32> to vector<256x4xf32>
    %5 = arith.addf %2, %4 : vector<256x4xf32>
    %6 = arith.negf %5 : vector<256x4xf32>
    %7 = math.exp %6 : vector<256x4xf32>
    %cst_5 = arith.constant 1.000000e+00 : f32
    %8 = vector.broadcast %cst_5 : f32 to vector<256x4xf32>
    %9 = arith.addf %8, %7 : vector<256x4xf32>
    %10 = arith.divf %8, %9 : vector<256x4xf32>
    %11 = arith.mulf %5, %10 : vector<256x4xf32>
    %c0_6 = arith.constant 0 : index
    %c0_7 = arith.constant 0 : index
    %12 = vector.load %arg2[%c0_6, %c0_7] : memref<256x4xf32, #tpu.memory_space<vmem>>, vector<256x4xf32>
    %c0_8 = arith.constant 0 : index
    %c0_9 = arith.constant 0 : index
    %13 = vector.load %arg5[%c0_8, %c0_9] : memref<1x4xf32, #tpu.memory_space<vmem>>, vector<1x4xf32>
    %14 = vector.broadcast %13 : vector<1x4xf32> to vector<256x4xf32>
    %15 = arith.addf %12, %14 : vector<256x4xf32>
    %16 = arith.negf %15 : vector<256x4xf32>
    %17 = math.exp %16 : vector<256x4xf32>
    %cst_10 = arith.constant 1.000000e+00 : f32
    %18 = vector.broadcast %cst_10 : f32 to vector<256x4xf32>
    %19 = arith.addf %18, %17 : vector<256x4xf32>
    %20 = arith.divf %18, %19 : vector<256x4xf32>
    %21 = arith.mulf %15, %20 : vector<256x4xf32>
    %c0_11 = arith.constant 0 : index
    %c0_12 = arith.constant 0 : index
    %22 = vector.load %arg6[%c0_11, %c0_12] : memref<4x8xf32, #tpu.memory_space<vmem>>, vector<4x8xf32>
    %cst_13 = arith.constant dense<0.000000e+00> : vector<256x8xf32>
    %23 = tpu.matmul %11, %22, %cst_13 {dimension_numbers = #tpu.dot_dimension_numbers<[1], [0], [0], [1], [0, 0, 1, 1], [], []>} : vector<256x4xf32>, vector<4x8xf32>, vector<256x8xf32> -> vector<256x8xf32>
    %c0_14 = arith.constant 0 : index
    %c0_15 = arith.constant 0 : index
    %24 = vector.load %arg7[%c0_14, %c0_15] : memref<4x8xf32, #tpu.memory_space<vmem>>, vector<4x8xf32>
    %cst_16 = arith.constant dense<0.000000e+00> : vector<256x8xf32>
    %25 = tpu.matmul %21, %24, %cst_16 {dimension_numbers = #tpu.dot_dimension_numbers<[1], [0], [0], [1], [0, 0, 1, 1], [], []>} : vector<256x4xf32>, vector<4x8xf32>, vector<256x8xf32> -> vector<256x8xf32>
    %26 = arith.addf %23, %25 : vector<256x8xf32>
    %c0_17 = arith.constant 0 : index
    %c0_18 = arith.constant 0 : index
    %27 = vector.load %arg8[%c0_17, %c0_18] : memref<1x8xf32, #tpu.memory_space<vmem>>, vector<1x8xf32>
    %28 = vector.broadcast %27 : vector<1x8xf32> to vector<256x8xf32>
    %29 = arith.addf %26, %28 : vector<256x8xf32>
    %30 = arith.negf %29 : vector<256x8xf32>
    %31 = math.exp %30 : vector<256x8xf32>
    %cst_19 = arith.constant 1.000000e+00 : f32
    %32 = vector.broadcast %cst_19 : f32 to vector<256x8xf32>
    %33 = arith.addf %32, %31 : vector<256x8xf32>
    %34 = arith.divf %32, %33 : vector<256x8xf32>
    %35 = arith.mulf %29, %34 : vector<256x8xf32>
    %c0_20 = arith.constant 0 : index
    %c0_21 = arith.constant 0 : index
    %36 = vector.load %arg9[%c0_20, %c0_21] : memref<256x8xf32, #tpu.memory_space<vmem>>, vector<256x8xf32>
    tpu.vector_store %arg9[%c0_20, %c0_21], %35 {strides = array<i32>} : memref<256x8xf32, #tpu.memory_space<vmem>>, vector<256x8xf32>,
    return
  }
  func.func @transform_0(%arg0: i32) -> (i32, i32) {
    %c0_i32 = arith.constant 0 : i32
    %c0_i32_0 = arith.constant 0 : i32
    return %arg0, %c0_i32 : i32, i32
  }
  func.func @transform_1(%arg0: i32) -> (i32, i32) {
    %c0_i32 = arith.constant 0 : i32
    %c0_i32_0 = arith.constant 0 : i32
    return %arg0, %c0_i32 : i32, i32
  }
  func.func @transform_2(%arg0: i32) -> (i32, i32) {
    %c0_i32 = arith.constant 0 : i32
    %c0_i32_0 = arith.constant 0 : i32
    %c0_i32_1 = arith.constant 0 : i32
    return %c0_i32, %c0_i32_0 : i32, i32
  }
  func.func @transform_3(%arg0: i32) -> (i32, i32) {
    %c0_i32 = arith.constant 0 : i32
    %c0_i32_0 = arith.constant 0 : i32
    %c0_i32_1 = arith.constant 0 : i32
    return %c0_i32, %c0_i32_0 : i32, i32
  }
  func.func @transform_4(%arg0: i32) -> (i32, i32) {
    %c0_i32 = arith.constant 0 : i32
    %c0_i32_0 = arith.constant 0 : i32
    %c0_i32_1 = arith.constant 0 : i32
    return %c0_i32, %c0_i32_0 : i32, i32
  }
  func.func @transform_5(%arg0: i32) -> (i32, i32) {
    %c0_i32 = arith.constant 0 : i32
    %c0_i32_0 = arith.constant 0 : i32
    %c0_i32_1 = arith.constant 0 : i32
    return %c0_i32, %c0_i32_0 : i32, i32
  }
  func.func @transform_6(%arg0: i32) -> (i32, i32) {
    %c0_i32 = arith.constant 0 : i32
    %c0_i32_0 = arith.constant 0 : i32
    %c0_i32_1 = arith.constant 0 : i32
    return %c0_i32, %c0_i32_0 : i32, i32
  }
  func.func @transform_7(%arg0: i32) -> (i32, i32) {
    %c0_i32 = arith.constant 0 : i32
    %c0_i32_0 = arith.constant 0 : i32
    %c0_i32_1 = arith.constant 0 : i32
    return %c0_i32, %c0_i32_0 : i32, i32
  }
  func.func @transform_8(%arg0: i32) -> (i32, i32) {
    %c0_i32 = arith.constant 0 : i32
    %c0_i32_0 = arith.constant 0 : i32
    return %arg0, %c0_i32 : i32, i32
  }
}

</mosaic_0001>

<bundles_post_ra>
// kernel: bottleneck_csp_forward.4
= control target key start
LH: loop header
LB: loop body
LE: loop exit
PB: predicated region body
PF: predicated region fallthrough
CT: control target
= control target key end

     0   :  { %s1659_s18 = smov 0   ;;  %s2085_s0 = inlined_call_operand.vmem [shape: f32[512,8], index: 0, kind: input, shape index: {}]   ;;  %s2086_s1 = inlined_call_operand.vmem [shape: f32[8,4], index: 1, kind: input, shape index: {}]   ;;  %s2087_s2 = inlined_call_operand.vmem [shape: f32[1,4], index: 2, kind: input, shape index: {}]   ;;  %s2088_s3 = inlined_call_operand.vmem [shape: f32[8,4], index: 3, kind: input, shape index: {}]   ;;  %s2089_s4 = inlined_call_operand.vmem [shape: f32[512,4], index: 4, kind: output, shape index: {0}]   ;;  %s2090_s5 = inlined_call_operand.vmem [shape: f32[512,4], index: 5, kind: output, shape index: {1}]  }
   0x1 LB: > { %s1209_s19 = sadd.s32 4294967295, %s1627_s18   ;;  %p1213_p0 = scmp.ge.s32.totalorder %s1627_s18, 1  ;;  %s1627_s18 = sphi %s1659_s18, %s16_s18  }
   0x2   : > { %p191_p1 = scmp.lt.s32.totalorder %s1627_s18, 3 }
   0x4   : > { %p192_p2 = pnand %p1213_p0, %p191_p1 }
   0x5   : > { %v274_v0 = vld [vmem:[%s2086_s1] sm:$0xff] (!%p192_p2)  ;;  %s1214_s22 = sshll.u32 (!%p192_p2), %s1209_s19, 5  ;;  %vm282_vm0 = vcmask (!%p192_p2), 64512   ;;  %vm828_vm1 = vcmask (!%p192_p2), 31744  }
   0x6   : > { %195 = sbr.rel (%p192_p2) target bundleno = 326 (0x146), region = 36  ;;  %v861_v1 = vld [vmem:[%s2088_s3] sm:$0xff] (!%p192_p2)  ;;  %1385 = vmatprep.subr.mxu0 (!%p192_p2), %v274_v0  ;;  %p225_p3 = scmp.lt.s32.totalorder (!%p192_p2), %s1214_s22, 63 }
   0x7   : > { %1435 = vmatprep.subr.mxu1 (!%p192_p2), %v861_v1  ;;  %1386 = vmatpush3.msra.mxu0 (!%p192_p2), %v274_v0  ;;  %v1780_v34 = vld [vmem:[%s2087_s2] ss:$0 sm:$0xff] (!%p192_p2) }
   0x8   : > { %1436 = vmatpush3.msra.mxu1 (!%p192_p2), %v861_v1 }
   0xd   : > { %s2092_s22 = smov (!%p225_p3, %s1214_s22), 63 }
   0xe   : > { %s1673_s25 = sshll.u32 %s2092_s22, 3 }
   0xf   : > { %s1679_s28 = scalar_lea.vmem %s2085_s0, %s1673_s25  ;;  %s1786_s8 = scalar_lea.vmem %s2090_s5, %s1673_s25 }
  0x10   : > { %v242_v2 = vld [vmem:[%s1679_s28] sm:$0xff]  ;;  %v243_v3 = vld [vmem:[%s1679_s28 + $0x8] sm:$0xff]  ;;  %v244_v4 = vld [vmem:[%s1679_s28 + $0x10] sm:$0xff]  ;;  %s1875_s11 = scalar_lea.vmem %s2089_s4, %s1673_s25 }
  0x11   : > { %1387 = vmatprep.mubr.msk.f32.mxu0 %vm282_vm0, %v242_v2  ;;  %1437 = vmatprep.mubr.msk.f32.mxu1 %vm282_vm0, %v242_v2  ;;  %v245_v5 = vld [vmem:[%s1679_s28 + $0x18] sm:$0xff]  ;;  %v246_v6 = vld [vmem:[%s1679_s28 + $0x20] sm:$0xff]  ;;  %v247_v7 = vld [vmem:[%s1679_s28 + $0x28] sm:$0xff] }
  0x12   : > { %1388 = vmatmul.mubr.msk.f32.vlgmr.msra.gmra.mrb[0].mxu0 %vm282_vm0, %v243_v3  ;;  %1438 = vmatmul.mubr.msk.f32.vlgmr.msra.gmra.mrb[0].mxu1 %vm282_vm0, %v243_v3  ;;  %v248_v8 = vld [vmem:[%s1679_s28 + $0x30] sm:$0xff]  ;;  %v249_v9 = vld [vmem:[%s1679_s28 + $0x38] sm:$0xff]  ;;  %v250_v10 = vld [vmem:[%s1679_s28 + $0x40] sm:$0xff] }
  0x13   : > { %1390 = vmatprep.mubr.msk.f32.mxu0 %vm282_vm0, %v244_v4  ;;  %1440 = vmatprep.mubr.msk.f32.mxu1 %vm282_vm0, %v244_v4  ;;  %v251_v11 = vld [vmem:[%s1679_s28 + $0x48] sm:$0xff]  ;;  %v252_v12 = vld [vmem:[%s1679_s28 + $0x50] sm:$0xff]  ;;  %v253_v13 = vld [vmem:[%s1679_s28 + $0x58] sm:$0xff] }
  0x14   : > { %v254_v14 = vld [vmem:[%s1679_s28 + $0x60] sm:$0xff]  ;;  %v255_v15 = vld [vmem:[%s1679_s28 + $0x68] sm:$0xff]  ;;  %v256_v16 = vld [vmem:[%s1679_s28 + $0x70] sm:$0xff] }
  0x15   : > { %v257_v17 = vld [vmem:[%s1679_s28 + $0x78] sm:$0xff]  ;;  %v258_v18 = vld [vmem:[%s1679_s28 + $0x80] sm:$0xff]  ;;  %v259_v19 = vld [vmem:[%s1679_s28 + $0x88] sm:$0xff] }
  0x16   : > { %1391 = vmatmul.mubr.msk.f32.gmra.mrb[2].mxu0 %vm282_vm0, %v245_v5  ;;  %1441 = vmatmul.mubr.msk.f32.gmra.mrb[2].mxu1 %vm282_vm0, %v245_v5  ;;  %v260_v20 = vld [vmem:[%s1679_s28 + $0x90] sm:$0xff]  ;;  %v261_v21 = vld [vmem:[%s1679_s28 + $0x98] sm:$0xff]  ;;  %v262_v22 = vld [vmem:[%s1679_s28 + $0xa0] sm:$0xff] }
  0x17   : > { %1393 = vmatprep.mubr.msk.f32.mxu0 %vm282_vm0, %v246_v6  ;;  %1443 = vmatprep.mubr.msk.f32.mxu1 %vm282_vm0, %v246_v6  ;;  %v263_v23 = vld [vmem:[%s1679_s28 + $0xa8] sm:$0xff]  ;;  %v264_v24 = vld [vmem:[%s1679_s28 + $0xb0] sm:$0xff]  ;;  %v265_v25 = vld [vmem:[%s1679_s28 + $0xb8] sm:$0xff] }
  0x18   : > { %v266_v26 = vld [vmem:[%s1679_s28 + $0xc0] sm:$0xff]  ;;  %v267_v27 = vld [vmem:[%s1679_s28 + $0xc8] sm:$0xff]  ;;  %v268_v28 = vld [vmem:[%s1679_s28 + $0xd0] sm:$0xff] }
  0x19   : > { %v269_v29 = vld [vmem:[%s1679_s28 + $0xd8] sm:$0xff]  ;;  %v270_v30 = vld [vmem:[%s1679_s28 + $0xe0] sm:$0xff]  ;;  %v271_v31 = vld [vmem:[%s1679_s28 + $0xe8] sm:$0xff] }
  0x1a   : > { %1394 = vmatmul.mubr.msk.f32.gmra.mrb[4].mxu0 %vm282_vm0, %v247_v7  ;;  %1444 = vmatmul.mubr.msk.f32.gmra.mrb[4].mxu1 %vm282_vm0, %v247_v7  ;;  %v272_v32 = vld [vmem:[%s1679_s28 + $0xf0] sm:$0xff]  ;;  %v273_v33 = vld [vmem:[%s1679_s28 + $0xf8] sm:$0xff] }
  0x1b   : > { %1396 = vmatprep.mubr.msk.f32.mxu0 %vm282_vm0, %v248_v8  ;;  %1446 = vmatprep.mubr.msk.f32.mxu1 %vm282_vm0, %v248_v8 }
  0x1e   : > { %1397 = vmatmul.mubr.msk.f32.gmra.mrb[6].mxu0 %vm282_vm0, %v249_v9  ;;  %1447 = vmatmul.mubr.msk.f32.gmra.mrb[6].mxu1 %vm282_vm0, %v249_v9 }
  0x1f   : > { %1399 = vmatprep.mubr.msk.f32.mxu0 %vm282_vm0, %v250_v10  ;;  %1449 = vmatprep.mubr.msk.f32.mxu1 %vm282_vm0, %v250_v10 }
  0x22   : > { %1400 = vmatmul.mubr.msk.f32.gmra.mrb[8].mxu0 %vm282_vm0, %v251_v11  ;;  %1450 = vmatmul.mubr.msk.f32.gmra.mrb[8].mxu1 %vm282_vm0, %v251_v11 }
  0x23   : > { %1402 = vmatprep.mubr.msk.f32.mxu0 %vm282_vm0, %v252_v12  ;;  %1452 = vmatprep.mubr.msk.f32.mxu1 %vm282_vm0, %v252_v12 }
  0x26   : > { %1403 = vmatmul.mubr.msk.f32.gmra.mrb[10].mxu0 %vm282_vm0, %v253_v13  ;;  %1453 = vmatmul.mubr.msk.f32.gmra.mrb[10].mxu1 %vm282_vm0, %v253_v13 }
  0x27   : > { %1405 = vmatprep.mubr.msk.f32.mxu0 %vm282_vm0, %v254_v14  ;;  %1455 = vmatprep.mubr.msk.f32.mxu1 %vm282_vm0, %v254_v14 }
  0x2a   : > { %1406 = vmatmul.mubr.msk.f32.gmra.mrb[12].mxu0 %vm282_vm0, %v255_v15  ;;  %1456 = vmatmul.mubr.msk.f32.gmra.mrb[12].mxu1 %vm282_vm0, %v255_v15 }
  0x2b   : > { %1408 = vmatprep.mubr.msk.f32.mxu0 %vm282_vm0, %v256_v16  ;;  %1458 = vmatprep.mubr.msk.f32.mxu1 %vm282_vm0, %v256_v16 }
  0x2e   : > { %1409 = vmatmul.mubr.msk.f32.gmra.mrb[14].mxu0 %vm282_vm0, %v257_v17  ;;  %1459 = vmatmul.mubr.msk.f32.gmra.mrb[14].mxu1 %vm282_vm0, %v257_v17 }
  0x2f   : > { %1411 = vmatprep.mubr.msk.f32.mxu0 %vm282_vm0, %v258_v18  ;;  %1461 = vmatprep.mubr.msk.f32.mxu1 %vm282_vm0, %v258_v18 }
  0x32   : > { %1412 = vmatmul.mubr.msk.f32.gmra.mrb[16].mxu0 %vm282_vm0, %v259_v19  ;;  %1462 = vmatmul.mubr.msk.f32.gmra.mrb[16].mxu1 %vm282_vm0, %v259_v19 }
  0x33   : > { %1414 = vmatprep.mubr.msk.f32.mxu0 %vm282_vm0, %v260_v20  ;;  %1464 = vmatprep.mubr.msk.f32.mxu1 %vm282_vm0, %v260_v20 }
  0x36   : > { %1415 = vmatmul.mubr.msk.f32.gmra.mrb[18].mxu0 %vm282_vm0, %v261_v21  ;;  %1465 = vmatmul.mubr.msk.f32.gmra.mrb[18].mxu1 %vm282_vm0, %v261_v21 }
  0x37   : > { %1417 = vmatprep.mubr.msk.f32.mxu0 %vm282_vm0, %v262_v22  ;;  %1467 = vmatprep.mubr.msk.f32.mxu1 %vm282_vm0, %v262_v22 }
  0x3a   : > { %1418 = vmatmul.mubr.msk.f32.gmra.mrb[20].mxu0 %vm282_vm0, %v263_v23  ;;  %1468 = vmatmul.mubr.msk.f32.gmra.mrb[20].mxu1 %vm282_vm0, %v263_v23 }
  0x3b   : > { %1420 = vmatprep.mubr.msk.f32.mxu0 %vm282_vm0, %v264_v24  ;;  %1470 = vmatprep.mubr.msk.f32.mxu1 %vm282_vm0, %v264_v24 }
  0x3e   : > { %1421 = vmatmul.mubr.msk.f32.gmra.mrb[22].mxu0 %vm282_vm0, %v265_v25  ;;  %1471 = vmatmul.mubr.msk.f32.gmra.mrb[22].mxu1 %vm282_vm0, %v265_v25 }
  0x3f   : > { %1423 = vmatprep.mubr.msk.f32.mxu0 %vm282_vm0, %v266_v26  ;;  %1473 = vmatprep.mubr.msk.f32.mxu1 %vm282_vm0, %v266_v26 }
  0x42   : > { %1424 = vmatmul.mubr.msk.f32.gmra.mrb[24].mxu0 %vm282_vm0, %v267_v27  ;;  %1474 = vmatmul.mubr.msk.f32.gmra.mrb[24].mxu1 %vm282_vm0, %v267_v27 }
  0x43   : > { %1426 = vmatprep.mubr.msk.f32.mxu0 %vm282_vm0, %v268_v28  ;;  %1476 = vmatprep.mubr.msk.f32.mxu1 %vm282_vm0, %v268_v28 }
  0x46   : > { %1427 = vmatmul.mubr.msk.f32.gmra.mrb[26].mxu0 %vm282_vm0, %v269_v29  ;;  %1477 = vmatmul.mubr.msk.f32.gmra.mrb[26].mxu1 %vm282_vm0, %v269_v29 }
  0x47   : > { %1429 = vmatprep.mubr.msk.f32.mxu0 %vm282_vm0, %v270_v30  ;;  %1479 = vmatprep.mubr.msk.f32.mxu1 %vm282_vm0, %v270_v30 }
  0x4a   : > { %1430 = vmatmul.mubr.msk.f32.gmra.mrb[28].mxu0 %vm282_vm0, %v271_v31  ;;  %1480 = vmatmul.mubr.msk.f32.gmra.mrb[28].mxu1 %vm282_vm0, %v271_v31 }
  0x4b   : > { %1432 = vmatprep.mubr.msk.f32.mxu0 %vm282_vm0, %v272_v32  ;;  %1482 = vmatprep.mubr.msk.f32.mxu1 %vm282_vm0, %v272_v32 }
  0x4e   : > { %1433 = vmatmul.mubr.msk.f32.gmra.mrb[30].mxu0 %vm282_vm0, %v273_v33  ;;  %1483 = vmatmul.mubr.msk.f32.gmra.mrb[30].mxu1 %vm282_vm0, %v273_v33 }
  0xe5   : > { %v1389_v35 = vpop.f32.mrb[0].mxu0  ;;  %v1439_v36 = vpop.f32.mrb[0].mxu1 }
  0xe6   : > { %v1789_v37 = vadd.f32 %v1389_v35, %v1780_v34  ;;  %v445_v38 = vpop.f32.mrb[1].mxu0  ;;  %1088 = vst.msk [vmem:[%s1786_s8 + $0x8] sm:$0xff] %vm828_vm1, %v1439_v36  ;;  %v928_v39 = vpop.f32.mrb[1].mxu1 }
  0xe7   : > { %v1794_v40 = vadd.f32 %v1780_v34, %v445_v38  ;;  %1087 = vst.msk [vmem:[%s1786_s8] sm:$0xff] %vm828_vm1, %v928_v39 }
  0xe8   : > { %v1254_v41 = vmul.f32 -1.442695, %v1789_v37 }
  0xe9   : > { %v1253_v42 = vmul.f32 -1.442695, %v1794_v40  ;;  %v1392_v43 = vpop.f32.mrb[2].mxu0  ;;  %v1442_v44 = vpop.f32.mrb[2].mxu1 }
  0xea   : > { %1493 = vpow2.f32 %v1254_v41  ;;  %v1801_v45 = vadd.f32 %v1392_v43, %v1780_v34  ;;  %v455_v46 = vpop.f32.mrb[3].mxu0  ;;  %1090 = vst.msk [vmem:[%s1786_s8 + $0x18] sm:$0xff] %vm828_vm1, %v1442_v44  ;;  %v938_v47 = vpop.f32.mrb[3].mxu1 }
  0xeb   : > { %1495 = vpow2.f32 %v1253_v42  ;;  %v1806_v48 = vadd.f32 %v1780_v34, %v455_v46  ;;  %1089 = vst.msk [vmem:[%s1786_s8 + $0x10] sm:$0xff] %vm828_vm1, %v938_v47 }
  0xec   : > { %v1256_v49 = vmul.f32 -1.442695, %v1801_v45 }
  0xed   : > { %v1255_v50 = vmul.f32 -1.442695, %v1806_v48  ;;  %v1395_v51 = vpop.f32.mrb[4].mxu0  ;;  %v1445_v52 = vpop.f32.mrb[4].mxu1 }
  0xee   : > { %1497 = vpow2.f32 %v1256_v49  ;;  %v1813_v53 = vadd.f32 %v1395_v51, %v1780_v34  ;;  %v465_v54 = vpop.f32.mrb[5].mxu0  ;;  %1092 = vst.msk [vmem:[%s1786_s8 + $0x28] sm:$0xff] %vm828_vm1, %v1445_v52  ;;  %v948_v55 = vpop.f32.mrb[5].mxu1 }
  0xef   : > { %1499 = vpow2.f32 %v1255_v50  ;;  %v1818_v56 = vadd.f32 %v1780_v34, %v465_v54  ;;  %1091 = vst.msk [vmem:[%s1786_s8 + $0x20] sm:$0xff] %vm828_vm1, %v948_v55 }
  0xf0   : > { %v1258_v57 = vmul.f32 -1.442695, %v1813_v53 }
  0xf1   : > { %v1257_v58 = vmul.f32 -1.442695, %v1818_v56  ;;  %v1398_v59 = vpop.f32.mrb[6].mxu0  ;;  %v1448_v60 = vpop.f32.mrb[6].mxu1 }
  0xf2   : > { %1501 = vpow2.f32 %v1258_v57  ;;  %v1825_v61 = vadd.f32 %v1398_v59, %v1780_v34  ;;  %v475_v62 = vpop.f32.mrb[7].mxu0  ;;  %1094 = vst.msk [vmem:[%s1786_s8 + $0x38] sm:$0xff] %vm828_vm1, %v1448_v60  ;;  %v958_v63 = vpop.f32.mrb[7].mxu1 }
  0xf3   : > { %1503 = vpow2.f32 %v1257_v58  ;;  %v1830_v0 = vadd.f32 %v1780_v34, %v475_v62  ;;  %1093 = vst.msk [vmem:[%s1786_s8 + $0x30] sm:$0xff] %vm828_vm1, %v958_v63 }
  0xf4   : > { %v1494_v1 = vpop.eup %1493  ;;  %v1260_v2 = vmul.f32 -1.442695, %v1825_v61 }
  0xf5   : > { %v1496_v3 = vpop.eup %1495  ;;  %v701_v4 = vadd.f32 1.0, %v1494_v1  ;;  %v1259_v5 = vmul.f32 -1.442695, %v1830_v0  ;;  %v1401_v6 = vpop.f32.mrb[8].mxu0 }
  0xf6   : > { %v1451_v7 = vpop.f32.mrb[8].mxu1  ;;  %v700_v8 = vadd.f32 1.0, %v1496_v3  ;;  %1505 = vpow2.f32 %v1260_v2  ;;  %v1837_v9 = vadd.f32 %v1401_v6, %v1780_v34  ;;  %v485_v10 = vpop.f32.mrb[9].mxu0 }
  0xf7   : > { %1096 = vst.msk [vmem:[%s1786_s8 + $0x48] sm:$0xff] %vm828_vm1, %v1451_v7  ;;  %v968_v11 = vpop.f32.mrb[9].mxu1  ;;  %1507 = vrcp.f32 %v701_v4  ;;  %v1842_v12 = vadd.f32 %v1780_v34, %v485_v10 }
  0xf8   : > { %1095 = vst.msk [vmem:[%s1786_s8 + $0x40] sm:$0xff] %vm828_vm1, %v968_v11  ;;  %v1498_v13 = vpop.eup %1497  ;;  %1509 = vrcp.f32 %v700_v8  ;;  %v1262_v14 = vmul.f32 -1.442695, %v1837_v9 }
  0xf9   : > { %v1500_v15 = vpop.eup %1499  ;;  %v703_v16 = vadd.f32 1.0, %v1498_v13  ;;  %1511 = vpow2.f32 %v1259_v5  ;;  %v1261_v17 = vmul.f32 -1.442695, %v1842_v12  ;;  %v1404_v18 = vpop.f32.mrb[10].mxu0 }
  0xfa   : > { %v1454_v19 = vpop.f32.mrb[10].mxu1  ;;  %v702_v20 = vadd.f32 1.0, %v1500_v15  ;;  %1513 = vpow2.f32 %v1262_v14  ;;  %v1849_v21 = vadd.f32 %v1404_v18, %v1780_v34  ;;  %v495_v22 = vpop.f32.mrb[11].mxu0 }
  0xfb   : > { %1098 = vst.msk [vmem:[%s1786_s8 + $0x58] sm:$0xff] %vm828_vm1, %v1454_v19  ;;  %v978_v23 = vpop.f32.mrb[11].mxu1  ;;  %1515 = vrcp.f32 %v703_v16  ;;  %v1854_v24 = vadd.f32 %v1780_v34, %v495_v22 }
  0xfc   : > { %1097 = vst.msk [vmem:[%s1786_s8 + $0x50] sm:$0xff] %vm828_vm1, %v978_v23  ;;  %v1502_v25 = vpop.eup %1501  ;;  %1517 = vrcp.f32 %v702_v20  ;;  %v1264_v26 = vmul.f32 -1.442695, %v1849_v21 }
  0xfd   : > { %v1504_v27 = vpop.eup %1503  ;;  %v705_v28 = vadd.f32 1.0, %v1502_v25  ;;  %1519 = vpow2.f32 %v1261_v17  ;;  %v1263_v29 = vmul.f32 -1.442695, %v1854_v24  ;;  %v1407_v30 = vpop.f32.mrb[12].mxu0 }
  0xfe   : > { %v1457_v31 = vpop.f32.mrb[12].mxu1  ;;  %v704_v32 = vadd.f32 1.0, %v1504_v27  ;;  %1521 = vpow2.f32 %v1264_v26  ;;  %v1861_v33 = vadd.f32 %v1407_v30, %v1780_v34  ;;  %v505_v35 = vpop.f32.mrb[13].mxu0 }
  0xff   : > { %1100 = vst.msk [vmem:[%s1786_s8 + $0x68] sm:$0xff] %vm828_vm1, %v1457_v31  ;;  %v988_v36 = vpop.f32.mrb[13].mxu1  ;;  %1523 = vrcp.f32 %v705_v28  ;;  %v1866_v38 = vadd.f32 %v1780_v34, %v505_v35 }
 0x100   : > { %1099 = vst.msk [vmem:[%s1786_s8 + $0x60] sm:$0xff] %vm828_vm1, %v988_v36  ;;  %v1506_v39 = vpop.eup %1505  ;;  %1525 = vrcp.f32 %v704_v32  ;;  %v1266_v41 = vmul.f32 -1.442695, %v1861_v33 }
 0x101   : > { %v1508_v42 = vpop.eup %1507  ;;  %v707_v43 = vadd.f32 1.0, %v1506_v39  ;;  %1527 = vpow2.f32 %v1263_v29  ;;  %v1265_v44 = vmul.f32 -1.442695, %v1866_v38  ;;  %v1410_v46 = vpop.f32.mrb[14].mxu0 }
 0x102   : > { %v1460_v47 = vpop.f32.mrb[14].mxu1  ;;  %v1510_v49 = vpop.eup %1509  ;;  %v797_v50 = vmul.f32 %v1508_v42, %v1789_v37  ;;  %1529 = vpow2.f32 %v1266_v41  ;;  %v1880_v51 = vadd.f32 %v1410_v46, %v1780_v34 }
 0x103   : > { %v515_v52 = vpop.f32.mrb[15].mxu0  ;;  %1102 = vst.msk [vmem:[%s1786_s8 + $0x78] sm:$0xff] %vm828_vm1, %v1460_v47  ;;  %v998_v54 = vpop.f32.mrb[15].mxu1  ;;  %v796_v57 = vmul.f32 %v1510_v49, %v1794_v40  ;;  %1531 = vrcp.f32 %v707_v43 }
 0x104   : > { %v1512_v55 = vpop.eup %1511  ;;  %v1886_v58 = vadd.f32 %v1780_v34, %v515_v52  ;;  %1101 = vst.msk [vmem:[%s1786_s8 + $0x70] sm:$0xff] %vm828_vm1, %v998_v54  ;;  %830 = vst.msk [vmem:[%s1875_s11 + $0x8] sm:$0xff] %vm828_vm1, %v797_v50  ;;  %1533 = vpow2.f32 %v1265_v44  ;;  %v1268_v60 = vmul.f32 -1.442695, %v1880_v51 }
 0x105   : > { %v1514_v59 = vpop.eup %1513  ;;  %v706_v37 = vadd.f32 1.0, %v1512_v55  ;;  %829 = vst.msk [vmem:[%s1875_s11] sm:$0xff] %vm828_vm1, %v796_v57  ;;  %v1413_v1 = vpop.f32.mrb[16].mxu0 }
 0x106   : > { %v1516_v62 = vpop.eup %1515  ;;  %v709_v63 = vadd.f32 1.0, %v1514_v59  ;;  %v1267_v40 = vmul.f32 -1.442695, %v1886_v58  ;;  %v1463_v2 = vpop.f32.mrb[16].mxu1  ;;  %v1898_v5 = vadd.f32 %v1413_v1, %v1780_v34 }
 0x107   : > { %v1518_v3 = vpop.eup %1517  ;;  %v799_v4 = vmul.f32 %v1516_v62, %v1801_v45  ;;  %1535 = vrcp.f32 %v706_v37  ;;  %v525_v6 = vpop.f32.mrb[17].mxu0  ;;  %1104 = vst.msk [vmem:[%s1786_s8 + $0x88] sm:$0xff] %vm828_vm1, %v1463_v2 }
 0x108   : > { %v1008_v7 = vpop.f32.mrb[17].mxu1  ;;  %v1520_v8 = vpop.eup %1519  ;;  %v798_v10 = vmul.f32 %v1518_v3, %v1806_v48  ;;  %1537 = vrcp.f32 %v709_v63  ;;  %v1904_v11 = vadd.f32 %v1780_v34, %v525_v6  ;;  %v1270_v14 = vmul.f32 -1.442695, %v1898_v5 }
 0x109   : > { %1103 = vst.msk [vmem:[%s1786_s8 + $0x80] sm:$0xff] %vm828_vm1, %v1008_v7  ;;  %v1522_v13 = vpop.eup %1521  ;;  %832 = vst.msk [vmem:[%s1875_s11 + $0x18] sm:$0xff] %vm828_vm1, %v799_v4  ;;  %v708_v45 = vadd.f32 1.0, %v1520_v8  ;;  %1539 = vpow2.f32 %v1268_v60  ;;  %v1416_v17 = vpop.f32.mrb[18].mxu0 }
 0x10a   : > { %v1524_v15 = vpop.eup %1523  ;;  %831 = vst.msk [vmem:[%s1875_s11 + $0x10] sm:$0xff] %vm828_vm1, %v798_v10  ;;  %v711_v16 = vadd.f32 1.0, %v1522_v13  ;;  %1541 = vpow2.f32 %v1267_v40  ;;  %v1269_v48 = vmul.f32 -1.442695, %v1904_v11  ;;  %v1466_v18 = vpop.f32.mrb[18].mxu1  ;;  %v1916_v22 = vadd.f32 %v1416_v17, %v1780_v34 }
 0x10b   : > { %v1526_v19 = vpop.eup %1525  ;;  %v801_v20 = vmul.f32 %v1524_v15, %v1813_v53  ;;  %1543 = vrcp.f32 %v708_v45  ;;  %v535_v23 = vpop.f32.mrb[19].mxu0  ;;  %1106 = vst.msk [vmem:[%s1786_s8 + $0x98] sm:$0xff] %vm828_vm1, %v1466_v18 }
 0x10c   : > { %v1018_v25 = vpop.f32.mrb[19].mxu1  ;;  %v1528_v26 = vpop.eup %1527  ;;  %v800_v27 = vmul.f32 %v1526_v19, %v1818_v56  ;;  %1545 = vrcp.f32 %v711_v16  ;;  %v1922_v28 = vadd.f32 %v1780_v34, %v535_v23  ;;  %v1272_v30 = vmul.f32 -1.442695, %v1916_v22 }
 0x10d   : > { %1105 = vst.msk [vmem:[%s1786_s8 + $0x90] sm:$0xff] %vm828_vm1, %v1018_v25  ;;  %v1530_v29 = vpop.eup %1529  ;;  %834 = vst.msk [vmem:[%s1875_s11 + $0x28] sm:$0xff] %vm828_vm1, %v801_v20  ;;  %v710_v53 = vadd.f32 1.0, %v1528_v26  ;;  %1547 = vpow2.f32 %v1270_v14  ;;  %v1419_v56 = vpop.f32.mrb[20].mxu0 }
 0x10e   : > { %v1532_v31 = vpop.eup %1531  ;;  %833 = vst.msk [vmem:[%s1875_s11 + $0x20] sm:$0xff] %vm828_vm1, %v800_v27  ;;  %v713_v32 = vadd.f32 1.0, %v1530_v29  ;;  %1549 = vpow2.f32 %v1269_v48  ;;  %v1469_v35 = vpop.f32.mrb[20].mxu1  ;;  %v1271_v41 = vmul.f32 -1.442695, %v1922_v28  ;;  %v1934_v42 = vadd.f32 %v1419_v56, %v1780_v34 }
 0x10f   : > { %v1534_v36 = vpop.eup %1533  ;;  %v803_v39 = vmul.f32 %v1532_v31, %v1825_v61  ;;  %1551 = vrcp.f32 %v710_v53  ;;  %v545_v43 = vpop.f32.mrb[21].mxu0  ;;  %1108 = vst.msk [vmem:[%s1786_s8 + $0xa8] sm:$0xff] %vm828_vm1, %v1469_v35 }
 0x110   : > { %v1028_v44 = vpop.f32.mrb[21].mxu1  ;;  %1553 = vrcp.f32 %v713_v32  ;;  %v712_v46 = vadd.f32 1.0, %v1534_v36  ;;  %v1939_v47 = vadd.f32 %v1780_v34, %v545_v43  ;;  %v1274_v61 = vmul.f32 -1.442695, %v1934_v42 }
 0x111   : > { %1107 = vst.msk [vmem:[%s1786_s8 + $0xa0] sm:$0xff] %vm828_vm1, %v1028_v44  ;;  %v1536_v49 = vpop.eup %1535  ;;  %836 = vst.msk [vmem:[%s1875_s11 + $0x38] sm:$0xff] %vm828_vm1, %v803_v39  ;;  %1555 = vpow2.f32 %v1272_v30  ;;  %v1422_v55 = vpop.f32.mrb[22].mxu0 }
 0x112   : > { %v1538_v50 = vpop.eup %1537  ;;  %v802_v52 = vmul.f32 %v1536_v49, %v1830_v0  ;;  %1557 = vrcp.f32 %v712_v46  ;;  %v1273_v54 = vmul.f32 -1.442695, %v1939_v47  ;;  %v1472_v57 = vpop.f32.mrb[22].mxu1  ;;  %v1950_v60 = vadd.f32 %v1422_v55, %v1780_v34 }
 0x113   : > { %v1540_v59 = vpop.eup %1539  ;;  %v805_v37 = vmul.f32 %v1538_v50, %v1837_v9  ;;  %1559 = vpow2.f32 %v1271_v41  ;;  %v555_v62 = vpop.f32.mrb[23].mxu0  ;;  %1110 = vst.msk [vmem:[%s1786_s8 + $0xb8] sm:$0xff] %vm828_vm1, %v1472_v57 }
 0x114   : > { %v1038_v63 = vpop.f32.mrb[23].mxu1  ;;  %v1542_v40 = vpop.eup %1541  ;;  %835 = vst.msk [vmem:[%s1875_s11 + $0x30] sm:$0xff] %vm828_vm1, %v802_v52  ;;  %v715_v0 = vadd.f32 1.0, %v1540_v59  ;;  %1561 = vpow2.f32 %v1274_v61  ;;  %v1957_v1 = vadd.f32 %v1780_v34, %v555_v62  ;;  %v1276_v3 = vmul.f32 -1.442695, %v1950_v60 }
 0x115   : > { %1109 = vst.msk [vmem:[%s1786_s8 + $0xb0] sm:$0xff] %vm828_vm1, %v1038_v63  ;;  %v1544_v2 = vpop.eup %1543  ;;  %838 = vst.msk [vmem:[%s1875_s11 + $0x48] sm:$0xff] %vm828_vm1, %v805_v37  ;;  %v714_v9 = vadd.f32 1.0, %v1542_v40  ;;  %1563 = vpow2.f32 %v1273_v54  ;;  %v1425_v8 = vpop.f32.mrb[24].mxu0 }
 0x116   : > { %v1546_v4 = vpop.eup %1545  ;;  %v804_v6 = vmul.f32 %v1544_v2, %v1842_v12  ;;  %1565 = vrcp.f32 %v715_v0  ;;  %v1275_v7 = vmul.f32 -1.442695, %v1957_v1  ;;  %v1475_v10 = vpop.f32.mrb[24].mxu1  ;;  %v1968_v14 = vadd.f32 %v1425_v8, %v1780_v34 }
 0x117   : > { %v1548_v13 = vpop.eup %1547  ;;  %v807_v45 = vmul.f32 %v1546_v4, %v1849_v21  ;;  %1567 = vrcp.f32 %v714_v9  ;;  %v565_v15 = vpop.f32.mrb[25].mxu0  ;;  %1112 = vst.msk [vmem:[%s1786_s8 + $0xc8] sm:$0xff] %vm828_vm1, %v1475_v10 }
 0x118   : > { %v1048_v16 = vpop.f32.mrb[25].mxu1  ;;  %v1550_v48 = vpop.eup %1549  ;;  %837 = vst.msk [vmem:[%s1875_s11 + $0x40] sm:$0xff] %vm828_vm1, %v804_v6  ;;  %v717_v12 = vadd.f32 1.0, %v1548_v13  ;;  %1569 = vpow2.f32 %v1276_v3  ;;  %v1975_v17 = vadd.f32 %v1780_v34, %v565_v15  ;;  %v1278_v19 = vmul.f32 -1.442695, %v1968_v14 }
 0x119   : > { %1111 = vst.msk [vmem:[%s1786_s8 + $0xc0] sm:$0xff] %vm828_vm1, %v1048_v16  ;;  %v1552_v18 = vpop.eup %1551  ;;  %840 = vst.msk [vmem:[%s1875_s11 + $0x58] sm:$0xff] %vm828_vm1, %v807_v45  ;;  %v716_v21 = vadd.f32 1.0, %v1550_v48  ;;  %1571 = vpow2.f32 %v1275_v7  ;;  %v1428_v26 = vpop.f32.mrb[26].mxu0 }
 0x11a   : > { %v1554_v20 = vpop.eup %1553  ;;  %v806_v23 = vmul.f32 %v1552_v18, %v1854_v24  ;;  %1573 = vrcp.f32 %v717_v12  ;;  %v1277_v25 = vmul.f32 -1.442695, %v1975_v17  ;;  %v1478_v27 = vpop.f32.mrb[26].mxu1  ;;  %v1986_v30 = vadd.f32 %v1428_v26, %v1780_v34 }
 0x11b   : > { %v1556_v29 = vpop.eup %1555  ;;  %v809_v53 = vmul.f32 %v1554_v20, %v1861_v33  ;;  %1575 = vrcp.f32 %v716_v21  ;;  %v575_v31 = vpop.f32.mrb[27].mxu0  ;;  %1114 = vst.msk [vmem:[%s1786_s8 + $0xd8] sm:$0xff] %vm828_vm1, %v1478_v27 }
 0x11c   : > { %v1058_v32 = vpop.f32.mrb[27].mxu1  ;;  %v1558_v56 = vpop.eup %1557  ;;  %839 = vst.msk [vmem:[%s1875_s11 + $0x50] sm:$0xff] %vm828_vm1, %v806_v23  ;;  %v719_v24 = vadd.f32 1.0, %v1556_v29  ;;  %1577 = vpow2.f32 %v1278_v19  ;;  %v1993_v35 = vadd.f32 %v1780_v34, %v575_v31  ;;  %v1280_v39 = vmul.f32 -1.442695, %v1986_v30 }
 0x11d   : > { %1113 = vst.msk [vmem:[%s1786_s8 + $0xd0] sm:$0xff] %vm828_vm1, %v1058_v32  ;;  %v1560_v33 = vpop.eup %1559  ;;  %842 = vst.msk [vmem:[%s1875_s11 + $0x68] sm:$0xff] %vm828_vm1, %v809_v53  ;;  %v808_v36 = vmul.f32 %v1558_v56, %v1866_v38  ;;  %1579 = vpow2.f32 %v1277_v25  ;;  %v1431_v44 = vpop.f32.mrb[28].mxu0 }
 0x11e   : > { %v1562_v41 = vpop.eup %1561  ;;  %1581 = vrcp.f32 %v719_v24  ;;  %v718_v43 = vadd.f32 1.0, %v1560_v33  ;;  %v1481_v46 = vpop.f32.mrb[28].mxu1  ;;  %v1279_v50 = vmul.f32 -1.442695, %v1993_v35  ;;  %v2005_v52 = vadd.f32 %v1431_v44, %v1780_v34 }
 0x11f   : > { %v1564_v49 = vpop.eup %1563  ;;  %841 = vst.msk [vmem:[%s1875_s11 + $0x60] sm:$0xff] %vm828_vm1, %v808_v36  ;;  %v721_v61 = vadd.f32 1.0, %v1562_v41  ;;  %1583 = vpow2.f32 %v1280_v39  ;;  %v585_v38 = vpop.f32.mrb[29].mxu0  ;;  %1116 = vst.msk [vmem:[%s1786_s8 + $0xe8] sm:$0xff] %vm828_vm1, %v1481_v46 }
 0x120   : > { %v1068_v54 = vpop.f32.mrb[29].mxu1  ;;  %v1566_v55 = vpop.eup %1565  ;;  %1585 = vrcp.f32 %v718_v43  ;;  %v720_v57 = vadd.f32 1.0, %v1564_v49  ;;  %v2010_v59 = vadd.f32 %v1780_v34, %v585_v38  ;;  %v1282_v63 = vmul.f32 -1.442695, %v2005_v52 }
 0x121   : > { %1115 = vst.msk [vmem:[%s1786_s8 + $0xe0] sm:$0xff] %vm828_vm1, %v1068_v54  ;;  %v1568_v37 = vpop.eup %1567  ;;  %v811_v62 = vmul.f32 %v1566_v55, %v1880_v51  ;;  %1587 = vrcp.f32 %v721_v61  ;;  %v1434_v2 = vpop.f32.mrb[30].mxu0 }
 0x122   : > { %v1570_v40 = vpop.eup %1569  ;;  %v810_v0 = vmul.f32 %v1568_v37, %v1886_v58  ;;  %1589 = vrcp.f32 %v720_v57  ;;  %v1484_v9 = vpop.f32.mrb[30].mxu1  ;;  %v1281_v6 = vmul.f32 -1.442695, %v2010_v59  ;;  %v2021_v51 = vadd.f32 %v1434_v2, %v1780_v34 }
 0x123   : > { %v1572_v3 = vpop.eup %1571  ;;  %844 = vst.msk [vmem:[%s1875_s11 + $0x78] sm:$0xff] %vm828_vm1, %v811_v62  ;;  %v723_v4 = vadd.f32 1.0, %v1570_v40  ;;  %1591 = vpow2.f32 %v1279_v50  ;;  %v595_v7 = vpop.f32.mrb[31].mxu0  ;;  %1118 = vst.msk [vmem:[%s1786_s8 + $0xf8] sm:$0xff] %vm828_vm1, %v1484_v9 }
 0x124   : > { %v1078_v8 = vpop.f32.mrb[31].mxu1  ;;  %v1574_v58 = vpop.eup %1573  ;;  %843 = vst.msk [vmem:[%s1875_s11 + $0x70] sm:$0xff] %vm828_vm1, %v810_v0  ;;  %v722_v10 = vadd.f32 1.0, %v1572_v3  ;;  %1593 = vpow2.f32 %v1282_v63  ;;  %v2028_v13 = vadd.f32 %v1780_v34, %v595_v7  ;;  %v1284_v16 = vmul.f32 -1.442695, %v2021_v51 }
 0x125   : > { %1117 = vst.msk [vmem:[%s1786_s8 + $0xf0] sm:$0xff] %vm828_vm1, %v1078_v8  ;;  %v1576_v45 = vpop.eup %1575  ;;  %v813_v15 = vmul.f32 %v1574_v58, %v1898_v5  ;;  %1595 = vrcp.f32 %v723_v4 }
 0x126   : > { %v1578_v48 = vpop.eup %1577  ;;  %v812_v12 = vmul.f32 %v1576_v45, %v1904_v11  ;;  %1597 = vrcp.f32 %v722_v10  ;;  %v1283_v34 = vmul.f32 -1.442695, %v2028_v13 }
 0x127   : > { %v1580_v18 = vpop.eup %1579  ;;  %846 = vst.msk [vmem:[%s1875_s11 + $0x88] sm:$0xff] %vm828_vm1, %v813_v15  ;;  %v725_v21 = vadd.f32 1.0, %v1578_v48  ;;  %1599 = vpow2.f32 %v1281_v6 }
 0x128   : > { %v1582_v19 = vpop.eup %1581  ;;  %845 = vst.msk [vmem:[%s1875_s11 + $0x80] sm:$0xff] %vm828_vm1, %v812_v12  ;;  %v724_v20 = vadd.f32 1.0, %v1580_v18  ;;  %1601 = vpow2.f32 %v1284_v16 }
 0x129   : > { %v1584_v5 = vpop.eup %1583  ;;  %v815_v23 = vmul.f32 %v1582_v19, %v1916_v22  ;;  %1603 = vrcp.f32 %v725_v21 }
 0x12a   : > { %v1586_v11 = vpop.eup %1585  ;;  %1605 = vrcp.f32 %v724_v20  ;;  %v727_v25 = vadd.f32 1.0, %v1584_v5 }
 0x12b   : > { %v1588_v26 = vpop.eup %1587  ;;  %848 = vst.msk [vmem:[%s1875_s11 + $0x98] sm:$0xff] %vm828_vm1, %v815_v23  ;;  %v814_v27 = vmul.f32 %v1586_v11, %v1922_v28  ;;  %1607 = vpow2.f32 %v1283_v34 }
 0x12c   : > { %v1590_v29 = vpop.eup %1589  ;;  %v817_v53 = vmul.f32 %v1588_v26, %v1934_v42  ;;  %1609 = vrcp.f32 %v727_v25 }
 0x12d   : > { %v1592_v31 = vpop.eup %1591  ;;  %847 = vst.msk [vmem:[%s1875_s11 + $0x90] sm:$0xff] %vm828_vm1, %v814_v27  ;;  %v816_v22 = vmul.f32 %v1590_v29, %v1939_v47 }
 0x12e   : > { %v1594_v32 = vpop.eup %1593  ;;  %850 = vst.msk [vmem:[%s1875_s11 + $0xa8] sm:$0xff] %vm828_vm1, %v817_v53  ;;  %v726_v56 = vadd.f32 1.0, %v1592_v31 }
 0x12f   : > { %v1596_v24 = vpop.eup %1595  ;;  %849 = vst.msk [vmem:[%s1875_s11 + $0xa0] sm:$0xff] %vm828_vm1, %v816_v22  ;;  %v729_v28 = vadd.f32 1.0, %v1594_v32 }
 0x130   : > { %v1598_v33 = vpop.eup %1597  ;;  %v819_v36 = vmul.f32 %v1596_v24, %v1950_v60  ;;  %1611 = vrcp.f32 %v726_v56 }
 0x131   : > { %v1600_v42 = vpop.eup %1599  ;;  %v818_v39 = vmul.f32 %v1598_v33, %v1957_v1  ;;  %1613 = vrcp.f32 %v729_v28 }
 0x132   : > { %v1602_v47 = vpop.eup %1601  ;;  %852 = vst.msk [vmem:[%s1875_s11 + $0xb8] sm:$0xff] %vm828_vm1, %v819_v36  ;;  %v728_v41 = vadd.f32 1.0, %v1600_v42 }
 0x133   : > { %v1604_v43 = vpop.eup %1603  ;;  %851 = vst.msk [vmem:[%s1875_s11 + $0xb0] sm:$0xff] %vm828_vm1, %v818_v39  ;;  %v731_v44 = vadd.f32 1.0, %v1602_v47 }
 0x134   : > { %v1606_v46 = vpop.eup %1605  ;;  %v821_v49 = vmul.f32 %v1604_v43, %v1968_v14  ;;  %1615 = vrcp.f32 %v728_v41 }
 0x135   : > { %v1608_v60 = vpop.eup %1607  ;;  %v820_v1 = vmul.f32 %v1606_v46, %v1975_v17  ;;  %1617 = vrcp.f32 %v731_v44 }
 0x136   : > { %v1610_v61 = vpop.eup %1609  ;;  %854 = vst.msk [vmem:[%s1875_s11 + $0xc8] sm:$0xff] %vm828_vm1, %v821_v49  ;;  %v730_v50 = vadd.f32 1.0, %v1608_v60 }
 0x137   : > { %853 = vst.msk [vmem:[%s1875_s11 + $0xc0] sm:$0xff] %vm828_vm1, %v820_v1  ;;  %v823_v38 = vmul.f32 %v1610_v61, %v1986_v30 }
 0x138   : > { %1619 = vrcp.f32 %v730_v50 }
 0x139   : > { %856 = vst.msk [vmem:[%s1875_s11 + $0xd8] sm:$0xff] %vm828_vm1, %v823_v38 }
 0x13a   : > { %v1612_v14 = vpop.eup %1611 }
 0x13b   : > { %v1614_v54 = vpop.eup %1613  ;;  %v822_v55 = vmul.f32 %v1612_v14, %v1993_v35 }
 0x13c   : > { %v825_v17 = vmul.f32 %v1614_v54, %v2005_v52 }
 0x13d   : > { %855 = vst.msk [vmem:[%s1875_s11 + $0xd0] sm:$0xff] %vm828_vm1, %v822_v55 }
 0x13e   : > { %v1616_v57 = vpop.eup %1615  ;;  %858 = vst.msk [vmem:[%s1875_s11 + $0xe8] sm:$0xff] %vm828_vm1, %v825_v17 }
 0x13f   : > { %v1618_v37 = vpop.eup %1617  ;;  %v824_v62 = vmul.f32 %v1616_v57, %v2010_v59 }
 0x140   : > { %v827_v30 = vmul.f32 %v1618_v37, %v2021_v51 }
 0x141   : > { %857 = vst.msk [vmem:[%s1875_s11 + $0xe0] sm:$0xff] %vm828_vm1, %v824_v62 }
 0x142   : > { %v1620_v63 = vpop.eup %1619  ;;  %860 = vst.msk [vmem:[%s1875_s11 + $0xf8] sm:$0xff] %vm828_vm1, %v827_v30 }
 0x143   : > { %v826_v40 = vmul.f32 %v1620_v63, %v2028_v13 }
 0x145   : > { %859 = vst.msk [vmem:[%s1875_s11 + $0xf0] sm:$0xff] %vm828_vm1, %v826_v40 }
 0x146 PF: > { %s16_s18 = sadd.s32 1, %s1627_s18  }
 0x147   : > { %p13_p4 = scmp.ge.s32.totalorder %s16_s18, 4  }
 0x149   :  { %15 = sbr.rel (!%p13_p4) target bundleno = 1 (0x1), region = 78 }

// kernel: bottleneck_csp_forward.5
= control target key start
LH: loop header
LB: loop body
LE: loop exit
PB: predicated region body
PF: predicated region fallthrough
CT: control target
= control target key end

     0   :  { %s5611_s12 = smov 0   ;;  %s6834_s0 = inlined_call_operand.vmem [shape: f32[2,16,16,4], index: 0, kind: input, shape index: {}]   ;;  %s6835_s1 = inlined_call_operand.vmem [shape: f32[3,3,4,4], index: 1, kind: input, shape index: {}]   ;;  %s6836_s2 = inlined_call_operand.vmem [shape: f32[1,4], index: 2, kind: input, shape index: {}]   ;;  %s6837_s3 = inlined_call_operand.vmem [shape: f32[2,256,4], index: 3, kind: output, shape index: {}]  }
   0x1 LB: > { %s4089_s13 = sadd.s32 4294967295, %s5588_s12   ;;  %p4093_p0 = scmp.ge.s32.totalorder %s5588_s12, 1  ;;  %s5588_s12 = sphi %s5611_s12, %s13_s12  }
   0x2   : > { %p137_p1 = scmp.lt.s32.totalorder %s5588_s12, 3 }
   0x4   : > { %p138_p2 = pnand %p4093_p0, %p137_p1 }
   0x6   : > { %141 = sbr.rel (%p138_p2) target bundleno = 585 (0x249), region = 32 }
   0xd   : > { %v5622_v0 = vld [vmem:[%s6835_s1 + $0x4] sm:$0xf]  ;;  %vm455_vm0 = vcmask 1043456   ;;  %vm171_vm1 = vcmask 31744   ;;  %vm174_vm2 = vcmask 25600   ;;  %v5590_v1 = vmov 0.0  }
   0xe   : > { %4737 = vmatprep.subr.msk.mxu1 %vm455_vm0, %v5622_v0  ;;  %172 = vst.msk [vmem:[#allocation2] sm:$0xff] %vm171_vm1, %v5590_v1  ;;  %173 = vst.msk [vmem:[#allocation2 + $0x8] sm:$0xff] %vm171_vm1, %v5590_v1  ;;  %v5683_v2 = vld [vmem:[%s6835_s1 + $0x10] sm:$0xf]  ;;  %p161_p3 = scmp.lt.s32.totalorder %s4089_s13, 1 }
   0xf   : > { %176 = vst.msk [vmem:[#allocation2 + $0x18] sm:$0xff] %vm171_vm1, %v5590_v1  ;;  %177 = vst.msk [vmem:[#allocation2 + $0x20] sm:$0xff] %vm171_vm1, %v5590_v1  ;;  %v324_v3 = vld [vmem:[%s6835_s1] sm:$0xf]  ;;  %4738 = vmatpush3.msk.msra.mxu1 %vm455_vm0, %v5622_v0  ;;  %4937 = vmatprep.subr.msk.mxu0 %vm455_vm0, %v5683_v2  ;;  %v5697_v4 = vld [vmem:[%s6835_s1 + $0x14] sm:$0xf] }
  0x10   : > { %179 = vst.msk [vmem:[#allocation2 + $0x30] sm:$0xff] %vm171_vm1, %v5590_v1  ;;  %180 = vst.msk [vmem:[#allocation2 + $0x38] sm:$0xff] %vm171_vm1, %v5590_v1  ;;  %4938 = vmatpush3.msk.msra.mxu0 %vm455_vm0, %v5683_v2  ;;  %s6947_s13 = smov (!%p161_p3, %s4089_s13), 1  ;;  %4787 = vmatprep.subr.msk.mxu1 %vm455_vm0, %v324_v3  ;;  %v5722_v8 = vld [vmem:[%s6835_s1 + $0x8] sm:$0xf] }
  0x11   : > { %182 = vst.msk [vmem:[#allocation2 + $0x48] sm:$0xff] %vm171_vm1, %v5590_v1  ;;  %183 = vst.msk [vmem:[#allocation2 + $0x50] sm:$0xff] %vm171_vm1, %v5590_v1  ;;  %4987 = vmatprep.subr.msk.mxu0 %vm455_vm0, %v5697_v4  ;;  %s4438_s22 = sshll.u32 %s6947_s13, 8  ;;  %v5777_v33 = vld [vmem:[%s6835_s1 + $0x18] sm:$0xf] }
  0x12   : > { %185 = vst.msk [vmem:[#allocation2 + $0x60] sm:$0xff] %vm171_vm1, %v5590_v1  ;;  %186 = vst.msk [vmem:[#allocation2 + $0x68] sm:$0xff] %vm171_vm1, %v5590_v1  ;;  %s5714_s25 = scalar_lea.vmem %s6834_s0, %s4438_s22  ;;  %v5906_v63 = vld [vmem:[%s6835_s1 + $0x1c] sm:$0xf]  ;;  %s6659_s15 = scalar_lea.vmem %s6837_s3, %s4438_s22 }
  0x13   : > { %188 = vst.msk [vmem:[#allocation2 + $0x78] sm:$0xff] %vm171_vm1, %v5590_v1  ;;  %189 = vst.msk [vmem:[#allocation2 + $0x80] sm:$0xff] %vm171_vm1, %v5590_v1  ;;  %v227_v5 = vld [vmem:[%s5714_s25] sm:$0xff]  ;;  %v228_v6 = vld [vmem:[%s5714_s25 + $0x8] sm:$0xff] }
  0x14   : > { %191 = vst.msk [vmem:[#allocation2 + $0x90] sm:$0xff] %vm171_vm1, %v5590_v1  ;;  %192 = vst.msk [vmem:[#allocation2 + $0x98] sm:$0xff] %vm171_vm1, %v5590_v1  ;;  %v229_v7 = vld [vmem:[%s5714_s25 + $0x10] sm:$0xff]  ;;  %v230_v11 = vld [vmem:[%s5714_s25 + $0x18] sm:$0xff] }
  0x15   : > { %194 = vst.msk [vmem:[#allocation2 + $0xa8] sm:$0xff] %vm171_vm1, %v5590_v1  ;;  %195 = vst.msk [vmem:[#allocation2 + $0xb0] sm:$0xff] %vm171_vm1, %v5590_v1  ;;  %v325_v9 = vld [vmem:[#allocation2 + $0x1] sm:$0xff]  ;;  %v233_v14 = vld [vmem:[%s5714_s25 + $0x30] sm:$0xff] }
  0x16   : > { %197 = vst.msk [vmem:[#allocation2 + $0xc0] sm:$0xff] %vm171_vm1, %v5590_v1  ;;  %198 = vst.msk [vmem:[#allocation2 + $0xc8] sm:$0xff] %vm171_vm1, %v5590_v1  ;;  %4739 = vmatprep.mubr.msk.f32.mxu1 %vm171_vm1, %v325_v9  ;;  %v231_v12 = vld [vmem:[%s5714_s25 + $0x20] sm:$0xff]  ;;  %v232_v13 = vld [vmem:[%s5714_s25 + $0x28] sm:$0xff] }
  0x17   : > { %200 = vst.msk [vmem:[#allocation2 + $0xd8] sm:$0xff] %vm171_vm1, %v5590_v1  ;;  %201 = vst.msk [vmem:[#allocation2 + $0xe0] sm:$0xff] %vm171_vm1, %v5590_v1  ;;  %v234_v15 = vld [vmem:[%s5714_s25 + $0x38] sm:$0xff]  ;;  %v235_v16 = vld [vmem:[%s5714_s25 + $0x40] sm:$0xff] }
  0x18   : > { %203 = vst.msk [vmem:[#allocation2 + $0xf0] sm:$0xff] %vm171_vm1, %v5590_v1  ;;  %204 = vst.msk [vmem:[#allocation2 + $0xf8] sm:$0xff] %vm171_vm1, %v5590_v1  ;;  %v236_v17 = vld [vmem:[%s5714_s25 + $0x48] sm:$0xff]  ;;  %v237_v18 = vld [vmem:[%s5714_s25 + $0x50] sm:$0xff] }
  0x19   : > { %206 = vst.msk [vmem:[#allocation2 + $0x108] sm:$0xff] %vm171_vm1, %v5590_v1  ;;  %207 = vst.msk [vmem:[#allocation2 + $0x110] sm:$0xff] %vm171_vm1, %v5590_v1  ;;  %v238_v19 = vld [vmem:[%s5714_s25 + $0x58] sm:$0xff]  ;;  %v239_v20 = vld [vmem:[%s5714_s25 + $0x60] sm:$0xff] }
  0x1a   : > { %209 = vst.msk [vmem:[#allocation2 + $0x120] sm:$0xff] %vm171_vm1, %v5590_v1  ;;  %210 = vst.msk [vmem:[#allocation2 + $0x128] sm:$0xff] %vm171_vm1, %v5590_v1  ;;  %v240_v21 = vld [vmem:[%s5714_s25 + $0x68] sm:$0xff]  ;;  %v241_v22 = vld [vmem:[%s5714_s25 + $0x70] sm:$0xff] }
  0x1b   : > { %212 = vst.msk [vmem:[#allocation2 + $0x138] sm:$0xff] %vm171_vm1, %v5590_v1  ;;  %213 = vst.msk [vmem:[#allocation2 + $0x140] sm:$0xff] %vm171_vm1, %v5590_v1  ;;  %v242_v23 = vld [vmem:[%s5714_s25 + $0x78] sm:$0xff]  ;;  %v243_v24 = vld [vmem:[%s5714_s25 + $0x80] sm:$0xff] }
  0x1c   : > { %215 = vst.msk [vmem:[#allocation2 + $0x150] sm:$0xff] %vm171_vm1, %v5590_v1  ;;  %216 = vst.msk [vmem:[#allocation2 + $0x158] sm:$0xff] %vm171_vm1, %v5590_v1  ;;  %v244_v25 = vld [vmem:[%s5714_s25 + $0x88] sm:$0xff]  ;;  %v245_v26 = vld [vmem:[%s5714_s25 + $0x90] sm:$0xff] }
  0x1d   : > { %218 = vst.msk [vmem:[#allocation2 + $0x168] sm:$0xff] %vm171_vm1, %v5590_v1  ;;  %219 = vst.msk [vmem:[#allocation2 + $0x170] sm:$0xff] %vm171_vm1, %v5590_v1  ;;  %v246_v27 = vld [vmem:[%s5714_s25 + $0x98] sm:$0xff]  ;;  %v247_v28 = vld [vmem:[%s5714_s25 + $0xa0] sm:$0xff] }
  0x1e   : > { %221 = vst.msk [vmem:[#allocation2 + $0x180] sm:$0xff] %vm171_vm1, %v5590_v1  ;;  %222 = vst.msk [vmem:[#allocation2 + $0x188] sm:$0xff] %vm171_vm1, %v5590_v1  ;;  %v248_v29 = vld [vmem:[%s5714_s25 + $0xa8] sm:$0xff]  ;;  %v249_v38 = vld [vmem:[%s5714_s25 + $0xb0] sm:$0xff] }
  0x1f   : > { %224 = vst.msk [vmem:[#allocation2 + $0x198] sm:$0xff] %vm171_vm1, %v5590_v1  ;;  %225 = vst.msk [vmem:[#allocation2 + $0x1a0] sm:$0xff] %vm171_vm1, %v5590_v1  ;;  %v250_v39 = vld [vmem:[%s5714_s25 + $0xb8] sm:$0xff]  ;;  %v251_v40 = vld [vmem:[%s5714_s25 + $0xc0] sm:$0xff] }
  0x20   : > { %175 = vst.msk [vmem:[#allocation2 + $0x10] sm:$0x3] %vm174_vm2, %v5590_v1  ;;  %178 = vst.msk [vmem:[#allocation2 + $0x28] sm:$0x3] %vm174_vm2, %v5590_v1  ;;  %v252_v42 = vld [vmem:[%s5714_s25 + $0xc8] sm:$0xff]  ;;  %v253_v44 = vld [vmem:[%s5714_s25 + $0xd0] sm:$0xff] }
  0x21   : > { %181 = vst.msk [vmem:[#allocation2 + $0x40] sm:$0x3] %vm174_vm2, %v5590_v1  ;;  %184 = vst.msk [vmem:[#allocation2 + $0x58] sm:$0x3] %vm174_vm2, %v5590_v1  ;;  %v254_v45 = vld [vmem:[%s5714_s25 + $0xd8] sm:$0xff]  ;;  %v255_v46 = vld [vmem:[%s5714_s25 + $0xe0] sm:$0xff] }
  0x22   : > { %187 = vst.msk [vmem:[#allocation2 + $0x70] sm:$0x3] %vm174_vm2, %v5590_v1  ;;  %190 = vst.msk [vmem:[#allocation2 + $0x88] sm:$0x3] %vm174_vm2, %v5590_v1  ;;  %v256_v47 = vld [vmem:[%s5714_s25 + $0xe8] sm:$0xff]  ;;  %v257_v57 = vld [vmem:[%s5714_s25 + $0xf0] sm:$0xff] }
  0x23   : > { %193 = vst.msk [vmem:[#allocation2 + $0xa0] sm:$0x3] %vm174_vm2, %v5590_v1  ;;  %196 = vst.msk [vmem:[#allocation2 + $0xb8] sm:$0x3] %vm174_vm2, %v5590_v1  ;;  %v258_v58 = vld [vmem:[%s5714_s25 + $0xf8] sm:$0xff] }
  0x24   : > { %199 = vst.msk [vmem:[#allocation2 + $0xd0] sm:$0x3] %vm174_vm2, %v5590_v1  ;;  %202 = vst.msk [vmem:[#allocation2 + $0xe8] sm:$0x3] %vm174_vm2, %v5590_v1 }
  0x25   : > { %205 = vst.msk [vmem:[#allocation2 + $0x100] sm:$0x3] %vm174_vm2, %v5590_v1  ;;  %208 = vst.msk [vmem:[#allocation2 + $0x118] sm:$0x3] %vm174_vm2, %v5590_v1 }
  0x26   : > { %211 = vst.msk [vmem:[#allocation2 + $0x130] sm:$0x3] %vm174_vm2, %v5590_v1  ;;  %214 = vst.msk [vmem:[#allocation2 + $0x148] sm:$0x3] %vm174_vm2, %v5590_v1 }
  0x27   : > { %217 = vst.msk [vmem:[#allocation2 + $0x160] sm:$0x3] %vm174_vm2, %v5590_v1  ;;  %220 = vst.msk [vmem:[#allocation2 + $0x178] sm:$0x3] %vm174_vm2, %v5590_v1  ;;  %v326_v10 = vld [vmem:[#allocation2 + $0x9] sm:$0xff] }
  0x28   : > { %223 = vst.msk [vmem:[#allocation2 + $0x190] sm:$0x3] %vm174_vm2, %v5590_v1  ;;  %226 = vst.msk [vmem:[#allocation2 + $0x1a8] sm:$0x3] %vm174_vm2, %v5590_v1  ;;  %4740 = vmatmul.mubr.msk.f32.vlgmr.msra.gmra.mrb[0].mxu1 %vm171_vm1, %v326_v10 }
  0x29   : > { %260 = vst.msk [vmem:[#allocation2 + $0x19] sm:$0xff] %vm171_vm1, %v227_v5  ;;  %261 = vst.msk [vmem:[#allocation2 + $0x21] sm:$0xff] %vm171_vm1, %v228_v6  ;;  %4788 = vmatpush3.msk.msra.mxu1 %vm455_vm0, %v324_v3 }
  0x2a   : > { %262 = vst.msk [vmem:[#allocation2 + $0x31] sm:$0xff] %vm171_vm1, %v229_v7  ;;  %263 = vst.msk [vmem:[#allocation2 + $0x39] sm:$0xff] %vm171_vm1, %v230_v11  ;;  %4837 = vmatprep.subr.msk.mxu1 %vm455_vm0, %v5722_v8 }
  0x2b   : > { %264 = vst.msk [vmem:[#allocation2 + $0x49] sm:$0xff] %vm171_vm1, %v231_v12  ;;  %265 = vst.msk [vmem:[#allocation2 + $0x51] sm:$0xff] %vm171_vm1, %v232_v13 }
  0x2c   : > { %266 = vst.msk [vmem:[#allocation2 + $0x61] sm:$0xff] %vm171_vm1, %v233_v14  ;;  %267 = vst.msk [vmem:[#allocation2 + $0x69] sm:$0xff] %vm171_vm1, %v234_v15 }
  0x2d   : > { %268 = vst.msk [vmem:[#allocation2 + $0x79] sm:$0xff] %vm171_vm1, %v235_v16  ;;  %269 = vst.msk [vmem:[#allocation2 + $0x81] sm:$0xff] %vm171_vm1, %v236_v17 }
  0x2e   : > { %270 = vst.msk [vmem:[#allocation2 + $0x91] sm:$0xff] %vm171_vm1, %v237_v18  ;;  %271 = vst.msk [vmem:[#allocation2 + $0x99] sm:$0xff] %vm171_vm1, %v238_v19 }
  0x2f   : > { %272 = vst.msk [vmem:[#allocation2 + $0xa9] sm:$0xff] %vm171_vm1, %v239_v20  ;;  %273 = vst.msk [vmem:[#allocation2 + $0xb1] sm:$0xff] %vm171_vm1, %v240_v21 }
  0x30   : > { %274 = vst.msk [vmem:[#allocation2 + $0xc1] sm:$0xff] %vm171_vm1, %v241_v22  ;;  %275 = vst.msk [vmem:[#allocation2 + $0xc9] sm:$0xff] %vm171_vm1, %v242_v23  ;;  %v327_v30 = vld [vmem:[#allocation2 + $0x19] sm:$0xff]  ;;  %v328_v31 = vld [vmem:[#allocation2 + $0x21] sm:$0xff] }
  0x31   : > { %276 = vst.msk [vmem:[#allocation2 + $0xd9] sm:$0xff] %vm171_vm1, %v243_v24  ;;  %277 = vst.msk [vmem:[#allocation2 + $0xe1] sm:$0xff] %vm171_vm1, %v244_v25  ;;  %v5767_v32 = vld [vmem:[#allocation2 + $0x31] sm:$0xff]  ;;  %4742 = vmatprep.mubr.msk.f32.mxu1 %vm171_vm1, %v327_v30  ;;  %4939 = vmatprep.mubr.msk.f32.mxu0 %vm171_vm1, %v327_v30  ;;  %v5785_v34 = vld [vmem:[#allocation2 + $0x39] sm:$0xff] }
  0x32   : > { %278 = vst.msk [vmem:[#allocation2 + $0xf1] sm:$0xff] %vm171_vm1, %v245_v26  ;;  %279 = vst.msk [vmem:[#allocation2 + $0xf9] sm:$0xff] %vm171_vm1, %v246_v27  ;;  %4743 = vmatmul.mubr.msk.f32.gmra.mrb[2].mxu1 %vm171_vm1, %v328_v31  ;;  %4940 = vmatmul.mubr.msk.f32.vlgmr.msra.gmra.mrb[0].mxu0 %vm171_vm1, %v328_v31  ;;  %v5789_v35 = vld [vmem:[#allocation2 + $0x49] sm:$0xff]  ;;  %v5801_v36 = vld [vmem:[#allocation2 + $0x51] sm:$0xff] }
  0x33   : > { %280 = vst.msk [vmem:[#allocation2 + $0x109] sm:$0xff] %vm171_vm1, %v247_v28  ;;  %281 = vst.msk [vmem:[#allocation2 + $0x111] sm:$0xff] %vm171_vm1, %v248_v29  ;;  %4988 = vmatpush3.msk.msra.mxu0 %vm455_vm0, %v5697_v4  ;;  %4745 = vmatprep.mubr.msk.f32.mxu1 %vm171_vm1, %v5767_v32  ;;  %v5803_v37 = vld [vmem:[#allocation2 + $0x61] sm:$0xff]  ;;  %v5817_v41 = vld [vmem:[#allocation2 + $0x69] sm:$0xff] }
  0x34   : > { %4942 = vmatprep.mubr.msk.f32.mxu0 %vm171_vm1, %v5767_v32  ;;  %5037 = vmatprep.subr.msk.mxu0 %vm455_vm0, %v5777_v33  ;;  %282 = vst.msk [vmem:[#allocation2 + $0x121] sm:$0xff] %vm171_vm1, %v249_v38  ;;  %283 = vst.msk [vmem:[#allocation2 + $0x129] sm:$0xff] %vm171_vm1, %v250_v39  ;;  %v5822_v43 = vld [vmem:[#allocation2 + $0x79] sm:$0xff]  ;;  %v5840_v48 = vld [vmem:[#allocation2 + $0x81] sm:$0xff] }
  0x35   : > { %284 = vst.msk [vmem:[#allocation2 + $0x139] sm:$0xff] %vm171_vm1, %v251_v40  ;;  %285 = vst.msk [vmem:[#allocation2 + $0x141] sm:$0xff] %vm171_vm1, %v252_v42  ;;  %v5843_v49 = vld [vmem:[#allocation2 + $0x91] sm:$0xff]  ;;  %v5853_v50 = vld [vmem:[#allocation2 + $0x99] sm:$0xff] }
  0x36   : > { %4746 = vmatmul.mubr.msk.f32.gmra.mrb[4].mxu1 %vm171_vm1, %v5785_v34  ;;  %4943 = vmatmul.mubr.msk.f32.gmra.mrb[2].mxu0 %vm171_vm1, %v5785_v34  ;;  %286 = vst.msk [vmem:[#allocation2 + $0x151] sm:$0xff] %vm171_vm1, %v253_v44  ;;  %287 = vst.msk [vmem:[#allocation2 + $0x159] sm:$0xff] %vm171_vm1, %v254_v45  ;;  %v5855_v51 = vld [vmem:[#allocation2 + $0xa9] sm:$0xff]  ;;  %v5865_v52 = vld [vmem:[#allocation2 + $0xb1] sm:$0xff] }
  0x37   : > { %4748 = vmatprep.mubr.msk.f32.mxu1 %vm171_vm1, %v5789_v35  ;;  %4945 = vmatprep.mubr.msk.f32.mxu0 %vm171_vm1, %v5789_v35  ;;  %288 = vst.msk [vmem:[#allocation2 + $0x169] sm:$0xff] %vm171_vm1, %v255_v46  ;;  %289 = vst.msk [vmem:[#allocation2 + $0x171] sm:$0xff] %vm171_vm1, %v256_v47  ;;  %v5867_v53 = vld [vmem:[#allocation2 + $0xc1] sm:$0xff]  ;;  %v5877_v54 = vld [vmem:[#allocation2 + $0xc9] sm:$0xff] }
  0x38   : > { %6884 = vst [vmem:[#allocation3_spill] sm:$0xff] %v5877_v54  ;;  %v5879_v55 = vld [vmem:[#allocation2 + $0x1a] sm:$0xff]  ;;  %290 = vst.msk [vmem:[#allocation2 + $0x181] sm:$0xff] %vm171_vm1, %v257_v57  ;;  %v5897_v60 = vld [vmem:[#allocation2 + $0x22] sm:$0xff] }
  0x39   : > { %v5881_v56 = vld [vmem:[#allocation2 + $0xd9] sm:$0xff]  ;;  %291 = vst.msk [vmem:[#allocation2 + $0x189] sm:$0xff] %vm171_vm1, %v258_v58  ;;  %v5895_v59 = vld [vmem:[#allocation2 + $0xe1] sm:$0xff]  ;;  %v5899_v61 = vld [vmem:[#allocation2 + $0xf1] sm:$0xff] }
  0x3a   : > { %4749 = vmatmul.mubr.msk.f32.gmra.mrb[6].mxu1 %vm171_vm1, %v5801_v36  ;;  %4946 = vmatmul.mubr.msk.f32.gmra.mrb[4].mxu0 %vm171_vm1, %v5801_v36  ;;  %6885 = vst [vmem:[#allocation4_spill] sm:$0xff] %v5881_v56  ;;  %6886 = vst [vmem:[#allocation5_spill] sm:$0xff] %v5895_v59  ;;  %v5901_v62 = vld [vmem:[#allocation2 + $0x32] sm:$0xff]  ;;  %v5918_v1 = vld [vmem:[#allocation2 + $0x3a] sm:$0xff] }
  0x3b   : > { %4751 = vmatprep.mubr.msk.f32.mxu1 %vm171_vm1, %v5803_v37  ;;  %4948 = vmatprep.mubr.msk.f32.mxu0 %vm171_vm1, %v5803_v37  ;;  %6887 = vst [vmem:[#allocation6_spill] sm:$0xff] %v5899_v61  ;;  %v5916_v0 = vld [vmem:[#allocation2 + $0xf9] sm:$0xff]  ;;  %v5922_v3 = vld [vmem:[#allocation2 + $0x109] sm:$0xff]  ;;  %v5936_v5 = vld [vmem:[#allocation2 + $0x111] sm:$0xff] }
  0x3c   : > { %6888 = vst [vmem:[#allocation7_spill] sm:$0xff] %v5916_v0  ;;  %6889 = vst [vmem:[#allocation8_spill] sm:$0xff] %v5922_v3  ;;  %v5924_v4 = vld [vmem:[#allocation2 + $0x4a] sm:$0xff]  ;;  %v5938_v6 = vld [vmem:[#allocation2 + $0x52] sm:$0xff] }
  0x3d   : > { %6890 = vst [vmem:[#allocation9_spill] sm:$0xff] %v5936_v5  ;;  %v5940_v7 = vld [vmem:[#allocation2 + $0x121] sm:$0xff]  ;;  %v5952_v10 = vld [vmem:[#allocation2 + $0x129] sm:$0xff]  ;;  %v5956_v12 = vld [vmem:[#allocation2 + $0x139] sm:$0xff] }
  0x3e   : > { %4752 = vmatmul.mubr.msk.f32.gmra.mrb[8].mxu1 %vm171_vm1, %v5817_v41  ;;  %4949 = vmatmul.mubr.msk.f32.gmra.mrb[6].mxu0 %vm171_vm1, %v5817_v41  ;;  %6891 = vst [vmem:[#allocation10_spill] sm:$0xff] %v5940_v7  ;;  %v5942_v9 = vld [vmem:[#allocation2 + $0x62] sm:$0xff]  ;;  %6892 = vst [vmem:[#allocation11_spill] sm:$0xff] %v5952_v10  ;;  %v5954_v11 = vld [vmem:[#allocation2 + $0x6a] sm:$0xff] }
  0x3f   : > { %4754 = vmatprep.mubr.msk.f32.mxu1 %vm171_vm1, %v5822_v43  ;;  %4951 = vmatprep.mubr.msk.f32.mxu0 %vm171_vm1, %v5822_v43  ;;  %6893 = vst [vmem:[#allocation12_spill] sm:$0xff] %v5956_v12  ;;  %v5958_v13 = vld [vmem:[#allocation2 + $0x7a] sm:$0xff]  ;;  %v5970_v15 = vld [vmem:[#allocation2 + $0x82] sm:$0xff]  ;;  %v5972_v16 = vld [vmem:[#allocation2 + $0x151] sm:$0xff] }
  0x40   : > { %v5968_v14 = vld [vmem:[#allocation2 + $0x141] sm:$0xff]  ;;  %6895 = vst [vmem:[#allocation14_spill] sm:$0xff] %v5972_v16  ;;  %v5974_v17 = vld [vmem:[#allocation2 + $0x92] sm:$0xff]  ;;  %v5988_v20 = vld [vmem:[#allocation2 + $0x169] sm:$0xff] }
  0x41   : > { %6894 = vst [vmem:[#allocation13_spill] sm:$0xff] %v5968_v14  ;;  %v5984_v18 = vld [vmem:[#allocation2 + $0x159] sm:$0xff]  ;;  %6897 = vst [vmem:[#allocation16_spill] sm:$0xff] %v5988_v20  ;;  %v5990_v21 = vld [vmem:[#allocation2 + $0xaa] sm:$0xff] }
  0x42   : > { %4755 = vmatmul.mubr.msk.f32.gmra.mrb[10].mxu1 %vm171_vm1, %v5840_v48  ;;  %4952 = vmatmul.mubr.msk.f32.gmra.mrb[8].mxu0 %vm171_vm1, %v5840_v48  ;;  %6896 = vst [vmem:[#allocation15_spill] sm:$0xff] %v5984_v18  ;;  %v5986_v19 = vld [vmem:[#allocation2 + $0x9a] sm:$0xff]  ;;  %v6000_v22 = vld [vmem:[#allocation2 + $0x171] sm:$0xff]  ;;  %v6004_v25 = vld [vmem:[#allocation2 + $0xc2] sm:$0xff] }
  0x43   : > { %4757 = vmatprep.mubr.msk.f32.mxu1 %vm171_vm1, %v5843_v49  ;;  %4954 = vmatprep.mubr.msk.f32.mxu0 %vm171_vm1, %v5843_v49  ;;  %6898 = vst [vmem:[#allocation17_spill] sm:$0xff] %v6000_v22  ;;  %v6002_v23 = vld [vmem:[#allocation2 + $0xb2] sm:$0xff]  ;;  %v292_v24 = vld [vmem:[#allocation2] sm:$0xff]  ;;  %v293_v26 = vld [vmem:[#allocation2 + $0x8] sm:$0xff] }
  0x44   : > { %v6013_v27 = vld [vmem:[#allocation2 + $0xca] sm:$0xff]  ;;  %v6015_v28 = vld [vmem:[#allocation2 + $0x18] sm:$0xff]  ;;  %v6031_v31 = vld [vmem:[#allocation2 + $0x20] sm:$0xff] }
  0x45   : > { %6899 = vst [vmem:[#allocation18_spill] sm:$0xff] %v6015_v28  ;;  %v6017_v29 = vld [vmem:[#allocation2 + $0xda] sm:$0xff]  ;;  %v6025_v30 = vld [vmem:[%s6835_s1 + $0xc] sm:$0xf]  ;;  %6900 = vst [vmem:[#allocation19_spill] sm:$0xff] %v6031_v31 }
  0x46   : > { %4758 = vmatmul.mubr.msk.f32.gmra.mrb[12].mxu1 %vm171_vm1, %v5853_v50  ;;  %4955 = vmatmul.mubr.msk.f32.gmra.mrb[10].mxu0 %vm171_vm1, %v5853_v50  ;;  %v6037_v38 = vld [vmem:[#allocation2 + $0x30] sm:$0xff]  ;;  %v6053_v40 = vld [vmem:[#allocation2 + $0xfa] sm:$0xff]  ;;  %v6055_v42 = vld [vmem:[#allocation2 + $0x48] sm:$0xff] }
  0x47   : > { %4760 = vmatprep.mubr.msk.f32.mxu1 %vm171_vm1, %v5855_v51  ;;  %4957 = vmatprep.mubr.msk.f32.mxu0 %vm171_vm1, %v5855_v51  ;;  %6901 = vst [vmem:[#allocation20_spill] sm:$0xff] %v6037_v38  ;;  %v6039_v39 = vld [vmem:[#allocation2 + $0xf2] sm:$0xff]  ;;  %6903 = vst [vmem:[#allocation22_spill] sm:$0xff] %v6055_v42  ;;  %v6057_v44 = vld [vmem:[#allocation2 + $0x10a] sm:$0xff] }
  0x48   : > { %v6067_v45 = vld [vmem:[#allocation2 + $0x50] sm:$0xff]  ;;  %v6071_v47 = vld [vmem:[#allocation2 + $0x60] sm:$0xff]  ;;  %v6083_v58 = vld [vmem:[#allocation2 + $0x68] sm:$0xff] }
  0x49   : > { %6904 = vst [vmem:[#allocation23_spill] sm:$0xff] %v6067_v45  ;;  %v6069_v46 = vld [vmem:[#allocation2 + $0x112] sm:$0xff]  ;;  %6905 = vst [vmem:[#allocation24_spill] sm:$0xff] %v6071_v47  ;;  %v6073_v57 = vld [vmem:[#allocation2 + $0x122] sm:$0xff] }
  0x4a   : > { %4761 = vmatmul.mubr.msk.f32.gmra.mrb[14].mxu1 %vm171_vm1, %v5865_v52  ;;  %4958 = vmatmul.mubr.msk.f32.gmra.mrb[12].mxu0 %vm171_vm1, %v5865_v52  ;;  %6906 = vst [vmem:[#allocation25_spill] sm:$0xff] %v6083_v58 }
  0x4b   : > { %4763 = vmatprep.mubr.msk.f32.mxu1 %vm171_vm1, %v5867_v53  ;;  %4960 = vmatprep.mubr.msk.f32.mxu0 %vm171_vm1, %v5867_v53 }
  0x4e   : > { %4764 = vmatmul.mubr.msk.f32.gmra.mrb[16].mxu1 %vm171_vm1, %v5877_v54  ;;  %4961 = vmatmul.mubr.msk.f32.gmra.mrb[14].mxu0 %vm171_vm1, %v5877_v54  ;;  %v6161_v54 = vld [vmem:[#allocation2 + $0xe0] sm:$0xff] }
  0x4f   : > { %4766 = vmatprep.mubr.msk.f32.mxu1 %vm171_vm1, %v5881_v56  ;;  %4989 = vmatprep.mubr.msk.f32.mxu0 %vm171_vm1, %v5879_v55  ;;  %v6149_v56 = vld [vmem:[#allocation2 + $0x18a] sm:$0xff] }
  0x50   : > { %6914 = vst [vmem:[#allocation33_spill] sm:$0xff] %v6149_v56 }
  0x52   : > { %4767 = vmatmul.mubr.msk.f32.gmra.mrb[18].mxu1 %vm171_vm1, %v5895_v59  ;;  %4990 = vmatmul.mubr.msk.f32.vlgmr.msra.gmra.mrb[0].mxu0 %vm171_vm1, %v5897_v60  ;;  %v6137_v59 = vld [vmem:[#allocation2 + $0x182] sm:$0xff] }
  0x53   : > { %5038 = vmatpush3.msk.msra.mxu0 %vm455_vm0, %v5777_v33  ;;  %4769 = vmatprep.mubr.msk.f32.mxu1 %vm171_vm1, %v5899_v61  ;;  %v6033_v33 = vld [vmem:[#allocation2 + $0xe2] sm:$0xff]  ;;  %6913 = vst [vmem:[#allocation32_spill] sm:$0xff] %v6137_v59 }
  0x54   : > { %4992 = vmatprep.mubr.msk.f32.mxu0 %vm171_vm1, %v5901_v62  ;;  %5087 = vmatprep.subr.msk.mxu0 %vm455_vm0, %v5906_v63  ;;  %v6135_v61 = vld [vmem:[#allocation2 + $0xc0] sm:$0xff] }
  0x56   : > { %4770 = vmatmul.mubr.msk.f32.gmra.mrb[20].mxu1 %vm171_vm1, %v5916_v0  ;;  %4993 = vmatmul.mubr.msk.f32.gmra.mrb[2].mxu0 %vm171_vm1, %v5918_v1  ;;  %v6133_v0 = vld [vmem:[#allocation2 + $0x172] sm:$0xff] }
  0x57   : > { %4772 = vmatprep.mubr.msk.f32.mxu1 %vm171_vm1, %v5922_v3  ;;  %4995 = vmatprep.mubr.msk.f32.mxu0 %vm171_vm1, %v5924_v4  ;;  %v6131_v3 = vld [vmem:[#allocation2 + $0xb0] sm:$0xff]  ;;  %6912 = vst [vmem:[#allocation31_spill] sm:$0xff] %v6133_v0 }
  0x58   : > { %6911 = vst [vmem:[#allocation30_spill] sm:$0xff] %v6131_v3 }
  0x5a   : > { %4773 = vmatmul.mubr.msk.f32.gmra.mrb[22].mxu1 %vm171_vm1, %v5936_v5  ;;  %4996 = vmatmul.mubr.msk.f32.gmra.mrb[4].mxu0 %vm171_vm1, %v5938_v6  ;;  %v6121_v5 = vld [vmem:[#allocation2 + $0x16a] sm:$0xff] }
  0x5b   : > { %4775 = vmatprep.mubr.msk.f32.mxu1 %vm171_vm1, %v5940_v7  ;;  %4998 = vmatprep.mubr.msk.f32.mxu0 %vm171_vm1, %v5942_v9  ;;  %v6119_v7 = vld [vmem:[#allocation2 + $0xa8] sm:$0xff] }
  0x5e   : > { %4776 = vmatmul.mubr.msk.f32.gmra.mrb[24].mxu1 %vm171_vm1, %v5952_v10  ;;  %4999 = vmatmul.mubr.msk.f32.gmra.mrb[6].mxu0 %vm171_vm1, %v5954_v11  ;;  %v6117_v10 = vld [vmem:[#allocation2 + $0x15a] sm:$0xff] }
  0x5f   : > { %4778 = vmatprep.mubr.msk.f32.mxu1 %vm171_vm1, %v5956_v12  ;;  %5001 = vmatprep.mubr.msk.f32.mxu0 %vm171_vm1, %v5958_v13  ;;  %v6115_v12 = vld [vmem:[#allocation2 + $0x98] sm:$0xff] }
  0x60   : > { %6910 = vst [vmem:[#allocation29_spill] sm:$0xff] %v6115_v12 }
  0x62   : > { %4779 = vmatmul.mubr.msk.f32.gmra.mrb[26].mxu1 %vm171_vm1, %v5968_v14  ;;  %5002 = vmatmul.mubr.msk.f32.gmra.mrb[8].mxu0 %vm171_vm1, %v5970_v15  ;;  %v6105_v14 = vld [vmem:[#allocation2 + $0x152] sm:$0xff] }
  0x63   : > { %4781 = vmatprep.mubr.msk.f32.mxu1 %vm171_vm1, %v5972_v16  ;;  %5004 = vmatprep.mubr.msk.f32.mxu0 %vm171_vm1, %v5974_v17  ;;  %v6103_v16 = vld [vmem:[#allocation2 + $0x90] sm:$0xff] }
  0x64   : > { %6909 = vst [vmem:[#allocation28_spill] sm:$0xff] %v6103_v16 }
  0x66   : > { %4782 = vmatmul.mubr.msk.f32.gmra.mrb[28].mxu1 %vm171_vm1, %v5984_v18  ;;  %5005 = vmatmul.mubr.msk.f32.gmra.mrb[10].mxu0 %vm171_vm1, %v5986_v19  ;;  %v6101_v18 = vld [vmem:[#allocation2 + $0x142] sm:$0xff] }
  0x67   : > { %4784 = vmatprep.mubr.msk.f32.mxu1 %vm171_vm1, %v5988_v20  ;;  %5007 = vmatprep.mubr.msk.f32.mxu0 %vm171_vm1, %v5990_v21  ;;  %v6099_v20 = vld [vmem:[#allocation2 + $0x80] sm:$0xff] }
  0x68   : > { %6908 = vst [vmem:[#allocation27_spill] sm:$0xff] %v6099_v20 }
  0x6a   : > { %4785 = vmatmul.mubr.msk.f32.gmra.mrb[30].mxu1 %vm171_vm1, %v6000_v22  ;;  %5008 = vmatmul.mubr.msk.f32.gmra.mrb[12].mxu0 %vm171_vm1, %v6002_v23  ;;  %v6089_v22 = vld [vmem:[#allocation2 + $0x13a] sm:$0xff] }
  0x6b   : > { %4789 = vmatprep.mubr.msk.f32.mxu1 %vm171_vm1, %v292_v24  ;;  %5010 = vmatprep.mubr.msk.f32.mxu0 %vm171_vm1, %v6004_v25  ;;  %v6085_v24 = vld [vmem:[#allocation2 + $0x12a] sm:$0xff] }
  0x6e   : > { %4790 = vmatmul.mubr.msk.f32.vlgmr.msra.gmra.mrb[0].mxu1 %vm171_vm1, %v293_v26  ;;  %5011 = vmatmul.mubr.msk.f32.gmra.mrb[14].mxu0 %vm171_vm1, %v6013_v27  ;;  %v6087_v26 = vld [vmem:[#allocation2 + $0x78] sm:$0xff] }
  0x6f   : > { %4792 = vmatprep.mubr.msk.f32.mxu1 %vm171_vm1, %v6015_v28  ;;  %5013 = vmatprep.mubr.msk.f32.mxu0 %vm171_vm1, %v6017_v29  ;;  %6907 = vst [vmem:[#allocation26_spill] sm:$0xff] %v6087_v26  ;;  %v6151_v28 = vld [vmem:[#allocation2 + $0xd8] sm:$0xff] }
  0x70   : > { %4838 = vmatpush3.msk.msra.mxu1 %vm455_vm0, %v5722_v8  ;;  %v6051_v8 = vld [vmem:[#allocation2 + $0x38] sm:$0xff] }
  0x71   : > { %4887 = vmatprep.subr.msk.mxu1 %vm455_vm0, %v6025_v30  ;;  %6902 = vst [vmem:[#allocation21_spill] sm:$0xff] %v6051_v8 }
  0x72   : > { %4793 = vmatmul.mubr.msk.f32.gmra.mrb[2].mxu1 %vm171_vm1, %v6031_v31  ;;  %5014 = vmatmul.mubr.msk.f32.gmra.mrb[16].mxu0 %vm171_vm1, %v6033_v33  ;;  %v6147_v31 = vld [vmem:[#allocation2 + $0xc8] sm:$0xff] }
  0x73   : > { %4795 = vmatprep.mubr.msk.f32.mxu1 %vm171_vm1, %v6037_v38  ;;  %5016 = vmatprep.mubr.msk.f32.mxu0 %vm171_vm1, %v6039_v39 }
  0x76   : > { %4796 = vmatmul.mubr.msk.f32.gmra.mrb[4].mxu1 %vm171_vm1, %v6051_v8  ;;  %5017 = vmatmul.mubr.msk.f32.gmra.mrb[18].mxu0 %vm171_vm1, %v6053_v40 }
  0x77   : > { %4798 = vmatprep.mubr.msk.f32.mxu1 %vm171_vm1, %v6055_v42  ;;  %5019 = vmatprep.mubr.msk.f32.mxu0 %vm171_vm1, %v6057_v44 }
  0x7a   : > { %4799 = vmatmul.mubr.msk.f32.gmra.mrb[6].mxu1 %vm171_vm1, %v6067_v45  ;;  %5020 = vmatmul.mubr.msk.f32.gmra.mrb[20].mxu0 %vm171_vm1, %v6069_v46 }
  0x7b   : > { %4801 = vmatprep.mubr.msk.f32.mxu1 %vm171_vm1, %v6071_v47  ;;  %5022 = vmatprep.mubr.msk.f32.mxu0 %vm171_vm1, %v6073_v57 }
  0x7e   : > { %4802 = vmatmul.mubr.msk.f32.gmra.mrb[8].mxu1 %vm171_vm1, %v6083_v58  ;;  %5023 = vmatmul.mubr.msk.f32.gmra.mrb[22].mxu0 %vm171_vm1, %v6085_v24 }
  0x7f   : > { %4804 = vmatprep.mubr.msk.f32.mxu1 %vm171_vm1, %v6087_v26  ;;  %5025 = vmatprep.mubr.msk.f32.mxu0 %vm171_vm1, %v6089_v22 }
  0x82   : > { %4805 = vmatmul.mubr.msk.f32.gmra.mrb[10].mxu1 %vm171_vm1, %v6099_v20  ;;  %5026 = vmatmul.mubr.msk.f32.gmra.mrb[24].mxu0 %vm171_vm1, %v6101_v18 }
  0x83   : > { %4807 = vmatprep.mubr.msk.f32.mxu1 %vm171_vm1, %v6103_v16  ;;  %5028 = vmatprep.mubr.msk.f32.mxu0 %vm171_vm1, %v6105_v14 }
  0x86   : > { %4808 = vmatmul.mubr.msk.f32.gmra.mrb[12].mxu1 %vm171_vm1, %v6115_v12  ;;  %5029 = vmatmul.mubr.msk.f32.gmra.mrb[26].mxu0 %vm171_vm1, %v6117_v10 }
  0x87   : > { %4810 = vmatprep.mubr.msk.f32.mxu1 %vm171_vm1, %v6119_v7  ;;  %5031 = vmatprep.mubr.msk.f32.mxu0 %vm171_vm1, %v6121_v5 }
  0x8a   : > { %4811 = vmatmul.mubr.msk.f32.gmra.mrb[14].mxu1 %vm171_vm1, %v6131_v3  ;;  %5032 = vmatmul.mubr.msk.f32.gmra.mrb[28].mxu0 %vm171_vm1, %v6133_v0  ;;  %v6168_v0 = vld [vmem:[%s6835_s1 + $0x20] sm:$0xf] }
  0x8b   : > { %4813 = vmatprep.mubr.msk.f32.mxu1 %vm171_vm1, %v6135_v61  ;;  %5034 = vmatprep.mubr.msk.f32.mxu0 %vm171_vm1, %v6137_v59  ;;  %v6163_v59 = vld [vmem:[#allocation2 + $0xf0] sm:$0xff] }
  0x8e   : > { %4814 = vmatmul.mubr.msk.f32.gmra.mrb[16].mxu1 %vm171_vm1, %v6147_v31  ;;  %5035 = vmatmul.mubr.msk.f32.gmra.mrb[30].mxu0 %vm171_vm1, %v6149_v56  ;;  %v6178_v56 = vld [vmem:[#allocation2 + $0xf8] sm:$0xff] }
  0x8f   : > { %4816 = vmatprep.mubr.msk.f32.mxu1 %vm171_vm1, %v6151_v28  ;;  %5039 = vmatprep.mubr.msk.f32.mxu0 %vm171_vm1, %v6037_v38  ;;  %v6182_v38 = vld [vmem:[#allocation2 + $0x108] sm:$0xff] }
  0x92   : > { %4817 = vmatmul.mubr.msk.f32.gmra.mrb[18].mxu1 %vm171_vm1, %v6161_v54  ;;  %5040 = vmatmul.mubr.msk.f32.vlgmr.msra.gmra.mrb[0].mxu0 %vm171_vm1, %v6051_v8  ;;  %v6208_v8 = vld [vmem:[#allocation2 + $0x138] sm:$0xff] }
  0x93   : > { %5088 = vmatpush3.msk.msra.mxu0 %vm455_vm0, %v5906_v63  ;;  %4819 = vmatprep.mubr.msk.f32.mxu1 %vm171_vm1, %v6163_v59  ;;  %v6194_v63 = vld [vmem:[#allocation2 + $0x110] sm:$0xff] }
  0x94   : > { %5042 = vmatprep.mubr.msk.f32.mxu0 %vm171_vm1, %v6055_v42  ;;  %5137 = vmatprep.subr.msk.mxu0 %vm455_vm0, %v6168_v0  ;;  %v6196_v42 = vld [vmem:[#allocation2 + $0x120] sm:$0xff] }
  0x96   : > { %4820 = vmatmul.mubr.msk.f32.gmra.mrb[20].mxu1 %vm171_vm1, %v6178_v56  ;;  %5043 = vmatmul.mubr.msk.f32.gmra.mrb[2].mxu0 %vm171_vm1, %v6067_v45  ;;  %v6206_v45 = vld [vmem:[#allocation2 + $0x128] sm:$0xff] }
  0x97   : > { %4822 = vmatprep.mubr.msk.f32.mxu1 %vm171_vm1, %v6182_v38  ;;  %5045 = vmatprep.mubr.msk.f32.mxu0 %vm171_vm1, %v6071_v47  ;;  %v6220_v47 = vld [vmem:[#allocation2 + $0x150] sm:$0xff] }
  0x9a   : > { %4823 = vmatmul.mubr.msk.f32.gmra.mrb[22].mxu1 %vm171_vm1, %v6194_v63  ;;  %5046 = vmatmul.mubr.msk.f32.gmra.mrb[4].mxu0 %vm171_vm1, %v6083_v58  ;;  %v6218_v58 = vld [vmem:[#allocation2 + $0x140] sm:$0xff] }
  0x9b   : > { %4825 = vmatprep.mubr.msk.f32.mxu1 %vm171_vm1, %v6196_v42  ;;  %5048 = vmatprep.mubr.msk.f32.mxu0 %vm171_vm1, %v6087_v26  ;;  %v6232_v26 = vld [vmem:[#allocation2 + $0x168] sm:$0xff] }
  0x9e   : > { %4826 = vmatmul.mubr.msk.f32.gmra.mrb[24].mxu1 %vm171_vm1, %v6206_v45  ;;  %5049 = vmatmul.mubr.msk.f32.gmra.mrb[6].mxu0 %vm171_vm1, %v6099_v20  ;;  %v6230_v20 = vld [vmem:[#allocation2 + $0x158] sm:$0xff] }
  0x9f   : > { %4828 = vmatprep.mubr.msk.f32.mxu1 %vm171_vm1, %v6208_v8  ;;  %5051 = vmatprep.mubr.msk.f32.mxu0 %vm171_vm1, %v6103_v16  ;;  %v1008_v16 = vld [vmem:[#allocation2 + $0x2] sm:$0xff] }
  0xa2   : > { %4829 = vmatmul.mubr.msk.f32.gmra.mrb[26].mxu1 %vm171_vm1, %v6218_v58  ;;  %5052 = vmatmul.mubr.msk.f32.gmra.mrb[8].mxu0 %vm171_vm1, %v6115_v12  ;;  %v6242_v12 = vld [vmem:[#allocation2 + $0x170] sm:$0xff] }
  0xa3   : > { %4831 = vmatprep.mubr.msk.f32.mxu1 %vm171_vm1, %v6220_v47  ;;  %5054 = vmatprep.mubr.msk.f32.mxu0 %vm171_vm1, %v6119_v7 }
  0xa6   : > { %4832 = vmatmul.mubr.msk.f32.gmra.mrb[28].mxu1 %vm171_vm1, %v6230_v20  ;;  %5055 = vmatmul.mubr.msk.f32.gmra.mrb[10].mxu0 %vm171_vm1, %v6131_v3  ;;  %v1009_v3 = vld [vmem:[#allocation2 + $0xa] sm:$0xff] }
  0xa7   : > { %4834 = vmatprep.mubr.msk.f32.mxu1 %vm171_vm1, %v6232_v26  ;;  %5057 = vmatprep.mubr.msk.f32.mxu0 %vm171_vm1, %v6135_v61 }
  0xaa   : > { %4835 = vmatmul.mubr.msk.f32.gmra.mrb[30].mxu1 %vm171_vm1, %v6242_v12  ;;  %5058 = vmatmul.mubr.msk.f32.gmra.mrb[12].mxu0 %vm171_vm1, %v6147_v31 }
  0xab   : > { %4839 = vmatprep.mubr.msk.f32.mxu1 %vm171_vm1, %v1008_v16  ;;  %5060 = vmatprep.mubr.msk.f32.mxu0 %vm171_vm1, %v6151_v28  ;;  %v2600_v16 = vld [vmem:[#allocation2 + $0x1a0] sm:$0xff] }
  0xae   : > { %4840 = vmatmul.mubr.msk.f32.vlgmr.msra.gmra.mrb[0].mxu1 %vm171_vm1, %v1009_v3  ;;  %5061 = vmatmul.mubr.msk.f32.gmra.mrb[14].mxu0 %vm171_vm1, %v6161_v54  ;;  %v2599_v3 = vld [vmem:[#allocation2 + $0x198] sm:$0xff] }
  0xaf   : > { %4842 = vmatprep.mubr.msk.f32.mxu1 %vm171_vm1, %v5879_v55  ;;  %5063 = vmatprep.mubr.msk.f32.mxu0 %vm171_vm1, %v6163_v59  ;;  %v6302_v55 = vld [vmem:[#allocation2 + $0x180] sm:$0xff] }
  0xb0   : > { %4888 = vmatpush3.msk.msra.mxu1 %vm455_vm0, %v6025_v30  ;;  %v6929_v30 = vld [vmem:[#allocation24_spill] sm:$0xff] }
  0xb1   : > { %5187 = vmatprep.subr.msk.mxu1 %vm455_vm0, %v5683_v2 }
  0xb2   : > { %4843 = vmatmul.mubr.msk.f32.gmra.mrb[2].mxu1 %vm171_vm1, %v5897_v60  ;;  %5064 = vmatmul.mubr.msk.f32.gmra.mrb[16].mxu0 %vm171_vm1, %v6178_v56  ;;  %v6312_v60 = vld [vmem:[#allocation2 + $0x188] sm:$0xff] }
  0xb3   : > { %4845 = vmatprep.mubr.msk.f32.mxu1 %vm171_vm1, %v5901_v62  ;;  %5066 = vmatprep.mubr.msk.f32.mxu0 %vm171_vm1, %v6182_v38 }
  0xb6   : > { %4846 = vmatmul.mubr.msk.f32.gmra.mrb[4].mxu1 %vm171_vm1, %v5918_v1  ;;  %5067 = vmatmul.mubr.msk.f32.gmra.mrb[18].mxu0 %vm171_vm1, %v6194_v63 }
  0xb7   : > { %4848 = vmatprep.mubr.msk.f32.mxu1 %vm171_vm1, %v5924_v4  ;;  %5069 = vmatprep.mubr.msk.f32.mxu0 %vm171_vm1, %v6196_v42 }
  0xba   : > { %4849 = vmatmul.mubr.msk.f32.gmra.mrb[6].mxu1 %vm171_vm1, %v5938_v6  ;;  %5070 = vmatmul.mubr.msk.f32.gmra.mrb[20].mxu0 %vm171_vm1, %v6206_v45 }
  0xbb   : > { %4851 = vmatprep.mubr.msk.f32.mxu1 %vm171_vm1, %v5942_v9  ;;  %5072 = vmatprep.mubr.msk.f32.mxu0 %vm171_vm1, %v6208_v8 }
  0xbe   : > { %4852 = vmatmul.mubr.msk.f32.gmra.mrb[8].mxu1 %vm171_vm1, %v5954_v11  ;;  %5073 = vmatmul.mubr.msk.f32.gmra.mrb[22].mxu0 %vm171_vm1, %v6218_v58 }
  0xbf   : > { %4854 = vmatprep.mubr.msk.f32.mxu1 %vm171_vm1, %v5958_v13  ;;  %5075 = vmatprep.mubr.msk.f32.mxu0 %vm171_vm1, %v6220_v47 }
  0xc2   : > { %4855 = vmatmul.mubr.msk.f32.gmra.mrb[10].mxu1 %vm171_vm1, %v5970_v15  ;;  %5076 = vmatmul.mubr.msk.f32.gmra.mrb[24].mxu0 %vm171_vm1, %v6230_v20 }
  0xc3   : > { %4857 = vmatprep.mubr.msk.f32.mxu1 %vm171_vm1, %v5974_v17  ;;  %5078 = vmatprep.mubr.msk.f32.mxu0 %vm171_vm1, %v6232_v26 }
  0xc6   : > { %4858 = vmatmul.mubr.msk.f32.gmra.mrb[12].mxu1 %vm171_vm1, %v5986_v19  ;;  %5079 = vmatmul.mubr.msk.f32.gmra.mrb[26].mxu0 %vm171_vm1, %v6242_v12 }
  0xc7   : > { %4860 = vmatprep.mubr.msk.f32.mxu1 %vm171_vm1, %v5990_v21  ;;  %5081 = vmatprep.mubr.msk.f32.mxu0 %vm171_vm1, %v6302_v55 }
  0xca   : > { %4861 = vmatmul.mubr.msk.f32.gmra.mrb[14].mxu1 %vm171_vm1, %v6002_v23  ;;  %5082 = vmatmul.mubr.msk.f32.gmra.mrb[28].mxu0 %vm171_vm1, %v6312_v60 }
  0xcb   : > { %4863 = vmatprep.mubr.msk.f32.mxu1 %vm171_vm1, %v6004_v25  ;;  %5084 = vmatprep.mubr.msk.f32.mxu0 %vm171_vm1, %v2599_v3  ;;  %v6931_v3 = vld [vmem:[#allocation25_spill] sm:$0xff] }
  0xce   : > { %4864 = vmatmul.mubr.msk.f32.gmra.mrb[16].mxu1 %vm171_vm1, %v6013_v27  ;;  %5085 = vmatmul.mubr.msk.f32.gmra.mrb[30].mxu0 %vm171_vm1, %v2600_v16  ;;  %v6932_v16 = vld [vmem:[#allocation11_spill] sm:$0xff] }
  0xcf   : > { %4866 = vmatprep.mubr.msk.f32.mxu1 %vm171_vm1, %v6017_v29  ;;  %5089 = vmatprep.mubr.msk.f32.mxu0 %vm171_vm1, %v5767_v32  ;;  %v6915_v32 = vld [vmem:[#allocation31_spill] sm:$0xff] }
  0xd2   : > { %4867 = vmatmul.mubr.msk.f32.gmra.mrb[18].mxu1 %vm171_vm1, %v6033_v33  ;;  %5090 = vmatmul.mubr.msk.f32.vlgmr.msra.gmra.mrb[0].mxu0 %vm171_vm1, %v5785_v34  ;;  %v6916_v34 = vld [vmem:[#allocation3_spill] sm:$0xff] }
  0xd3   : > { %5138 = vmatpush3.msk.msra.mxu0 %vm455_vm0, %v6168_v0  ;;  %4869 = vmatprep.mubr.msk.f32.mxu1 %vm171_vm1, %v6039_v39  ;;  %v6928_v0 = vld [vmem:[#allocation9_spill] sm:$0xff] }
  0xd4   : > { %5092 = vmatprep.mubr.msk.f32.mxu0 %vm171_vm1, %v5789_v35  ;;  %v6917_v35 = vld [vmem:[#allocation18_spill] sm:$0xff] }
  0xd6   : > { %4870 = vmatmul.mubr.msk.f32.gmra.mrb[20].mxu1 %vm171_vm1, %v6053_v40  ;;  %5093 = vmatmul.mubr.msk.f32.gmra.mrb[2].mxu0 %vm171_vm1, %v5801_v36  ;;  %v6918_v36 = vld [vmem:[#allocation4_spill] sm:$0xff] }
  0xd7   : > { %4872 = vmatprep.mubr.msk.f32.mxu1 %vm171_vm1, %v6057_v44  ;;  %5095 = vmatprep.mubr.msk.f32.mxu0 %vm171_vm1, %v5803_v37  ;;  %v6919_v37 = vld [vmem:[#allocation19_spill] sm:$0xff] }
  0xda   : > { %4873 = vmatmul.mubr.msk.f32.gmra.mrb[22].mxu1 %vm171_vm1, %v6069_v46  ;;  %5096 = vmatmul.mubr.msk.f32.gmra.mrb[4].mxu0 %vm171_vm1, %v5817_v41  ;;  %v6920_v41 = vld [vmem:[#allocation5_spill] sm:$0xff] }
  0xdb   : > { %4875 = vmatprep.mubr.msk.f32.mxu1 %vm171_vm1, %v6073_v57  ;;  %5098 = vmatprep.mubr.msk.f32.mxu0 %vm171_vm1, %v5822_v43  ;;  %v6921_v43 = vld [vmem:[#allocation20_spill] sm:$0xff] }
  0xde   : > { %4876 = vmatmul.mubr.msk.f32.gmra.mrb[24].mxu1 %vm171_vm1, %v6085_v24  ;;  %5099 = vmatmul.mubr.msk.f32.gmra.mrb[6].mxu0 %vm171_vm1, %v5840_v48  ;;  %v6922_v48 = vld [vmem:[#allocation6_spill] sm:$0xff] }
  0xdf   : > { %4878 = vmatprep.mubr.msk.f32.mxu1 %vm171_vm1, %v6089_v22  ;;  %5101 = vmatprep.mubr.msk.f32.mxu0 %vm171_vm1, %v5843_v49  ;;  %v6923_v49 = vld [vmem:[#allocation21_spill] sm:$0xff] }
  0xe2   : > { %4879 = vmatmul.mubr.msk.f32.gmra.mrb[26].mxu1 %vm171_vm1, %v6101_v18  ;;  %5102 = vmatmul.mubr.msk.f32.gmra.mrb[8].mxu0 %vm171_vm1, %v5853_v50  ;;  %v6924_v50 = vld [vmem:[#allocation7_spill] sm:$0xff] }
  0xe3   : > { %4881 = vmatprep.mubr.msk.f32.mxu1 %vm171_vm1, %v6105_v14  ;;  %5104 = vmatprep.mubr.msk.f32.mxu0 %vm171_vm1, %v5855_v51  ;;  %v6925_v51 = vld [vmem:[#allocation22_spill] sm:$0xff] }
  0xe6   : > { %4882 = vmatmul.mubr.msk.f32.gmra.mrb[28].mxu1 %vm171_vm1, %v6117_v10  ;;  %5105 = vmatmul.mubr.msk.f32.gmra.mrb[10].mxu0 %vm171_vm1, %v5865_v52  ;;  %v6926_v52 = vld [vmem:[#allocation8_spill] sm:$0xff] }
  0xe7   : > { %4884 = vmatprep.mubr.msk.f32.mxu1 %vm171_vm1, %v6121_v5  ;;  %5107 = vmatprep.mubr.msk.f32.mxu0 %vm171_vm1, %v5867_v53  ;;  %v6927_v53 = vld [vmem:[#allocation23_spill] sm:$0xff] }
  0xea   : > { %4885 = vmatmul.mubr.msk.f32.gmra.mrb[30].mxu1 %vm171_vm1, %v6915_v32  ;;  %5108 = vmatmul.mubr.msk.f32.gmra.mrb[12].mxu0 %vm171_vm1, %v6916_v34  ;;  %v6933_v34 = vld [vmem:[#allocation26_spill] sm:$0xff] }
  0xeb   : > { %4889 = vmatprep.mubr.msk.f32.mxu1 %vm171_vm1, %v6917_v35  ;;  %5110 = vmatprep.mubr.msk.f32.mxu0 %vm171_vm1, %v6918_v36  ;;  %v6934_v35 = vld [vmem:[#allocation12_spill] sm:$0xff] }
  0xee   : > { %4890 = vmatmul.mubr.msk.f32.vlgmr.msra.gmra.mrb[0].mxu1 %vm171_vm1, %v6919_v37  ;;  %5111 = vmatmul.mubr.msk.f32.gmra.mrb[14].mxu0 %vm171_vm1, %v6920_v41  ;;  %v6935_v37 = vld [vmem:[#allocation27_spill] sm:$0xff] }
  0xef   : > { %4892 = vmatprep.mubr.msk.f32.mxu1 %vm171_vm1, %v6921_v43  ;;  %5113 = vmatprep.mubr.msk.f32.mxu0 %vm171_vm1, %v6922_v48  ;;  %v6936_v43 = vld [vmem:[#allocation13_spill] sm:$0xff] }
  0xf0   : > { %5188 = vmatpush3.msk.msra.mxu1 %vm455_vm0, %v5683_v2  ;;  %v6930_v2 = vld [vmem:[#allocation10_spill] sm:$0xff] }
  0xf2   : > { %4893 = vmatmul.mubr.msk.f32.gmra.mrb[2].mxu1 %vm171_vm1, %v6923_v49  ;;  %5114 = vmatmul.mubr.msk.f32.gmra.mrb[16].mxu0 %vm171_vm1, %v6924_v50  ;;  %v6937_v49 = vld [vmem:[#allocation28_spill] sm:$0xff] }
  0xf3   : > { %4895 = vmatprep.mubr.msk.f32.mxu1 %vm171_vm1, %v6925_v51  ;;  %5116 = vmatprep.mubr.msk.f32.mxu0 %vm171_vm1, %v6926_v52  ;;  %v6938_v51 = vld [vmem:[#allocation14_spill] sm:$0xff] }
  0xf6   : > { %4896 = vmatmul.mubr.msk.f32.gmra.mrb[4].mxu1 %vm171_vm1, %v6927_v53  ;;  %5117 = vmatmul.mubr.msk.f32.gmra.mrb[18].mxu0 %vm171_vm1, %v6928_v0  ;;  %v6939_v53 = vld [vmem:[#allocation29_spill] sm:$0xff] }
  0xf7   : > { %4898 = vmatprep.mubr.msk.f32.mxu1 %vm171_vm1, %v6929_v30  ;;  %5119 = vmatprep.mubr.msk.f32.mxu0 %vm171_vm1, %v6930_v2  ;;  %v6940_v30 = vld [vmem:[#allocation15_spill] sm:$0xff] }
  0xfa   : > { %4899 = vmatmul.mubr.msk.f32.gmra.mrb[6].mxu1 %vm171_vm1, %v6931_v3  ;;  %5120 = vmatmul.mubr.msk.f32.gmra.mrb[20].mxu0 %vm171_vm1, %v6932_v16  ;;  %v6941_v3 = vld [vmem:[#allocation16_spill] sm:$0xff] }
  0xfb   : > { %4901 = vmatprep.mubr.msk.f32.mxu1 %vm171_vm1, %v6933_v34  ;;  %5122 = vmatprep.mubr.msk.f32.mxu0 %vm171_vm1, %v6934_v35  ;;  %v6436_v34 = vld [vmem:[#allocation2 + $0x181] sm:$0xff] }
  0xfe   : > { %4902 = vmatmul.mubr.msk.f32.gmra.mrb[8].mxu1 %vm171_vm1, %v6935_v37  ;;  %5123 = vmatmul.mubr.msk.f32.gmra.mrb[22].mxu0 %vm171_vm1, %v6936_v43  ;;  %v6942_v37 = vld [vmem:[#allocation30_spill] sm:$0xff] }
  0xff   : > { %4904 = vmatprep.mubr.msk.f32.mxu1 %vm171_vm1, %v6937_v49  ;;  %5125 = vmatprep.mubr.msk.f32.mxu0 %vm171_vm1, %v6938_v51  ;;  %v6943_v49 = vld [vmem:[#allocation17_spill] sm:$0xff] }
 0x102   : > { %4905 = vmatmul.mubr.msk.f32.gmra.mrb[10].mxu1 %vm171_vm1, %v6939_v53  ;;  %5126 = vmatmul.mubr.msk.f32.gmra.mrb[24].mxu0 %vm171_vm1, %v6940_v30  ;;  %v6446_v53 = vld [vmem:[#allocation2 + $0x189] sm:$0xff] }
 0x103   : > { %4907 = vmatprep.mubr.msk.f32.mxu1 %vm171_vm1, %v6119_v7  ;;  %5128 = vmatprep.mubr.msk.f32.mxu0 %vm171_vm1, %v6941_v3  ;;  %v2989_v7 = vld [vmem:[#allocation2 + $0x199] sm:$0xff] }
 0x106   : > { %4908 = vmatmul.mubr.msk.f32.gmra.mrb[12].mxu1 %vm171_vm1, %v6942_v37  ;;  %5129 = vmatmul.mubr.msk.f32.gmra.mrb[26].mxu0 %vm171_vm1, %v6943_v49  ;;  %v2990_v37 = vld [vmem:[#allocation2 + $0x1a1] sm:$0xff] }
 0x107   : > { %4910 = vmatprep.mubr.msk.f32.mxu1 %vm171_vm1, %v6135_v61  ;;  %5131 = vmatprep.mubr.msk.f32.mxu0 %vm171_vm1, %v6436_v34  ;;  %v3380_v61 = vld [vmem:[#allocation2 + $0x1a2] sm:$0xff] }
 0x10a   : > { %4911 = vmatmul.mubr.msk.f32.gmra.mrb[14].mxu1 %vm171_vm1, %v6147_v31  ;;  %5132 = vmatmul.mubr.msk.f32.gmra.mrb[28].mxu0 %vm171_vm1, %v6446_v53 }
 0x10b   : > { %4913 = vmatprep.mubr.msk.f32.mxu1 %vm171_vm1, %v6151_v28  ;;  %5134 = vmatprep.mubr.msk.f32.mxu0 %vm171_vm1, %v2989_v7 }
 0x10e   : > { %4914 = vmatmul.mubr.msk.f32.gmra.mrb[16].mxu1 %vm171_vm1, %v6161_v54  ;;  %5135 = vmatmul.mubr.msk.f32.gmra.mrb[30].mxu0 %vm171_vm1, %v2990_v37  ;;  %v6944_v54 = vld [vmem:[#allocation32_spill] sm:$0xff] }
 0x10f   : > { %4916 = vmatprep.mubr.msk.f32.mxu1 %vm171_vm1, %v6163_v59  ;;  %5139 = vmatprep.mubr.msk.f32.mxu0 %vm171_vm1, %v5901_v62  ;;  %v6945_v59 = vld [vmem:[#allocation33_spill] sm:$0xff] }
 0x112   : > { %4917 = vmatmul.mubr.msk.f32.gmra.mrb[18].mxu1 %vm171_vm1, %v6178_v56  ;;  %5140 = vmatmul.mubr.msk.f32.vlgmr.msra.gmra.mrb[0].mxu0 %vm171_vm1, %v5918_v1  ;;  %v3379_v56 = vld [vmem:[#allocation2 + $0x19a] sm:$0xff] }
 0x113   : > { %4919 = vmatprep.mubr.msk.f32.mxu1 %vm171_vm1, %v6182_v38  ;;  %5142 = vmatprep.mubr.msk.f32.mxu0 %vm171_vm1, %v5924_v4 }
 0x116   : > { %4920 = vmatmul.mubr.msk.f32.gmra.mrb[20].mxu1 %vm171_vm1, %v6194_v63  ;;  %5143 = vmatmul.mubr.msk.f32.gmra.mrb[2].mxu0 %vm171_vm1, %v5938_v6 }
 0x117   : > { %4922 = vmatprep.mubr.msk.f32.mxu1 %vm171_vm1, %v6196_v42  ;;  %5145 = vmatprep.mubr.msk.f32.mxu0 %vm171_vm1, %v5942_v9 }
 0x11a   : > { %4923 = vmatmul.mubr.msk.f32.gmra.mrb[22].mxu1 %vm171_vm1, %v6206_v45  ;;  %5146 = vmatmul.mubr.msk.f32.gmra.mrb[4].mxu0 %vm171_vm1, %v5954_v11 }
 0x11b   : > { %4925 = vmatprep.mubr.msk.f32.mxu1 %vm171_vm1, %v6208_v8  ;;  %5148 = vmatprep.mubr.msk.f32.mxu0 %vm171_vm1, %v5958_v13 }
 0x11e   : > { %4926 = vmatmul.mubr.msk.f32.gmra.mrb[24].mxu1 %vm171_vm1, %v6218_v58  ;;  %5149 = vmatmul.mubr.msk.f32.gmra.mrb[6].mxu0 %vm171_vm1, %v5970_v15 }
 0x11f   : > { %4928 = vmatprep.mubr.msk.f32.mxu1 %vm171_vm1, %v6220_v47  ;;  %5151 = vmatprep.mubr.msk.f32.mxu0 %vm171_vm1, %v5974_v17 }
 0x122   : > { %4929 = vmatmul.mubr.msk.f32.gmra.mrb[26].mxu1 %vm171_vm1, %v6230_v20  ;;  %5152 = vmatmul.mubr.msk.f32.gmra.mrb[8].mxu0 %vm171_vm1, %v5986_v19 }
 0x123   : > { %4931 = vmatprep.mubr.msk.f32.mxu1 %vm171_vm1, %v6232_v26  ;;  %5154 = vmatprep.mubr.msk.f32.mxu0 %vm171_vm1, %v5990_v21 }
 0x126   : > { %4932 = vmatmul.mubr.msk.f32.gmra.mrb[28].mxu1 %vm171_vm1, %v6242_v12  ;;  %5155 = vmatmul.mubr.msk.f32.gmra.mrb[10].mxu0 %vm171_vm1, %v6002_v23 }
 0x127   : > { %4934 = vmatprep.mubr.msk.f32.mxu1 %vm171_vm1, %v6302_v55  ;;  %5157 = vmatprep.mubr.msk.f32.mxu0 %vm171_vm1, %v6004_v25 }
 0x12a   : > { %4935 = vmatmul.mubr.msk.f32.gmra.mrb[30].mxu1 %vm171_vm1, %v6312_v60  ;;  %5158 = vmatmul.mubr.msk.f32.gmra.mrb[12].mxu0 %vm171_vm1, %v6013_v27 }
 0x12b   : > { %4963 = vmatprep.mubr.msk.f32.mxu1 %vm171_vm1, %v6918_v36  ;;  %5160 = vmatprep.mubr.msk.f32.mxu0 %vm171_vm1, %v6017_v29 }
 0x12e   : > { %4964 = vmatmul.mubr.msk.f32.vlgmr.msra.gmra.mrb[16].mxu1 %vm171_vm1, %v6920_v41  ;;  %5161 = vmatmul.mubr.msk.f32.gmra.mrb[14].mxu0 %vm171_vm1, %v6033_v33 }
 0x12f   : > { %4966 = vmatprep.mubr.msk.f32.mxu1 %vm171_vm1, %v6922_v48  ;;  %5163 = vmatprep.mubr.msk.f32.mxu0 %vm171_vm1, %v6039_v39 }
 0x132   : > { %4967 = vmatmul.mubr.msk.f32.gmra.mrb[18].mxu1 %vm171_vm1, %v6924_v50  ;;  %5164 = vmatmul.mubr.msk.f32.gmra.mrb[16].mxu0 %vm171_vm1, %v6053_v40 }
 0x133   : > { %4969 = vmatprep.mubr.msk.f32.mxu1 %vm171_vm1, %v6926_v52  ;;  %5166 = vmatprep.mubr.msk.f32.mxu0 %vm171_vm1, %v6057_v44 }
 0x136   : > { %4970 = vmatmul.mubr.msk.f32.gmra.mrb[20].mxu1 %vm171_vm1, %v6928_v0  ;;  %5167 = vmatmul.mubr.msk.f32.gmra.mrb[18].mxu0 %vm171_vm1, %v6069_v46 }
 0x137   : > { %4972 = vmatprep.mubr.msk.f32.mxu1 %vm171_vm1, %v6930_v2  ;;  %5169 = vmatprep.mubr.msk.f32.mxu0 %vm171_vm1, %v6073_v57 }
 0x13a   : > { %4973 = vmatmul.mubr.msk.f32.gmra.mrb[22].mxu1 %vm171_vm1, %v6932_v16  ;;  %5170 = vmatmul.mubr.msk.f32.gmra.mrb[20].mxu0 %vm171_vm1, %v6085_v24 }
 0x13b   : > { %4975 = vmatprep.mubr.msk.f32.mxu1 %vm171_vm1, %v6934_v35  ;;  %5172 = vmatprep.mubr.msk.f32.mxu0 %vm171_vm1, %v6089_v22  ;;  %v6593_v22 = vld [vmem:[%s6836_s2] ss:$0 sm:$0xff] }
 0x13e   : > { %4976 = vmatmul.mubr.msk.f32.gmra.mrb[24].mxu1 %vm171_vm1, %v6936_v43  ;;  %5173 = vmatmul.mubr.msk.f32.gmra.mrb[22].mxu0 %vm171_vm1, %v6101_v18 }
 0x13f   : > { %4978 = vmatprep.mubr.msk.f32.mxu1 %vm171_vm1, %v6938_v51  ;;  %5175 = vmatprep.mubr.msk.f32.mxu0 %vm171_vm1, %v6105_v14 }
 0x142   : > { %4979 = vmatmul.mubr.msk.f32.gmra.mrb[26].mxu1 %vm171_vm1, %v6940_v30  ;;  %5176 = vmatmul.mubr.msk.f32.gmra.mrb[24].mxu0 %vm171_vm1, %v6117_v10 }
 0x143   : > { %4981 = vmatprep.mubr.msk.f32.mxu1 %vm171_vm1, %v6941_v3  ;;  %5178 = vmatprep.mubr.msk.f32.mxu0 %vm171_vm1, %v6121_v5 }
 0x146   : > { %4982 = vmatmul.mubr.msk.f32.gmra.mrb[28].mxu1 %vm171_vm1, %v6943_v49  ;;  %5179 = vmatmul.mubr.msk.f32.gmra.mrb[26].mxu0 %vm171_vm1, %v6915_v32 }
 0x147   : > { %4984 = vmatprep.mubr.msk.f32.mxu1 %vm171_vm1, %v6436_v34  ;;  %5181 = vmatprep.mubr.msk.f32.mxu0 %vm171_vm1, %v6944_v54 }
 0x14a   : > { %4985 = vmatmul.mubr.msk.f32.gmra.mrb[30].mxu1 %vm171_vm1, %v6446_v53  ;;  %5182 = vmatmul.mubr.msk.f32.gmra.mrb[28].mxu0 %vm171_vm1, %v6945_v59 }
 0x14b   : > { %5184 = vmatprep.mubr.msk.f32.mxu0 %vm171_vm1, %v3379_v56 }
 0x14e   : > { %5185 = vmatmul.mubr.msk.f32.gmra.mrb[30].mxu0 %vm171_vm1, %v3380_v61 }
 0x1c1   : > { %v4891_v62 = vpop.f32.mrb[0].mxu1 }
 0x1c2   : > { %v1597_v1 = vpop.f32.mrb[1].mxu1 }
 0x1c5   : > { %v4894_v4 = vpop.f32.mrb[2].mxu1 }
 0x1c6   : > { %v1607_v5 = vpop.f32.mrb[3].mxu1 }
 0x1c9   : > { %v4897_v6 = vpop.f32.mrb[4].mxu1 }
 0x1ca   : > { %v1617_v9 = vpop.f32.mrb[5].mxu1 }
 0x1cd   : > { %v4900_v10 = vpop.f32.mrb[6].mxu1 }
 0x1ce   : > { %v1627_v11 = vpop.f32.mrb[7].mxu1 }
 0x1d1   : > { %v4903_v12 = vpop.f32.mrb[8].mxu1 }
 0x1d2   : > { %v1637_v13 = vpop.f32.mrb[9].mxu1 }
 0x1d5   : > { %v4906_v14 = vpop.f32.mrb[10].mxu1 }
 0x1d6   : > { %v6580_v15 = vpop.f32.mrb[11].mxu1 }
 0x1d9   : > { %v6582_v17 = vpop.f32.mrb[12].mxu1 }
 0x1da   : > { %v6584_v18 = vpop.f32.mrb[13].mxu1 }
 0x1dd   : > { %v6586_v19 = vpop.f32.mrb[14].mxu1 }
 0x1de   : > { %v6588_v20 = vpop.f32.mrb[15].mxu1 }
 0x1e5   : > { %v5141_v21 = vpop.f32.mrb[0].mxu0 }
 0x1e6   : > { %v5189_v23 = vadd.f32 %v5141_v21, %v4891_v62  ;;  %v3548_v25 = vpop.f32.mrb[1].mxu0 }
 0x1e7   : > { %v5190_v27 = vadd.f32 %v3548_v25, %v1597_v1 }
 0x1e8   : > { %v6596_v28 = vadd.f32 %v5189_v23, %v6593_v22 }
 0x1e9   : > { %v6599_v29 = vadd.f32 %v5190_v27, %v6593_v22  ;;  %v5144_v31 = vpop.f32.mrb[2].mxu0 }
 0x1ea   : > { %v4405_v33 = vmul.f32 -1.442695, %v6596_v28  ;;  %v5191_v38 = vadd.f32 %v5144_v31, %v4894_v4  ;;  %v3558_v39 = vpop.f32.mrb[3].mxu0 }
 0x1eb   : > { %v4404_v8 = vmul.f32 -1.442695, %v6599_v29  ;;  %v5192_v40 = vadd.f32 %v3558_v39, %v1607_v5 }
 0x1ec   : > { %5454 = vpow2.f32 %v4405_v33  ;;  %v6604_v42 = vadd.f32 %v5191_v38, %v6593_v22 }
 0x1ed   : > { %5456 = vpow2.f32 %v4404_v8  ;;  %v6607_v44 = vadd.f32 %v5192_v40, %v6593_v22  ;;  %v5147_v45 = vpop.f32.mrb[4].mxu0 }
 0x1ee   : > { %v4407_v46 = vmul.f32 -1.442695, %v6604_v42  ;;  %v5193_v47 = vadd.f32 %v5147_v45, %v4897_v6  ;;  %v3568_v57 = vpop.f32.mrb[5].mxu0 }
 0x1ef   : > { %v4406_v58 = vmul.f32 -1.442695, %v6607_v44  ;;  %v5194_v24 = vadd.f32 %v3568_v57, %v1617_v9 }
 0x1f0   : > { %5458 = vpow2.f32 %v4407_v46  ;;  %v6612_v26 = vadd.f32 %v5193_v47, %v6593_v22 }
 0x1f1   : > { %5460 = vpow2.f32 %v4406_v58  ;;  %v6615_v63 = vadd.f32 %v5194_v24, %v6593_v22  ;;  %v5150_v55 = vpop.f32.mrb[6].mxu0 }
 0x1f2   : > { %v4409_v60 = vmul.f32 -1.442695, %v6612_v26  ;;  %v5195_v32 = vadd.f32 %v5150_v55, %v4900_v10  ;;  %v3578_v36 = vpop.f32.mrb[7].mxu0 }
 0x1f3   : > { %v4408_v41 = vmul.f32 -1.442695, %v6615_v63  ;;  %v5196_v48 = vadd.f32 %v3578_v36, %v1627_v11 }
 0x1f4   : > { %5462 = vpow2.f32 %v4409_v60  ;;  %v6620_v50 = vadd.f32 %v5195_v32, %v6593_v22 }
 0x1f5   : > { %5464 = vpow2.f32 %v4408_v41  ;;  %v6623_v52 = vadd.f32 %v5196_v48, %v6593_v22  ;;  %v5153_v0 = vpop.f32.mrb[8].mxu0 }
 0x1f6   : > { %v5455_v2 = vpop.eup %5454  ;;  %v4411_v16 = vmul.f32 -1.442695, %v6620_v50  ;;  %v5197_v35 = vadd.f32 %v5153_v0, %v4903_v12  ;;  %v3588_v43 = vpop.f32.mrb[9].mxu0 }
 0x1f7   : > { %v5457_v51 = vpop.eup %5456  ;;  %v3875_v30 = vadd.f32 1.0, %v5455_v2  ;;  %v4410_v3 = vmul.f32 -1.442695, %v6623_v52  ;;  %v5198_v34 = vadd.f32 %v3588_v43, %v1637_v13 }
 0x1f8   : > { %v3874_v49 = vadd.f32 1.0, %v5457_v51  ;;  %5466 = vpow2.f32 %v4411_v16  ;;  %v6628_v53 = vadd.f32 %v5197_v35, %v6593_v22 }
 0x1f9   : > { %5468 = vrcp.f32 %v3875_v30  ;;  %v6631_v7 = vadd.f32 %v5198_v34, %v6593_v22  ;;  %v5156_v37 = vpop.f32.mrb[10].mxu0 }
 0x1fa   : > { %v5459_v54 = vpop.eup %5458  ;;  %5470 = vrcp.f32 %v3874_v49  ;;  %v4413_v56 = vmul.f32 -1.442695, %v6628_v53  ;;  %v5199_v59 = vadd.f32 %v5156_v37, %v4906_v14  ;;  %v3598_v61 = vpop.f32.mrb[11].mxu0 }
 0x1fb   : > { %v5461_v62 = vpop.eup %5460  ;;  %v3877_v1 = vadd.f32 1.0, %v5459_v54  ;;  %5472 = vpow2.f32 %v4410_v3  ;;  %v4412_v4 = vmul.f32 -1.442695, %v6631_v7  ;;  %v5200_v5 = vadd.f32 %v3598_v61, %v6580_v15 }
 0x1fc   : > { %v3876_v6 = vadd.f32 1.0, %v5461_v62  ;;  %5474 = vpow2.f32 %v4413_v56  ;;  %v6637_v9 = vadd.f32 %v5199_v59, %v6593_v22 }
 0x1fd   : > { %5476 = vrcp.f32 %v3877_v1  ;;  %v6640_v10 = vadd.f32 %v5200_v5, %v6593_v22  ;;  %v5159_v11 = vpop.f32.mrb[12].mxu0 }
 0x1fe   : > { %v5463_v12 = vpop.eup %5462  ;;  %5478 = vrcp.f32 %v3876_v6  ;;  %v4415_v13 = vmul.f32 -1.442695, %v6637_v9  ;;  %v5201_v14 = vadd.f32 %v5159_v11, %v6582_v17  ;;  %v3608_v21 = vpop.f32.mrb[13].mxu0 }
 0x1ff   : > { %v5465_v23 = vpop.eup %5464  ;;  %v3879_v25 = vadd.f32 1.0, %v5463_v12  ;;  %5480 = vpow2.f32 %v4412_v4  ;;  %v4414_v15 = vmul.f32 -1.442695, %v6640_v10  ;;  %v5202_v27 = vadd.f32 %v3608_v21, %v6584_v18 }
 0x200   : > { %v3878_v31 = vadd.f32 1.0, %v5465_v23  ;;  %5482 = vpow2.f32 %v4415_v13  ;;  %v6647_v33 = vadd.f32 %v5201_v14, %v6593_v22 }
 0x201   : > { %5484 = vrcp.f32 %v3879_v25  ;;  %v6650_v38 = vadd.f32 %v5202_v27, %v6593_v22  ;;  %v4965_v39 = vpop.f32.mrb[16].mxu1  ;;  %v5162_v17 = vpop.f32.mrb[14].mxu0 }
 0x202   : > { %v5467_v8 = vpop.eup %5466  ;;  %5486 = vrcp.f32 %v3878_v31  ;;  %v4417_v40 = vmul.f32 -1.442695, %v6647_v33  ;;  %v5203_v45 = vadd.f32 %v5162_v17, %v6586_v19  ;;  %v2067_v46 = vpop.f32.mrb[17].mxu1 }
 0x203   : > { %v3618_v47 = vpop.f32.mrb[15].mxu0  ;;  %v5469_v18 = vpop.eup %5468  ;;  %v3881_v57 = vadd.f32 1.0, %v5467_v8  ;;  %5488 = vpow2.f32 %v4414_v15  ;;  %v4416_v58 = vmul.f32 -1.442695, %v6650_v38 }
 0x204   : > { %v5204_v24 = vadd.f32 %v3618_v47, %v6588_v20  ;;  %v5471_v55 = vpop.eup %5470  ;;  %v3971_v60 = vmul.f32 %v5469_v18, %v6596_v28  ;;  %5490 = vpow2.f32 %v4417_v40  ;;  %v6665_v19 = vadd.f32 %v5203_v45, %v6593_v22 }
 0x205   : > { %v5473_v32 = vpop.eup %5472  ;;  %v3970_v36 = vmul.f32 %v5471_v55, %v6599_v29  ;;  %5492 = vrcp.f32 %v3881_v57  ;;  %v4968_v48 = vpop.f32.mrb[18].mxu1 }
 0x206   : > { %v6669_v41 = vadd.f32 %v5204_v24, %v6593_v22  ;;  %v5165_v0 = vpop.f32.mrb[16].mxu0  ;;  %v5475_v2 = vpop.eup %5474  ;;  %4003 = vst.msk [vmem:[%s6659_s15 + $0x8] sm:$0xff] %vm171_vm1, %v3971_v60  ;;  %v3880_v20 = vadd.f32 1.0, %v5473_v32  ;;  %5494 = vpow2.f32 %v4416_v58  ;;  %v4419_v28 = vmul.f32 -1.442695, %v6665_v19 }
 0x207   : > { %v5205_v16 = vadd.f32 %v5165_v0, %v4965_v39  ;;  %v2077_v35 = vpop.f32.mrb[19].mxu1  ;;  %v3628_v43 = vpop.f32.mrb[17].mxu0  ;;  %4002 = vst.msk [vmem:[%s6659_s15] sm:$0xff] %vm171_vm1, %v3970_v36  ;;  %v3883_v29 = vadd.f32 1.0, %v5475_v2 }
 0x208   : > { %v5477_v51 = vpop.eup %5476  ;;  %v4418_v30 = vmul.f32 -1.442695, %v6669_v41  ;;  %v5206_v3 = vadd.f32 %v3628_v43, %v2067_v46  ;;  %5496 = vrcp.f32 %v3880_v20 }
 0x209   : > { %v5479_v34 = vpop.eup %5478  ;;  %v3973_v49 = vmul.f32 %v5477_v51, %v6604_v42  ;;  %v6679_v37 = vadd.f32 %v5205_v16, %v6593_v22  ;;  %5498 = vrcp.f32 %v3883_v29  ;;  %v4971_v61 = vpop.f32.mrb[20].mxu1 }
 0x20a   : > { %v5481_v54 = vpop.eup %5480  ;;  %v3972_v56 = vmul.f32 %v5479_v34, %v6607_v44  ;;  %v6683_v59 = vadd.f32 %v5206_v3, %v6593_v22  ;;  %v5168_v62 = vpop.f32.mrb[18].mxu0  ;;  %5500 = vpow2.f32 %v4419_v28 }
 0x20b   : > { %v5483_v1 = vpop.eup %5482  ;;  %4005 = vst.msk [vmem:[%s6659_s15 + $0x18] sm:$0xff] %vm171_vm1, %v3973_v49  ;;  %v3882_v4 = vadd.f32 1.0, %v5481_v54  ;;  %v4421_v42 = vmul.f32 -1.442695, %v6679_v37  ;;  %v5207_v5 = vadd.f32 %v5168_v62, %v4968_v48  ;;  %v2087_v6 = vpop.f32.mrb[21].mxu1  ;;  %5502 = vpow2.f32 %v4418_v30 }
 0x20c   : > { %v3638_v11 = vpop.f32.mrb[19].mxu0  ;;  %v5485_v12 = vpop.eup %5484  ;;  %4004 = vst.msk [vmem:[%s6659_s15 + $0x10] sm:$0xff] %vm171_vm1, %v3972_v56  ;;  %v3885_v44 = vadd.f32 1.0, %v5483_v1  ;;  %v4420_v13 = vmul.f32 -1.442695, %v6683_v59 }
 0x20d   : > { %v5208_v14 = vadd.f32 %v3638_v11, %v2077_v35  ;;  %v5487_v21 = vpop.eup %5486  ;;  %v3975_v23 = vmul.f32 %v5485_v12, %v6612_v26  ;;  %5504 = vrcp.f32 %v3882_v4  ;;  %v6693_v25 = vadd.f32 %v5207_v5, %v6593_v22  ;;  %v4974_v39 = vpop.f32.mrb[22].mxu1 }
 0x20e   : > { %v5489_v15 = vpop.eup %5488  ;;  %v3974_v27 = vmul.f32 %v5487_v21, %v6615_v63  ;;  %5506 = vrcp.f32 %v3885_v44  ;;  %v5171_v17 = vpop.f32.mrb[20].mxu0 }
 0x20f   : > { %v6697_v31 = vadd.f32 %v5208_v14, %v6593_v22  ;;  %v5491_v8 = vpop.eup %5490  ;;  %4007 = vst.msk [vmem:[%s6659_s15 + $0x28] sm:$0xff] %vm171_vm1, %v3975_v23  ;;  %v3884_v40 = vadd.f32 1.0, %v5489_v15  ;;  %5508 = vpow2.f32 %v4421_v42  ;;  %v4423_v26 = vmul.f32 -1.442695, %v6693_v25  ;;  %v2097_v46 = vpop.f32.mrb[23].mxu1 }
 0x210   : > { %v5209_v45 = vadd.f32 %v5171_v17, %v4971_v61  ;;  %v3648_v47 = vpop.f32.mrb[21].mxu0  ;;  %v5493_v18 = vpop.eup %5492  ;;  %4006 = vst.msk [vmem:[%s6659_s15 + $0x20] sm:$0xff] %vm171_vm1, %v3974_v27  ;;  %v3887_v63 = vadd.f32 1.0, %v5491_v8  ;;  %5510 = vpow2.f32 %v4420_v13 }
 0x211   : > { %v5210_v57 = vadd.f32 %v3648_v47, %v2087_v6  ;;  %v5495_v58 = vpop.eup %5494  ;;  %v3977_v24 = vmul.f32 %v5493_v18, %v6620_v50  ;;  %5512 = vrcp.f32 %v3884_v40  ;;  %v4422_v55 = vmul.f32 -1.442695, %v6697_v31  ;;  %v4977_v48 = vpop.f32.mrb[24].mxu1 }
 0x212   : > { %v6707_v60 = vadd.f32 %v5209_v45, %v6593_v22  ;;  %5514 = vrcp.f32 %v3887_v63  ;;  %v3886_v32 = vadd.f32 1.0, %v5495_v58  ;;  %v5174_v0 = vpop.f32.mrb[22].mxu0  ;;  %v5497_v2 = vpop.eup %5496 }
 0x213   : > { %v6710_v36 = vadd.f32 %v5210_v57, %v6593_v22  ;;  %4009 = vst.msk [vmem:[%s6659_s15 + $0x38] sm:$0xff] %vm171_vm1, %v3977_v24  ;;  %5516 = vpow2.f32 %v4423_v26  ;;  %v5211_v20 = vadd.f32 %v5174_v0, %v4974_v39  ;;  %v2107_v28 = vpop.f32.mrb[25].mxu1  ;;  %v3658_v16 = vpop.f32.mrb[23].mxu0  ;;  %v3976_v43 = vmul.f32 %v5497_v2, %v6623_v52 }
 0x214   : > { %v4425_v50 = vmul.f32 -1.442695, %v6707_v60  ;;  %v5499_v35 = vpop.eup %5498  ;;  %5518 = vrcp.f32 %v3886_v32  ;;  %v5212_v29 = vadd.f32 %v3658_v16, %v2097_v46 }
 0x215   : > { %v4424_v51 = vmul.f32 -1.442695, %v6710_v36  ;;  %v5501_v30 = vpop.eup %5500  ;;  %v3979_v3 = vmul.f32 %v5499_v35, %v6628_v53  ;;  %5520 = vpow2.f32 %v4422_v55  ;;  %v6719_v34 = vadd.f32 %v5211_v20, %v6593_v22  ;;  %4008 = vst.msk [vmem:[%s6659_s15 + $0x30] sm:$0xff] %vm171_vm1, %v3976_v43  ;;  %v4980_v52 = vpop.f32.mrb[26].mxu1 }
 0x216   : > { %v5503_v49 = vpop.eup %5502  ;;  %v3889_v54 = vadd.f32 1.0, %v5501_v30  ;;  %5522 = vpow2.f32 %v4425_v50  ;;  %v6724_v56 = vadd.f32 %v5212_v29, %v6593_v22  ;;  %v5177_v61 = vpop.f32.mrb[24].mxu0 }
 0x217   : > { %v5505_v62 = vpop.eup %5504  ;;  %4011 = vst.msk [vmem:[%s6659_s15 + $0x48] sm:$0xff] %vm171_vm1, %v3979_v3  ;;  %v3888_v1 = vadd.f32 1.0, %v5503_v49  ;;  %5524 = vpow2.f32 %v4424_v51  ;;  %v4427_v53 = vmul.f32 -1.442695, %v6719_v34  ;;  %v5213_v4 = vadd.f32 %v5177_v61, %v4977_v48  ;;  %v2117_v42 = vpop.f32.mrb[27].mxu1 }
 0x218   : > { %v3668_v5 = vpop.f32.mrb[25].mxu0  ;;  %v5507_v6 = vpop.eup %5506  ;;  %v3978_v11 = vmul.f32 %v5505_v62, %v6631_v7  ;;  %5526 = vrcp.f32 %v3889_v54  ;;  %v4426_v12 = vmul.f32 -1.442695, %v6724_v56 }
 0x219   : > { %v5214_v44 = vadd.f32 %v3668_v5, %v2107_v28  ;;  %v5509_v13 = vpop.eup %5508  ;;  %v3981_v14 = vmul.f32 %v5507_v6, %v6637_v9  ;;  %5528 = vrcp.f32 %v3888_v1  ;;  %v6733_v21 = vadd.f32 %v5213_v4, %v6593_v22  ;;  %v4983_v7 = vpop.f32.mrb[28].mxu1 }
 0x21a   : > { %v5511_v23 = vpop.eup %5510  ;;  %4010 = vst.msk [vmem:[%s6659_s15 + $0x40] sm:$0xff] %vm171_vm1, %v3978_v11  ;;  %v3891_v15 = vadd.f32 1.0, %v5509_v13  ;;  %5530 = vpow2.f32 %v4427_v53  ;;  %v5180_v39 = vpop.f32.mrb[26].mxu0 }
 0x21b   : > { %v6738_v27 = vadd.f32 %v5214_v44, %v6593_v22  ;;  %v5513_v17 = vpop.eup %5512  ;;  %4013 = vst.msk [vmem:[%s6659_s15 + $0x58] sm:$0xff] %vm171_vm1, %v3981_v14  ;;  %v3890_v8 = vadd.f32 1.0, %v5511_v23  ;;  %5532 = vpow2.f32 %v4426_v12  ;;  %v4429_v9 = vmul.f32 -1.442695, %v6733_v21  ;;  %v2127_v26 = vpop.f32.mrb[29].mxu1 }
 0x21c   : > { %v5215_v40 = vadd.f32 %v5180_v39, %v4980_v52  ;;  %v3678_v45 = vpop.f32.mrb[27].mxu0  ;;  %v5515_v46 = vpop.eup %5514  ;;  %v3980_v47 = vmul.f32 %v5513_v17, %v6640_v10  ;;  %5534 = vrcp.f32 %v3891_v15 }
 0x21d   : > { %v4428_v18 = vmul.f32 -1.442695, %v6738_v27  ;;  %v5216_v63 = vadd.f32 %v3678_v45, %v2117_v42  ;;  %v5517_v57 = vpop.eup %5516  ;;  %v3983_v58 = vmul.f32 %v5515_v46, %v6647_v33  ;;  %5536 = vrcp.f32 %v3890_v8  ;;  %v4986_v10 = vpop.f32.mrb[30].mxu1 }
 0x21e   : > { %v6747_v24 = vadd.f32 %v5215_v40, %v6593_v22  ;;  %v5519_v55 = vpop.eup %5518  ;;  %4012 = vst.msk [vmem:[%s6659_s15 + $0x50] sm:$0xff] %vm171_vm1, %v3980_v47  ;;  %v3893_v32 = vadd.f32 1.0, %v5517_v57  ;;  %5538 = vpow2.f32 %v4429_v9  ;;  %v5183_v0 = vpop.f32.mrb[28].mxu0 }
 0x21f   : > { %v6752_v48 = vadd.f32 %v5216_v63, %v6593_v22  ;;  %v5521_v2 = vpop.eup %5520  ;;  %4015 = vst.msk [vmem:[%s6659_s15 + $0x68] sm:$0xff] %vm171_vm1, %v3983_v58  ;;  %v3982_v33 = vmul.f32 %v5519_v55, %v6650_v38  ;;  %5540 = vpow2.f32 %v4428_v18  ;;  %v5217_v20 = vadd.f32 %v5183_v0, %v4983_v7  ;;  %v2137_v28 = vpop.f32.mrb[31].mxu1 }
 0x220   : > { %v4431_v50 = vmul.f32 -1.442695, %v6747_v24  ;;  %v3688_v16 = vpop.f32.mrb[29].mxu0  ;;  %v5523_v35 = vpop.eup %5522  ;;  %5542 = vrcp.f32 %v3893_v32  ;;  %v3892_v43 = vadd.f32 1.0, %v5521_v2 }
 0x221   : > { %v5218_v51 = vadd.f32 %v3688_v16, %v2127_v26  ;;  %v5525_v29 = vpop.eup %5524  ;;  %4014 = vst.msk [vmem:[%s6659_s15 + $0x60] sm:$0xff] %vm171_vm1, %v3982_v33  ;;  %v3895_v30 = vadd.f32 1.0, %v5523_v35  ;;  %v4430_v3 = vmul.f32 -1.442695, %v6752_v48  ;;  %v6762_v49 = vadd.f32 %v5217_v20, %v6593_v22  ;;  %v5186_v61 = vpop.f32.mrb[30].mxu0 }
 0x222   : > { %5544 = vpow2.f32 %v4431_v50  ;;  %v5527_v38 = vpop.eup %5526  ;;  %v3894_v54 = vadd.f32 1.0, %v5525_v29  ;;  %v5219_v4 = vadd.f32 %v5186_v61, %v4986_v10  ;;  %v3698_v42 = vpop.f32.mrb[31].mxu0 }
 0x223   : > { %5546 = vrcp.f32 %v3892_v43  ;;  %v6765_v52 = vadd.f32 %v5218_v51, %v6593_v22  ;;  %v5529_v62 = vpop.eup %5528  ;;  %v3985_v1 = vmul.f32 %v5527_v38, %v6665_v19  ;;  %v4433_v53 = vmul.f32 -1.442695, %v6762_v49 }
 0x224   : > { %5548 = vrcp.f32 %v3895_v30  ;;  %v5531_v5 = vpop.eup %5530  ;;  %v3984_v6 = vmul.f32 %v5529_v62, %v6669_v41  ;;  %v5220_v11 = vadd.f32 %v3698_v42, %v2137_v28  ;;  %v6774_v19 = vadd.f32 %v5219_v4, %v6593_v22 }
 0x225   : > { %5550 = vrcp.f32 %v3894_v54  ;;  %v5533_v12 = vpop.eup %5532  ;;  %4017 = vst.msk [vmem:[%s6659_s15 + $0x78] sm:$0xff] %vm171_vm1, %v3985_v1  ;;  %v3897_v44 = vadd.f32 1.0, %v5531_v5  ;;  %v4432_v13 = vmul.f32 -1.442695, %v6765_v52 }
 0x226   : > { %5552 = vpow2.f32 %v4430_v3  ;;  %v5535_v14 = vpop.eup %5534  ;;  %4016 = vst.msk [vmem:[%s6659_s15 + $0x70] sm:$0xff] %vm171_vm1, %v3984_v6  ;;  %v3896_v23 = vadd.f32 1.0, %v5533_v12  ;;  %v6779_v41 = vadd.f32 %v5220_v11, %v6593_v22  ;;  %v4435_v39 = vmul.f32 -1.442695, %v6774_v19 }
 0x227   : > { %5554 = vpow2.f32 %v4433_v53  ;;  %v5537_v15 = vpop.eup %5536  ;;  %v3987_v7 = vmul.f32 %v5535_v14, %v6679_v37 }
 0x228   : > { %5556 = vrcp.f32 %v3897_v44  ;;  %v5539_v17 = vpop.eup %5538  ;;  %v3986_v8 = vmul.f32 %v5537_v15, %v6683_v59  ;;  %v4434_v26 = vmul.f32 -1.442695, %v6779_v41 }
 0x229   : > { %5558 = vrcp.f32 %v3896_v23  ;;  %v5541_v9 = vpop.eup %5540  ;;  %4019 = vst.msk [vmem:[%s6659_s15 + $0x88] sm:$0xff] %vm171_vm1, %v3987_v7  ;;  %v3899_v40 = vadd.f32 1.0, %v5539_v17 }
 0x22a   : > { %5560 = vpow2.f32 %v4432_v13  ;;  %v5543_v22 = vpop.eup %5542  ;;  %4018 = vst.msk [vmem:[%s6659_s15 + $0x80] sm:$0xff] %vm171_vm1, %v3986_v8  ;;  %v3898_v45 = vadd.f32 1.0, %v5541_v9 }
 0x22b   : > { %5562 = vpow2.f32 %v4435_v39  ;;  %v3989_v46 = vmul.f32 %v5543_v22, %v6693_v25 }
 0x22c   : > { %v5545_v37 = vpop.eup %5544  ;;  %5564 = vrcp.f32 %v3899_v40 }
 0x22d   : > { %v5547_v59 = vpop.eup %5546  ;;  %5566 = vrcp.f32 %v3898_v45  ;;  %v3901_v47 = vadd.f32 1.0, %v5545_v37  ;;  %4021 = vst.msk [vmem:[%s6659_s15 + $0x98] sm:$0xff] %vm171_vm1, %v3989_v46 }
 0x22e   : > { %v5549_v18 = vpop.eup %5548  ;;  %v3988_v63 = vmul.f32 %v5547_v59, %v6697_v31  ;;  %5568 = vpow2.f32 %v4434_v26 }
 0x22f   : > { %v5551_v57 = vpop.eup %5550  ;;  %v3991_v58 = vmul.f32 %v5549_v18, %v6707_v60  ;;  %5570 = vrcp.f32 %v3901_v47 }
 0x230   : > { %v5553_v55 = vpop.eup %5552  ;;  %4020 = vst.msk [vmem:[%s6659_s15 + $0x90] sm:$0xff] %vm171_vm1, %v3988_v63  ;;  %v3990_v25 = vmul.f32 %v5551_v57, %v6710_v36 }
 0x231   : > { %v5555_v32 = vpop.eup %5554  ;;  %4023 = vst.msk [vmem:[%s6659_s15 + $0xa8] sm:$0xff] %vm171_vm1, %v3991_v58  ;;  %v3900_v10 = vadd.f32 1.0, %v5553_v55 }
 0x232   : > { %v5557_v0 = vpop.eup %5556  ;;  %4022 = vst.msk [vmem:[%s6659_s15 + $0xa0] sm:$0xff] %vm171_vm1, %v3990_v25  ;;  %v3903_v31 = vadd.f32 1.0, %v5555_v32 }
 0x233   : > { %v5559_v2 = vpop.eup %5558  ;;  %v3993_v33 = vmul.f32 %v5557_v0, %v6719_v34  ;;  %5572 = vrcp.f32 %v3900_v10 }
 0x234   : > { %v5561_v60 = vpop.eup %5560  ;;  %v3992_v50 = vmul.f32 %v5559_v2, %v6724_v56  ;;  %5574 = vrcp.f32 %v3903_v31 }
 0x235   : > { %v5563_v36 = vpop.eup %5562  ;;  %4025 = vst.msk [vmem:[%s6659_s15 + $0xb8] sm:$0xff] %vm171_vm1, %v3993_v33  ;;  %v3902_v20 = vadd.f32 1.0, %v5561_v60 }
 0x236   : > { %v5565_v28 = vpop.eup %5564  ;;  %4024 = vst.msk [vmem:[%s6659_s15 + $0xb0] sm:$0xff] %vm171_vm1, %v3992_v50  ;;  %v3905_v16 = vadd.f32 1.0, %v5563_v36 }
 0x237   : > { %v5567_v35 = vpop.eup %5566  ;;  %v3995_v43 = vmul.f32 %v5565_v28, %v6733_v21  ;;  %5576 = vrcp.f32 %v3902_v20 }
 0x238   : > { %v5569_v34 = vpop.eup %5568  ;;  %v3994_v56 = vmul.f32 %v5567_v35, %v6738_v27  ;;  %5578 = vrcp.f32 %v3905_v16 }
 0x239   : > { %v5571_v51 = vpop.eup %5570  ;;  %4027 = vst.msk [vmem:[%s6659_s15 + $0xc8] sm:$0xff] %vm171_vm1, %v3995_v43  ;;  %v3904_v29 = vadd.f32 1.0, %v5569_v34 }
 0x23a   : > { %4026 = vst.msk [vmem:[%s6659_s15 + $0xc0] sm:$0xff] %vm171_vm1, %v3994_v56  ;;  %v3997_v30 = vmul.f32 %v5571_v51, %v6747_v24 }
 0x23b   : > { %5580 = vrcp.f32 %v3904_v29 }
 0x23c   : > { %4029 = vst.msk [vmem:[%s6659_s15 + $0xd8] sm:$0xff] %vm171_vm1, %v3997_v30 }
 0x23d   : > { %v5573_v21 = vpop.eup %5572 }
 0x23e   : > { %v5575_v3 = vpop.eup %5574  ;;  %v3996_v38 = vmul.f32 %v5573_v21, %v6752_v48 }
 0x23f   : > { %v3999_v27 = vmul.f32 %v5575_v3, %v6762_v49 }
 0x240   : > { %4028 = vst.msk [vmem:[%s6659_s15 + $0xd0] sm:$0xff] %vm171_vm1, %v3996_v38 }
 0x241   : > { %v5577_v54 = vpop.eup %5576  ;;  %4031 = vst.msk [vmem:[%s6659_s15 + $0xe8] sm:$0xff] %vm171_vm1, %v3999_v27 }
 0x242   : > { %v5579_v61 = vpop.eup %5578  ;;  %v3998_v62 = vmul.f32 %v5577_v54, %v6765_v52 }
 0x243   : > { %v4001_v24 = vmul.f32 %v5579_v61, %v6774_v19 }
 0x244   : > { %4030 = vst.msk [vmem:[%s6659_s15 + $0xe0] sm:$0xff] %vm171_vm1, %v3998_v62 }
 0x245   : > { %v5581_v1 = vpop.eup %5580  ;;  %4033 = vst.msk [vmem:[%s6659_s15 + $0xf8] sm:$0xff] %vm171_vm1, %v4001_v24 }
 0x246   : > { %v4000_v53 = vmul.f32 %v5581_v1, %v6779_v41 }
 0x248   : > { %4032 = vst.msk [vmem:[%s6659_s15 + $0xf0] sm:$0xff] %vm171_vm1, %v4000_v53 }
 0x249 PF: > { %s13_s12 = sadd.s32 1, %s5588_s12  }
 0x24a   : > { %p10_p4 = scmp.ge.s32.totalorder %s13_s12, 4  }
 0x24c   :  { %12 = sbr.rel (!%p10_p4) target bundleno = 1 (0x1), region = 72 }

// kernel: bottleneck_csp_forward.7
= control target key start
LH: loop header
LB: loop body
LE: loop exit
PB: predicated region body
PF: predicated region fallthrough
CT: control target
= control target key end

     0   :  { %s3169_s27 = smov 0   ;;  %s3954_s0 = inlined_call_operand.vmem [shape: f32[512,4], index: 0, kind: input, shape index: {}]   ;;  %s3955_s1 = inlined_call_operand.vmem [shape: f32[512,4], index: 1, kind: input, shape index: {}]   ;;  %s3956_s2 = inlined_call_operand.vmem [shape: f32[4,4], index: 2, kind: input, shape index: {}]   ;;  %s3957_s3 = inlined_call_operand.vmem [shape: f32[1,4], index: 3, kind: input, shape index: {}]   ;;  %s3958_s4 = inlined_call_operand.vmem [shape: f32[1,4], index: 4, kind: input, shape index: {}]   ;;  %s3959_s5 = inlined_call_operand.vmem [shape: f32[4,8], index: 5, kind: input, shape index: {}]   ;;  %s3960_s6 = inlined_call_operand.vmem [shape: f32[4,8], index: 6, kind: input, shape index: {}]   ;;  %s3961_s7 = inlined_call_operand.vmem [shape: f32[1,8], index: 7, kind: input, shape index: {}]   ;;  %s3962_s8 = inlined_call_operand.vmem [shape: f32[512,8], index: 8, kind: output, shape index: {}]  }
   0x1 LB: > { %s2230_s28 = sadd.s32 4294967295, %s3122_s27   ;;  %p2234_p0 = scmp.ge.s32.totalorder %s3122_s27, 1  ;;  %s3122_s27 = sphi %s3169_s27, %s18_s27  }
   0x2   : > { %p274_p1 = scmp.lt.s32.totalorder %s3122_s27, 3 }
   0x4   : > { %p275_p2 = pnand %p2234_p0, %p274_p1 }
   0x5   : > { %v363_v0 = vld [vmem:[%s3956_s2] sm:$0xf] (!%p275_p2)  ;;  %vm468_vm0 = vcmask (!%p275_p2), 1043456   ;;  %s2235_s9 = sshll.u32 (!%p275_p2), %s2230_s28, 5  ;;  %vm371_vm1 = vcmask (!%p275_p2), 31744   ;;  %vm2129_vm2 = vcmask (!%p275_p2), 64512  }
   0x6   : > { %278 = sbr.rel (%p275_p2) target bundleno = 571 (0x23b), region = 52  ;;  %2540 = vmatprep.subr.msk.mxu0 (!%p275_p2), %vm468_vm0, %v363_v0  ;;  %p314_p3 = scmp.lt.s32.totalorder (!%p275_p2), %s2235_s9, 63  ;;  %v1217_v1 = vld [vmem:[%s3960_s6] sm:$0xf] (!%p275_p2) }
   0x7   : > { %2541 = vmatpush3.msk.msra.mxu0 (!%p275_p2), %vm468_vm0, %v363_v0  ;;  %2690 = vmatprep.subr.msk.mxu1 (!%p275_p2), %vm468_vm0, %v1217_v1  ;;  %v3264_v32 = vld [vmem:[%s3958_s4] ss:$0 sm:$0xff] (!%p275_p2) }
   0x8   : > { %2590 = vmatprep.subr.msk.mxu0 (!%p275_p2), %vm468_vm0, %v1217_v1  ;;  %2691 = vmatpush3.msk.msra.mxu1 (!%p275_p2), %vm468_vm0, %v1217_v1 }
   0xd   : > { %s3964_s9 = smov (!%p314_p3, %s2235_s9), 63 }
   0xe   : > { %s3188_s12 = sshll.u32 %s3964_s9, 3 }
   0xf   : > { %s3194_s15 = scalar_lea.vmem %s3954_s0, %s3188_s12  ;;  %s3257_s18 = scalar_lea.vmem %s3955_s1, %s3188_s12 }
  0x10   : > { %v331_v2 = vld [vmem:[%s3194_s15] sm:$0xff]  ;;  %v332_v3 = vld [vmem:[%s3194_s15 + $0x8] sm:$0xff]  ;;  %v333_v4 = vld [vmem:[%s3194_s15 + $0x10] sm:$0xff]  ;;  %s3774_s30 = scalar_lea.vmem %s3962_s8, %s3188_s12 }
  0x11   : > { %2542 = vmatprep.mubr.msk.f32.mxu0 %vm371_vm1, %v331_v2  ;;  %v334_v5 = vld [vmem:[%s3194_s15 + $0x18] sm:$0xff]  ;;  %v335_v6 = vld [vmem:[%s3194_s15 + $0x20] sm:$0xff]  ;;  %v336_v7 = vld [vmem:[%s3194_s15 + $0x28] sm:$0xff] }
  0x12   : > { %2543 = vmatmul.mubr.msk.f32.vlgmr.msra.gmra.mrb[0].mxu0 %vm371_vm1, %v332_v3  ;;  %v337_v8 = vld [vmem:[%s3194_s15 + $0x30] sm:$0xff]  ;;  %v338_v9 = vld [vmem:[%s3194_s15 + $0x38] sm:$0xff]  ;;  %v339_v10 = vld [vmem:[%s3194_s15 + $0x40] sm:$0xff] }
  0x13   : > { %2545 = vmatprep.mubr.msk.f32.mxu0 %vm371_vm1, %v333_v4  ;;  %2591 = vmatpush3.msk.msra.mxu0 %vm468_vm0, %v1217_v1  ;;  %v340_v11 = vld [vmem:[%s3194_s15 + $0x48] sm:$0xff]  ;;  %v341_v12 = vld [vmem:[%s3194_s15 + $0x50] sm:$0xff]  ;;  %v342_v13 = vld [vmem:[%s3194_s15 + $0x58] sm:$0xff] }
  0x14   : > { %v343_v14 = vld [vmem:[%s3194_s15 + $0x60] sm:$0xff]  ;;  %v344_v15 = vld [vmem:[%s3194_s15 + $0x68] sm:$0xff]  ;;  %v345_v16 = vld [vmem:[%s3194_s15 + $0x70] sm:$0xff] }
  0x15   : > { %v346_v17 = vld [vmem:[%s3194_s15 + $0x78] sm:$0xff]  ;;  %v347_v18 = vld [vmem:[%s3194_s15 + $0x80] sm:$0xff]  ;;  %v348_v19 = vld [vmem:[%s3194_s15 + $0x88] sm:$0xff] }
  0x16   : > { %2546 = vmatmul.mubr.msk.f32.gmra.mrb[2].mxu0 %vm371_vm1, %v334_v5  ;;  %v349_v20 = vld [vmem:[%s3194_s15 + $0x90] sm:$0xff]  ;;  %v350_v21 = vld [vmem:[%s3194_s15 + $0x98] sm:$0xff]  ;;  %v351_v22 = vld [vmem:[%s3194_s15 + $0xa0] sm:$0xff] }
  0x17   : > { %2548 = vmatprep.mubr.msk.f32.mxu0 %vm371_vm1, %v335_v6  ;;  %v352_v23 = vld [vmem:[%s3194_s15 + $0xa8] sm:$0xff]  ;;  %v353_v24 = vld [vmem:[%s3194_s15 + $0xb0] sm:$0xff]  ;;  %v354_v25 = vld [vmem:[%s3194_s15 + $0xb8] sm:$0xff] }
  0x18   : > { %v355_v26 = vld [vmem:[%s3194_s15 + $0xc0] sm:$0xff]  ;;  %v356_v27 = vld [vmem:[%s3194_s15 + $0xc8] sm:$0xff]  ;;  %v357_v28 = vld [vmem:[%s3194_s15 + $0xd0] sm:$0xff] }
  0x19   : > { %v358_v29 = vld [vmem:[%s3194_s15 + $0xd8] sm:$0xff]  ;;  %v359_v30 = vld [vmem:[%s3194_s15 + $0xe0] sm:$0xff]  ;;  %v360_v33 = vld [vmem:[%s3194_s15 + $0xe8] sm:$0xff] }
  0x1a   : > { %2549 = vmatmul.mubr.msk.f32.gmra.mrb[4].mxu0 %vm371_vm1, %v336_v7  ;;  %v937_v31 = vld [vmem:[%s3257_s18 + $0x80] sm:$0xff]  ;;  %v938_v35 = vld [vmem:[%s3257_s18 + $0x88] sm:$0xff]  ;;  %v361_v36 = vld [vmem:[%s3194_s15 + $0xf0] sm:$0xff] }
  0x1b   : > { %2551 = vmatprep.mubr.msk.f32.mxu0 %vm371_vm1, %v337_v8  ;;  %v3269_v34 = vadd.f32 %v3264_v32, %v937_v31  ;;  %v3274_v37 = vadd.f32 %v3264_v32, %v938_v35  ;;  %v939_v40 = vld [vmem:[%s3257_s18 + $0x90] sm:$0xff]  ;;  %v362_v41 = vld [vmem:[%s3194_s15 + $0xf8] sm:$0xff]  ;;  %v941_v47 = vld [vmem:[%s3257_s18 + $0xa0] sm:$0xff] }
  0x1c   : > { %v3283_v42 = vadd.f32 %v3264_v32, %v939_v40  ;;  %v940_v43 = vld [vmem:[%s3257_s18 + $0x98] sm:$0xff]  ;;  %v3294_v48 = vadd.f32 %v3264_v32, %v941_v47  ;;  %v942_v49 = vld [vmem:[%s3257_s18 + $0xa8] sm:$0xff]  ;;  %v943_v53 = vld [vmem:[%s3257_s18 + $0xb0] sm:$0xff] }
  0x1d   : > { %v2324_v38 = vmul.f32 -1.442695, %v3269_v34  ;;  %v2325_v39 = vmul.f32 -1.442695, %v3274_v37  ;;  %v3287_v44 = vadd.f32 %v3264_v32, %v940_v43  ;;  %v3298_v50 = vadd.f32 %v3264_v32, %v942_v49  ;;  %v944_v57 = vld [vmem:[%s3257_s18 + $0xb8] sm:$0xff]  ;;  %v945_v63 = vld [vmem:[%s3257_s18 + $0xc0] sm:$0xff] }
  0x1e   : > { %2552 = vmatmul.mubr.msk.f32.gmra.mrb[6].mxu0 %vm371_vm1, %v338_v9  ;;  %v2326_v45 = vmul.f32 -1.442695, %v3283_v42  ;;  %v2328_v51 = vmul.f32 -1.442695, %v3294_v48  ;;  %v3304_v54 = vadd.f32 %v3264_v32, %v943_v53  ;;  %v3309_v60 = vadd.f32 %v3264_v32, %v944_v57  ;;  %v946_v2 = vld [vmem:[%s3257_s18 + $0xc8] sm:$0xff]  ;;  %v947_v9 = vld [vmem:[%s3257_s18 + $0xd0] sm:$0xff] }
  0x1f   : > { %2554 = vmatprep.mubr.msk.f32.mxu0 %vm371_vm1, %v339_v10  ;;  %2732 = vpow2.f32 %v2324_v38  ;;  %v2327_v46 = vmul.f32 -1.442695, %v3287_v44  ;;  %v2329_v52 = vmul.f32 -1.442695, %v3298_v50  ;;  %v3314_v1 = vadd.f32 %v3264_v32, %v945_v63  ;;  %v952_v38 = vld [vmem:[%s3257_s18 + $0xf8] sm:$0xff]  ;;  %v921_v47 = vld [vmem:[%s3257_s18] sm:$0xff] }
  0x20   : > { %2734 = vpow2.f32 %v2325_v39  ;;  %v2330_v56 = vmul.f32 -1.442695, %v3304_v54  ;;  %v2331_v62 = vmul.f32 -1.442695, %v3309_v60  ;;  %v3318_v5 = vadd.f32 %v3264_v32, %v946_v2  ;;  %v922_v53 = vld [vmem:[%s3257_s18 + $0x8] sm:$0xff]  ;;  %v923_v63 = vld [vmem:[%s3257_s18 + $0x10] sm:$0xff] }
  0x21   : > { %2736 = vpow2.f32 %v2326_v45  ;;  %v2332_v7 = vmul.f32 -1.442695, %v3314_v1 }
  0x22   : > { %2555 = vmatmul.mubr.msk.f32.gmra.mrb[8].mxu0 %vm371_vm1, %v340_v11  ;;  %2738 = vpow2.f32 %v2327_v46  ;;  %v2333_v8 = vmul.f32 -1.442695, %v3318_v5  ;;  %v3324_v11 = vadd.f32 %v3264_v32, %v947_v9 }
  0x23   : > { %2557 = vmatprep.mubr.msk.f32.mxu0 %vm371_vm1, %v341_v12  ;;  %2740 = vpow2.f32 %v2328_v51  ;;  %v948_v12 = vld [vmem:[%s3257_s18 + $0xd8] sm:$0xff] }
  0x24   : > { %2742 = vpow2.f32 %v2329_v52  ;;  %v3361_v52 = vadd.f32 %v3264_v32, %v921_v47 }
  0x25   : > { %2744 = vpow2.f32 %v2330_v56 }
  0x26   : > { %2558 = vmatmul.mubr.msk.f32.gmra.mrb[10].mxu0 %vm371_vm1, %v342_v13 }
  0x27   : > { %2560 = vmatprep.mubr.msk.f32.mxu0 %vm371_vm1, %v343_v14 }
  0x29   : > { %v2733_v55 = vpop.eup %2732 }
  0x2a   : > { %2561 = vmatmul.mubr.msk.f32.gmra.mrb[12].mxu0 %vm371_vm1, %v344_v15  ;;  %v2735_v58 = vpop.eup %2734  ;;  %v1104_v59 = vadd.f32 1.0, %v2733_v55  ;;  %v3328_v15 = vadd.f32 %v3264_v32, %v948_v12 }
  0x2b   : > { %2563 = vmatprep.mubr.msk.f32.mxu0 %vm371_vm1, %v345_v16  ;;  %v1105_v61 = vadd.f32 1.0, %v2735_v58  ;;  %v2737_v0 = vpop.eup %2736  ;;  %v2308_v58 = vmul.f32 -1.442695, %v3361_v52 }
  0x2c   : > { %2746 = vrcp.f32 %v1104_v59  ;;  %v2739_v3 = vpop.eup %2738  ;;  %v1106_v4 = vadd.f32 1.0, %v2737_v0 }
  0x2d   : > { %2748 = vrcp.f32 %v1105_v61  ;;  %v1107_v6 = vadd.f32 1.0, %v2739_v3  ;;  %v2741_v10 = vpop.eup %2740  ;;  %v3375_v3 = vadd.f32 %v3264_v32, %v923_v63 }
  0x2e   : > { %2564 = vmatmul.mubr.msk.f32.gmra.mrb[14].mxu0 %vm371_vm1, %v346_v17  ;;  %2750 = vpow2.f32 %v2331_v62  ;;  %v2743_v13 = vpop.eup %2742  ;;  %v1108_v14 = vadd.f32 1.0, %v2741_v10  ;;  %v2334_v17 = vmul.f32 -1.442695, %v3324_v11 }
  0x2f   : > { %2566 = vmatprep.mubr.msk.f32.mxu0 %vm371_vm1, %v347_v18  ;;  %2752 = vrcp.f32 %v1106_v4  ;;  %v1109_v16 = vadd.f32 1.0, %v2743_v13  ;;  %v2335_v18 = vmul.f32 -1.442695, %v3328_v15 }
  0x30   : > { %2754 = vrcp.f32 %v1107_v6  ;;  %v924_v6 = vld [vmem:[%s3257_s18 + $0x18] sm:$0xff] }
  0x31   : > { %2756 = vpow2.f32 %v2332_v7  ;;  %v3382_v9 = vadd.f32 %v3264_v32, %v924_v6 }
  0x32   : > { %2567 = vmatmul.mubr.msk.f32.gmra.mrb[16].mxu0 %vm371_vm1, %v348_v19  ;;  %2758 = vpow2.f32 %v2333_v8  ;;  %v949_v19 = vld [vmem:[%s3257_s18 + $0xe0] sm:$0xff]  ;;  %v2310_v8 = vmul.f32 -1.442695, %v3375_v3 }
  0x33   : > { %2569 = vmatprep.mubr.msk.f32.mxu0 %vm371_vm1, %v349_v20  ;;  %2760 = vrcp.f32 %v1108_v14  ;;  %v2745_v20 = vpop.eup %2744 }
  0x34   : > { %2762 = vrcp.f32 %v1109_v16  ;;  %v2311_v16 = vmul.f32 -1.442695, %v3382_v9 }
  0x35   : > { %2764 = vpow2.f32 %v2334_v17  ;;  %v925_v17 = vld [vmem:[%s3257_s18 + $0x20] sm:$0xff] }
  0x36   : > { %2570 = vmatmul.mubr.msk.f32.gmra.mrb[18].mxu0 %vm371_vm1, %v350_v21  ;;  %v3334_v21 = vadd.f32 %v3264_v32, %v949_v19  ;;  %2766 = vpow2.f32 %v2335_v18  ;;  %v3389_v18 = vadd.f32 %v3264_v32, %v925_v17  ;;  %v926_v19 = vld [vmem:[%s3257_s18 + $0x28] sm:$0xff] }
  0x37   : > { %2572 = vmatprep.mubr.msk.f32.mxu0 %vm371_vm1, %v351_v22  ;;  %v950_v22 = vld [vmem:[%s3257_s18 + $0xe8] sm:$0xff] }
  0x38   : > { %v934_v17 = vld [vmem:[%s3257_s18 + $0x68] sm:$0xff] }
  0x3a   : > { %2573 = vmatmul.mubr.msk.f32.gmra.mrb[20].mxu0 %vm371_vm1, %v352_v23  ;;  %v2747_v23 = vpop.eup %2746 }
  0x3b   : > { %2575 = vmatprep.mubr.msk.f32.mxu0 %vm371_vm1, %v353_v24  ;;  %v1110_v24 = vadd.f32 1.0, %v2745_v20 }
  0x3d   : > { %2768 = vrcp.f32 %v1110_v24 }
  0x3e   : > { %2576 = vmatmul.mubr.msk.f32.gmra.mrb[22].mxu0 %vm371_vm1, %v354_v25  ;;  %v3338_v25 = vadd.f32 %v3264_v32, %v950_v22  ;;  %v3393_v22 = vadd.f32 %v3264_v32, %v926_v19  ;;  %v3453_v19 = vadd.f32 %v3264_v32, %v934_v17 }
  0x3f   : > { %2578 = vmatprep.mubr.msk.f32.mxu0 %vm371_vm1, %v355_v26  ;;  %v2749_v26 = vpop.eup %2748 }
  0x40   : > { %v2337_v31 = vmul.f32 -1.442695, %v3338_v25 }
  0x42   : > { %2579 = vmatmul.mubr.msk.f32.gmra.mrb[24].mxu0 %vm371_vm1, %v356_v27  ;;  %v1200_v27 = vmul.f32 %v2747_v23, %v3269_v34 }
  0x43   : > { %2581 = vmatprep.mubr.msk.f32.mxu0 %vm371_vm1, %v357_v28  ;;  %v2336_v28 = vmul.f32 -1.442695, %v3334_v21 }
  0x44   : > { %2616 = vmatprep.mubr.msk.f32.mxu1 %vm371_vm1, %v1200_v27 }
  0x45   : > { %2770 = vpow2.f32 %v2336_v28  ;;  %v2313_v28 = vmul.f32 -1.442695, %v3393_v22 }
  0x46   : > { %2582 = vmatmul.mubr.msk.f32.gmra.mrb[26].mxu0 %vm371_vm1, %v358_v29  ;;  %v2751_v29 = vpop.eup %2750  ;;  %2772 = vpow2.f32 %v2337_v31 }
  0x47   : > { %2584 = vmatprep.mubr.msk.f32.mxu0 %vm371_vm1, %v359_v30  ;;  %v1201_v30 = vmul.f32 %v2749_v26, %v3274_v37  ;;  %v1111_v35 = vadd.f32 1.0, %v2751_v29  ;;  %v2753_v34 = vpop.eup %2752  ;;  %v3352_v37 = vadd.f32 %v3264_v32, %v952_v38  ;;  %v2312_v26 = vmul.f32 -1.442695, %v3389_v18  ;;  %v927_v29 = vld [vmem:[%s3257_s18 + $0x30] sm:$0xff] }
  0x48   : > { %v2755_v39 = vpop.eup %2754  ;;  %v1202_v40 = vmul.f32 %v2753_v34, %v3283_v42 }
  0x49   : > { %2617 = vmatmul.mubr.msk.f32.vlgmr.msra.gmra.mrb[0].mxu1 %vm371_vm1, %v1201_v30  ;;  %2774 = vrcp.f32 %v1111_v35  ;;  %v2757_v43 = vpop.eup %2756  ;;  %v1203_v45 = vmul.f32 %v2755_v39, %v3287_v44  ;;  %v2339_v46 = vmul.f32 -1.442695, %v3352_v37  ;;  %v3366_v44 = vadd.f32 %v3264_v32, %v922_v53  ;;  %v928_v35 = vld [vmem:[%s3257_s18 + $0x38] sm:$0xff]  ;;  %v930_v53 = vld [vmem:[%s3257_s18 + $0x48] sm:$0xff] }
  0x4a   : > { %2585 = vmatmul.mubr.msk.f32.gmra.mrb[28].mxu0 %vm371_vm1, %v360_v33  ;;  %v951_v33 = vld [vmem:[%s3257_s18 + $0xf0] sm:$0xff]  ;;  %v2759_v49 = vpop.eup %2758  ;;  %2619 = vmatprep.mubr.msk.f32.mxu1 %vm371_vm1, %v1202_v40  ;;  %v1112_v51 = vadd.f32 1.0, %v2757_v43  ;;  %v3406_v39 = vadd.f32 %v3264_v32, %v928_v35 }
  0x4b   : > { %2587 = vmatprep.mubr.msk.f32.mxu0 %vm371_vm1, %v361_v36  ;;  %v3347_v36 = vadd.f32 %v3264_v32, %v951_v33  ;;  %v2761_v42 = vpop.eup %2760  ;;  %v1113_v55 = vadd.f32 1.0, %v2759_v49  ;;  %v2309_v62 = vmul.f32 -1.442695, %v3366_v44  ;;  %v3401_v33 = vadd.f32 %v3264_v32, %v927_v29 }
  0x4c   : > { %v2763_v56 = vpop.eup %2762  ;;  %v1204_v57 = vmul.f32 %v2761_v42, %v3294_v48 }
  0x4d   : > { %2620 = vmatmul.mubr.msk.f32.gmra.mrb[2].mxu1 %vm371_vm1, %v1203_v45  ;;  %v2765_v59 = vpop.eup %2764  ;;  %v1205_v61 = vmul.f32 %v2763_v56, %v3298_v50  ;;  %v3420_v56 = vadd.f32 %v3264_v32, %v930_v53 }
  0x4e   : > { %2588 = vmatmul.mubr.msk.f32.gmra.mrb[30].mxu0 %vm371_vm1, %v362_v41  ;;  %v2338_v41 = vmul.f32 -1.442695, %v3347_v36  ;;  %v2767_v0 = vpop.eup %2766  ;;  %2622 = vmatprep.mubr.msk.f32.mxu1 %vm371_vm1, %v1204_v57  ;;  %v1114_v2 = vadd.f32 1.0, %v2765_v59 }
  0x4f   : > { %v2769_v48 = vpop.eup %2768  ;;  %v1115_v4 = vadd.f32 1.0, %v2767_v0 }
  0x50   : > { %2776 = vpow2.f32 %v2338_v41  ;;  %v2771_v50 = vpop.eup %2770  ;;  %v1206_v7 = vmul.f32 %v2769_v48, %v3304_v54  ;;  %v932_v48 = vld [vmem:[%s3257_s18 + $0x58] sm:$0xff] }
  0x51   : > { %2778 = vpow2.f32 %v2339_v46  ;;  %2623 = vmatmul.mubr.msk.f32.gmra.mrb[4].mxu1 %vm371_vm1, %v1205_v61  ;;  %v2773_v10 = vpop.eup %2772  ;;  %v1116_v12 = vadd.f32 1.0, %v2771_v50  ;;  %v2315_v46 = vmul.f32 -1.442695, %v3406_v39 }
  0x52   : > { %2780 = vrcp.f32 %v1112_v51  ;;  %2625 = vmatprep.mubr.msk.f32.mxu1 %vm371_vm1, %v1206_v7  ;;  %v1117_v14 = vadd.f32 1.0, %v2773_v10  ;;  %v933_v10 = vld [vmem:[%s3257_s18 + $0x60] sm:$0xff] }
  0x53   : > { %2782 = vrcp.f32 %v1113_v55  ;;  %v2775_v13 = vpop.eup %2774 }
  0x54   : > { %2784 = vpow2.f32 %v2308_v58  ;;  %v1207_v54 = vmul.f32 %v2775_v13, %v3309_v60  ;;  %v1216_v13 = vld [vmem:[%s3959_s5] sm:$0xf] }
  0x55   : > { %2786 = vpow2.f32 %v2309_v62  ;;  %v931_v62 = vld [vmem:[%s3257_s18 + $0x50] sm:$0xff]  ;;  %2640 = vmatprep.subr.msk.mxu1 %vm468_vm0, %v1216_v13 }
  0x56   : > { %2788 = vrcp.f32 %v1114_v2  ;;  %2626 = vmatmul.mubr.msk.f32.gmra.mrb[6].mxu1 %vm371_vm1, %v1207_v54  ;;  %v3430_v2 = vadd.f32 %v3264_v32, %v931_v62 }
  0x57   : > { %2790 = vrcp.f32 %v1115_v4  ;;  %2641 = vmatpush3.msk.msra.mxu1 %vm468_vm0, %v1216_v13 }
  0x58   : > { %2792 = vpow2.f32 %v2310_v8  ;;  %v2318_v50 = vmul.f32 -1.442695, %v3430_v2 }
  0x59   : > { %2794 = vrcp.f32 %v1116_v12 }
  0x5a   : > { %v2777_v20 = vpop.eup %2776  ;;  %2796 = vrcp.f32 %v1117_v14 }
  0x5b   : > { %v2779_v23 = vpop.eup %2778  ;;  %v1118_v24 = vadd.f32 1.0, %v2777_v20  ;;  %2798 = vpow2.f32 %v2311_v16  ;;  %v3447_v16 = vadd.f32 %v3264_v32, %v933_v10 }
  0x5c   : > { %v2781_v27 = vpop.eup %2780  ;;  %v1119_v60 = vadd.f32 1.0, %v2779_v23 }
  0x5d   : > { %v2783_v30 = vpop.eup %2782  ;;  %v1208_v31 = vmul.f32 %v2781_v27, %v3314_v1  ;;  %2800 = vrcp.f32 %v1118_v24  ;;  %v2314_v1 = vmul.f32 -1.442695, %v3401_v33  ;;  %v2320_v23 = vmul.f32 -1.442695, %v3447_v16 }
  0x5e   : > { %v2785_v38 = vpop.eup %2784  ;;  %v1209_v34 = vmul.f32 %v2783_v30, %v3318_v5  ;;  %2802 = vrcp.f32 %v1119_v60  ;;  %v929_v5 = vld [vmem:[%s3257_s18 + $0x40] sm:$0xff]  ;;  %v2321_v27 = vmul.f32 -1.442695, %v3453_v19  ;;  %v935_v60 = vld [vmem:[%s3257_s18 + $0x70] sm:$0xff] }
  0x5f   : > { %v2787_v40 = vpop.eup %2786  ;;  %2628 = vmatprep.mubr.msk.f32.mxu1 %vm371_vm1, %v1208_v31  ;;  %v1088_v41 = vadd.f32 1.0, %v2785_v38  ;;  %2804 = vpow2.f32 %v2312_v26  ;;  %v3415_v51 = vadd.f32 %v3264_v32, %v929_v5  ;;  %v3463_v30 = vadd.f32 %v3264_v32, %v935_v60  ;;  %v936_v31 = vld [vmem:[%s3257_s18 + $0x78] sm:$0xff] }
  0x60   : > { %v2789_v43 = vpop.eup %2788  ;;  %2629 = vmatmul.mubr.msk.f32.gmra.mrb[8].mxu1 %vm371_vm1, %v1209_v34  ;;  %v1089_v45 = vadd.f32 1.0, %v2787_v40  ;;  %2806 = vpow2.f32 %v2313_v28  ;;  %v3468_v34 = vadd.f32 %v3264_v32, %v936_v31 }
  0x61   : > { %v2791_v47 = vpop.eup %2790  ;;  %v1210_v49 = vmul.f32 %v2789_v43, %v3324_v11  ;;  %2808 = vrcp.f32 %v1088_v41  ;;  %v2316_v11 = vmul.f32 -1.442695, %v3415_v51 }
  0x62   : > { %v2793_v42 = vpop.eup %2792  ;;  %v1211_v55 = vmul.f32 %v2791_v47, %v3328_v15  ;;  %2810 = vrcp.f32 %v1089_v45  ;;  %v2317_v15 = vmul.f32 -1.442695, %v3420_v56 }
  0x63   : > { %v2795_v57 = vpop.eup %2794  ;;  %2631 = vmatprep.mubr.msk.f32.mxu1 %vm371_vm1, %v1210_v49  ;;  %v1090_v58 = vadd.f32 1.0, %v2793_v42  ;;  %2812 = vpow2.f32 %v2314_v1 }
  0x64   : > { %v2797_v59 = vpop.eup %2796  ;;  %2632 = vmatmul.mubr.msk.f32.gmra.mrb[10].mxu1 %vm371_vm1, %v1211_v55  ;;  %v1212_v61 = vmul.f32 %v2795_v57, %v3334_v21  ;;  %2814 = vpow2.f32 %v2315_v46  ;;  %v3435_v21 = vadd.f32 %v3264_v32, %v932_v48  ;;  %v2323_v46 = vmul.f32 -1.442695, %v3468_v34 }
  0x65   : > { %v2799_v63 = vpop.eup %2798  ;;  %v1213_v0 = vmul.f32 %v2797_v59, %v3338_v25  ;;  %2816 = vrcp.f32 %v1090_v58 }
  0x66   : > { %2634 = vmatprep.mubr.msk.f32.mxu1 %vm371_vm1, %v1212_v61  ;;  %v1091_v4 = vadd.f32 1.0, %v2799_v63  ;;  %2818 = vpow2.f32 %v2316_v11  ;;  %v2319_v8 = vmul.f32 -1.442695, %v3435_v21 }
  0x67   : > { %v2801_v6 = vpop.eup %2800  ;;  %2820 = vpow2.f32 %v2317_v15 }
  0x68   : > { %v2803_v7 = vpop.eup %2802  ;;  %2635 = vmatmul.mubr.msk.f32.gmra.mrb[12].mxu1 %vm371_vm1, %v1213_v0  ;;  %v1214_v25 = vmul.f32 %v2801_v6, %v3347_v36  ;;  %2822 = vrcp.f32 %v1091_v4 }
  0x69   : > { %v2805_v12 = vpop.eup %2804  ;;  %v1215_v14 = vmul.f32 %v2803_v7, %v3352_v37  ;;  %2824 = vpow2.f32 %v2318_v50 }
  0x6a   : > { %v2807_v54 = vpop.eup %2806  ;;  %2637 = vmatprep.mubr.msk.f32.mxu1 %vm371_vm1, %v1214_v25  ;;  %v1092_v36 = vadd.f32 1.0, %v2805_v12  ;;  %2826 = vpow2.f32 %v2319_v8 }
  0x6b   : > { %v2809_v20 = vpop.eup %2808  ;;  %v1093_v37 = vadd.f32 1.0, %v2807_v54 }
  0x6c   : > { %v2811_v24 = vpop.eup %2810  ;;  %2638 = vmatmul.mubr.msk.f32.gmra.mrb[14].mxu1 %vm371_vm1, %v1215_v14  ;;  %v1184_v26 = vmul.f32 %v2809_v20, %v3361_v52  ;;  %2828 = vrcp.f32 %v1092_v36 }
  0x6d   : > { %v2813_v28 = vpop.eup %2812  ;;  %v1185_v29 = vmul.f32 %v2811_v24, %v3366_v44  ;;  %2830 = vrcp.f32 %v1093_v37  ;;  %v2322_v44 = vmul.f32 -1.442695, %v3463_v30 }
  0x6e   : > { %v2815_v35 = vpop.eup %2814  ;;  %2592 = vmatprep.mubr.msk.f32.mxu0 %vm371_vm1, %v1184_v26  ;;  %v1094_v38 = vadd.f32 1.0, %v2813_v28  ;;  %2832 = vpow2.f32 %v2320_v23 }
  0x6f   : > { %v2817_v52 = vpop.eup %2816  ;;  %2593 = vmatmul.mubr.msk.f32.vlgmr.msra.gmra.mrb[32].mxu0 %vm371_vm1, %v1185_v29  ;;  %v1095_v40 = vadd.f32 1.0, %v2815_v35  ;;  %2834 = vpow2.f32 %v2321_v27 }
  0x70   : > { %v2819_v41 = vpop.eup %2818  ;;  %v1186_v1 = vmul.f32 %v2817_v52, %v3375_v3  ;;  %2836 = vrcp.f32 %v1094_v38 }
  0x71   : > { %v2821_v43 = vpop.eup %2820  ;;  %2838 = vrcp.f32 %v1095_v40  ;;  %v1096_v45 = vadd.f32 1.0, %v2819_v41 }
  0x72   : > { %v2823_v5 = vpop.eup %2822  ;;  %2595 = vmatprep.mubr.msk.f32.mxu0 %vm371_vm1, %v1186_v1  ;;  %v1097_v32 = vadd.f32 1.0, %v2821_v43  ;;  %2840 = vpow2.f32 %v2322_v44 }
  0x73   : > { %v2825_v47 = vpop.eup %2824  ;;  %v1187_v49 = vmul.f32 %v2823_v5, %v3382_v9  ;;  %2842 = vrcp.f32 %v1096_v45 }
  0x74   : > { %v2827_v53 = vpop.eup %2826  ;;  %2844 = vrcp.f32 %v1097_v32  ;;  %v1098_v42 = vadd.f32 1.0, %v2825_v47 }
  0x75   : > { %2596 = vmatmul.mubr.msk.f32.gmra.mrb[34].mxu0 %vm371_vm1, %v1187_v49  ;;  %v1099_v3 = vadd.f32 1.0, %v2827_v53  ;;  %2846 = vpow2.f32 %v2323_v46 }
  0x76   : > { %v2829_v55 = vpop.eup %2828  ;;  %2848 = vrcp.f32 %v1098_v42 }
  0x77   : > { %v2831_v57 = vpop.eup %2830  ;;  %v1188_v58 = vmul.f32 %v2829_v55, %v3389_v18  ;;  %2850 = vrcp.f32 %v1099_v3 }
  0x78   : > { %v2833_v11 = vpop.eup %2832  ;;  %v1189_v59 = vmul.f32 %v2831_v57, %v3393_v22 }
  0x79   : > { %v2835_v61 = vpop.eup %2834  ;;  %2598 = vmatprep.mubr.msk.f32.mxu0 %vm371_vm1, %v1188_v58  ;;  %v1100_v9 = vadd.f32 1.0, %v2833_v11 }
  0x7a   : > { %v2837_v15 = vpop.eup %2836  ;;  %2599 = vmatmul.mubr.msk.f32.gmra.mrb[36].mxu0 %vm371_vm1, %v1189_v59  ;;  %v1101_v62 = vadd.f32 1.0, %v2835_v61 }
  0x7b   : > { %v2839_v63 = vpop.eup %2838  ;;  %v1190_v0 = vmul.f32 %v2837_v15, %v3401_v33  ;;  %2852 = vrcp.f32 %v1100_v9 }
  0x7c   : > { %v2841_v48 = vpop.eup %2840  ;;  %v1191_v4 = vmul.f32 %v2839_v63, %v3406_v39  ;;  %2854 = vrcp.f32 %v1101_v62 }
  0x7d   : > { %v2843_v18 = vpop.eup %2842  ;;  %2601 = vmatprep.mubr.msk.f32.mxu0 %vm371_vm1, %v1190_v0  ;;  %v1102_v22 = vadd.f32 1.0, %v2841_v48 }
  0x7e   : > { %v2845_v6 = vpop.eup %2844  ;;  %2602 = vmatmul.mubr.msk.f32.gmra.mrb[38].mxu0 %vm371_vm1, %v1191_v4  ;;  %v1192_v50 = vmul.f32 %v2843_v18, %v3415_v51 }
  0x7f   : > { %v2847_v7 = vpop.eup %2846  ;;  %v1193_v25 = vmul.f32 %v2845_v6, %v3420_v56  ;;  %2856 = vrcp.f32 %v1102_v22 }
  0x80   : > { %v2849_v8 = vpop.eup %2848  ;;  %2604 = vmatprep.mubr.msk.f32.mxu0 %vm371_vm1, %v1192_v50  ;;  %v1103_v33 = vadd.f32 1.0, %v2847_v7 }
  0x81   : > { %v2851_v10 = vpop.eup %2850  ;;  %v1194_v39 = vmul.f32 %v2849_v8, %v3430_v2 }
  0x82   : > { %2605 = vmatmul.mubr.msk.f32.gmra.mrb[40].mxu0 %vm371_vm1, %v1193_v25  ;;  %v1195_v12 = vmul.f32 %v2851_v10, %v3435_v21  ;;  %2858 = vrcp.f32 %v1103_v33 }
  0x83   : > { %2607 = vmatprep.mubr.msk.f32.mxu0 %vm371_vm1, %v1194_v39 }
  0x85   : > { %v2853_v13 = vpop.eup %2852 }
  0x86   : > { %v2855_v51 = vpop.eup %2854  ;;  %2608 = vmatmul.mubr.msk.f32.gmra.mrb[42].mxu0 %vm371_vm1, %v1195_v12  ;;  %v1196_v56 = vmul.f32 %v2853_v13, %v3447_v16  ;;  %v3504_v16 = vld [vmem:[%s3957_s3] ss:$0 sm:$0xff] }
  0x87   : > { %v1197_v14 = vmul.f32 %v2855_v51, %v3453_v19 }
  0x88   : > { %2610 = vmatprep.mubr.msk.f32.mxu0 %vm371_vm1, %v1196_v56 }
  0x89   : > { %v2857_v17 = vpop.eup %2856 }
  0x8a   : > { %2611 = vmatmul.mubr.msk.f32.gmra.mrb[44].mxu0 %vm371_vm1, %v1197_v14  ;;  %v1198_v2 = vmul.f32 %v2857_v17, %v3463_v30 }
  0x8c   : > { %v2859_v54 = vpop.eup %2858  ;;  %2613 = vmatprep.mubr.msk.f32.mxu0 %vm371_vm1, %v1198_v2 }
  0x8d   : > { %v1199_v21 = vmul.f32 %v2859_v54, %v3468_v34 }
  0x8f   : > { %2614 = vmatmul.mubr.msk.f32.gmra.mrb[46].mxu0 %vm371_vm1, %v1199_v21 }
  0xe5   : > { %v2544_v36 = vpop.f32.mrb[0].mxu0 }
  0xe6   : > { %v3507_v19 = vadd.f32 %v2544_v36, %v3504_v16  ;;  %v538_v20 = vpop.f32.mrb[1].mxu0 }
  0xe7   : > { %v3510_v37 = vadd.f32 %v3504_v16, %v538_v20 }
  0xe8   : > { %v2276_v23 = vmul.f32 -1.442695, %v3507_v19 }
  0xe9   : > { %v2275_v24 = vmul.f32 -1.442695, %v3510_v37  ;;  %v2547_v26 = vpop.f32.mrb[2].mxu0 }
  0xea   : > { %2860 = vpow2.f32 %v2276_v23  ;;  %v3515_v27 = vadd.f32 %v2547_v26, %v3504_v16  ;;  %v548_v60 = vpop.f32.mrb[3].mxu0 }
  0xeb   : > { %2862 = vpow2.f32 %v2275_v24  ;;  %v3518_v28 = vadd.f32 %v3504_v16, %v548_v60 }
  0xec   : > { %v2278_v29 = vmul.f32 -1.442695, %v3515_v27 }
  0xed   : > { %v2277_v30 = vmul.f32 -1.442695, %v3518_v28  ;;  %v2550_v31 = vpop.f32.mrb[4].mxu0 }
  0xee   : > { %2864 = vpow2.f32 %v2278_v29  ;;  %v3523_v35 = vadd.f32 %v2550_v31, %v3504_v16  ;;  %v558_v38 = vpop.f32.mrb[5].mxu0 }
  0xef   : > { %2866 = vpow2.f32 %v2277_v30  ;;  %v3526_v34 = vadd.f32 %v3504_v16, %v558_v38 }
  0xf0   : > { %v2280_v52 = vmul.f32 -1.442695, %v3523_v35 }
  0xf1   : > { %v2279_v40 = vmul.f32 -1.442695, %v3526_v34  ;;  %v2553_v44 = vpop.f32.mrb[6].mxu0 }
  0xf2   : > { %2868 = vpow2.f32 %v2280_v52  ;;  %v3531_v41 = vadd.f32 %v2553_v44, %v3504_v16  ;;  %v568_v1 = vpop.f32.mrb[7].mxu0 }
  0xf3   : > { %2870 = vpow2.f32 %v2279_v40  ;;  %v3534_v43 = vadd.f32 %v3504_v16, %v568_v1 }
  0xf4   : > { %v2861_v45 = vpop.eup %2860  ;;  %v2282_v46 = vmul.f32 -1.442695, %v3531_v41 }
  0xf5   : > { %v2863_v5 = vpop.eup %2862  ;;  %v794_v32 = vadd.f32 1.0, %v2861_v45  ;;  %v2281_v47 = vmul.f32 -1.442695, %v3534_v43  ;;  %v2556_v49 = vpop.f32.mrb[8].mxu0 }
  0xf6   : > { %v793_v53 = vadd.f32 1.0, %v2863_v5  ;;  %2872 = vpow2.f32 %v2282_v46  ;;  %v3539_v42 = vadd.f32 %v2556_v49, %v3504_v16  ;;  %v578_v3 = vpop.f32.mrb[9].mxu0 }
  0xf7   : > { %2874 = vrcp.f32 %v794_v32  ;;  %v3542_v55 = vadd.f32 %v3504_v16, %v578_v3 }
  0xf8   : > { %v2865_v57 = vpop.eup %2864  ;;  %2876 = vrcp.f32 %v793_v53  ;;  %v2284_v58 = vmul.f32 -1.442695, %v3539_v42 }
  0xf9   : > { %v2867_v11 = vpop.eup %2866  ;;  %v796_v59 = vadd.f32 1.0, %v2865_v57  ;;  %2878 = vpow2.f32 %v2281_v47  ;;  %v2283_v61 = vmul.f32 -1.442695, %v3542_v55  ;;  %v2559_v9 = vpop.f32.mrb[10].mxu0 }
  0xfa   : > { %v795_v15 = vadd.f32 1.0, %v2867_v11  ;;  %2880 = vpow2.f32 %v2284_v58  ;;  %v3547_v62 = vadd.f32 %v2559_v9, %v3504_v16  ;;  %v588_v63 = vpop.f32.mrb[11].mxu0 }
  0xfb   : > { %2882 = vrcp.f32 %v796_v59  ;;  %v3550_v0 = vadd.f32 %v3504_v16, %v588_v63 }
  0xfc   : > { %v2869_v48 = vpop.eup %2868  ;;  %2884 = vrcp.f32 %v795_v15  ;;  %v2286_v4 = vmul.f32 -1.442695, %v3547_v62 }
  0xfd   : > { %v2871_v18 = vpop.eup %2870  ;;  %v798_v22 = vadd.f32 1.0, %v2869_v48  ;;  %2886 = vpow2.f32 %v2283_v61  ;;  %v2285_v6 = vmul.f32 -1.442695, %v3550_v0  ;;  %v2562_v50 = vpop.f32.mrb[12].mxu0 }
  0xfe   : > { %v797_v7 = vadd.f32 1.0, %v2871_v18  ;;  %2888 = vpow2.f32 %v2286_v4  ;;  %v3555_v25 = vadd.f32 %v2562_v50, %v3504_v16  ;;  %v598_v8 = vpop.f32.mrb[13].mxu0 }
  0xff   : > { %2890 = vrcp.f32 %v798_v22  ;;  %v3558_v33 = vadd.f32 %v3504_v16, %v598_v8 }
 0x100   : > { %v2873_v10 = vpop.eup %2872  ;;  %2892 = vrcp.f32 %v797_v7  ;;  %v2288_v39 = vmul.f32 -1.442695, %v3555_v25 }
 0x101   : > { %v2875_v12 = vpop.eup %2874  ;;  %v800_v13 = vadd.f32 1.0, %v2873_v10  ;;  %2894 = vpow2.f32 %v2285_v6  ;;  %v2287_v51 = vmul.f32 -1.442695, %v3558_v33  ;;  %v2565_v56 = vpop.f32.mrb[14].mxu0 }
 0x102   : > { %v2877_v14 = vpop.eup %2876  ;;  %2896 = vpow2.f32 %v2288_v39  ;;  %v3563_v17 = vadd.f32 %v2565_v56, %v3504_v16  ;;  %v608_v2 = vpop.f32.mrb[15].mxu0  ;;  %v890_v23 = vmul.f32 %v2875_v12, %v3507_v19 }
 0x103   : > { %v2879_v54 = vpop.eup %2878  ;;  %v889_v21 = vmul.f32 %v2877_v14, %v3510_v37  ;;  %v3567_v36 = vadd.f32 %v3504_v16, %v608_v2  ;;  %2898 = vpow2.f32 %v2287_v51 }
 0x104   : > { %v2881_v20 = vpop.eup %2880  ;;  %v799_v24 = vadd.f32 1.0, %v2879_v54  ;;  %v2290_v26 = vmul.f32 -1.442695, %v3563_v17  ;;  %2900 = vrcp.f32 %v800_v13 }
 0x105   : > { %v2883_v60 = vpop.eup %2882  ;;  %v802_v29 = vadd.f32 1.0, %v2881_v20  ;;  %v2289_v30 = vmul.f32 -1.442695, %v3567_v36  ;;  %v2568_v31 = vpop.f32.mrb[16].mxu0  ;;  %2642 = vmatprep.mubr.msk.f32.mxu1 %vm371_vm1, %v889_v21 }
 0x106   : > { %v2885_v38 = vpop.eup %2884  ;;  %2902 = vrcp.f32 %v799_v24  ;;  %v3574_v37 = vadd.f32 %v2568_v31, %v3504_v16  ;;  %v618_v52 = vpop.f32.mrb[17].mxu0  ;;  %2643 = vmatmul.mubr.msk.f32.vlgmr.msra.gmra.mrb[16].mxu1 %vm371_vm1, %v890_v23  ;;  %v892_v45 = vmul.f32 %v2883_v60, %v3515_v27 }
 0x107   : > { %v2887_v19 = vpop.eup %2886  ;;  %v891_v40 = vmul.f32 %v2885_v38, %v3518_v28  ;;  %2904 = vrcp.f32 %v802_v29  ;;  %v3579_v44 = vadd.f32 %v3504_v16, %v618_v52 }
 0x108   : > { %v2889_v1 = vpop.eup %2888  ;;  %v801_v46 = vadd.f32 1.0, %v2887_v19  ;;  %2906 = vpow2.f32 %v2290_v26  ;;  %v2292_v5 = vmul.f32 -1.442695, %v3574_v37 }
 0x109   : > { %v2891_v32 = vpop.eup %2890  ;;  %v804_v47 = vadd.f32 1.0, %v2889_v1  ;;  %2908 = vpow2.f32 %v2289_v30  ;;  %v2291_v49 = vmul.f32 -1.442695, %v3579_v44  ;;  %v2571_v53 = vpop.f32.mrb[18].mxu0  ;;  %2645 = vmatprep.mubr.msk.f32.mxu1 %vm371_vm1, %v891_v40 }
 0x10a   : > { %v2893_v28 = vpop.eup %2892  ;;  %2910 = vrcp.f32 %v801_v46  ;;  %v3586_v3 = vadd.f32 %v2571_v53, %v3504_v16  ;;  %v628_v57 = vpop.f32.mrb[19].mxu0  ;;  %2646 = vmatmul.mubr.msk.f32.gmra.mrb[18].mxu1 %vm371_vm1, %v892_v45  ;;  %v894_v61 = vmul.f32 %v2891_v32, %v3523_v35 }
 0x10b   : > { %v2895_v27 = vpop.eup %2894  ;;  %v893_v58 = vmul.f32 %v2893_v28, %v3526_v34  ;;  %2912 = vrcp.f32 %v804_v47  ;;  %v3591_v11 = vadd.f32 %v3504_v16, %v628_v57 }
 0x10c   : > { %v2897_v59 = vpop.eup %2896  ;;  %v803_v9 = vadd.f32 1.0, %v2895_v27  ;;  %2914 = vpow2.f32 %v2292_v5  ;;  %v2294_v15 = vmul.f32 -1.442695, %v3586_v3 }
 0x10d   : > { %v806_v63 = vadd.f32 1.0, %v2897_v59  ;;  %2916 = vpow2.f32 %v2291_v49  ;;  %v2574_v48 = vpop.f32.mrb[20].mxu0  ;;  %2648 = vmatprep.mubr.msk.f32.mxu1 %vm371_vm1, %v893_v58  ;;  %v2899_v4 = vpop.eup %2898  ;;  %v2293_v34 = vmul.f32 -1.442695, %v3591_v11 }
 0x10e   : > { %2918 = vrcp.f32 %v803_v9  ;;  %v3598_v18 = vadd.f32 %v2574_v48, %v3504_v16  ;;  %v638_v22 = vpop.f32.mrb[21].mxu0  ;;  %2649 = vmatmul.mubr.msk.f32.gmra.mrb[20].mxu1 %vm371_vm1, %v894_v61  ;;  %v2901_v35 = vpop.eup %2900  ;;  %v805_v6 = vadd.f32 1.0, %v2899_v4 }
 0x10f   : > { %2920 = vrcp.f32 %v806_v63  ;;  %v3602_v50 = vadd.f32 %v3504_v16, %v638_v22  ;;  %v896_v56 = vmul.f32 %v2901_v35, %v3531_v41 }
 0x110   : > { %v2903_v7 = vpop.eup %2902  ;;  %2922 = vpow2.f32 %v2294_v15  ;;  %v2296_v8 = vmul.f32 -1.442695, %v3598_v18 }
 0x111   : > { %v2905_v10 = vpop.eup %2904  ;;  %v895_v39 = vmul.f32 %v2903_v7, %v3534_v43  ;;  %2924 = vrcp.f32 %v805_v6  ;;  %v2295_v12 = vmul.f32 -1.442695, %v3602_v50  ;;  %v2577_v13 = vpop.f32.mrb[22].mxu0 }
 0x112   : > { %v2907_v51 = vpop.eup %2906  ;;  %2926 = vpow2.f32 %v2293_v34  ;;  %v3609_v14 = vadd.f32 %v2577_v13, %v3504_v16  ;;  %v648_v2 = vpop.f32.mrb[23].mxu0  ;;  %v898_v31 = vmul.f32 %v2905_v10, %v3539_v42 }
 0x113   : > { %v2909_v54 = vpop.eup %2908  ;;  %v808_v21 = vadd.f32 1.0, %v2907_v51  ;;  %2928 = vpow2.f32 %v2296_v8  ;;  %2651 = vmatprep.mubr.msk.f32.mxu1 %vm371_vm1, %v895_v39  ;;  %v3613_v20 = vadd.f32 %v3504_v16, %v648_v2 }
 0x114   : > { %v2911_v43 = vpop.eup %2910  ;;  %v807_v23 = vadd.f32 1.0, %v2909_v54  ;;  %2930 = vpow2.f32 %v2295_v12  ;;  %v2298_v24 = vmul.f32 -1.442695, %v3609_v14  ;;  %2652 = vmatmul.mubr.msk.f32.gmra.mrb[22].mxu1 %vm371_vm1, %v896_v56 }
 0x115   : > { %v2913_v41 = vpop.eup %2912  ;;  %v897_v26 = vmul.f32 %v2911_v43, %v3542_v55  ;;  %2932 = vrcp.f32 %v808_v21  ;;  %v2297_v60 = vmul.f32 -1.442695, %v3613_v20  ;;  %v2580_v29 = vpop.f32.mrb[24].mxu0 }
 0x116   : > { %v2915_v30 = vpop.eup %2914  ;;  %2934 = vrcp.f32 %v807_v23  ;;  %v3621_v38 = vadd.f32 %v2580_v29, %v3504_v16  ;;  %v658_v52 = vpop.f32.mrb[25].mxu0  ;;  %v900_v53 = vmul.f32 %v2913_v41, %v3547_v62 }
 0x117   : > { %v2917_v19 = vpop.eup %2916  ;;  %v810_v40 = vadd.f32 1.0, %v2915_v30  ;;  %2936 = vpow2.f32 %v2298_v24  ;;  %2654 = vmatprep.mubr.msk.f32.mxu1 %vm371_vm1, %v897_v26  ;;  %v3625_v1 = vadd.f32 %v3504_v16, %v658_v52 }
 0x118   : > { %v2919_v55 = vpop.eup %2918  ;;  %v809_v45 = vadd.f32 1.0, %v2917_v19  ;;  %2938 = vpow2.f32 %v2297_v60  ;;  %v2300_v46 = vmul.f32 -1.442695, %v3621_v38  ;;  %2655 = vmatmul.mubr.msk.f32.gmra.mrb[24].mxu1 %vm371_vm1, %v898_v31 }
 0x119   : > { %v2921_v42 = vpop.eup %2920  ;;  %v899_v5 = vmul.f32 %v2919_v55, %v3550_v0  ;;  %2940 = vrcp.f32 %v810_v40  ;;  %v2299_v32 = vmul.f32 -1.442695, %v3625_v1  ;;  %v2583_v47 = vpop.f32.mrb[26].mxu0 }
 0x11a   : > { %v2923_v49 = vpop.eup %2922  ;;  %2942 = vrcp.f32 %v809_v45  ;;  %v3633_v28 = vadd.f32 %v2583_v47, %v3504_v16  ;;  %v668_v57 = vpop.f32.mrb[27].mxu0  ;;  %v902_v15 = vmul.f32 %v2921_v42, %v3555_v25 }
 0x11b   : > { %v2925_v27 = vpop.eup %2924  ;;  %v812_v58 = vadd.f32 1.0, %v2923_v49  ;;  %2944 = vpow2.f32 %v2300_v46  ;;  %2657 = vmatprep.mubr.msk.f32.mxu1 %vm371_vm1, %v899_v5  ;;  %v3637_v59 = vadd.f32 %v3504_v16, %v668_v57 }
 0x11c   : > { %v2927_v0 = vpop.eup %2926  ;;  %v901_v61 = vmul.f32 %v2925_v27, %v3558_v33  ;;  %2946 = vpow2.f32 %v2299_v32  ;;  %v2302_v9 = vmul.f32 -1.442695, %v3633_v28  ;;  %2658 = vmatmul.mubr.msk.f32.gmra.mrb[26].mxu1 %vm371_vm1, %v900_v53 }
 0x11d   : > { %v2929_v62 = vpop.eup %2928  ;;  %2948 = vrcp.f32 %v812_v58  ;;  %v811_v63 = vadd.f32 1.0, %v2927_v0  ;;  %v2586_v48 = vpop.f32.mrb[28].mxu0  ;;  %v2301_v22 = vmul.f32 -1.442695, %v3637_v59 }
 0x11e   : > { %v2931_v4 = vpop.eup %2930  ;;  %v814_v34 = vadd.f32 1.0, %v2929_v62  ;;  %2950 = vpow2.f32 %v2302_v9  ;;  %v3645_v35 = vadd.f32 %v2586_v48, %v3504_v16  ;;  %2660 = vmatprep.mubr.msk.f32.mxu1 %vm371_vm1, %v901_v61  ;;  %v678_v33 = vpop.f32.mrb[29].mxu0 }
 0x11f   : > { %v2933_v6 = vpop.eup %2932  ;;  %2952 = vrcp.f32 %v811_v63  ;;  %v813_v7 = vadd.f32 1.0, %v2931_v4  ;;  %v3649_v8 = vadd.f32 %v3504_v16, %v678_v33 }
 0x120   : > { %v2935_v25 = vpop.eup %2934  ;;  %2954 = vrcp.f32 %v814_v34  ;;  %v2304_v10 = vmul.f32 -1.442695, %v3645_v35  ;;  %2661 = vmatmul.mubr.msk.f32.gmra.mrb[28].mxu1 %vm371_vm1, %v902_v15  ;;  %v904_v12 = vmul.f32 %v2933_v6, %v3563_v17 }
 0x121   : > { %v2937_v39 = vpop.eup %2936  ;;  %v903_v13 = vmul.f32 %v2935_v25, %v3567_v36  ;;  %2956 = vrcp.f32 %v813_v7  ;;  %v2589_v51 = vpop.f32.mrb[30].mxu0  ;;  %v2303_v54 = vmul.f32 -1.442695, %v3649_v8 }
 0x122   : > { %v2939_v56 = vpop.eup %2938  ;;  %v816_v2 = vadd.f32 1.0, %v2937_v39  ;;  %2958 = vpow2.f32 %v2301_v22  ;;  %v3657_v21 = vadd.f32 %v2589_v51, %v3504_v16  ;;  %v688_v43 = vpop.f32.mrb[31].mxu0 }
 0x123   : > { %v2941_v23 = vpop.eup %2940  ;;  %v815_v24 = vadd.f32 1.0, %v2939_v56  ;;  %2960 = vpow2.f32 %v2304_v10  ;;  %2663 = vmatprep.mubr.msk.f32.mxu1 %vm371_vm1, %v903_v13  ;;  %v3661_v17 = vadd.f32 %v3504_v16, %v688_v43 }
 0x124   : > { %v2943_v36 = vpop.eup %2942  ;;  %2962 = vrcp.f32 %v816_v2  ;;  %v2306_v41 = vmul.f32 -1.442695, %v3657_v21  ;;  %2664 = vmatmul.mubr.msk.f32.gmra.mrb[30].mxu1 %vm371_vm1, %v904_v12  ;;  %v906_v30 = vmul.f32 %v2941_v23, %v3574_v37 }
 0x125   : > { %v2945_v26 = vpop.eup %2944  ;;  %v905_v60 = vmul.f32 %v2943_v36, %v3579_v44  ;;  %2964 = vrcp.f32 %v815_v24  ;;  %v2305_v52 = vmul.f32 -1.442695, %v3661_v17 }
 0x126   : > { %v2947_v29 = vpop.eup %2946  ;;  %v818_v31 = vadd.f32 1.0, %v2945_v26  ;;  %2966 = vpow2.f32 %v2303_v54  ;;  %v3713_v26 = vld [vmem:[%s3961_s7] ss:$0 sm:$0xff] }
 0x127   : > { %v2949_v19 = vpop.eup %2948  ;;  %v817_v16 = vadd.f32 1.0, %v2947_v29  ;;  %2968 = vpow2.f32 %v2306_v41  ;;  %2666 = vmatprep.mubr.msk.f32.mxu1 %vm371_vm1, %v905_v60 }
 0x128   : > { %v2951_v40 = vpop.eup %2950  ;;  %2970 = vrcp.f32 %v818_v31  ;;  %2667 = vmatmul.mubr.msk.f32.gmra.mrb[0].mxu1 %vm371_vm1, %v906_v30  ;;  %v908_v42 = vmul.f32 %v2949_v19, %v3586_v3 }
 0x129   : > { %v2953_v55 = vpop.eup %2952  ;;  %2972 = vrcp.f32 %v817_v16  ;;  %v820_v46 = vadd.f32 1.0, %v2951_v40 }
 0x12a   : > { %v2955_v44 = vpop.eup %2954  ;;  %v907_v45 = vmul.f32 %v2953_v55, %v3591_v11  ;;  %2974 = vpow2.f32 %v2305_v52 }
 0x12b   : > { %v2957_v37 = vpop.eup %2956  ;;  %2976 = vrcp.f32 %v820_v46  ;;  %v910_v27 = vmul.f32 %v2955_v44, %v3598_v18 }
 0x12c   : > { %v2959_v5 = vpop.eup %2958  ;;  %v909_v32 = vmul.f32 %v2957_v37, %v3602_v50  ;;  %2669 = vmatprep.mubr.msk.f32.mxu1 %vm371_vm1, %v907_v45 }
 0x12d   : > { %v2961_v47 = vpop.eup %2960  ;;  %v819_v49 = vadd.f32 1.0, %v2959_v5  ;;  %2670 = vmatmul.mubr.msk.f32.gmra.mrb[2].mxu1 %vm371_vm1, %v908_v42 }
 0x12e   : > { %v2963_v53 = vpop.eup %2962  ;;  %v822_v57 = vadd.f32 1.0, %v2961_v47  ;;  %2672 = vmatprep.mubr.msk.f32.mxu1 %vm371_vm1, %v909_v32 }
 0x12f   : > { %v2965_v11 = vpop.eup %2964  ;;  %2978 = vrcp.f32 %v819_v49  ;;  %v912_v15 = vmul.f32 %v2963_v53, %v3609_v14 }
 0x130   : > { %v2967_v58 = vpop.eup %2966  ;;  %v911_v3 = vmul.f32 %v2965_v11, %v3613_v20  ;;  %2980 = vrcp.f32 %v822_v57 }
 0x131   : > { %v2969_v0 = vpop.eup %2968  ;;  %v821_v50 = vadd.f32 1.0, %v2967_v58  ;;  %2673 = vmatmul.mubr.msk.f32.gmra.mrb[4].mxu1 %vm371_vm1, %v910_v27 }
 0x132   : > { %v2971_v61 = vpop.eup %2970  ;;  %v824_v9 = vadd.f32 1.0, %v2969_v0  ;;  %2675 = vmatprep.mubr.msk.f32.mxu1 %vm371_vm1, %v911_v3 }
 0x133   : > { %v2973_v62 = vpop.eup %2972  ;;  %2982 = vrcp.f32 %v821_v50  ;;  %v914_v20 = vmul.f32 %v2971_v61, %v3621_v38 }
 0x134   : > { %v2975_v63 = vpop.eup %2974  ;;  %v913_v18 = vmul.f32 %v2973_v62, %v3625_v1  ;;  %2984 = vrcp.f32 %v824_v9 }
 0x135   : > { %v823_v48 = vadd.f32 1.0, %v2975_v63  ;;  %2676 = vmatmul.mubr.msk.f32.gmra.mrb[6].mxu1 %vm371_vm1, %v912_v15  ;;  %v2977_v4 = vpop.eup %2976 }
 0x136   : > { %2678 = vmatprep.mubr.msk.f32.mxu1 %vm371_vm1, %v913_v18  ;;  %v916_v14 = vmul.f32 %v2977_v4, %v3633_v28 }
 0x137   : > { %2986 = vrcp.f32 %v823_v48 }
 0x139   : > { %v2979_v34 = vpop.eup %2978  ;;  %2679 = vmatmul.mubr.msk.f32.gmra.mrb[8].mxu1 %vm371_vm1, %v914_v20 }
 0x13a   : > { %v915_v22 = vmul.f32 %v2979_v34, %v3637_v59  ;;  %v2981_v33 = vpop.eup %2980 }
 0x13b   : > { %v918_v7 = vmul.f32 %v2981_v33, %v3645_v35 }
 0x13c   : > { %2681 = vmatprep.mubr.msk.f32.mxu1 %vm371_vm1, %v915_v22 }
 0x13d   : > { %v2983_v1 = vpop.eup %2982  ;;  %2682 = vmatmul.mubr.msk.f32.gmra.mrb[10].mxu1 %vm371_vm1, %v916_v14 }
 0x13e   : > { %v917_v6 = vmul.f32 %v2983_v1, %v3649_v8  ;;  %v2985_v38 = vpop.eup %2984 }
 0x13f   : > { %v920_v28 = vmul.f32 %v2985_v38, %v3657_v21 }
 0x140   : > { %2684 = vmatprep.mubr.msk.f32.mxu1 %vm371_vm1, %v917_v6 }
 0x141   : > { %v2987_v25 = vpop.eup %2986  ;;  %2685 = vmatmul.mubr.msk.f32.gmra.mrb[12].mxu1 %vm371_vm1, %v918_v7 }
 0x142   : > { %v919_v59 = vmul.f32 %v2987_v25, %v3661_v17  ;;  %v2594_v10 = vpop.f32.mrb[32].mxu0 }
 0x143   : > { %v1383_v39 = vpop.f32.mrb[33].mxu0 }
 0x144   : > { %2687 = vmatprep.mubr.msk.f32.mxu1 %vm371_vm1, %v919_v59 }
 0x145   : > { %2688 = vmatmul.mubr.msk.f32.gmra.mrb[14].mxu1 %vm371_vm1, %v920_v28 }
 0x148   : > { %v2597_v12 = vpop.f32.mrb[34].mxu0 }
 0x149   : > { %v1393_v8 = vpop.f32.mrb[35].mxu0 }
 0x14d   : > { %v2600_v13 = vpop.f32.mrb[36].mxu0 }
 0x14e   : > { %v1403_v35 = vpop.f32.mrb[37].mxu0 }
 0x151   : > { %v2603_v51 = vpop.f32.mrb[38].mxu0 }
 0x152   : > { %v1413_v56 = vpop.f32.mrb[39].mxu0 }
 0x155   : > { %v2606_v2 = vpop.f32.mrb[40].mxu0 }
 0x156   : > { %v1423_v54 = vpop.f32.mrb[41].mxu0 }
 0x159   : > { %v3698_v43 = vpop.f32.mrb[42].mxu0 }
 0x15a   : > { %v3700_v23 = vpop.f32.mrb[43].mxu0 }
 0x15d   : > { %v3702_v24 = vpop.f32.mrb[44].mxu0 }
 0x15e   : > { %v3704_v21 = vpop.f32.mrb[45].mxu0 }
 0x162   : > { %v3706_v17 = vpop.f32.mrb[46].mxu0 }
 0x163   : > { %v3708_v36 = vpop.f32.mrb[47].mxu0 }
 0x1d9   : > { %v2644_v41 = vpop.f32.mrb[16].mxu1 }
 0x1da   : > { %v1713_v60 = vadd.f32 %v2644_v41, %v2594_v10  ;;  %v1707_v29 = vpop.f32.mrb[17].mxu1 }
 0x1db   : > { %v1708_v30 = vadd.f32 %v1707_v29, %v1383_v39 }
 0x1dc   : > { %v3716_v31 = vadd.f32 %v3713_v26, %v1713_v60 }
 0x1dd   : > { %v3719_v52 = vadd.f32 %v3713_v26, %v1708_v30  ;;  %v2647_v19 = vpop.f32.mrb[18].mxu1 }
 0x1de   : > { %v2408_v16 = vmul.f32 -1.442695, %v3716_v31  ;;  %v1723_v40 = vadd.f32 %v2647_v19, %v2597_v12  ;;  %v1717_v55 = vpop.f32.mrb[19].mxu1 }
 0x1df   : > { %v2407_v44 = vmul.f32 -1.442695, %v3719_v52  ;;  %v1718_v45 = vadd.f32 %v1717_v55, %v1393_v8 }
 0x1e0   : > { %2988 = vpow2.f32 %v2408_v16  ;;  %v3724_v46 = vadd.f32 %v3713_v26, %v1723_v40 }
 0x1e1   : > { %2990 = vpow2.f32 %v2407_v44  ;;  %v3727_v37 = vadd.f32 %v3713_v26, %v1718_v45  ;;  %v2650_v42 = vpop.f32.mrb[20].mxu1 }
 0x1e2   : > { %v2410_v5 = vmul.f32 -1.442695, %v3724_v46  ;;  %v1733_v32 = vadd.f32 %v2650_v42, %v2600_v13  ;;  %v1727_v47 = vpop.f32.mrb[21].mxu1 }
 0x1e3   : > { %v2409_v49 = vmul.f32 -1.442695, %v3727_v37  ;;  %v1728_v53 = vadd.f32 %v1727_v47, %v1403_v35 }
 0x1e4   : > { %2992 = vpow2.f32 %v2410_v5  ;;  %v3732_v57 = vadd.f32 %v3713_v26, %v1733_v32 }
 0x1e5   : > { %2994 = vpow2.f32 %v2409_v49  ;;  %v3735_v11 = vadd.f32 %v3713_v26, %v1728_v53 }
 0x1e6   : > { %v2412_v27 = vmul.f32 -1.442695, %v3732_v57 }
 0x1e7   : > { %v2411_v58 = vmul.f32 -1.442695, %v3735_v11  ;;  %v2653_v3 = vpop.f32.mrb[22].mxu1 }
 0x1e8   : > { %2996 = vpow2.f32 %v2412_v27  ;;  %v1743_v0 = vadd.f32 %v2653_v3, %v2603_v51  ;;  %v1737_v50 = vpop.f32.mrb[23].mxu1 }
 0x1e9   : > { %2998 = vpow2.f32 %v2411_v58  ;;  %v1738_v61 = vadd.f32 %v1737_v50, %v1413_v56 }
 0x1ea   : > { %v2989_v9 = vpop.eup %2988  ;;  %v3740_v62 = vadd.f32 %v3713_v26, %v1743_v0 }
 0x1eb   : > { %v2991_v15 = vpop.eup %2990  ;;  %v2002_v63 = vadd.f32 1.0, %v2989_v9  ;;  %v3743_v18 = vadd.f32 %v3713_v26, %v1738_v61  ;;  %v2656_v48 = vpop.f32.mrb[24].mxu1 }
 0x1ec   : > { %v2001_v20 = vadd.f32 1.0, %v2991_v15  ;;  %v2414_v4 = vmul.f32 -1.442695, %v3740_v62  ;;  %v1753_v34 = vadd.f32 %v2656_v48, %v2606_v2  ;;  %v1747_v22 = vpop.f32.mrb[25].mxu1 }
 0x1ed   : > { %3000 = vrcp.f32 %v2002_v63  ;;  %v2413_v14 = vmul.f32 -1.442695, %v3743_v18  ;;  %v1748_v33 = vadd.f32 %v1747_v22, %v1423_v54 }
 0x1ee   : > { %v2993_v1 = vpop.eup %2992  ;;  %3002 = vrcp.f32 %v2001_v20  ;;  %v3748_v6 = vadd.f32 %v3713_v26, %v1753_v34 }
 0x1ef   : > { %v2995_v7 = vpop.eup %2994  ;;  %v2004_v38 = vadd.f32 1.0, %v2993_v1  ;;  %3004 = vpow2.f32 %v2414_v4  ;;  %v3751_v25 = vadd.f32 %v3713_v26, %v1748_v33  ;;  %v2659_v59 = vpop.f32.mrb[26].mxu1 }
 0x1f0   : > { %v2003_v28 = vadd.f32 1.0, %v2995_v7  ;;  %3006 = vpow2.f32 %v2413_v14  ;;  %v2416_v10 = vmul.f32 -1.442695, %v3748_v6  ;;  %v1763_v39 = vadd.f32 %v2659_v59, %v3698_v43  ;;  %v1757_v12 = vpop.f32.mrb[27].mxu1 }
 0x1f1   : > { %3008 = vrcp.f32 %v2004_v38  ;;  %v2415_v8 = vmul.f32 -1.442695, %v3751_v25  ;;  %v1758_v13 = vadd.f32 %v1757_v12, %v3700_v23 }
 0x1f2   : > { %v2997_v35 = vpop.eup %2996  ;;  %3010 = vrcp.f32 %v2003_v28  ;;  %v3758_v51 = vadd.f32 %v3713_v26, %v1763_v39 }
 0x1f3   : > { %v2999_v56 = vpop.eup %2998  ;;  %v2006_v2 = vadd.f32 1.0, %v2997_v35  ;;  %3012 = vpow2.f32 %v2416_v10  ;;  %v3761_v54 = vadd.f32 %v3713_v26, %v1758_v13  ;;  %v2662_v41 = vpop.f32.mrb[28].mxu1 }
 0x1f4   : > { %v2005_v43 = vadd.f32 1.0, %v2999_v56  ;;  %3014 = vpow2.f32 %v2415_v8  ;;  %v2418_v60 = vmul.f32 -1.442695, %v3758_v51  ;;  %v1773_v29 = vadd.f32 %v2662_v41, %v3702_v24  ;;  %v1767_v23 = vpop.f32.mrb[29].mxu1 }
 0x1f5   : > { %3016 = vrcp.f32 %v2006_v2  ;;  %v2417_v30 = vmul.f32 -1.442695, %v3761_v54  ;;  %v1768_v19 = vadd.f32 %v1767_v23, %v3704_v21 }
 0x1f6   : > { %3018 = vrcp.f32 %v2005_v43  ;;  %v3768_v16 = vadd.f32 %v3713_v26, %v1773_v29 }
 0x1f7   : > { %v3001_v40 = vpop.eup %3000  ;;  %3020 = vpow2.f32 %v2418_v60  ;;  %v3777_v24 = vadd.f32 %v3713_v26, %v1768_v19  ;;  %v2665_v55 = vpop.f32.mrb[30].mxu1 }
 0x1f8   : > { %v3003_v44 = vpop.eup %3002  ;;  %v2098_v21 = vmul.f32 %v3001_v40, %v3716_v31  ;;  %3022 = vpow2.f32 %v2417_v30  ;;  %v2420_v45 = vmul.f32 -1.442695, %v3768_v16  ;;  %v1783_v42 = vadd.f32 %v2665_v55, %v3706_v17  ;;  %v1777_v5 = vpop.f32.mrb[31].mxu1 }
 0x1f9   : > { %v3005_v32 = vpop.eup %3004  ;;  %v2097_v47 = vmul.f32 %v3003_v44, %v3719_v52  ;;  %v2419_v49 = vmul.f32 -1.442695, %v3777_v24  ;;  %v1778_v53 = vadd.f32 %v1777_v5, %v3708_v36 }
 0x1fa   : > { %v3007_v27 = vpop.eup %3006  ;;  %2131 = vst.msk [vmem:[%s3774_s30 + $0x8] sm:$0xff] %vm2129_vm2, %v2098_v21  ;;  %v2008_v58 = vadd.f32 1.0, %v3005_v32  ;;  %3024 = vpow2.f32 %v2420_v45  ;;  %v3788_v31 = vadd.f32 %v3713_v26, %v1783_v42 }
 0x1fb   : > { %v3009_v3 = vpop.eup %3008  ;;  %2130 = vst.msk [vmem:[%s3774_s30] sm:$0xff] %vm2129_vm2, %v2097_v47  ;;  %v2007_v17 = vadd.f32 1.0, %v3007_v27  ;;  %3026 = vpow2.f32 %v2419_v49  ;;  %v3793_v52 = vadd.f32 %v3713_v26, %v1778_v53  ;;  %v2668_v0 = vpop.f32.mrb[0].mxu1 }
 0x1fc   : > { %v3011_v50 = vpop.eup %3010  ;;  %v2100_v36 = vmul.f32 %v3009_v3, %v3724_v46  ;;  %3028 = vrcp.f32 %v2008_v58  ;;  %v2422_v61 = vmul.f32 -1.442695, %v3788_v31  ;;  %v3798_v9 = vadd.f32 %v2668_v0, %v3713_v26  ;;  %v1787_v15 = vpop.f32.mrb[1].mxu1 }
 0x1fd   : > { %v3013_v63 = vpop.eup %3012  ;;  %v2099_v48 = vmul.f32 %v3011_v50, %v3727_v37  ;;  %3030 = vrcp.f32 %v2007_v17  ;;  %v2421_v20 = vmul.f32 -1.442695, %v3793_v52  ;;  %v3803_v4 = vadd.f32 %v3713_v26, %v1787_v15 }
 0x1fe   : > { %v3015_v34 = vpop.eup %3014  ;;  %2133 = vst.msk [vmem:[%s3774_s30 + $0x18] sm:$0xff] %vm2129_vm2, %v2100_v36  ;;  %v2010_v46 = vadd.f32 1.0, %v3013_v63  ;;  %3032 = vpow2.f32 %v2422_v61  ;;  %v2424_v22 = vmul.f32 -1.442695, %v3798_v9 }
 0x1ff   : > { %v3017_v14 = vpop.eup %3016  ;;  %2132 = vst.msk [vmem:[%s3774_s30 + $0x10] sm:$0xff] %vm2129_vm2, %v2099_v48  ;;  %v2009_v33 = vadd.f32 1.0, %v3015_v34  ;;  %3034 = vpow2.f32 %v2421_v20  ;;  %v2423_v37 = vmul.f32 -1.442695, %v3803_v4 }
 0x200   : > { %v3019_v1 = vpop.eup %3018  ;;  %v2102_v7 = vmul.f32 %v3017_v14, %v3732_v57  ;;  %3036 = vrcp.f32 %v2010_v46  ;;  %v2671_v38 = vpop.f32.mrb[2].mxu1 }
 0x201   : > { %v3021_v59 = vpop.eup %3020  ;;  %v2101_v28 = vmul.f32 %v3019_v1, %v3735_v11  ;;  %3038 = vrcp.f32 %v2009_v33  ;;  %v3814_v10 = vadd.f32 %v2671_v38, %v3713_v26  ;;  %v1797_v39 = vpop.f32.mrb[3].mxu1 }
 0x202   : > { %v3023_v12 = vpop.eup %3022  ;;  %2135 = vst.msk [vmem:[%s3774_s30 + $0x28] sm:$0xff] %vm2129_vm2, %v2102_v7  ;;  %v2012_v8 = vadd.f32 1.0, %v3021_v59  ;;  %3040 = vpow2.f32 %v2424_v22  ;;  %v3819_v13 = vadd.f32 %v3713_v26, %v1797_v39 }
 0x203   : > { %2134 = vst.msk [vmem:[%s3774_s30 + $0x20] sm:$0xff] %vm2129_vm2, %v2101_v28  ;;  %v2011_v57 = vadd.f32 1.0, %v3023_v12  ;;  %3042 = vpow2.f32 %v2423_v37  ;;  %v2426_v35 = vmul.f32 -1.442695, %v3814_v10 }
 0x204   : > { %v3025_v11 = vpop.eup %3024  ;;  %3044 = vrcp.f32 %v2012_v8  ;;  %v2674_v56 = vpop.f32.mrb[4].mxu1  ;;  %v2425_v43 = vmul.f32 -1.442695, %v3819_v13 }
 0x205   : > { %v3027_v2 = vpop.eup %3026  ;;  %3046 = vrcp.f32 %v2011_v57  ;;  %v2014_v41 = vadd.f32 1.0, %v3025_v11  ;;  %v3826_v60 = vadd.f32 %v2674_v56, %v3713_v26  ;;  %v1807_v29 = vpop.f32.mrb[5].mxu1 }
 0x206   : > { %v3029_v23 = vpop.eup %3028  ;;  %v2013_v30 = vadd.f32 1.0, %v3027_v2  ;;  %3048 = vpow2.f32 %v2426_v35  ;;  %v3829_v19 = vadd.f32 %v3713_v26, %v1807_v29 }
 0x207   : > { %v3031_v40 = vpop.eup %3030  ;;  %v2104_v55 = vmul.f32 %v3029_v23, %v3740_v62  ;;  %3050 = vrcp.f32 %v2014_v41  ;;  %v2428_v44 = vmul.f32 -1.442695, %v3826_v60 }
 0x208   : > { %v3033_v21 = vpop.eup %3032  ;;  %v2103_v45 = vmul.f32 %v3031_v40, %v3743_v18  ;;  %3052 = vrcp.f32 %v2013_v30  ;;  %v2677_v42 = vpop.f32.mrb[6].mxu1  ;;  %v2427_v47 = vmul.f32 -1.442695, %v3829_v19 }
 0x209   : > { %v3035_v5 = vpop.eup %3034  ;;  %2137 = vst.msk [vmem:[%s3774_s30 + $0x38] sm:$0xff] %vm2129_vm2, %v2104_v55  ;;  %v2016_v32 = vadd.f32 1.0, %v3033_v21  ;;  %3054 = vpow2.f32 %v2425_v43  ;;  %v3838_v49 = vadd.f32 %v2677_v42, %v3713_v26  ;;  %v1817_v62 = vpop.f32.mrb[7].mxu1 }
 0x20a   : > { %v3037_v53 = vpop.eup %3036  ;;  %2136 = vst.msk [vmem:[%s3774_s30 + $0x30] sm:$0xff] %vm2129_vm2, %v2103_v45  ;;  %v2015_v27 = vadd.f32 1.0, %v3035_v5  ;;  %3056 = vpow2.f32 %v2428_v44  ;;  %v3843_v18 = vadd.f32 %v3713_v26, %v1817_v62 }
 0x20b   : > { %v3039_v58 = vpop.eup %3038  ;;  %v2106_v3 = vmul.f32 %v3037_v53, %v3748_v6  ;;  %3058 = vrcp.f32 %v2016_v32  ;;  %v2430_v17 = vmul.f32 -1.442695, %v3838_v49 }
 0x20c   : > { %v3041_v0 = vpop.eup %3040  ;;  %v2105_v50 = vmul.f32 %v3039_v58, %v3751_v25  ;;  %3060 = vrcp.f32 %v2015_v27  ;;  %v2680_v36 = vpop.f32.mrb[8].mxu1  ;;  %v2429_v63 = vmul.f32 -1.442695, %v3843_v18 }
 0x20d   : > { %v3043_v61 = vpop.eup %3042  ;;  %2139 = vst.msk [vmem:[%s3774_s30 + $0x48] sm:$0xff] %vm2129_vm2, %v2106_v3  ;;  %v2018_v15 = vadd.f32 1.0, %v3041_v0  ;;  %3062 = vpow2.f32 %v2427_v47  ;;  %v3852_v48 = vadd.f32 %v2680_v36, %v3713_v26  ;;  %v1827_v20 = vpop.f32.mrb[9].mxu1 }
 0x20e   : > { %v3045_v6 = vpop.eup %3044  ;;  %2138 = vst.msk [vmem:[%s3774_s30 + $0x40] sm:$0xff] %vm2129_vm2, %v2105_v50  ;;  %v2017_v34 = vadd.f32 1.0, %v3043_v61  ;;  %3064 = vpow2.f32 %v2430_v17  ;;  %v3857_v25 = vadd.f32 %v3713_v26, %v1827_v20 }
 0x20f   : > { %v3047_v46 = vpop.eup %3046  ;;  %v2108_v22 = vmul.f32 %v3045_v6, %v3758_v51  ;;  %3066 = vrcp.f32 %v2018_v15  ;;  %v2432_v14 = vmul.f32 -1.442695, %v3852_v48 }
 0x210   : > { %v3049_v33 = vpop.eup %3048  ;;  %v2107_v37 = vmul.f32 %v3047_v46, %v3761_v54  ;;  %3068 = vrcp.f32 %v2017_v34  ;;  %v2431_v1 = vmul.f32 -1.442695, %v3857_v25  ;;  %v2683_v7 = vpop.f32.mrb[10].mxu1 }
 0x211   : > { %v3051_v38 = vpop.eup %3050  ;;  %2141 = vst.msk [vmem:[%s3774_s30 + $0x58] sm:$0xff] %vm2129_vm2, %v2108_v22  ;;  %v2020_v59 = vadd.f32 1.0, %v3049_v33  ;;  %3070 = vpow2.f32 %v2429_v63  ;;  %v3866_v28 = vadd.f32 %v2683_v7, %v3713_v26  ;;  %v1837_v51 = vpop.f32.mrb[11].mxu1 }
 0x212   : > { %v3053_v39 = vpop.eup %3052  ;;  %2140 = vst.msk [vmem:[%s3774_s30 + $0x50] sm:$0xff] %vm2129_vm2, %v2107_v37  ;;  %v2110_v54 = vmul.f32 %v3051_v38, %v3768_v16  ;;  %3072 = vpow2.f32 %v2432_v14  ;;  %v3872_v12 = vadd.f32 %v3713_v26, %v1837_v51 }
 0x213   : > { %v3055_v8 = vpop.eup %3054  ;;  %v2109_v57 = vmul.f32 %v3053_v39, %v3777_v24  ;;  %3074 = vrcp.f32 %v2020_v59  ;;  %v2434_v35 = vmul.f32 -1.442695, %v3866_v28 }
 0x214   : > { %v3057_v11 = vpop.eup %3056  ;;  %2143 = vst.msk [vmem:[%s3774_s30 + $0x68] sm:$0xff] %vm2129_vm2, %v2110_v54  ;;  %v2019_v56 = vadd.f32 1.0, %v3055_v8  ;;  %3076 = vpow2.f32 %v2431_v1  ;;  %v2433_v2 = vmul.f32 -1.442695, %v3872_v12  ;;  %v2686_v41 = vpop.f32.mrb[12].mxu1 }
 0x215   : > { %v3059_v16 = vpop.eup %3058  ;;  %2142 = vst.msk [vmem:[%s3774_s30 + $0x60] sm:$0xff] %vm2129_vm2, %v2109_v57  ;;  %v2022_v43 = vadd.f32 1.0, %v3057_v11  ;;  %3078 = vpow2.f32 %v2434_v35  ;;  %v3882_v29 = vadd.f32 %v2686_v41, %v3713_v26  ;;  %v1847_v24 = vpop.f32.mrb[13].mxu1 }
 0x216   : > { %v3061_v23 = vpop.eup %3060  ;;  %v2112_v30 = vmul.f32 %v3059_v16, %v3788_v31  ;;  %3080 = vrcp.f32 %v2019_v56  ;;  %v3886_v40 = vadd.f32 %v3713_v26, %v1847_v24 }
 0x217   : > { %v3063_v55 = vpop.eup %3062  ;;  %v2111_v44 = vmul.f32 %v3061_v23, %v3793_v52  ;;  %3082 = vrcp.f32 %v2022_v43  ;;  %v2436_v21 = vmul.f32 -1.442695, %v3882_v29 }
 0x218   : > { %v3065_v45 = vpop.eup %3064  ;;  %2145 = vst.msk [vmem:[%s3774_s30 + $0x78] sm:$0xff] %vm2129_vm2, %v2112_v30  ;;  %v2021_v42 = vadd.f32 1.0, %v3063_v55  ;;  %3084 = vpow2.f32 %v2433_v2  ;;  %v2435_v5 = vmul.f32 -1.442695, %v3886_v40  ;;  %v2689_v32 = vpop.f32.mrb[14].mxu1 }
 0x219   : > { %v3067_v31 = vpop.eup %3066  ;;  %2144 = vst.msk [vmem:[%s3774_s30 + $0x70] sm:$0xff] %vm2129_vm2, %v2111_v44  ;;  %v2024_v47 = vadd.f32 1.0, %v3065_v45  ;;  %3086 = vpow2.f32 %v2436_v21  ;;  %v3896_v62 = vadd.f32 %v2689_v32, %v3713_v26  ;;  %v1857_v52 = vpop.f32.mrb[15].mxu1 }
 0x21a   : > { %v3069_v53 = vpop.eup %3068  ;;  %v2114_v27 = vmul.f32 %v3067_v31, %v3798_v9  ;;  %3088 = vrcp.f32 %v2021_v42  ;;  %v3900_v58 = vadd.f32 %v3713_v26, %v1857_v52 }
 0x21b   : > { %v3071_v3 = vpop.eup %3070  ;;  %v2113_v17 = vmul.f32 %v3069_v53, %v3803_v4  ;;  %3090 = vrcp.f32 %v2024_v47  ;;  %v2438_v0 = vmul.f32 -1.442695, %v3896_v62 }
 0x21c   : > { %v3073_v50 = vpop.eup %3072  ;;  %2147 = vst.msk [vmem:[%s3774_s30 + $0x88] sm:$0xff] %vm2129_vm2, %v2114_v27  ;;  %v2023_v36 = vadd.f32 1.0, %v3071_v3  ;;  %3092 = vpow2.f32 %v2435_v5  ;;  %v2437_v61 = vmul.f32 -1.442695, %v3900_v58 }
 0x21d   : > { %v3075_v15 = vpop.eup %3074  ;;  %2146 = vst.msk [vmem:[%s3774_s30 + $0x80] sm:$0xff] %vm2129_vm2, %v2113_v17  ;;  %v2026_v9 = vadd.f32 1.0, %v3073_v50  ;;  %3094 = vpow2.f32 %v2438_v0 }
 0x21e   : > { %v3077_v26 = vpop.eup %3076  ;;  %v2116_v63 = vmul.f32 %v3075_v15, %v3814_v10  ;;  %3096 = vrcp.f32 %v2023_v36 }
 0x21f   : > { %v3079_v4 = vpop.eup %3078  ;;  %3098 = vrcp.f32 %v2026_v9  ;;  %v2025_v20 = vadd.f32 1.0, %v3077_v26 }
 0x220   : > { %v3081_v6 = vpop.eup %3080  ;;  %2149 = vst.msk [vmem:[%s3774_s30 + $0x98] sm:$0xff] %vm2129_vm2, %v2116_v63  ;;  %v2028_v34 = vadd.f32 1.0, %v3079_v4  ;;  %3100 = vpow2.f32 %v2437_v61 }
 0x221   : > { %v3083_v46 = vpop.eup %3082  ;;  %v2115_v22 = vmul.f32 %v3081_v6, %v3819_v13  ;;  %3102 = vrcp.f32 %v2025_v20 }
 0x222   : > { %v3085_v14 = vpop.eup %3084  ;;  %v2118_v33 = vmul.f32 %v3083_v46, %v3826_v60  ;;  %3104 = vrcp.f32 %v2028_v34 }
 0x223   : > { %v3087_v10 = vpop.eup %3086  ;;  %2148 = vst.msk [vmem:[%s3774_s30 + $0x90] sm:$0xff] %vm2129_vm2, %v2115_v22  ;;  %v2027_v37 = vadd.f32 1.0, %v3085_v14 }
 0x224   : > { %v3089_v1 = vpop.eup %3088  ;;  %2151 = vst.msk [vmem:[%s3774_s30 + $0xa8] sm:$0xff] %vm2129_vm2, %v2118_v33  ;;  %v2030_v7 = vadd.f32 1.0, %v3087_v10 }
 0x225   : > { %v3091_v38 = vpop.eup %3090  ;;  %v2117_v59 = vmul.f32 %v3089_v1, %v3829_v19  ;;  %3106 = vrcp.f32 %v2027_v37 }
 0x226   : > { %v3093_v13 = vpop.eup %3092  ;;  %v2120_v51 = vmul.f32 %v3091_v38, %v3838_v49  ;;  %3108 = vrcp.f32 %v2030_v7 }
 0x227   : > { %v3095_v60 = vpop.eup %3094  ;;  %2150 = vst.msk [vmem:[%s3774_s30 + $0xa0] sm:$0xff] %vm2129_vm2, %v2117_v59  ;;  %v2029_v39 = vadd.f32 1.0, %v3093_v13 }
 0x228   : > { %v3097_v54 = vpop.eup %3096  ;;  %2153 = vst.msk [vmem:[%s3774_s30 + $0xb8] sm:$0xff] %vm2129_vm2, %v2120_v51  ;;  %v2032_v8 = vadd.f32 1.0, %v3095_v60 }
 0x229   : > { %v3099_v57 = vpop.eup %3098  ;;  %v2119_v19 = vmul.f32 %v3097_v54, %v3843_v18  ;;  %3110 = vrcp.f32 %v2029_v39 }
 0x22a   : > { %v3101_v35 = vpop.eup %3100  ;;  %v2122_v11 = vmul.f32 %v3099_v57, %v3852_v48  ;;  %3112 = vrcp.f32 %v2032_v8 }
 0x22b   : > { %v3103_v49 = vpop.eup %3102  ;;  %2152 = vst.msk [vmem:[%s3774_s30 + $0xb0] sm:$0xff] %vm2129_vm2, %v2119_v19  ;;  %v2031_v56 = vadd.f32 1.0, %v3101_v35 }
 0x22c   : > { %v3105_v2 = vpop.eup %3104  ;;  %2155 = vst.msk [vmem:[%s3774_s30 + $0xc8] sm:$0xff] %vm2129_vm2, %v2122_v11  ;;  %v2121_v41 = vmul.f32 %v3103_v49, %v3857_v25 }
 0x22d   : > { %v2124_v16 = vmul.f32 %v3105_v2, %v3866_v28  ;;  %3114 = vrcp.f32 %v2031_v56 }
 0x22e   : > { %2154 = vst.msk [vmem:[%s3774_s30 + $0xc0] sm:$0xff] %vm2129_vm2, %v2121_v41 }
 0x22f   : > { %v3107_v18 = vpop.eup %3106  ;;  %2157 = vst.msk [vmem:[%s3774_s30 + $0xd8] sm:$0xff] %vm2129_vm2, %v2124_v16 }
 0x230   : > { %v3109_v48 = vpop.eup %3108  ;;  %v2123_v43 = vmul.f32 %v3107_v18, %v3872_v12 }
 0x231   : > { %v2126_v24 = vmul.f32 %v3109_v48, %v3882_v29 }
 0x232   : > { %2156 = vst.msk [vmem:[%s3774_s30 + $0xd0] sm:$0xff] %vm2129_vm2, %v2123_v43 }
 0x233   : > { %v3111_v23 = vpop.eup %3110  ;;  %2159 = vst.msk [vmem:[%s3774_s30 + $0xe8] sm:$0xff] %vm2129_vm2, %v2126_v24 }
 0x234   : > { %v3113_v25 = vpop.eup %3112  ;;  %v2125_v28 = vmul.f32 %v3111_v23, %v3886_v40 }
 0x235   : > { %v2128_v30 = vmul.f32 %v3113_v25, %v3896_v62 }
 0x236   : > { %2158 = vst.msk [vmem:[%s3774_s30 + $0xe0] sm:$0xff] %vm2129_vm2, %v2125_v28 }
 0x237   : > { %v3115_v55 = vpop.eup %3114  ;;  %2161 = vst.msk [vmem:[%s3774_s30 + $0xf8] sm:$0xff] %vm2129_vm2, %v2128_v30 }
 0x238   : > { %v2127_v44 = vmul.f32 %v3115_v55, %v3900_v58 }
 0x23a   : > { %2160 = vst.msk [vmem:[%s3774_s30 + $0xf0] sm:$0xff] %vm2129_vm2, %v2127_v44 }
 0x23b PF: > { %s18_s27 = sadd.s32 1, %s3122_s27  }
 0x23c   : > { %p15_p4 = scmp.ge.s32.totalorder %s18_s27, 4  }
 0x23e   :  { %17 = sbr.rel (!%p15_p4) target bundleno = 1 (0x1), region = 85 }

// kernel: bottleneck_csp_forward.6
= control target key start
LH: loop header
LB: loop body
LE: loop exit
PB: predicated region body
PF: predicated region fallthrough
CT: control target
= control target key end

     0   :  { %s5742_s15 = smov 0   ;;  %s7000_s0 = inlined_call_operand.vmem [shape: f32[2,16,16,4], index: 0, kind: input, shape index: {}]   ;;  %s7001_s1 = inlined_call_operand.vmem [shape: f32[3,3,4,4], index: 1, kind: input, shape index: {}]   ;;  %s7002_s2 = inlined_call_operand.vmem [shape: f32[1,4], index: 2, kind: input, shape index: {}]   ;;  %s7003_s3 = inlined_call_operand.vmem [shape: f32[2,256,4], index: 3, kind: input, shape index: {}]   ;;  %s7004_s4 = inlined_call_operand.vmem [shape: f32[2,256,4], index: 4, kind: output, shape index: {}]  }
   0x1 LB: > { %s4212_s16 = sadd.s32 4294967295, %s5714_s15   ;;  %p4216_p0 = scmp.ge.s32.totalorder %s5714_s15, 1  ;;  %s5714_s15 = sphi %s5742_s15, %s14_s15  }
   0x2   : > { %p172_p1 = scmp.lt.s32.totalorder %s5714_s15, 3 }
   0x4   : > { %p173_p2 = pnand %p4216_p0, %p172_p1 }
   0x6   : > { %176 = sbr.rel (%p173_p2) target bundleno = 586 (0x24a), region = 36 }
   0xd   : > { %v5753_v0 = vld [vmem:[%s7001_s1 + $0x4] sm:$0xf]  ;;  %vm502_vm0 = vcmask 1043456   ;;  %vm218_vm1 = vcmask 31744   ;;  %vm221_vm2 = vcmask 25600   ;;  %v5716_v1 = vmov 0.0  }
   0xe   : > { %4863 = vmatprep.subr.msk.mxu1 %vm502_vm0, %v5753_v0  ;;  %219 = vst.msk [vmem:[#allocation2] sm:$0xff] %vm218_vm1, %v5716_v1  ;;  %220 = vst.msk [vmem:[#allocation2 + $0x8] sm:$0xff] %vm218_vm1, %v5716_v1  ;;  %v5814_v2 = vld [vmem:[%s7001_s1 + $0x10] sm:$0xf]  ;;  %p203_p3 = scmp.lt.s32.totalorder %s4212_s16, 1 }
   0xf   : > { %223 = vst.msk [vmem:[#allocation2 + $0x18] sm:$0xff] %vm218_vm1, %v5716_v1  ;;  %224 = vst.msk [vmem:[#allocation2 + $0x20] sm:$0xff] %vm218_vm1, %v5716_v1  ;;  %v371_v3 = vld [vmem:[%s7001_s1] sm:$0xf]  ;;  %4864 = vmatpush3.msk.msra.mxu1 %vm502_vm0, %v5753_v0  ;;  %5063 = vmatprep.subr.msk.mxu0 %vm502_vm0, %v5814_v2  ;;  %v5828_v4 = vld [vmem:[%s7001_s1 + $0x14] sm:$0xf] }
  0x10   : > { %226 = vst.msk [vmem:[#allocation2 + $0x30] sm:$0xff] %vm218_vm1, %v5716_v1  ;;  %227 = vst.msk [vmem:[#allocation2 + $0x38] sm:$0xff] %vm218_vm1, %v5716_v1  ;;  %5064 = vmatpush3.msk.msra.mxu0 %vm502_vm0, %v5814_v2  ;;  %s7114_s16 = smov (!%p203_p3, %s4212_s16), 1  ;;  %4913 = vmatprep.subr.msk.mxu1 %vm502_vm0, %v371_v3  ;;  %v5851_v8 = vld [vmem:[%s7001_s1 + $0x8] sm:$0xf] }
  0x11   : > { %229 = vst.msk [vmem:[#allocation2 + $0x48] sm:$0xff] %vm218_vm1, %v5716_v1  ;;  %230 = vst.msk [vmem:[#allocation2 + $0x50] sm:$0xff] %vm218_vm1, %v5716_v1  ;;  %5113 = vmatprep.subr.msk.mxu0 %vm502_vm0, %v5828_v4  ;;  %s5837_s25 = sshll.u32 %s7114_s16, 8  ;;  %v5906_v33 = vld [vmem:[%s7001_s1 + $0x18] sm:$0xf] }
  0x12   : > { %232 = vst.msk [vmem:[#allocation2 + $0x60] sm:$0xff] %vm218_vm1, %v5716_v1  ;;  %233 = vst.msk [vmem:[#allocation2 + $0x68] sm:$0xff] %vm218_vm1, %v5716_v1  ;;  %s5843_s28 = scalar_lea.vmem %s7000_s0, %s5837_s25  ;;  %v6035_v63 = vld [vmem:[%s7001_s1 + $0x1c] sm:$0xf]  ;;  %s6779_s18 = scalar_lea.vmem %s7003_s3, %s5837_s25 }
  0x13   : > { %235 = vst.msk [vmem:[#allocation2 + $0x78] sm:$0xff] %vm218_vm1, %v5716_v1  ;;  %236 = vst.msk [vmem:[#allocation2 + $0x80] sm:$0xff] %vm218_vm1, %v5716_v1  ;;  %v274_v5 = vld [vmem:[%s5843_s28] sm:$0xff]  ;;  %v275_v6 = vld [vmem:[%s5843_s28 + $0x8] sm:$0xff]  ;;  %s6801_s21 = scalar_lea.vmem %s7004_s4, %s5837_s25 }
  0x14   : > { %238 = vst.msk [vmem:[#allocation2 + $0x90] sm:$0xff] %vm218_vm1, %v5716_v1  ;;  %239 = vst.msk [vmem:[#allocation2 + $0x98] sm:$0xff] %vm218_vm1, %v5716_v1  ;;  %v276_v7 = vld [vmem:[%s5843_s28 + $0x10] sm:$0xff]  ;;  %v277_v11 = vld [vmem:[%s5843_s28 + $0x18] sm:$0xff] }
  0x15   : > { %241 = vst.msk [vmem:[#allocation2 + $0xa8] sm:$0xff] %vm218_vm1, %v5716_v1  ;;  %242 = vst.msk [vmem:[#allocation2 + $0xb0] sm:$0xff] %vm218_vm1, %v5716_v1  ;;  %v372_v9 = vld [vmem:[#allocation2 + $0x1] sm:$0xff]  ;;  %v280_v14 = vld [vmem:[%s5843_s28 + $0x30] sm:$0xff] }
  0x16   : > { %244 = vst.msk [vmem:[#allocation2 + $0xc0] sm:$0xff] %vm218_vm1, %v5716_v1  ;;  %245 = vst.msk [vmem:[#allocation2 + $0xc8] sm:$0xff] %vm218_vm1, %v5716_v1  ;;  %4865 = vmatprep.mubr.msk.f32.mxu1 %vm218_vm1, %v372_v9  ;;  %v278_v12 = vld [vmem:[%s5843_s28 + $0x20] sm:$0xff]  ;;  %v279_v13 = vld [vmem:[%s5843_s28 + $0x28] sm:$0xff] }
  0x17   : > { %247 = vst.msk [vmem:[#allocation2 + $0xd8] sm:$0xff] %vm218_vm1, %v5716_v1  ;;  %248 = vst.msk [vmem:[#allocation2 + $0xe0] sm:$0xff] %vm218_vm1, %v5716_v1  ;;  %v281_v15 = vld [vmem:[%s5843_s28 + $0x38] sm:$0xff]  ;;  %v282_v16 = vld [vmem:[%s5843_s28 + $0x40] sm:$0xff] }
  0x18   : > { %250 = vst.msk [vmem:[#allocation2 + $0xf0] sm:$0xff] %vm218_vm1, %v5716_v1  ;;  %251 = vst.msk [vmem:[#allocation2 + $0xf8] sm:$0xff] %vm218_vm1, %v5716_v1  ;;  %v283_v17 = vld [vmem:[%s5843_s28 + $0x48] sm:$0xff]  ;;  %v284_v18 = vld [vmem:[%s5843_s28 + $0x50] sm:$0xff] }
  0x19   : > { %253 = vst.msk [vmem:[#allocation2 + $0x108] sm:$0xff] %vm218_vm1, %v5716_v1  ;;  %254 = vst.msk [vmem:[#allocation2 + $0x110] sm:$0xff] %vm218_vm1, %v5716_v1  ;;  %v285_v19 = vld [vmem:[%s5843_s28 + $0x58] sm:$0xff]  ;;  %v286_v20 = vld [vmem:[%s5843_s28 + $0x60] sm:$0xff] }
  0x1a   : > { %256 = vst.msk [vmem:[#allocation2 + $0x120] sm:$0xff] %vm218_vm1, %v5716_v1  ;;  %257 = vst.msk [vmem:[#allocation2 + $0x128] sm:$0xff] %vm218_vm1, %v5716_v1  ;;  %v287_v21 = vld [vmem:[%s5843_s28 + $0x68] sm:$0xff]  ;;  %v288_v22 = vld [vmem:[%s5843_s28 + $0x70] sm:$0xff] }
  0x1b   : > { %259 = vst.msk [vmem:[#allocation2 + $0x138] sm:$0xff] %vm218_vm1, %v5716_v1  ;;  %260 = vst.msk [vmem:[#allocation2 + $0x140] sm:$0xff] %vm218_vm1, %v5716_v1  ;;  %v289_v23 = vld [vmem:[%s5843_s28 + $0x78] sm:$0xff]  ;;  %v290_v24 = vld [vmem:[%s5843_s28 + $0x80] sm:$0xff] }
  0x1c   : > { %262 = vst.msk [vmem:[#allocation2 + $0x150] sm:$0xff] %vm218_vm1, %v5716_v1  ;;  %263 = vst.msk [vmem:[#allocation2 + $0x158] sm:$0xff] %vm218_vm1, %v5716_v1  ;;  %v291_v25 = vld [vmem:[%s5843_s28 + $0x88] sm:$0xff]  ;;  %v292_v26 = vld [vmem:[%s5843_s28 + $0x90] sm:$0xff] }
  0x1d   : > { %265 = vst.msk [vmem:[#allocation2 + $0x168] sm:$0xff] %vm218_vm1, %v5716_v1  ;;  %266 = vst.msk [vmem:[#allocation2 + $0x170] sm:$0xff] %vm218_vm1, %v5716_v1  ;;  %v293_v27 = vld [vmem:[%s5843_s28 + $0x98] sm:$0xff]  ;;  %v294_v28 = vld [vmem:[%s5843_s28 + $0xa0] sm:$0xff] }
  0x1e   : > { %268 = vst.msk [vmem:[#allocation2 + $0x180] sm:$0xff] %vm218_vm1, %v5716_v1  ;;  %269 = vst.msk [vmem:[#allocation2 + $0x188] sm:$0xff] %vm218_vm1, %v5716_v1  ;;  %v295_v29 = vld [vmem:[%s5843_s28 + $0xa8] sm:$0xff]  ;;  %v296_v38 = vld [vmem:[%s5843_s28 + $0xb0] sm:$0xff] }
  0x1f   : > { %271 = vst.msk [vmem:[#allocation2 + $0x198] sm:$0xff] %vm218_vm1, %v5716_v1  ;;  %272 = vst.msk [vmem:[#allocation2 + $0x1a0] sm:$0xff] %vm218_vm1, %v5716_v1  ;;  %v297_v39 = vld [vmem:[%s5843_s28 + $0xb8] sm:$0xff]  ;;  %v298_v40 = vld [vmem:[%s5843_s28 + $0xc0] sm:$0xff] }
  0x20   : > { %222 = vst.msk [vmem:[#allocation2 + $0x10] sm:$0x3] %vm221_vm2, %v5716_v1  ;;  %225 = vst.msk [vmem:[#allocation2 + $0x28] sm:$0x3] %vm221_vm2, %v5716_v1  ;;  %v299_v42 = vld [vmem:[%s5843_s28 + $0xc8] sm:$0xff]  ;;  %v300_v44 = vld [vmem:[%s5843_s28 + $0xd0] sm:$0xff] }
  0x21   : > { %228 = vst.msk [vmem:[#allocation2 + $0x40] sm:$0x3] %vm221_vm2, %v5716_v1  ;;  %231 = vst.msk [vmem:[#allocation2 + $0x58] sm:$0x3] %vm221_vm2, %v5716_v1  ;;  %v301_v45 = vld [vmem:[%s5843_s28 + $0xd8] sm:$0xff]  ;;  %v302_v46 = vld [vmem:[%s5843_s28 + $0xe0] sm:$0xff] }
  0x22   : > { %234 = vst.msk [vmem:[#allocation2 + $0x70] sm:$0x3] %vm221_vm2, %v5716_v1  ;;  %237 = vst.msk [vmem:[#allocation2 + $0x88] sm:$0x3] %vm221_vm2, %v5716_v1  ;;  %v303_v47 = vld [vmem:[%s5843_s28 + $0xe8] sm:$0xff]  ;;  %v304_v57 = vld [vmem:[%s5843_s28 + $0xf0] sm:$0xff] }
  0x23   : > { %240 = vst.msk [vmem:[#allocation2 + $0xa0] sm:$0x3] %vm221_vm2, %v5716_v1  ;;  %243 = vst.msk [vmem:[#allocation2 + $0xb8] sm:$0x3] %vm221_vm2, %v5716_v1  ;;  %v305_v58 = vld [vmem:[%s5843_s28 + $0xf8] sm:$0xff] }
  0x24   : > { %246 = vst.msk [vmem:[#allocation2 + $0xd0] sm:$0x3] %vm221_vm2, %v5716_v1  ;;  %249 = vst.msk [vmem:[#allocation2 + $0xe8] sm:$0x3] %vm221_vm2, %v5716_v1 }
  0x25   : > { %252 = vst.msk [vmem:[#allocation2 + $0x100] sm:$0x3] %vm221_vm2, %v5716_v1  ;;  %255 = vst.msk [vmem:[#allocation2 + $0x118] sm:$0x3] %vm221_vm2, %v5716_v1 }
  0x26   : > { %258 = vst.msk [vmem:[#allocation2 + $0x130] sm:$0x3] %vm221_vm2, %v5716_v1  ;;  %261 = vst.msk [vmem:[#allocation2 + $0x148] sm:$0x3] %vm221_vm2, %v5716_v1 }
  0x27   : > { %264 = vst.msk [vmem:[#allocation2 + $0x160] sm:$0x3] %vm221_vm2, %v5716_v1  ;;  %267 = vst.msk [vmem:[#allocation2 + $0x178] sm:$0x3] %vm221_vm2, %v5716_v1  ;;  %v373_v10 = vld [vmem:[#allocation2 + $0x9] sm:$0xff] }
  0x28   : > { %270 = vst.msk [vmem:[#allocation2 + $0x190] sm:$0x3] %vm221_vm2, %v5716_v1  ;;  %273 = vst.msk [vmem:[#allocation2 + $0x1a8] sm:$0x3] %vm221_vm2, %v5716_v1  ;;  %4866 = vmatmul.mubr.msk.f32.vlgmr.msra.gmra.mrb[0].mxu1 %vm218_vm1, %v373_v10 }
  0x29   : > { %307 = vst.msk [vmem:[#allocation2 + $0x19] sm:$0xff] %vm218_vm1, %v274_v5  ;;  %308 = vst.msk [vmem:[#allocation2 + $0x21] sm:$0xff] %vm218_vm1, %v275_v6  ;;  %4914 = vmatpush3.msk.msra.mxu1 %vm502_vm0, %v371_v3 }
  0x2a   : > { %309 = vst.msk [vmem:[#allocation2 + $0x31] sm:$0xff] %vm218_vm1, %v276_v7  ;;  %310 = vst.msk [vmem:[#allocation2 + $0x39] sm:$0xff] %vm218_vm1, %v277_v11  ;;  %4963 = vmatprep.subr.msk.mxu1 %vm502_vm0, %v5851_v8 }
  0x2b   : > { %311 = vst.msk [vmem:[#allocation2 + $0x49] sm:$0xff] %vm218_vm1, %v278_v12  ;;  %312 = vst.msk [vmem:[#allocation2 + $0x51] sm:$0xff] %vm218_vm1, %v279_v13 }
  0x2c   : > { %313 = vst.msk [vmem:[#allocation2 + $0x61] sm:$0xff] %vm218_vm1, %v280_v14  ;;  %314 = vst.msk [vmem:[#allocation2 + $0x69] sm:$0xff] %vm218_vm1, %v281_v15 }
  0x2d   : > { %315 = vst.msk [vmem:[#allocation2 + $0x79] sm:$0xff] %vm218_vm1, %v282_v16  ;;  %316 = vst.msk [vmem:[#allocation2 + $0x81] sm:$0xff] %vm218_vm1, %v283_v17 }
  0x2e   : > { %317 = vst.msk [vmem:[#allocation2 + $0x91] sm:$0xff] %vm218_vm1, %v284_v18  ;;  %318 = vst.msk [vmem:[#allocation2 + $0x99] sm:$0xff] %vm218_vm1, %v285_v19 }
  0x2f   : > { %319 = vst.msk [vmem:[#allocation2 + $0xa9] sm:$0xff] %vm218_vm1, %v286_v20  ;;  %320 = vst.msk [vmem:[#allocation2 + $0xb1] sm:$0xff] %vm218_vm1, %v287_v21 }
  0x30   : > { %321 = vst.msk [vmem:[#allocation2 + $0xc1] sm:$0xff] %vm218_vm1, %v288_v22  ;;  %322 = vst.msk [vmem:[#allocation2 + $0xc9] sm:$0xff] %vm218_vm1, %v289_v23  ;;  %v374_v30 = vld [vmem:[#allocation2 + $0x19] sm:$0xff]  ;;  %v375_v31 = vld [vmem:[#allocation2 + $0x21] sm:$0xff] }
  0x31   : > { %323 = vst.msk [vmem:[#allocation2 + $0xd9] sm:$0xff] %vm218_vm1, %v290_v24  ;;  %324 = vst.msk [vmem:[#allocation2 + $0xe1] sm:$0xff] %vm218_vm1, %v291_v25  ;;  %v5896_v32 = vld [vmem:[#allocation2 + $0x31] sm:$0xff]  ;;  %4868 = vmatprep.mubr.msk.f32.mxu1 %vm218_vm1, %v374_v30  ;;  %5065 = vmatprep.mubr.msk.f32.mxu0 %vm218_vm1, %v374_v30  ;;  %v5914_v34 = vld [vmem:[#allocation2 + $0x39] sm:$0xff] }
  0x32   : > { %325 = vst.msk [vmem:[#allocation2 + $0xf1] sm:$0xff] %vm218_vm1, %v292_v26  ;;  %326 = vst.msk [vmem:[#allocation2 + $0xf9] sm:$0xff] %vm218_vm1, %v293_v27  ;;  %4869 = vmatmul.mubr.msk.f32.gmra.mrb[2].mxu1 %vm218_vm1, %v375_v31  ;;  %5066 = vmatmul.mubr.msk.f32.vlgmr.msra.gmra.mrb[0].mxu0 %vm218_vm1, %v375_v31  ;;  %v5918_v35 = vld [vmem:[#allocation2 + $0x49] sm:$0xff]  ;;  %v5930_v36 = vld [vmem:[#allocation2 + $0x51] sm:$0xff] }
  0x33   : > { %327 = vst.msk [vmem:[#allocation2 + $0x109] sm:$0xff] %vm218_vm1, %v294_v28  ;;  %328 = vst.msk [vmem:[#allocation2 + $0x111] sm:$0xff] %vm218_vm1, %v295_v29  ;;  %5114 = vmatpush3.msk.msra.mxu0 %vm502_vm0, %v5828_v4  ;;  %4871 = vmatprep.mubr.msk.f32.mxu1 %vm218_vm1, %v5896_v32  ;;  %v5932_v37 = vld [vmem:[#allocation2 + $0x61] sm:$0xff]  ;;  %v5946_v41 = vld [vmem:[#allocation2 + $0x69] sm:$0xff] }
  0x34   : > { %5068 = vmatprep.mubr.msk.f32.mxu0 %vm218_vm1, %v5896_v32  ;;  %5163 = vmatprep.subr.msk.mxu0 %vm502_vm0, %v5906_v33  ;;  %329 = vst.msk [vmem:[#allocation2 + $0x121] sm:$0xff] %vm218_vm1, %v296_v38  ;;  %330 = vst.msk [vmem:[#allocation2 + $0x129] sm:$0xff] %vm218_vm1, %v297_v39  ;;  %v5951_v43 = vld [vmem:[#allocation2 + $0x79] sm:$0xff]  ;;  %v5969_v48 = vld [vmem:[#allocation2 + $0x81] sm:$0xff] }
  0x35   : > { %331 = vst.msk [vmem:[#allocation2 + $0x139] sm:$0xff] %vm218_vm1, %v298_v40  ;;  %332 = vst.msk [vmem:[#allocation2 + $0x141] sm:$0xff] %vm218_vm1, %v299_v42  ;;  %v5972_v49 = vld [vmem:[#allocation2 + $0x91] sm:$0xff]  ;;  %v5982_v50 = vld [vmem:[#allocation2 + $0x99] sm:$0xff] }
  0x36   : > { %4872 = vmatmul.mubr.msk.f32.gmra.mrb[4].mxu1 %vm218_vm1, %v5914_v34  ;;  %5069 = vmatmul.mubr.msk.f32.gmra.mrb[2].mxu0 %vm218_vm1, %v5914_v34  ;;  %333 = vst.msk [vmem:[#allocation2 + $0x151] sm:$0xff] %vm218_vm1, %v300_v44  ;;  %334 = vst.msk [vmem:[#allocation2 + $0x159] sm:$0xff] %vm218_vm1, %v301_v45  ;;  %v5984_v51 = vld [vmem:[#allocation2 + $0xa9] sm:$0xff]  ;;  %v5994_v52 = vld [vmem:[#allocation2 + $0xb1] sm:$0xff] }
  0x37   : > { %4874 = vmatprep.mubr.msk.f32.mxu1 %vm218_vm1, %v5918_v35  ;;  %5071 = vmatprep.mubr.msk.f32.mxu0 %vm218_vm1, %v5918_v35  ;;  %335 = vst.msk [vmem:[#allocation2 + $0x169] sm:$0xff] %vm218_vm1, %v302_v46  ;;  %336 = vst.msk [vmem:[#allocation2 + $0x171] sm:$0xff] %vm218_vm1, %v303_v47  ;;  %v5996_v53 = vld [vmem:[#allocation2 + $0xc1] sm:$0xff]  ;;  %v6006_v54 = vld [vmem:[#allocation2 + $0xc9] sm:$0xff] }
  0x38   : > { %7051 = vst [vmem:[#allocation3_spill] sm:$0xff] %v6006_v54  ;;  %v6008_v55 = vld [vmem:[#allocation2 + $0x1a] sm:$0xff]  ;;  %337 = vst.msk [vmem:[#allocation2 + $0x181] sm:$0xff] %vm218_vm1, %v304_v57  ;;  %v6026_v60 = vld [vmem:[#allocation2 + $0x22] sm:$0xff] }
  0x39   : > { %v6010_v56 = vld [vmem:[#allocation2 + $0xd9] sm:$0xff]  ;;  %338 = vst.msk [vmem:[#allocation2 + $0x189] sm:$0xff] %vm218_vm1, %v305_v58  ;;  %v6024_v59 = vld [vmem:[#allocation2 + $0xe1] sm:$0xff]  ;;  %v6028_v61 = vld [vmem:[#allocation2 + $0xf1] sm:$0xff] }
  0x3a   : > { %4875 = vmatmul.mubr.msk.f32.gmra.mrb[6].mxu1 %vm218_vm1, %v5930_v36  ;;  %5072 = vmatmul.mubr.msk.f32.gmra.mrb[4].mxu0 %vm218_vm1, %v5930_v36  ;;  %7052 = vst [vmem:[#allocation4_spill] sm:$0xff] %v6010_v56  ;;  %7053 = vst [vmem:[#allocation5_spill] sm:$0xff] %v6024_v59  ;;  %v6030_v62 = vld [vmem:[#allocation2 + $0x32] sm:$0xff]  ;;  %v6047_v1 = vld [vmem:[#allocation2 + $0x3a] sm:$0xff] }
  0x3b   : > { %4877 = vmatprep.mubr.msk.f32.mxu1 %vm218_vm1, %v5932_v37  ;;  %5074 = vmatprep.mubr.msk.f32.mxu0 %vm218_vm1, %v5932_v37  ;;  %7054 = vst [vmem:[#allocation6_spill] sm:$0xff] %v6028_v61  ;;  %v6045_v0 = vld [vmem:[#allocation2 + $0xf9] sm:$0xff]  ;;  %v6051_v3 = vld [vmem:[#allocation2 + $0x109] sm:$0xff]  ;;  %v6065_v5 = vld [vmem:[#allocation2 + $0x111] sm:$0xff] }
  0x3c   : > { %7055 = vst [vmem:[#allocation7_spill] sm:$0xff] %v6045_v0  ;;  %7056 = vst [vmem:[#allocation8_spill] sm:$0xff] %v6051_v3  ;;  %v6053_v4 = vld [vmem:[#allocation2 + $0x4a] sm:$0xff]  ;;  %v6067_v6 = vld [vmem:[#allocation2 + $0x52] sm:$0xff] }
  0x3d   : > { %7057 = vst [vmem:[#allocation9_spill] sm:$0xff] %v6065_v5  ;;  %v6069_v7 = vld [vmem:[#allocation2 + $0x121] sm:$0xff]  ;;  %v6081_v10 = vld [vmem:[#allocation2 + $0x129] sm:$0xff]  ;;  %v6085_v12 = vld [vmem:[#allocation2 + $0x139] sm:$0xff] }
  0x3e   : > { %4878 = vmatmul.mubr.msk.f32.gmra.mrb[8].mxu1 %vm218_vm1, %v5946_v41  ;;  %5075 = vmatmul.mubr.msk.f32.gmra.mrb[6].mxu0 %vm218_vm1, %v5946_v41  ;;  %7058 = vst [vmem:[#allocation10_spill] sm:$0xff] %v6069_v7  ;;  %v6071_v9 = vld [vmem:[#allocation2 + $0x62] sm:$0xff]  ;;  %7059 = vst [vmem:[#allocation11_spill] sm:$0xff] %v6081_v10  ;;  %v6083_v11 = vld [vmem:[#allocation2 + $0x6a] sm:$0xff] }
  0x3f   : > { %4880 = vmatprep.mubr.msk.f32.mxu1 %vm218_vm1, %v5951_v43  ;;  %5077 = vmatprep.mubr.msk.f32.mxu0 %vm218_vm1, %v5951_v43  ;;  %7060 = vst [vmem:[#allocation12_spill] sm:$0xff] %v6085_v12  ;;  %v6087_v13 = vld [vmem:[#allocation2 + $0x7a] sm:$0xff]  ;;  %v6099_v15 = vld [vmem:[#allocation2 + $0x82] sm:$0xff]  ;;  %v6101_v16 = vld [vmem:[#allocation2 + $0x151] sm:$0xff] }
  0x40   : > { %v6097_v14 = vld [vmem:[#allocation2 + $0x141] sm:$0xff]  ;;  %7062 = vst [vmem:[#allocation14_spill] sm:$0xff] %v6101_v16  ;;  %v6103_v17 = vld [vmem:[#allocation2 + $0x92] sm:$0xff]  ;;  %v6117_v20 = vld [vmem:[#allocation2 + $0x169] sm:$0xff] }
  0x41   : > { %7061 = vst [vmem:[#allocation13_spill] sm:$0xff] %v6097_v14  ;;  %v6113_v18 = vld [vmem:[#allocation2 + $0x159] sm:$0xff]  ;;  %7064 = vst [vmem:[#allocation16_spill] sm:$0xff] %v6117_v20  ;;  %v6119_v21 = vld [vmem:[#allocation2 + $0xaa] sm:$0xff] }
  0x42   : > { %4881 = vmatmul.mubr.msk.f32.gmra.mrb[10].mxu1 %vm218_vm1, %v5969_v48  ;;  %5078 = vmatmul.mubr.msk.f32.gmra.mrb[8].mxu0 %vm218_vm1, %v5969_v48  ;;  %7063 = vst [vmem:[#allocation15_spill] sm:$0xff] %v6113_v18  ;;  %v6115_v19 = vld [vmem:[#allocation2 + $0x9a] sm:$0xff]  ;;  %v6129_v22 = vld [vmem:[#allocation2 + $0x171] sm:$0xff]  ;;  %v6133_v25 = vld [vmem:[#allocation2 + $0xc2] sm:$0xff] }
  0x43   : > { %4883 = vmatprep.mubr.msk.f32.mxu1 %vm218_vm1, %v5972_v49  ;;  %5080 = vmatprep.mubr.msk.f32.mxu0 %vm218_vm1, %v5972_v49  ;;  %7065 = vst [vmem:[#allocation17_spill] sm:$0xff] %v6129_v22  ;;  %v6131_v23 = vld [vmem:[#allocation2 + $0xb2] sm:$0xff]  ;;  %v339_v24 = vld [vmem:[#allocation2] sm:$0xff]  ;;  %v340_v26 = vld [vmem:[#allocation2 + $0x8] sm:$0xff] }
  0x44   : > { %v6142_v27 = vld [vmem:[#allocation2 + $0xca] sm:$0xff]  ;;  %v6144_v28 = vld [vmem:[#allocation2 + $0x18] sm:$0xff]  ;;  %v6160_v31 = vld [vmem:[#allocation2 + $0x20] sm:$0xff] }
  0x45   : > { %7066 = vst [vmem:[#allocation18_spill] sm:$0xff] %v6144_v28  ;;  %v6146_v29 = vld [vmem:[#allocation2 + $0xda] sm:$0xff]  ;;  %v6154_v30 = vld [vmem:[%s7001_s1 + $0xc] sm:$0xf]  ;;  %7067 = vst [vmem:[#allocation19_spill] sm:$0xff] %v6160_v31 }
  0x46   : > { %4884 = vmatmul.mubr.msk.f32.gmra.mrb[12].mxu1 %vm218_vm1, %v5982_v50  ;;  %5081 = vmatmul.mubr.msk.f32.gmra.mrb[10].mxu0 %vm218_vm1, %v5982_v50  ;;  %v6166_v38 = vld [vmem:[#allocation2 + $0x30] sm:$0xff]  ;;  %v6182_v40 = vld [vmem:[#allocation2 + $0xfa] sm:$0xff]  ;;  %v6184_v42 = vld [vmem:[#allocation2 + $0x48] sm:$0xff] }
  0x47   : > { %4886 = vmatprep.mubr.msk.f32.mxu1 %vm218_vm1, %v5984_v51  ;;  %5083 = vmatprep.mubr.msk.f32.mxu0 %vm218_vm1, %v5984_v51  ;;  %7068 = vst [vmem:[#allocation20_spill] sm:$0xff] %v6166_v38  ;;  %v6168_v39 = vld [vmem:[#allocation2 + $0xf2] sm:$0xff]  ;;  %7070 = vst [vmem:[#allocation22_spill] sm:$0xff] %v6184_v42  ;;  %v6186_v44 = vld [vmem:[#allocation2 + $0x10a] sm:$0xff] }
  0x48   : > { %v6196_v45 = vld [vmem:[#allocation2 + $0x50] sm:$0xff]  ;;  %v6200_v47 = vld [vmem:[#allocation2 + $0x60] sm:$0xff]  ;;  %v6212_v58 = vld [vmem:[#allocation2 + $0x68] sm:$0xff] }
  0x49   : > { %7071 = vst [vmem:[#allocation23_spill] sm:$0xff] %v6196_v45  ;;  %v6198_v46 = vld [vmem:[#allocation2 + $0x112] sm:$0xff]  ;;  %7072 = vst [vmem:[#allocation24_spill] sm:$0xff] %v6200_v47  ;;  %v6202_v57 = vld [vmem:[#allocation2 + $0x122] sm:$0xff] }
  0x4a   : > { %4887 = vmatmul.mubr.msk.f32.gmra.mrb[14].mxu1 %vm218_vm1, %v5994_v52  ;;  %5084 = vmatmul.mubr.msk.f32.gmra.mrb[12].mxu0 %vm218_vm1, %v5994_v52  ;;  %7073 = vst [vmem:[#allocation25_spill] sm:$0xff] %v6212_v58 }
  0x4b   : > { %4889 = vmatprep.mubr.msk.f32.mxu1 %vm218_vm1, %v5996_v53  ;;  %5086 = vmatprep.mubr.msk.f32.mxu0 %vm218_vm1, %v5996_v53 }
  0x4e   : > { %4890 = vmatmul.mubr.msk.f32.gmra.mrb[16].mxu1 %vm218_vm1, %v6006_v54  ;;  %5087 = vmatmul.mubr.msk.f32.gmra.mrb[14].mxu0 %vm218_vm1, %v6006_v54  ;;  %v6290_v54 = vld [vmem:[#allocation2 + $0xe0] sm:$0xff] }
  0x4f   : > { %4892 = vmatprep.mubr.msk.f32.mxu1 %vm218_vm1, %v6010_v56  ;;  %5115 = vmatprep.mubr.msk.f32.mxu0 %vm218_vm1, %v6008_v55  ;;  %v6278_v56 = vld [vmem:[#allocation2 + $0x18a] sm:$0xff] }
  0x50   : > { %7081 = vst [vmem:[#allocation33_spill] sm:$0xff] %v6278_v56 }
  0x52   : > { %4893 = vmatmul.mubr.msk.f32.gmra.mrb[18].mxu1 %vm218_vm1, %v6024_v59  ;;  %5116 = vmatmul.mubr.msk.f32.vlgmr.msra.gmra.mrb[0].mxu0 %vm218_vm1, %v6026_v60  ;;  %v6266_v59 = vld [vmem:[#allocation2 + $0x182] sm:$0xff] }
  0x53   : > { %5164 = vmatpush3.msk.msra.mxu0 %vm502_vm0, %v5906_v33  ;;  %4895 = vmatprep.mubr.msk.f32.mxu1 %vm218_vm1, %v6028_v61  ;;  %v6162_v33 = vld [vmem:[#allocation2 + $0xe2] sm:$0xff]  ;;  %7080 = vst [vmem:[#allocation32_spill] sm:$0xff] %v6266_v59 }
  0x54   : > { %5118 = vmatprep.mubr.msk.f32.mxu0 %vm218_vm1, %v6030_v62  ;;  %5213 = vmatprep.subr.msk.mxu0 %vm502_vm0, %v6035_v63  ;;  %v6264_v61 = vld [vmem:[#allocation2 + $0xc0] sm:$0xff] }
  0x56   : > { %4896 = vmatmul.mubr.msk.f32.gmra.mrb[20].mxu1 %vm218_vm1, %v6045_v0  ;;  %5119 = vmatmul.mubr.msk.f32.gmra.mrb[2].mxu0 %vm218_vm1, %v6047_v1  ;;  %v6262_v0 = vld [vmem:[#allocation2 + $0x172] sm:$0xff] }
  0x57   : > { %4898 = vmatprep.mubr.msk.f32.mxu1 %vm218_vm1, %v6051_v3  ;;  %5121 = vmatprep.mubr.msk.f32.mxu0 %vm218_vm1, %v6053_v4  ;;  %v6260_v3 = vld [vmem:[#allocation2 + $0xb0] sm:$0xff]  ;;  %7079 = vst [vmem:[#allocation31_spill] sm:$0xff] %v6262_v0 }
  0x58   : > { %7078 = vst [vmem:[#allocation30_spill] sm:$0xff] %v6260_v3 }
  0x5a   : > { %4899 = vmatmul.mubr.msk.f32.gmra.mrb[22].mxu1 %vm218_vm1, %v6065_v5  ;;  %5122 = vmatmul.mubr.msk.f32.gmra.mrb[4].mxu0 %vm218_vm1, %v6067_v6  ;;  %v6250_v5 = vld [vmem:[#allocation2 + $0x16a] sm:$0xff] }
  0x5b   : > { %4901 = vmatprep.mubr.msk.f32.mxu1 %vm218_vm1, %v6069_v7  ;;  %5124 = vmatprep.mubr.msk.f32.mxu0 %vm218_vm1, %v6071_v9  ;;  %v6248_v7 = vld [vmem:[#allocation2 + $0xa8] sm:$0xff] }
  0x5e   : > { %4902 = vmatmul.mubr.msk.f32.gmra.mrb[24].mxu1 %vm218_vm1, %v6081_v10  ;;  %5125 = vmatmul.mubr.msk.f32.gmra.mrb[6].mxu0 %vm218_vm1, %v6083_v11  ;;  %v6246_v10 = vld [vmem:[#allocation2 + $0x15a] sm:$0xff] }
  0x5f   : > { %4904 = vmatprep.mubr.msk.f32.mxu1 %vm218_vm1, %v6085_v12  ;;  %5127 = vmatprep.mubr.msk.f32.mxu0 %vm218_vm1, %v6087_v13  ;;  %v6244_v12 = vld [vmem:[#allocation2 + $0x98] sm:$0xff] }
  0x60   : > { %7077 = vst [vmem:[#allocation29_spill] sm:$0xff] %v6244_v12 }
  0x62   : > { %4905 = vmatmul.mubr.msk.f32.gmra.mrb[26].mxu1 %vm218_vm1, %v6097_v14  ;;  %5128 = vmatmul.mubr.msk.f32.gmra.mrb[8].mxu0 %vm218_vm1, %v6099_v15  ;;  %v6234_v14 = vld [vmem:[#allocation2 + $0x152] sm:$0xff] }
  0x63   : > { %4907 = vmatprep.mubr.msk.f32.mxu1 %vm218_vm1, %v6101_v16  ;;  %5130 = vmatprep.mubr.msk.f32.mxu0 %vm218_vm1, %v6103_v17  ;;  %v6232_v16 = vld [vmem:[#allocation2 + $0x90] sm:$0xff] }
  0x64   : > { %7076 = vst [vmem:[#allocation28_spill] sm:$0xff] %v6232_v16 }
  0x66   : > { %4908 = vmatmul.mubr.msk.f32.gmra.mrb[28].mxu1 %vm218_vm1, %v6113_v18  ;;  %5131 = vmatmul.mubr.msk.f32.gmra.mrb[10].mxu0 %vm218_vm1, %v6115_v19  ;;  %v6230_v18 = vld [vmem:[#allocation2 + $0x142] sm:$0xff] }
  0x67   : > { %4910 = vmatprep.mubr.msk.f32.mxu1 %vm218_vm1, %v6117_v20  ;;  %5133 = vmatprep.mubr.msk.f32.mxu0 %vm218_vm1, %v6119_v21  ;;  %v6228_v20 = vld [vmem:[#allocation2 + $0x80] sm:$0xff] }
  0x68   : > { %7075 = vst [vmem:[#allocation27_spill] sm:$0xff] %v6228_v20 }
  0x6a   : > { %4911 = vmatmul.mubr.msk.f32.gmra.mrb[30].mxu1 %vm218_vm1, %v6129_v22  ;;  %5134 = vmatmul.mubr.msk.f32.gmra.mrb[12].mxu0 %vm218_vm1, %v6131_v23  ;;  %v6218_v22 = vld [vmem:[#allocation2 + $0x13a] sm:$0xff] }
  0x6b   : > { %4915 = vmatprep.mubr.msk.f32.mxu1 %vm218_vm1, %v339_v24  ;;  %5136 = vmatprep.mubr.msk.f32.mxu0 %vm218_vm1, %v6133_v25  ;;  %v6214_v24 = vld [vmem:[#allocation2 + $0x12a] sm:$0xff] }
  0x6e   : > { %4916 = vmatmul.mubr.msk.f32.vlgmr.msra.gmra.mrb[0].mxu1 %vm218_vm1, %v340_v26  ;;  %5137 = vmatmul.mubr.msk.f32.gmra.mrb[14].mxu0 %vm218_vm1, %v6142_v27  ;;  %v6216_v26 = vld [vmem:[#allocation2 + $0x78] sm:$0xff] }
  0x6f   : > { %4918 = vmatprep.mubr.msk.f32.mxu1 %vm218_vm1, %v6144_v28  ;;  %5139 = vmatprep.mubr.msk.f32.mxu0 %vm218_vm1, %v6146_v29  ;;  %7074 = vst [vmem:[#allocation26_spill] sm:$0xff] %v6216_v26  ;;  %v6280_v28 = vld [vmem:[#allocation2 + $0xd8] sm:$0xff] }
  0x70   : > { %4964 = vmatpush3.msk.msra.mxu1 %vm502_vm0, %v5851_v8  ;;  %v6180_v8 = vld [vmem:[#allocation2 + $0x38] sm:$0xff] }
  0x71   : > { %5013 = vmatprep.subr.msk.mxu1 %vm502_vm0, %v6154_v30  ;;  %7069 = vst [vmem:[#allocation21_spill] sm:$0xff] %v6180_v8 }
  0x72   : > { %4919 = vmatmul.mubr.msk.f32.gmra.mrb[2].mxu1 %vm218_vm1, %v6160_v31  ;;  %5140 = vmatmul.mubr.msk.f32.gmra.mrb[16].mxu0 %vm218_vm1, %v6162_v33  ;;  %v6276_v31 = vld [vmem:[#allocation2 + $0xc8] sm:$0xff] }
  0x73   : > { %4921 = vmatprep.mubr.msk.f32.mxu1 %vm218_vm1, %v6166_v38  ;;  %5142 = vmatprep.mubr.msk.f32.mxu0 %vm218_vm1, %v6168_v39 }
  0x76   : > { %4922 = vmatmul.mubr.msk.f32.gmra.mrb[4].mxu1 %vm218_vm1, %v6180_v8  ;;  %5143 = vmatmul.mubr.msk.f32.gmra.mrb[18].mxu0 %vm218_vm1, %v6182_v40 }
  0x77   : > { %4924 = vmatprep.mubr.msk.f32.mxu1 %vm218_vm1, %v6184_v42  ;;  %5145 = vmatprep.mubr.msk.f32.mxu0 %vm218_vm1, %v6186_v44 }
  0x7a   : > { %4925 = vmatmul.mubr.msk.f32.gmra.mrb[6].mxu1 %vm218_vm1, %v6196_v45  ;;  %5146 = vmatmul.mubr.msk.f32.gmra.mrb[20].mxu0 %vm218_vm1, %v6198_v46 }
  0x7b   : > { %4927 = vmatprep.mubr.msk.f32.mxu1 %vm218_vm1, %v6200_v47  ;;  %5148 = vmatprep.mubr.msk.f32.mxu0 %vm218_vm1, %v6202_v57 }
  0x7e   : > { %4928 = vmatmul.mubr.msk.f32.gmra.mrb[8].mxu1 %vm218_vm1, %v6212_v58  ;;  %5149 = vmatmul.mubr.msk.f32.gmra.mrb[22].mxu0 %vm218_vm1, %v6214_v24 }
  0x7f   : > { %4930 = vmatprep.mubr.msk.f32.mxu1 %vm218_vm1, %v6216_v26  ;;  %5151 = vmatprep.mubr.msk.f32.mxu0 %vm218_vm1, %v6218_v22 }
  0x82   : > { %4931 = vmatmul.mubr.msk.f32.gmra.mrb[10].mxu1 %vm218_vm1, %v6228_v20  ;;  %5152 = vmatmul.mubr.msk.f32.gmra.mrb[24].mxu0 %vm218_vm1, %v6230_v18 }
  0x83   : > { %4933 = vmatprep.mubr.msk.f32.mxu1 %vm218_vm1, %v6232_v16  ;;  %5154 = vmatprep.mubr.msk.f32.mxu0 %vm218_vm1, %v6234_v14 }
  0x86   : > { %4934 = vmatmul.mubr.msk.f32.gmra.mrb[12].mxu1 %vm218_vm1, %v6244_v12  ;;  %5155 = vmatmul.mubr.msk.f32.gmra.mrb[26].mxu0 %vm218_vm1, %v6246_v10 }
  0x87   : > { %4936 = vmatprep.mubr.msk.f32.mxu1 %vm218_vm1, %v6248_v7  ;;  %5157 = vmatprep.mubr.msk.f32.mxu0 %vm218_vm1, %v6250_v5 }
  0x8a   : > { %4937 = vmatmul.mubr.msk.f32.gmra.mrb[14].mxu1 %vm218_vm1, %v6260_v3  ;;  %5158 = vmatmul.mubr.msk.f32.gmra.mrb[28].mxu0 %vm218_vm1, %v6262_v0  ;;  %v6297_v0 = vld [vmem:[%s7001_s1 + $0x20] sm:$0xf] }
  0x8b   : > { %4939 = vmatprep.mubr.msk.f32.mxu1 %vm218_vm1, %v6264_v61  ;;  %5160 = vmatprep.mubr.msk.f32.mxu0 %vm218_vm1, %v6266_v59  ;;  %v6292_v59 = vld [vmem:[#allocation2 + $0xf0] sm:$0xff] }
  0x8e   : > { %4940 = vmatmul.mubr.msk.f32.gmra.mrb[16].mxu1 %vm218_vm1, %v6276_v31  ;;  %5161 = vmatmul.mubr.msk.f32.gmra.mrb[30].mxu0 %vm218_vm1, %v6278_v56  ;;  %v6307_v56 = vld [vmem:[#allocation2 + $0xf8] sm:$0xff] }
  0x8f   : > { %4942 = vmatprep.mubr.msk.f32.mxu1 %vm218_vm1, %v6280_v28  ;;  %5165 = vmatprep.mubr.msk.f32.mxu0 %vm218_vm1, %v6166_v38  ;;  %v6311_v38 = vld [vmem:[#allocation2 + $0x108] sm:$0xff] }
  0x92   : > { %4943 = vmatmul.mubr.msk.f32.gmra.mrb[18].mxu1 %vm218_vm1, %v6290_v54  ;;  %5166 = vmatmul.mubr.msk.f32.vlgmr.msra.gmra.mrb[0].mxu0 %vm218_vm1, %v6180_v8  ;;  %v6337_v8 = vld [vmem:[#allocation2 + $0x138] sm:$0xff] }
  0x93   : > { %5214 = vmatpush3.msk.msra.mxu0 %vm502_vm0, %v6035_v63  ;;  %4945 = vmatprep.mubr.msk.f32.mxu1 %vm218_vm1, %v6292_v59  ;;  %v6323_v63 = vld [vmem:[#allocation2 + $0x110] sm:$0xff] }
  0x94   : > { %5168 = vmatprep.mubr.msk.f32.mxu0 %vm218_vm1, %v6184_v42  ;;  %5263 = vmatprep.subr.msk.mxu0 %vm502_vm0, %v6297_v0  ;;  %v6325_v42 = vld [vmem:[#allocation2 + $0x120] sm:$0xff] }
  0x96   : > { %4946 = vmatmul.mubr.msk.f32.gmra.mrb[20].mxu1 %vm218_vm1, %v6307_v56  ;;  %5169 = vmatmul.mubr.msk.f32.gmra.mrb[2].mxu0 %vm218_vm1, %v6196_v45  ;;  %v6335_v45 = vld [vmem:[#allocation2 + $0x128] sm:$0xff] }
  0x97   : > { %4948 = vmatprep.mubr.msk.f32.mxu1 %vm218_vm1, %v6311_v38  ;;  %5171 = vmatprep.mubr.msk.f32.mxu0 %vm218_vm1, %v6200_v47  ;;  %v6349_v47 = vld [vmem:[#allocation2 + $0x150] sm:$0xff] }
  0x9a   : > { %4949 = vmatmul.mubr.msk.f32.gmra.mrb[22].mxu1 %vm218_vm1, %v6323_v63  ;;  %5172 = vmatmul.mubr.msk.f32.gmra.mrb[4].mxu0 %vm218_vm1, %v6212_v58  ;;  %v6347_v58 = vld [vmem:[#allocation2 + $0x140] sm:$0xff] }
  0x9b   : > { %4951 = vmatprep.mubr.msk.f32.mxu1 %vm218_vm1, %v6325_v42  ;;  %5174 = vmatprep.mubr.msk.f32.mxu0 %vm218_vm1, %v6216_v26  ;;  %v6361_v26 = vld [vmem:[#allocation2 + $0x168] sm:$0xff] }
  0x9e   : > { %4952 = vmatmul.mubr.msk.f32.gmra.mrb[24].mxu1 %vm218_vm1, %v6335_v45  ;;  %5175 = vmatmul.mubr.msk.f32.gmra.mrb[6].mxu0 %vm218_vm1, %v6228_v20  ;;  %v6359_v20 = vld [vmem:[#allocation2 + $0x158] sm:$0xff] }
  0x9f   : > { %4954 = vmatprep.mubr.msk.f32.mxu1 %vm218_vm1, %v6337_v8  ;;  %5177 = vmatprep.mubr.msk.f32.mxu0 %vm218_vm1, %v6232_v16  ;;  %v1055_v16 = vld [vmem:[#allocation2 + $0x2] sm:$0xff] }
  0xa2   : > { %4955 = vmatmul.mubr.msk.f32.gmra.mrb[26].mxu1 %vm218_vm1, %v6347_v58  ;;  %5178 = vmatmul.mubr.msk.f32.gmra.mrb[8].mxu0 %vm218_vm1, %v6244_v12  ;;  %v6371_v12 = vld [vmem:[#allocation2 + $0x170] sm:$0xff] }
  0xa3   : > { %4957 = vmatprep.mubr.msk.f32.mxu1 %vm218_vm1, %v6349_v47  ;;  %5180 = vmatprep.mubr.msk.f32.mxu0 %vm218_vm1, %v6248_v7 }
  0xa6   : > { %4958 = vmatmul.mubr.msk.f32.gmra.mrb[28].mxu1 %vm218_vm1, %v6359_v20  ;;  %5181 = vmatmul.mubr.msk.f32.gmra.mrb[10].mxu0 %vm218_vm1, %v6260_v3  ;;  %v1056_v3 = vld [vmem:[#allocation2 + $0xa] sm:$0xff] }
  0xa7   : > { %4960 = vmatprep.mubr.msk.f32.mxu1 %vm218_vm1, %v6361_v26  ;;  %5183 = vmatprep.mubr.msk.f32.mxu0 %vm218_vm1, %v6264_v61 }
  0xaa   : > { %4961 = vmatmul.mubr.msk.f32.gmra.mrb[30].mxu1 %vm218_vm1, %v6371_v12  ;;  %5184 = vmatmul.mubr.msk.f32.gmra.mrb[12].mxu0 %vm218_vm1, %v6276_v31 }
  0xab   : > { %4965 = vmatprep.mubr.msk.f32.mxu1 %vm218_vm1, %v1055_v16  ;;  %5186 = vmatprep.mubr.msk.f32.mxu0 %vm218_vm1, %v6280_v28  ;;  %v2647_v16 = vld [vmem:[#allocation2 + $0x1a0] sm:$0xff] }
  0xae   : > { %4966 = vmatmul.mubr.msk.f32.vlgmr.msra.gmra.mrb[0].mxu1 %vm218_vm1, %v1056_v3  ;;  %5187 = vmatmul.mubr.msk.f32.gmra.mrb[14].mxu0 %vm218_vm1, %v6290_v54  ;;  %v2646_v3 = vld [vmem:[#allocation2 + $0x198] sm:$0xff] }
  0xaf   : > { %4968 = vmatprep.mubr.msk.f32.mxu1 %vm218_vm1, %v6008_v55  ;;  %5189 = vmatprep.mubr.msk.f32.mxu0 %vm218_vm1, %v6292_v59  ;;  %v6431_v55 = vld [vmem:[#allocation2 + $0x180] sm:$0xff] }
  0xb0   : > { %5014 = vmatpush3.msk.msra.mxu1 %vm502_vm0, %v6154_v30  ;;  %v7096_v30 = vld [vmem:[#allocation24_spill] sm:$0xff] }
  0xb1   : > { %5313 = vmatprep.subr.msk.mxu1 %vm502_vm0, %v5814_v2 }
  0xb2   : > { %4969 = vmatmul.mubr.msk.f32.gmra.mrb[2].mxu1 %vm218_vm1, %v6026_v60  ;;  %5190 = vmatmul.mubr.msk.f32.gmra.mrb[16].mxu0 %vm218_vm1, %v6307_v56  ;;  %v6441_v60 = vld [vmem:[#allocation2 + $0x188] sm:$0xff] }
  0xb3   : > { %4971 = vmatprep.mubr.msk.f32.mxu1 %vm218_vm1, %v6030_v62  ;;  %5192 = vmatprep.mubr.msk.f32.mxu0 %vm218_vm1, %v6311_v38 }
  0xb6   : > { %4972 = vmatmul.mubr.msk.f32.gmra.mrb[4].mxu1 %vm218_vm1, %v6047_v1  ;;  %5193 = vmatmul.mubr.msk.f32.gmra.mrb[18].mxu0 %vm218_vm1, %v6323_v63 }
  0xb7   : > { %4974 = vmatprep.mubr.msk.f32.mxu1 %vm218_vm1, %v6053_v4  ;;  %5195 = vmatprep.mubr.msk.f32.mxu0 %vm218_vm1, %v6325_v42 }
  0xba   : > { %4975 = vmatmul.mubr.msk.f32.gmra.mrb[6].mxu1 %vm218_vm1, %v6067_v6  ;;  %5196 = vmatmul.mubr.msk.f32.gmra.mrb[20].mxu0 %vm218_vm1, %v6335_v45 }
  0xbb   : > { %4977 = vmatprep.mubr.msk.f32.mxu1 %vm218_vm1, %v6071_v9  ;;  %5198 = vmatprep.mubr.msk.f32.mxu0 %vm218_vm1, %v6337_v8 }
  0xbe   : > { %4978 = vmatmul.mubr.msk.f32.gmra.mrb[8].mxu1 %vm218_vm1, %v6083_v11  ;;  %5199 = vmatmul.mubr.msk.f32.gmra.mrb[22].mxu0 %vm218_vm1, %v6347_v58 }
  0xbf   : > { %4980 = vmatprep.mubr.msk.f32.mxu1 %vm218_vm1, %v6087_v13  ;;  %5201 = vmatprep.mubr.msk.f32.mxu0 %vm218_vm1, %v6349_v47 }
  0xc2   : > { %4981 = vmatmul.mubr.msk.f32.gmra.mrb[10].mxu1 %vm218_vm1, %v6099_v15  ;;  %5202 = vmatmul.mubr.msk.f32.gmra.mrb[24].mxu0 %vm218_vm1, %v6359_v20 }
  0xc3   : > { %4983 = vmatprep.mubr.msk.f32.mxu1 %vm218_vm1, %v6103_v17  ;;  %5204 = vmatprep.mubr.msk.f32.mxu0 %vm218_vm1, %v6361_v26 }
  0xc6   : > { %4984 = vmatmul.mubr.msk.f32.gmra.mrb[12].mxu1 %vm218_vm1, %v6115_v19  ;;  %5205 = vmatmul.mubr.msk.f32.gmra.mrb[26].mxu0 %vm218_vm1, %v6371_v12 }
  0xc7   : > { %4986 = vmatprep.mubr.msk.f32.mxu1 %vm218_vm1, %v6119_v21  ;;  %5207 = vmatprep.mubr.msk.f32.mxu0 %vm218_vm1, %v6431_v55 }
  0xca   : > { %4987 = vmatmul.mubr.msk.f32.gmra.mrb[14].mxu1 %vm218_vm1, %v6131_v23  ;;  %5208 = vmatmul.mubr.msk.f32.gmra.mrb[28].mxu0 %vm218_vm1, %v6441_v60 }
  0xcb   : > { %4989 = vmatprep.mubr.msk.f32.mxu1 %vm218_vm1, %v6133_v25  ;;  %5210 = vmatprep.mubr.msk.f32.mxu0 %vm218_vm1, %v2646_v3  ;;  %v7098_v3 = vld [vmem:[#allocation25_spill] sm:$0xff] }
  0xce   : > { %4990 = vmatmul.mubr.msk.f32.gmra.mrb[16].mxu1 %vm218_vm1, %v6142_v27  ;;  %5211 = vmatmul.mubr.msk.f32.gmra.mrb[30].mxu0 %vm218_vm1, %v2647_v16  ;;  %v7099_v16 = vld [vmem:[#allocation11_spill] sm:$0xff] }
  0xcf   : > { %4992 = vmatprep.mubr.msk.f32.mxu1 %vm218_vm1, %v6146_v29  ;;  %5215 = vmatprep.mubr.msk.f32.mxu0 %vm218_vm1, %v5896_v32  ;;  %v7082_v32 = vld [vmem:[#allocation31_spill] sm:$0xff] }
  0xd2   : > { %4993 = vmatmul.mubr.msk.f32.gmra.mrb[18].mxu1 %vm218_vm1, %v6162_v33  ;;  %5216 = vmatmul.mubr.msk.f32.vlgmr.msra.gmra.mrb[0].mxu0 %vm218_vm1, %v5914_v34  ;;  %v7083_v34 = vld [vmem:[#allocation3_spill] sm:$0xff] }
  0xd3   : > { %5264 = vmatpush3.msk.msra.mxu0 %vm502_vm0, %v6297_v0  ;;  %4995 = vmatprep.mubr.msk.f32.mxu1 %vm218_vm1, %v6168_v39  ;;  %v7095_v0 = vld [vmem:[#allocation9_spill] sm:$0xff] }
  0xd4   : > { %5218 = vmatprep.mubr.msk.f32.mxu0 %vm218_vm1, %v5918_v35  ;;  %v7084_v35 = vld [vmem:[#allocation18_spill] sm:$0xff] }
  0xd6   : > { %4996 = vmatmul.mubr.msk.f32.gmra.mrb[20].mxu1 %vm218_vm1, %v6182_v40  ;;  %5219 = vmatmul.mubr.msk.f32.gmra.mrb[2].mxu0 %vm218_vm1, %v5930_v36  ;;  %v7085_v36 = vld [vmem:[#allocation4_spill] sm:$0xff] }
  0xd7   : > { %4998 = vmatprep.mubr.msk.f32.mxu1 %vm218_vm1, %v6186_v44  ;;  %5221 = vmatprep.mubr.msk.f32.mxu0 %vm218_vm1, %v5932_v37  ;;  %v7086_v37 = vld [vmem:[#allocation19_spill] sm:$0xff] }
  0xda   : > { %4999 = vmatmul.mubr.msk.f32.gmra.mrb[22].mxu1 %vm218_vm1, %v6198_v46  ;;  %5222 = vmatmul.mubr.msk.f32.gmra.mrb[4].mxu0 %vm218_vm1, %v5946_v41  ;;  %v7087_v41 = vld [vmem:[#allocation5_spill] sm:$0xff] }
  0xdb   : > { %5001 = vmatprep.mubr.msk.f32.mxu1 %vm218_vm1, %v6202_v57  ;;  %5224 = vmatprep.mubr.msk.f32.mxu0 %vm218_vm1, %v5951_v43  ;;  %v7088_v43 = vld [vmem:[#allocation20_spill] sm:$0xff] }
  0xde   : > { %5002 = vmatmul.mubr.msk.f32.gmra.mrb[24].mxu1 %vm218_vm1, %v6214_v24  ;;  %5225 = vmatmul.mubr.msk.f32.gmra.mrb[6].mxu0 %vm218_vm1, %v5969_v48  ;;  %v7089_v48 = vld [vmem:[#allocation6_spill] sm:$0xff] }
  0xdf   : > { %5004 = vmatprep.mubr.msk.f32.mxu1 %vm218_vm1, %v6218_v22  ;;  %5227 = vmatprep.mubr.msk.f32.mxu0 %vm218_vm1, %v5972_v49  ;;  %v7090_v49 = vld [vmem:[#allocation21_spill] sm:$0xff] }
  0xe2   : > { %5005 = vmatmul.mubr.msk.f32.gmra.mrb[26].mxu1 %vm218_vm1, %v6230_v18  ;;  %5228 = vmatmul.mubr.msk.f32.gmra.mrb[8].mxu0 %vm218_vm1, %v5982_v50  ;;  %v7091_v50 = vld [vmem:[#allocation7_spill] sm:$0xff] }
  0xe3   : > { %5007 = vmatprep.mubr.msk.f32.mxu1 %vm218_vm1, %v6234_v14  ;;  %5230 = vmatprep.mubr.msk.f32.mxu0 %vm218_vm1, %v5984_v51  ;;  %v7092_v51 = vld [vmem:[#allocation22_spill] sm:$0xff] }
  0xe6   : > { %5008 = vmatmul.mubr.msk.f32.gmra.mrb[28].mxu1 %vm218_vm1, %v6246_v10  ;;  %5231 = vmatmul.mubr.msk.f32.gmra.mrb[10].mxu0 %vm218_vm1, %v5994_v52  ;;  %v7093_v52 = vld [vmem:[#allocation8_spill] sm:$0xff] }
  0xe7   : > { %5010 = vmatprep.mubr.msk.f32.mxu1 %vm218_vm1, %v6250_v5  ;;  %5233 = vmatprep.mubr.msk.f32.mxu0 %vm218_vm1, %v5996_v53  ;;  %v7094_v53 = vld [vmem:[#allocation23_spill] sm:$0xff] }
  0xea   : > { %5011 = vmatmul.mubr.msk.f32.gmra.mrb[30].mxu1 %vm218_vm1, %v7082_v32  ;;  %5234 = vmatmul.mubr.msk.f32.gmra.mrb[12].mxu0 %vm218_vm1, %v7083_v34  ;;  %v7100_v34 = vld [vmem:[#allocation26_spill] sm:$0xff] }
  0xeb   : > { %5015 = vmatprep.mubr.msk.f32.mxu1 %vm218_vm1, %v7084_v35  ;;  %5236 = vmatprep.mubr.msk.f32.mxu0 %vm218_vm1, %v7085_v36  ;;  %v7101_v35 = vld [vmem:[#allocation12_spill] sm:$0xff] }
  0xee   : > { %5016 = vmatmul.mubr.msk.f32.vlgmr.msra.gmra.mrb[0].mxu1 %vm218_vm1, %v7086_v37  ;;  %5237 = vmatmul.mubr.msk.f32.gmra.mrb[14].mxu0 %vm218_vm1, %v7087_v41  ;;  %v7102_v37 = vld [vmem:[#allocation27_spill] sm:$0xff] }
  0xef   : > { %5018 = vmatprep.mubr.msk.f32.mxu1 %vm218_vm1, %v7088_v43  ;;  %5239 = vmatprep.mubr.msk.f32.mxu0 %vm218_vm1, %v7089_v48  ;;  %v7103_v43 = vld [vmem:[#allocation13_spill] sm:$0xff] }
  0xf0   : > { %5314 = vmatpush3.msk.msra.mxu1 %vm502_vm0, %v5814_v2  ;;  %v7097_v2 = vld [vmem:[#allocation10_spill] sm:$0xff] }
  0xf2   : > { %5019 = vmatmul.mubr.msk.f32.gmra.mrb[2].mxu1 %vm218_vm1, %v7090_v49  ;;  %5240 = vmatmul.mubr.msk.f32.gmra.mrb[16].mxu0 %vm218_vm1, %v7091_v50  ;;  %v7104_v49 = vld [vmem:[#allocation28_spill] sm:$0xff] }
  0xf3   : > { %5021 = vmatprep.mubr.msk.f32.mxu1 %vm218_vm1, %v7092_v51  ;;  %5242 = vmatprep.mubr.msk.f32.mxu0 %vm218_vm1, %v7093_v52  ;;  %v7105_v51 = vld [vmem:[#allocation14_spill] sm:$0xff] }
  0xf6   : > { %5022 = vmatmul.mubr.msk.f32.gmra.mrb[4].mxu1 %vm218_vm1, %v7094_v53  ;;  %5243 = vmatmul.mubr.msk.f32.gmra.mrb[18].mxu0 %vm218_vm1, %v7095_v0  ;;  %v7106_v53 = vld [vmem:[#allocation29_spill] sm:$0xff] }
  0xf7   : > { %5024 = vmatprep.mubr.msk.f32.mxu1 %vm218_vm1, %v7096_v30  ;;  %5245 = vmatprep.mubr.msk.f32.mxu0 %vm218_vm1, %v7097_v2  ;;  %v7107_v30 = vld [vmem:[#allocation15_spill] sm:$0xff] }
  0xfa   : > { %5025 = vmatmul.mubr.msk.f32.gmra.mrb[6].mxu1 %vm218_vm1, %v7098_v3  ;;  %5246 = vmatmul.mubr.msk.f32.gmra.mrb[20].mxu0 %vm218_vm1, %v7099_v16  ;;  %v7108_v3 = vld [vmem:[#allocation16_spill] sm:$0xff] }
  0xfb   : > { %5027 = vmatprep.mubr.msk.f32.mxu1 %vm218_vm1, %v7100_v34  ;;  %5248 = vmatprep.mubr.msk.f32.mxu0 %vm218_vm1, %v7101_v35  ;;  %v6565_v34 = vld [vmem:[#allocation2 + $0x181] sm:$0xff] }
  0xfe   : > { %5028 = vmatmul.mubr.msk.f32.gmra.mrb[8].mxu1 %vm218_vm1, %v7102_v37  ;;  %5249 = vmatmul.mubr.msk.f32.gmra.mrb[22].mxu0 %vm218_vm1, %v7103_v43  ;;  %v7109_v37 = vld [vmem:[#allocation30_spill] sm:$0xff] }
  0xff   : > { %5030 = vmatprep.mubr.msk.f32.mxu1 %vm218_vm1, %v7104_v49  ;;  %5251 = vmatprep.mubr.msk.f32.mxu0 %vm218_vm1, %v7105_v51  ;;  %v7110_v49 = vld [vmem:[#allocation17_spill] sm:$0xff] }
 0x102   : > { %5031 = vmatmul.mubr.msk.f32.gmra.mrb[10].mxu1 %vm218_vm1, %v7106_v53  ;;  %5252 = vmatmul.mubr.msk.f32.gmra.mrb[24].mxu0 %vm218_vm1, %v7107_v30  ;;  %v6575_v53 = vld [vmem:[#allocation2 + $0x189] sm:$0xff] }
 0x103   : > { %5033 = vmatprep.mubr.msk.f32.mxu1 %vm218_vm1, %v6248_v7  ;;  %5254 = vmatprep.mubr.msk.f32.mxu0 %vm218_vm1, %v7108_v3  ;;  %v3036_v7 = vld [vmem:[#allocation2 + $0x199] sm:$0xff] }
 0x106   : > { %5034 = vmatmul.mubr.msk.f32.gmra.mrb[12].mxu1 %vm218_vm1, %v7109_v37  ;;  %5255 = vmatmul.mubr.msk.f32.gmra.mrb[26].mxu0 %vm218_vm1, %v7110_v49  ;;  %v3037_v37 = vld [vmem:[#allocation2 + $0x1a1] sm:$0xff] }
 0x107   : > { %5036 = vmatprep.mubr.msk.f32.mxu1 %vm218_vm1, %v6264_v61  ;;  %5257 = vmatprep.mubr.msk.f32.mxu0 %vm218_vm1, %v6565_v34  ;;  %v3427_v61 = vld [vmem:[#allocation2 + $0x1a2] sm:$0xff] }
 0x10a   : > { %5037 = vmatmul.mubr.msk.f32.gmra.mrb[14].mxu1 %vm218_vm1, %v6276_v31  ;;  %5258 = vmatmul.mubr.msk.f32.gmra.mrb[28].mxu0 %vm218_vm1, %v6575_v53 }
 0x10b   : > { %5039 = vmatprep.mubr.msk.f32.mxu1 %vm218_vm1, %v6280_v28  ;;  %5260 = vmatprep.mubr.msk.f32.mxu0 %vm218_vm1, %v3036_v7 }
 0x10e   : > { %5040 = vmatmul.mubr.msk.f32.gmra.mrb[16].mxu1 %vm218_vm1, %v6290_v54  ;;  %5261 = vmatmul.mubr.msk.f32.gmra.mrb[30].mxu0 %vm218_vm1, %v3037_v37  ;;  %v7111_v54 = vld [vmem:[#allocation32_spill] sm:$0xff] }
 0x10f   : > { %5042 = vmatprep.mubr.msk.f32.mxu1 %vm218_vm1, %v6292_v59  ;;  %5265 = vmatprep.mubr.msk.f32.mxu0 %vm218_vm1, %v6030_v62  ;;  %v7112_v59 = vld [vmem:[#allocation33_spill] sm:$0xff] }
 0x112   : > { %5043 = vmatmul.mubr.msk.f32.gmra.mrb[18].mxu1 %vm218_vm1, %v6307_v56  ;;  %5266 = vmatmul.mubr.msk.f32.vlgmr.msra.gmra.mrb[0].mxu0 %vm218_vm1, %v6047_v1  ;;  %v3426_v56 = vld [vmem:[#allocation2 + $0x19a] sm:$0xff] }
 0x113   : > { %5045 = vmatprep.mubr.msk.f32.mxu1 %vm218_vm1, %v6311_v38  ;;  %5268 = vmatprep.mubr.msk.f32.mxu0 %vm218_vm1, %v6053_v4 }
 0x116   : > { %5046 = vmatmul.mubr.msk.f32.gmra.mrb[20].mxu1 %vm218_vm1, %v6323_v63  ;;  %5269 = vmatmul.mubr.msk.f32.gmra.mrb[2].mxu0 %vm218_vm1, %v6067_v6 }
 0x117   : > { %5048 = vmatprep.mubr.msk.f32.mxu1 %vm218_vm1, %v6325_v42  ;;  %5271 = vmatprep.mubr.msk.f32.mxu0 %vm218_vm1, %v6071_v9 }
 0x11a   : > { %5049 = vmatmul.mubr.msk.f32.gmra.mrb[22].mxu1 %vm218_vm1, %v6335_v45  ;;  %5272 = vmatmul.mubr.msk.f32.gmra.mrb[4].mxu0 %vm218_vm1, %v6083_v11 }
 0x11b   : > { %5051 = vmatprep.mubr.msk.f32.mxu1 %vm218_vm1, %v6337_v8  ;;  %5274 = vmatprep.mubr.msk.f32.mxu0 %vm218_vm1, %v6087_v13 }
 0x11e   : > { %5052 = vmatmul.mubr.msk.f32.gmra.mrb[24].mxu1 %vm218_vm1, %v6347_v58  ;;  %5275 = vmatmul.mubr.msk.f32.gmra.mrb[6].mxu0 %vm218_vm1, %v6099_v15 }
 0x11f   : > { %5054 = vmatprep.mubr.msk.f32.mxu1 %vm218_vm1, %v6349_v47  ;;  %5277 = vmatprep.mubr.msk.f32.mxu0 %vm218_vm1, %v6103_v17 }
 0x122   : > { %5055 = vmatmul.mubr.msk.f32.gmra.mrb[26].mxu1 %vm218_vm1, %v6359_v20  ;;  %5278 = vmatmul.mubr.msk.f32.gmra.mrb[8].mxu0 %vm218_vm1, %v6115_v19 }
 0x123   : > { %5057 = vmatprep.mubr.msk.f32.mxu1 %vm218_vm1, %v6361_v26  ;;  %5280 = vmatprep.mubr.msk.f32.mxu0 %vm218_vm1, %v6119_v21 }
 0x126   : > { %5058 = vmatmul.mubr.msk.f32.gmra.mrb[28].mxu1 %vm218_vm1, %v6371_v12  ;;  %5281 = vmatmul.mubr.msk.f32.gmra.mrb[10].mxu0 %vm218_vm1, %v6131_v23 }
 0x127   : > { %5060 = vmatprep.mubr.msk.f32.mxu1 %vm218_vm1, %v6431_v55  ;;  %5283 = vmatprep.mubr.msk.f32.mxu0 %vm218_vm1, %v6133_v25 }
 0x12a   : > { %5061 = vmatmul.mubr.msk.f32.gmra.mrb[30].mxu1 %vm218_vm1, %v6441_v60  ;;  %5284 = vmatmul.mubr.msk.f32.gmra.mrb[12].mxu0 %vm218_vm1, %v6142_v27 }
 0x12b   : > { %5089 = vmatprep.mubr.msk.f32.mxu1 %vm218_vm1, %v7085_v36  ;;  %5286 = vmatprep.mubr.msk.f32.mxu0 %vm218_vm1, %v6146_v29 }
 0x12e   : > { %5090 = vmatmul.mubr.msk.f32.vlgmr.msra.gmra.mrb[16].mxu1 %vm218_vm1, %v7087_v41  ;;  %5287 = vmatmul.mubr.msk.f32.gmra.mrb[14].mxu0 %vm218_vm1, %v6162_v33 }
 0x12f   : > { %5092 = vmatprep.mubr.msk.f32.mxu1 %vm218_vm1, %v7089_v48  ;;  %5289 = vmatprep.mubr.msk.f32.mxu0 %vm218_vm1, %v6168_v39 }
 0x132   : > { %5093 = vmatmul.mubr.msk.f32.gmra.mrb[18].mxu1 %vm218_vm1, %v7091_v50  ;;  %5290 = vmatmul.mubr.msk.f32.gmra.mrb[16].mxu0 %vm218_vm1, %v6182_v40 }
 0x133   : > { %5095 = vmatprep.mubr.msk.f32.mxu1 %vm218_vm1, %v7093_v52  ;;  %5292 = vmatprep.mubr.msk.f32.mxu0 %vm218_vm1, %v6186_v44 }
 0x136   : > { %5096 = vmatmul.mubr.msk.f32.gmra.mrb[20].mxu1 %vm218_vm1, %v7095_v0  ;;  %5293 = vmatmul.mubr.msk.f32.gmra.mrb[18].mxu0 %vm218_vm1, %v6198_v46 }
 0x137   : > { %5098 = vmatprep.mubr.msk.f32.mxu1 %vm218_vm1, %v7097_v2  ;;  %5295 = vmatprep.mubr.msk.f32.mxu0 %vm218_vm1, %v6202_v57 }
 0x13a   : > { %5099 = vmatmul.mubr.msk.f32.gmra.mrb[22].mxu1 %vm218_vm1, %v7099_v16  ;;  %5296 = vmatmul.mubr.msk.f32.gmra.mrb[20].mxu0 %vm218_vm1, %v6214_v24 }
 0x13b   : > { %5101 = vmatprep.mubr.msk.f32.mxu1 %vm218_vm1, %v7101_v35  ;;  %5298 = vmatprep.mubr.msk.f32.mxu0 %vm218_vm1, %v6218_v22  ;;  %v6722_v22 = vld [vmem:[%s7002_s2] ss:$0 sm:$0xff] }
 0x13e   : > { %5102 = vmatmul.mubr.msk.f32.gmra.mrb[24].mxu1 %vm218_vm1, %v7103_v43  ;;  %5299 = vmatmul.mubr.msk.f32.gmra.mrb[22].mxu0 %vm218_vm1, %v6230_v18 }
 0x13f   : > { %5104 = vmatprep.mubr.msk.f32.mxu1 %vm218_vm1, %v7105_v51  ;;  %5301 = vmatprep.mubr.msk.f32.mxu0 %vm218_vm1, %v6234_v14 }
 0x142   : > { %5105 = vmatmul.mubr.msk.f32.gmra.mrb[26].mxu1 %vm218_vm1, %v7107_v30  ;;  %5302 = vmatmul.mubr.msk.f32.gmra.mrb[24].mxu0 %vm218_vm1, %v6246_v10 }
 0x143   : > { %5107 = vmatprep.mubr.msk.f32.mxu1 %vm218_vm1, %v7108_v3  ;;  %5304 = vmatprep.mubr.msk.f32.mxu0 %vm218_vm1, %v6250_v5 }
 0x146   : > { %5108 = vmatmul.mubr.msk.f32.gmra.mrb[28].mxu1 %vm218_vm1, %v7110_v49  ;;  %5305 = vmatmul.mubr.msk.f32.gmra.mrb[26].mxu0 %vm218_vm1, %v7082_v32 }
 0x147   : > { %5110 = vmatprep.mubr.msk.f32.mxu1 %vm218_vm1, %v6565_v34  ;;  %5307 = vmatprep.mubr.msk.f32.mxu0 %vm218_vm1, %v7111_v54 }
 0x14a   : > { %5111 = vmatmul.mubr.msk.f32.gmra.mrb[30].mxu1 %vm218_vm1, %v6575_v53  ;;  %5308 = vmatmul.mubr.msk.f32.gmra.mrb[28].mxu0 %vm218_vm1, %v7112_v59 }
 0x14b   : > { %5310 = vmatprep.mubr.msk.f32.mxu0 %vm218_vm1, %v3426_v56 }
 0x14e   : > { %5311 = vmatmul.mubr.msk.f32.gmra.mrb[30].mxu0 %vm218_vm1, %v3427_v61 }
 0x1c1   : > { %v5017_v62 = vpop.f32.mrb[0].mxu1 }
 0x1c2   : > { %v1644_v1 = vpop.f32.mrb[1].mxu1 }
 0x1c5   : > { %v5020_v4 = vpop.f32.mrb[2].mxu1 }
 0x1c6   : > { %v1654_v5 = vpop.f32.mrb[3].mxu1 }
 0x1c9   : > { %v5023_v6 = vpop.f32.mrb[4].mxu1 }
 0x1ca   : > { %v1664_v9 = vpop.f32.mrb[5].mxu1 }
 0x1cd   : > { %v5026_v10 = vpop.f32.mrb[6].mxu1 }
 0x1ce   : > { %v1674_v11 = vpop.f32.mrb[7].mxu1 }
 0x1d1   : > { %v5029_v12 = vpop.f32.mrb[8].mxu1 }
 0x1d2   : > { %v1684_v13 = vpop.f32.mrb[9].mxu1 }
 0x1d5   : > { %v5032_v14 = vpop.f32.mrb[10].mxu1 }
 0x1d6   : > { %v6709_v15 = vpop.f32.mrb[11].mxu1 }
 0x1d9   : > { %v6711_v17 = vpop.f32.mrb[12].mxu1 }
 0x1da   : > { %v6713_v18 = vpop.f32.mrb[13].mxu1 }
 0x1dd   : > { %v6715_v19 = vpop.f32.mrb[14].mxu1 }
 0x1de   : > { %v6717_v20 = vpop.f32.mrb[15].mxu1 }
 0x1e5   : > { %v5267_v21 = vpop.f32.mrb[0].mxu0 }
 0x1e6   : > { %v5315_v23 = vadd.f32 %v5267_v21, %v5017_v62  ;;  %v3595_v25 = vpop.f32.mrb[1].mxu0 }
 0x1e7   : > { %v5316_v27 = vadd.f32 %v3595_v25, %v1644_v1 }
 0x1e8   : > { %v6725_v28 = vadd.f32 %v5315_v23, %v6722_v22 }
 0x1e9   : > { %v6728_v29 = vadd.f32 %v5316_v27, %v6722_v22  ;;  %v5270_v31 = vpop.f32.mrb[2].mxu0 }
 0x1ea   : > { %v4530_v33 = vmul.f32 -1.442695, %v6725_v28  ;;  %v5317_v38 = vadd.f32 %v5270_v31, %v5020_v4  ;;  %v3605_v39 = vpop.f32.mrb[3].mxu0 }
 0x1eb   : > { %v4529_v8 = vmul.f32 -1.442695, %v6728_v29  ;;  %v5318_v40 = vadd.f32 %v3605_v39, %v1654_v5 }
 0x1ec   : > { %5580 = vpow2.f32 %v4530_v33  ;;  %v6733_v42 = vadd.f32 %v5317_v38, %v6722_v22 }
 0x1ed   : > { %5582 = vpow2.f32 %v4529_v8  ;;  %v6736_v44 = vadd.f32 %v5318_v40, %v6722_v22  ;;  %v5273_v45 = vpop.f32.mrb[4].mxu0 }
 0x1ee   : > { %v4532_v46 = vmul.f32 -1.442695, %v6733_v42  ;;  %v5319_v47 = vadd.f32 %v5273_v45, %v5023_v6  ;;  %v3615_v57 = vpop.f32.mrb[5].mxu0 }
 0x1ef   : > { %v4531_v58 = vmul.f32 -1.442695, %v6736_v44  ;;  %v5320_v24 = vadd.f32 %v3615_v57, %v1664_v9  ;;  %v4050_v57 = vld [vmem:[%s6779_s18 + $0x8] sm:$0xff] }
 0x1f0   : > { %5584 = vpow2.f32 %v4532_v46  ;;  %v6741_v26 = vadd.f32 %v5319_v47, %v6722_v22 }
 0x1f1   : > { %5586 = vpow2.f32 %v4531_v58  ;;  %v6744_v63 = vadd.f32 %v5320_v24, %v6722_v22  ;;  %v5276_v55 = vpop.f32.mrb[6].mxu0 }
 0x1f2   : > { %v4534_v60 = vmul.f32 -1.442695, %v6741_v26  ;;  %v5321_v32 = vadd.f32 %v5276_v55, %v5026_v10  ;;  %v3625_v36 = vpop.f32.mrb[7].mxu0 }
 0x1f3   : > { %v4533_v41 = vmul.f32 -1.442695, %v6744_v63  ;;  %v5322_v48 = vadd.f32 %v3625_v36, %v1674_v11  ;;  %v4049_v36 = vld [vmem:[%s6779_s18] sm:$0xff] }
 0x1f4   : > { %5588 = vpow2.f32 %v4534_v60  ;;  %v6749_v50 = vadd.f32 %v5321_v32, %v6722_v22 }
 0x1f5   : > { %5590 = vpow2.f32 %v4533_v41  ;;  %v6752_v52 = vadd.f32 %v5322_v48, %v6722_v22  ;;  %v5279_v0 = vpop.f32.mrb[8].mxu0 }
 0x1f6   : > { %v5581_v2 = vpop.eup %5580  ;;  %v4536_v16 = vmul.f32 -1.442695, %v6749_v50  ;;  %v5323_v35 = vadd.f32 %v5279_v0, %v5029_v12  ;;  %v3635_v43 = vpop.f32.mrb[9].mxu0 }
 0x1f7   : > { %v5583_v51 = vpop.eup %5582  ;;  %v3922_v30 = vadd.f32 1.0, %v5581_v2  ;;  %v4535_v3 = vmul.f32 -1.442695, %v6752_v52  ;;  %v5324_v34 = vadd.f32 %v3635_v43, %v1684_v13 }
 0x1f8   : > { %v3921_v49 = vadd.f32 1.0, %v5583_v51  ;;  %5592 = vpow2.f32 %v4536_v16  ;;  %v6757_v53 = vadd.f32 %v5323_v35, %v6722_v22 }
 0x1f9   : > { %5594 = vrcp.f32 %v3922_v30  ;;  %v6760_v7 = vadd.f32 %v5324_v34, %v6722_v22  ;;  %v5282_v37 = vpop.f32.mrb[10].mxu0 }
 0x1fa   : > { %v5585_v54 = vpop.eup %5584  ;;  %5596 = vrcp.f32 %v3921_v49  ;;  %v4538_v56 = vmul.f32 -1.442695, %v6757_v53  ;;  %v5325_v59 = vadd.f32 %v5282_v37, %v5032_v14  ;;  %v3645_v61 = vpop.f32.mrb[11].mxu0 }
 0x1fb   : > { %v5587_v62 = vpop.eup %5586  ;;  %v3924_v1 = vadd.f32 1.0, %v5585_v54  ;;  %5598 = vpow2.f32 %v4535_v3  ;;  %v4537_v4 = vmul.f32 -1.442695, %v6760_v7  ;;  %v5326_v5 = vadd.f32 %v3645_v61, %v6709_v15  ;;  %v4051_v61 = vld [vmem:[%s6779_s18 + $0x10] sm:$0xff] }
 0x1fc   : > { %v3923_v6 = vadd.f32 1.0, %v5587_v62  ;;  %5600 = vpow2.f32 %v4538_v56  ;;  %v6766_v9 = vadd.f32 %v5325_v59, %v6722_v22 }
 0x1fd   : > { %5602 = vrcp.f32 %v3924_v1  ;;  %v6769_v10 = vadd.f32 %v5326_v5, %v6722_v22  ;;  %v5285_v11 = vpop.f32.mrb[12].mxu0 }
 0x1fe   : > { %v5589_v12 = vpop.eup %5588  ;;  %5604 = vrcp.f32 %v3923_v6  ;;  %v4540_v13 = vmul.f32 -1.442695, %v6766_v9  ;;  %v5327_v14 = vadd.f32 %v5285_v11, %v6711_v17  ;;  %v3655_v21 = vpop.f32.mrb[13].mxu0 }
 0x1ff   : > { %v5591_v23 = vpop.eup %5590  ;;  %v3926_v15 = vadd.f32 1.0, %v5589_v12  ;;  %5606 = vpow2.f32 %v4537_v4  ;;  %v4539_v25 = vmul.f32 -1.442695, %v6769_v10  ;;  %v5328_v27 = vadd.f32 %v3655_v21, %v6713_v18 }
 0x200   : > { %v3925_v31 = vadd.f32 1.0, %v5591_v23  ;;  %5608 = vpow2.f32 %v4540_v13  ;;  %v6782_v33 = vadd.f32 %v5327_v14, %v6722_v22 }
 0x201   : > { %5610 = vrcp.f32 %v3926_v15  ;;  %v6785_v17 = vadd.f32 %v5328_v27, %v6722_v22  ;;  %v5091_v38 = vpop.f32.mrb[16].mxu1  ;;  %v5288_v39 = vpop.f32.mrb[14].mxu0 }
 0x202   : > { %v5593_v8 = vpop.eup %5592  ;;  %5612 = vrcp.f32 %v3925_v31  ;;  %v4542_v18 = vmul.f32 -1.442695, %v6782_v33  ;;  %v5329_v40 = vadd.f32 %v5288_v39, %v6715_v19  ;;  %v2114_v45 = vpop.f32.mrb[17].mxu1 }
 0x203   : > { %v3665_v46 = vpop.f32.mrb[15].mxu0  ;;  %v5595_v47 = vpop.eup %5594  ;;  %v3928_v58 = vadd.f32 1.0, %v5593_v8  ;;  %5614 = vpow2.f32 %v4539_v25  ;;  %v4541_v24 = vmul.f32 -1.442695, %v6785_v17  ;;  %v4054_v25 = vld [vmem:[%s6779_s18 + $0x28] sm:$0xff]  ;;  %v4053_v8 = vld [vmem:[%s6779_s18 + $0x20] sm:$0xff] }
 0x204   : > { %v5330_v55 = vadd.f32 %v3665_v46, %v6717_v20  ;;  %v5597_v60 = vpop.eup %5596  ;;  %v4018_v32 = vmul.f32 %v5595_v47, %v6725_v28  ;;  %5616 = vpow2.f32 %v4542_v18  ;;  %v6795_v41 = vadd.f32 %v5329_v40, %v6722_v22 }
 0x205   : > { %v5599_v48 = vpop.eup %5598  ;;  %v4017_v19 = vmul.f32 %v5597_v60, %v6728_v29  ;;  %5618 = vrcp.f32 %v3928_v58  ;;  %v5094_v0 = vpop.f32.mrb[18].mxu1  ;;  %v4052_v29 = vld [vmem:[%s6779_s18 + $0x18] sm:$0xff] }
 0x206   : > { %v6805_v20 = vadd.f32 %v5330_v55, %v6722_v22  ;;  %v5291_v28 = vpop.f32.mrb[16].mxu0  ;;  %v5601_v2 = vpop.eup %5600  ;;  %v4082_v16 = vadd.f32 %v4050_v57, %v4018_v32  ;;  %v3927_v35 = vadd.f32 1.0, %v5599_v48  ;;  %5620 = vpow2.f32 %v4541_v24 }
 0x207   : > { %v4544_v43 = vmul.f32 -1.442695, %v6795_v41  ;;  %v2124_v51 = vpop.f32.mrb[19].mxu1  ;;  %v3675_v30 = vpop.f32.mrb[17].mxu0  ;;  %v4081_v34 = vadd.f32 %v4049_v36, %v4017_v19  ;;  %v3930_v49 = vadd.f32 1.0, %v5601_v2  ;;  %v5331_v54 = vadd.f32 %v5291_v28, %v5091_v38 }
 0x208   : > { %v5603_v3 = vpop.eup %5602  ;;  %v4543_v37 = vmul.f32 -1.442695, %v6805_v20  ;;  %4114 = vst.msk [vmem:[%s6801_s21 + $0x8] sm:$0xff] %vm218_vm1, %v4082_v16  ;;  %5622 = vrcp.f32 %v3927_v35  ;;  %v5332_v62 = vadd.f32 %v3675_v30, %v2114_v45 }
 0x209   : > { %v5605_v56 = vpop.eup %5604  ;;  %v4020_v59 = vmul.f32 %v5603_v3, %v6733_v42  ;;  %4113 = vst.msk [vmem:[%s6801_s21] sm:$0xff] %vm218_vm1, %v4081_v34  ;;  %5624 = vrcp.f32 %v3930_v49  ;;  %v6818_v5 = vadd.f32 %v5331_v54, %v6722_v22  ;;  %v5097_v6 = vpop.f32.mrb[20].mxu1  ;;  %v4055_v54 = vld [vmem:[%s6779_s18 + $0x30] sm:$0xff] }
 0x20a   : > { %v5607_v1 = vpop.eup %5606  ;;  %v4019_v4 = vmul.f32 %v5605_v56, %v6736_v44  ;;  %v5294_v11 = vpop.f32.mrb[18].mxu0  ;;  %5626 = vpow2.f32 %v4544_v43  ;;  %v6821_v14 = vadd.f32 %v5332_v62, %v6722_v22 }
 0x20b   : > { %v5609_v12 = vpop.eup %5608  ;;  %v4084_v13 = vadd.f32 %v4052_v29, %v4020_v59  ;;  %v3929_v42 = vadd.f32 1.0, %v5607_v1  ;;  %v2134_v21 = vpop.f32.mrb[21].mxu1  ;;  %5628 = vpow2.f32 %v4543_v37  ;;  %v4546_v31 = vmul.f32 -1.442695, %v6818_v5 }
 0x20c   : > { %v3685_v23 = vpop.f32.mrb[19].mxu0  ;;  %v5611_v15 = vpop.eup %5610  ;;  %v4083_v44 = vadd.f32 %v4051_v61, %v4019_v4  ;;  %v3932_v27 = vadd.f32 1.0, %v5609_v12  ;;  %v4545_v18 = vmul.f32 -1.442695, %v6821_v14  ;;  %v5333_v40 = vadd.f32 %v5294_v11, %v5094_v0  ;;  %v4056_v0 = vld [vmem:[%s6779_s18 + $0x38] sm:$0xff]  ;;  %v4058_v4 = vld [vmem:[%s6779_s18 + $0x48] sm:$0xff] }
 0x20d   : > { %v5613_v38 = vpop.eup %5612  ;;  %4116 = vst.msk [vmem:[%s6801_s21 + $0x18] sm:$0xff] %vm218_vm1, %v4084_v13  ;;  %v4022_v39 = vmul.f32 %v5611_v15, %v6741_v26  ;;  %5630 = vrcp.f32 %v3929_v42  ;;  %v5334_v47 = vadd.f32 %v3685_v23, %v2124_v51  ;;  %v5100_v57 = vpop.f32.mrb[22].mxu1 }
 0x20e   : > { %v5615_v45 = vpop.eup %5614  ;;  %4115 = vst.msk [vmem:[%s6801_s21 + $0x10] sm:$0xff] %vm218_vm1, %v4083_v44  ;;  %v4021_v46 = vmul.f32 %v5613_v38, %v6744_v63  ;;  %5632 = vrcp.f32 %v3932_v27  ;;  %v5297_v58 = vpop.f32.mrb[20].mxu0  ;;  %v6834_v26 = vadd.f32 %v5333_v40, %v6722_v22 }
 0x20f   : > { %v5617_v24 = vpop.eup %5616  ;;  %v4086_v55 = vadd.f32 %v4054_v25, %v4022_v39  ;;  %v3931_v60 = vadd.f32 1.0, %v5615_v45  ;;  %5634 = vpow2.f32 %v4546_v31  ;;  %v2144_v32 = vpop.f32.mrb[23].mxu1  ;;  %v6838_v63 = vadd.f32 %v5334_v47, %v6722_v22  ;;  %v4057_v39 = vld [vmem:[%s6779_s18 + $0x40] sm:$0xff] }
 0x210   : > { %v3695_v36 = vpop.f32.mrb[21].mxu0  ;;  %v5619_v48 = vpop.eup %5618  ;;  %v4085_v19 = vadd.f32 %v4053_v8, %v4021_v46  ;;  %v3934_v28 = vadd.f32 1.0, %v5617_v24  ;;  %5636 = vpow2.f32 %v4545_v18  ;;  %v4548_v35 = vmul.f32 -1.442695, %v6834_v26 }
 0x211   : > { %v5621_v2 = vpop.eup %5620  ;;  %4118 = vst.msk [vmem:[%s6801_s21 + $0x28] sm:$0xff] %vm218_vm1, %v4086_v55  ;;  %v4024_v16 = vmul.f32 %v5619_v48, %v6749_v50  ;;  %5638 = vrcp.f32 %v3931_v60  ;;  %v5335_v43 = vadd.f32 %v5297_v58, %v5097_v6  ;;  %v4547_v30 = vmul.f32 -1.442695, %v6838_v63  ;;  %v5103_v34 = vpop.f32.mrb[24].mxu1 }
 0x212   : > { %4117 = vst.msk [vmem:[%s6801_s21 + $0x20] sm:$0xff] %vm218_vm1, %v4085_v19  ;;  %5640 = vrcp.f32 %v3934_v28  ;;  %v3933_v51 = vadd.f32 1.0, %v5621_v2  ;;  %v5336_v3 = vadd.f32 %v3695_v36, %v2134_v21  ;;  %v5300_v29 = vpop.f32.mrb[22].mxu0  ;;  %v5623_v49 = vpop.eup %5622 }
 0x213   : > { %v4088_v37 = vadd.f32 %v4056_v0, %v4024_v16  ;;  %5642 = vpow2.f32 %v4548_v35  ;;  %v6849_v50 = vadd.f32 %v5335_v43, %v6722_v22  ;;  %v5337_v56 = vadd.f32 %v5300_v29, %v5100_v57  ;;  %v2154_v59 = vpop.f32.mrb[25].mxu1  ;;  %v3705_v61 = vpop.f32.mrb[23].mxu0  ;;  %v4060_v57 = vld [vmem:[%s6779_s18 + $0x58] sm:$0xff]  ;;  %v4059_v35 = vld [vmem:[%s6779_s18 + $0x50] sm:$0xff]  ;;  %v4062_v29 = vld [vmem:[%s6779_s18 + $0x68] sm:$0xff] }
 0x214   : > { %v5625_v62 = vpop.eup %5624  ;;  %v4023_v1 = vmul.f32 %v5623_v49, %v6752_v52  ;;  %5644 = vrcp.f32 %v3933_v51  ;;  %v6854_v6 = vadd.f32 %v5336_v3, %v6722_v22  ;;  %v5338_v11 = vadd.f32 %v3705_v61, %v2144_v32 }
 0x215   : > { %v5627_v12 = vpop.eup %5626  ;;  %4120 = vst.msk [vmem:[%s6801_s21 + $0x38] sm:$0xff] %vm218_vm1, %v4088_v37  ;;  %v4026_v13 = vmul.f32 %v5625_v62, %v6757_v53  ;;  %5646 = vpow2.f32 %v4547_v30  ;;  %v4550_v42 = vmul.f32 -1.442695, %v6849_v50  ;;  %v6861_v21 = vadd.f32 %v5337_v56, %v6722_v22  ;;  %v5106_v27 = vpop.f32.mrb[26].mxu1 }
 0x216   : > { %v5629_v23 = vpop.eup %5628  ;;  %v4087_v52 = vadd.f32 %v4055_v54, %v4023_v1  ;;  %v3936_v15 = vadd.f32 1.0, %v5627_v12  ;;  %v4549_v44 = vmul.f32 -1.442695, %v6854_v6  ;;  %v6865_v25 = vadd.f32 %v5338_v11, %v6722_v22  ;;  %v5303_v31 = vpop.f32.mrb[24].mxu0 }
 0x217   : > { %v5631_v53 = vpop.eup %5630  ;;  %v4090_v38 = vadd.f32 %v4058_v4, %v4026_v13  ;;  %v3935_v8 = vadd.f32 1.0, %v5629_v23  ;;  %5648 = vpow2.f32 %v4550_v42  ;;  %v4552_v18 = vmul.f32 -1.442695, %v6861_v21  ;;  %v2164_v40 = vpop.f32.mrb[27].mxu1  ;;  %v4061_v4 = vld [vmem:[%s6779_s18 + $0x60] sm:$0xff] }
 0x218   : > { %v3715_v45 = vpop.f32.mrb[25].mxu0  ;;  %v5633_v46 = vpop.eup %5632  ;;  %4119 = vst.msk [vmem:[%s6801_s21 + $0x30] sm:$0xff] %vm218_vm1, %v4087_v52  ;;  %v4025_v47 = vmul.f32 %v5631_v53, %v6760_v7  ;;  %5650 = vrcp.f32 %v3936_v15  ;;  %v5339_v58 = vadd.f32 %v5303_v31, %v5103_v34  ;;  %v4551_v60 = vmul.f32 -1.442695, %v6865_v25 }
 0x219   : > { %v5635_v24 = vpop.eup %5634  ;;  %4122 = vst.msk [vmem:[%s6801_s21 + $0x48] sm:$0xff] %vm218_vm1, %v4090_v38  ;;  %v4028_v55 = vmul.f32 %v5633_v46, %v6766_v9  ;;  %5652 = vrcp.f32 %v3935_v8  ;;  %v5340_v32 = vadd.f32 %v3715_v45, %v2154_v59  ;;  %v5109_v0 = vpop.f32.mrb[28].mxu1 }
 0x21a   : > { %v5637_v36 = vpop.eup %5636  ;;  %v4089_v48 = vadd.f32 %v4057_v39, %v4025_v47  ;;  %v3938_v19 = vadd.f32 1.0, %v5635_v24  ;;  %5654 = vpow2.f32 %v4549_v44  ;;  %v6878_v7 = vadd.f32 %v5339_v58, %v6722_v22  ;;  %v5306_v28 = vpop.f32.mrb[26].mxu0  ;;  %v4063_v24 = vld [vmem:[%s6779_s18 + $0x70] sm:$0xff] }
 0x21b   : > { %v5639_v2 = vpop.eup %5638  ;;  %v4092_v16 = vadd.f32 %v4060_v57, %v4028_v55  ;;  %v3937_v9 = vadd.f32 1.0, %v5637_v36  ;;  %5656 = vpow2.f32 %v4552_v18  ;;  %v6882_v43 = vadd.f32 %v5340_v32, %v6722_v22  ;;  %v2174_v51 = vpop.f32.mrb[29].mxu1 }
 0x21c   : > { %v3725_v30 = vpop.f32.mrb[27].mxu0  ;;  %v5641_v3 = vpop.eup %5640  ;;  %4121 = vst.msk [vmem:[%s6801_s21 + $0x40] sm:$0xff] %vm218_vm1, %v4089_v48  ;;  %v4027_v34 = vmul.f32 %v5639_v2, %v6769_v10  ;;  %5658 = vrcp.f32 %v3938_v19  ;;  %v4554_v49 = vmul.f32 -1.442695, %v6878_v7  ;;  %v5341_v37 = vadd.f32 %v5306_v28, %v5106_v27 }
 0x21d   : > { %v5643_v54 = vpop.eup %5642  ;;  %4124 = vst.msk [vmem:[%s6801_s21 + $0x58] sm:$0xff] %vm218_vm1, %v4092_v16  ;;  %v4030_v56 = vmul.f32 %v5641_v3, %v6782_v33  ;;  %5660 = vrcp.f32 %v3937_v9  ;;  %v4553_v59 = vmul.f32 -1.442695, %v6882_v43  ;;  %v5342_v61 = vadd.f32 %v3725_v30, %v2164_v40  ;;  %v5112_v12 = vpop.f32.mrb[30].mxu1  ;;  %v4064_v40 = vld [vmem:[%s6779_s18 + $0x78] sm:$0xff] }
 0x21e   : > { %v5645_v62 = vpop.eup %5644  ;;  %v4091_v1 = vadd.f32 %v4059_v35, %v4027_v34  ;;  %v3940_v11 = vadd.f32 1.0, %v5643_v54  ;;  %5662 = vpow2.f32 %v4551_v60  ;;  %v6895_v10 = vadd.f32 %v5341_v37, %v6722_v22  ;;  %v5309_v13 = vpop.f32.mrb[28].mxu0 }
 0x21f   : > { %v5647_v42 = vpop.eup %5646  ;;  %v4094_v23 = vadd.f32 %v4062_v29, %v4030_v56  ;;  %v4029_v33 = vmul.f32 %v5645_v62, %v6785_v17  ;;  %5664 = vpow2.f32 %v4554_v49  ;;  %v6899_v52 = vadd.f32 %v5342_v61, %v6722_v22  ;;  %v2184_v15 = vpop.f32.mrb[31].mxu1  ;;  %v4065_v29 = vld [vmem:[%s6779_s18 + $0x80] sm:$0xff] }
 0x220   : > { %v3735_v44 = vpop.f32.mrb[29].mxu0  ;;  %4123 = vst.msk [vmem:[%s6801_s21 + $0x50] sm:$0xff] %vm218_vm1, %v4091_v1  ;;  %5666 = vrcp.f32 %v3940_v11  ;;  %v3939_v27 = vadd.f32 1.0, %v5647_v42  ;;  %v4556_v31 = vmul.f32 -1.442695, %v6895_v10  ;;  %v5343_v53 = vadd.f32 %v5309_v13, %v5109_v0  ;;  %v4067_v42 = vld [vmem:[%s6779_s18 + $0x90] sm:$0xff] }
 0x221   : > { %v5649_v38 = vpop.eup %5648  ;;  %4126 = vst.msk [vmem:[%s6801_s21 + $0x68] sm:$0xff] %vm218_vm1, %v4094_v23  ;;  %v4093_v17 = vadd.f32 %v4061_v4, %v4029_v33  ;;  %5668 = vpow2.f32 %v4553_v59  ;;  %v4555_v39 = vmul.f32 -1.442695, %v6899_v52  ;;  %v5344_v8 = vadd.f32 %v3735_v44, %v2174_v51  ;;  %v5312_v47 = vpop.f32.mrb[30].mxu0  ;;  %v4066_v51 = vld [vmem:[%s6779_s18 + $0x88] sm:$0xff]  ;;  %v4068_v4 = vld [vmem:[%s6779_s18 + $0x98] sm:$0xff] }
 0x222   : > { %v5651_v18 = vpop.eup %5650  ;;  %5670 = vrcp.f32 %v3939_v27  ;;  %v3942_v45 = vadd.f32 1.0, %v5649_v38  ;;  %v6909_v46 = vadd.f32 %v5343_v53, %v6722_v22  ;;  %v5345_v60 = vadd.f32 %v5312_v47, %v5112_v12  ;;  %v3745_v32 = vpop.f32.mrb[31].mxu0 }
 0x223   : > { %v5653_v57 = vpop.eup %5652  ;;  %4125 = vst.msk [vmem:[%s6801_s21 + $0x60] sm:$0xff] %vm218_vm1, %v4093_v17  ;;  %v4032_v58 = vmul.f32 %v5651_v18, %v6795_v41  ;;  %5672 = vpow2.f32 %v4556_v31  ;;  %v6916_v55 = vadd.f32 %v5344_v8, %v6722_v22  ;;  %v5346_v0 = vadd.f32 %v3745_v32, %v2184_v15  ;;  %v4070_v31 = vld [vmem:[%s6779_s18 + $0xa8] sm:$0xff] }
 0x224   : > { %v5655_v36 = vpop.eup %5654  ;;  %v4031_v48 = vmul.f32 %v5653_v57, %v6805_v20  ;;  %5674 = vrcp.f32 %v3942_v45  ;;  %v4558_v19 = vmul.f32 -1.442695, %v6909_v46  ;;  %v6923_v20 = vadd.f32 %v5345_v60, %v6722_v22 }
 0x225   : > { %v5657_v28 = vpop.eup %5656  ;;  %v4096_v2 = vadd.f32 %v4064_v40, %v4032_v58  ;;  %v3941_v41 = vadd.f32 1.0, %v5655_v36  ;;  %5676 = vpow2.f32 %v4555_v39  ;;  %v4557_v16 = vmul.f32 -1.442695, %v6916_v55  ;;  %v4069_v40 = vld [vmem:[%s6779_s18 + $0xa0] sm:$0xff]  ;;  %v4072_v58 = vld [vmem:[%s6779_s18 + $0xb8] sm:$0xff] }
 0x226   : > { %v5659_v35 = vpop.eup %5658  ;;  %v4095_v9 = vadd.f32 %v4063_v24, %v4031_v48  ;;  %v3944_v30 = vadd.f32 1.0, %v5657_v28  ;;  %5678 = vpow2.f32 %v4558_v19  ;;  %v6930_v49 = vadd.f32 %v5346_v0, %v6722_v22  ;;  %v4071_v0 = vld [vmem:[%s6779_s18 + $0xb0] sm:$0xff] }
 0x227   : > { %v5661_v3 = vpop.eup %5660  ;;  %4128 = vst.msk [vmem:[%s6801_s21 + $0x78] sm:$0xff] %vm218_vm1, %v4096_v2  ;;  %v4034_v34 = vmul.f32 %v5659_v35, %v6818_v5  ;;  %5680 = vrcp.f32 %v3941_v41  ;;  %v4560_v56 = vmul.f32 -1.442695, %v6923_v20  ;;  %v4074_v41 = vld [vmem:[%s6779_s18 + $0xc8] sm:$0xff] }
 0x228   : > { %v5663_v37 = vpop.eup %5662  ;;  %4127 = vst.msk [vmem:[%s6801_s21 + $0x70] sm:$0xff] %vm218_vm1, %v4095_v9  ;;  %v4033_v54 = vmul.f32 %v5661_v3, %v6821_v14  ;;  %5682 = vrcp.f32 %v3944_v30  ;;  %v4559_v62 = vmul.f32 -1.442695, %v6930_v49 }
 0x229   : > { %v5665_v59 = vpop.eup %5664  ;;  %v4098_v61 = vadd.f32 %v4066_v51, %v4034_v34  ;;  %v3943_v5 = vadd.f32 1.0, %v5663_v37  ;;  %5684 = vpow2.f32 %v4557_v16  ;;  %v4073_v51 = vld [vmem:[%s6779_s18 + $0xc0] sm:$0xff] }
 0x22a   : > { %v5667_v1 = vpop.eup %5666  ;;  %v4097_v22 = vadd.f32 %v4065_v29, %v4033_v54  ;;  %v3946_v11 = vadd.f32 1.0, %v5665_v59  ;;  %5686 = vpow2.f32 %v4560_v56  ;;  %v4076_v29 = vld [vmem:[%s6779_s18 + $0xd8] sm:$0xff]  ;;  %v4075_v56 = vld [vmem:[%s6779_s18 + $0xd0] sm:$0xff] }
 0x22b   : > { %v5669_v12 = vpop.eup %5668  ;;  %4130 = vst.msk [vmem:[%s6801_s21 + $0x88] sm:$0xff] %vm218_vm1, %v4098_v61  ;;  %v4036_v14 = vmul.f32 %v5667_v1, %v6834_v26  ;;  %5688 = vrcp.f32 %v3943_v5  ;;  %v4078_v5 = vld [vmem:[%s6779_s18 + $0xe8] sm:$0xff] }
 0x22c   : > { %v5671_v13 = vpop.eup %5670  ;;  %4129 = vst.msk [vmem:[%s6801_s21 + $0x80] sm:$0xff] %vm218_vm1, %v4097_v22  ;;  %5690 = vrcp.f32 %v3946_v11  ;;  %v3945_v23 = vadd.f32 1.0, %v5669_v12 }
 0x22d   : > { %v5673_v33 = vpop.eup %5672  ;;  %v4100_v15 = vadd.f32 %v4068_v4, %v4036_v14  ;;  %v4035_v44 = vmul.f32 %v5671_v13, %v6838_v63  ;;  %5692 = vpow2.f32 %v4559_v62  ;;  %v4077_v4 = vld [vmem:[%s6779_s18 + $0xe0] sm:$0xff]  ;;  %v4080_v14 = vld [vmem:[%s6779_s18 + $0xf8] sm:$0xff] }
 0x22e   : > { %v5675_v27 = vpop.eup %5674  ;;  %5694 = vrcp.f32 %v3945_v23  ;;  %v3948_v26 = vadd.f32 1.0, %v5673_v33  ;;  %v4079_v23 = vld [vmem:[%s6779_s18 + $0xf0] sm:$0xff] }
 0x22f   : > { %v5677_v53 = vpop.eup %5676  ;;  %4132 = vst.msk [vmem:[%s6801_s21 + $0x98] sm:$0xff] %vm218_vm1, %v4100_v15  ;;  %v4099_v38 = vadd.f32 %v4067_v42, %v4035_v44  ;;  %v4038_v17 = vmul.f32 %v5675_v27, %v6849_v50 }
 0x230   : > { %v5679_v39 = vpop.eup %5678  ;;  %5696 = vrcp.f32 %v3948_v26  ;;  %v3947_v8 = vadd.f32 1.0, %v5677_v53 }
 0x231   : > { %v5681_v18 = vpop.eup %5680  ;;  %4131 = vst.msk [vmem:[%s6801_s21 + $0x90] sm:$0xff] %vm218_vm1, %v4099_v38  ;;  %v4102_v63 = vadd.f32 %v4070_v31, %v4038_v17  ;;  %v3950_v45 = vadd.f32 1.0, %v5679_v39 }
 0x232   : > { %v5683_v47 = vpop.eup %5682  ;;  %v4037_v57 = vmul.f32 %v5681_v18, %v6854_v6  ;;  %5698 = vrcp.f32 %v3947_v8 }
 0x233   : > { %v5685_v24 = vpop.eup %5684  ;;  %4134 = vst.msk [vmem:[%s6801_s21 + $0xa8] sm:$0xff] %vm218_vm1, %v4102_v63  ;;  %v4040_v50 = vmul.f32 %v5683_v47, %v6861_v21  ;;  %5700 = vrcp.f32 %v3950_v45 }
 0x234   : > { %v5687_v60 = vpop.eup %5686  ;;  %v4101_v32 = vadd.f32 %v4069_v40, %v4037_v57  ;;  %v3949_v36 = vadd.f32 1.0, %v5685_v24 }
 0x235   : > { %v5689_v48 = vpop.eup %5688  ;;  %v4104_v19 = vadd.f32 %v4072_v58, %v4040_v50  ;;  %v3952_v28 = vadd.f32 1.0, %v5687_v60 }
 0x236   : > { %v5691_v2 = vpop.eup %5690  ;;  %4133 = vst.msk [vmem:[%s6801_s21 + $0xa0] sm:$0xff] %vm218_vm1, %v4101_v32  ;;  %v4039_v6 = vmul.f32 %v5689_v48, %v6865_v25  ;;  %5702 = vrcp.f32 %v3949_v36 }
 0x237   : > { %v5693_v21 = vpop.eup %5692  ;;  %4136 = vst.msk [vmem:[%s6801_s21 + $0xb8] sm:$0xff] %vm218_vm1, %v4104_v19  ;;  %v4042_v16 = vmul.f32 %v5691_v2, %v6878_v7  ;;  %5704 = vrcp.f32 %v3952_v28 }
 0x238   : > { %v5695_v35 = vpop.eup %5694  ;;  %v4103_v9 = vadd.f32 %v4071_v0, %v4039_v6  ;;  %v3951_v30 = vadd.f32 1.0, %v5693_v21 }
 0x239   : > { %v4106_v3 = vadd.f32 %v4074_v41, %v4042_v16  ;;  %v4041_v34 = vmul.f32 %v5695_v35, %v6882_v43 }
 0x23a   : > { %v5697_v25 = vpop.eup %5696  ;;  %4135 = vst.msk [vmem:[%s6801_s21 + $0xb0] sm:$0xff] %vm218_vm1, %v4103_v9  ;;  %5706 = vrcp.f32 %v3951_v30 }
 0x23b   : > { %4138 = vst.msk [vmem:[%s6801_s21 + $0xc8] sm:$0xff] %vm218_vm1, %v4106_v3  ;;  %v4105_v7 = vadd.f32 %v4073_v51, %v4041_v34  ;;  %v4044_v37 = vmul.f32 %v5697_v25, %v6895_v10 }
 0x23c   : > { %v5699_v54 = vpop.eup %5698 }
 0x23d   : > { %v5701_v59 = vpop.eup %5700  ;;  %4137 = vst.msk [vmem:[%s6801_s21 + $0xc0] sm:$0xff] %vm218_vm1, %v4105_v7  ;;  %v4108_v43 = vadd.f32 %v4076_v29, %v4044_v37  ;;  %v4043_v61 = vmul.f32 %v5699_v54, %v6899_v52 }
 0x23e   : > { %v4046_v62 = vmul.f32 %v5701_v59, %v6909_v46 }
 0x23f   : > { %4140 = vst.msk [vmem:[%s6801_s21 + $0xd8] sm:$0xff] %vm218_vm1, %v4108_v43  ;;  %v4107_v1 = vadd.f32 %v4075_v56, %v4043_v61 }
 0x240   : > { %v5703_v10 = vpop.eup %5702  ;;  %v4110_v22 = vadd.f32 %v4078_v5, %v4046_v62 }
 0x241   : > { %v5705_v11 = vpop.eup %5704  ;;  %4139 = vst.msk [vmem:[%s6801_s21 + $0xd0] sm:$0xff] %vm218_vm1, %v4107_v1  ;;  %v4045_v12 = vmul.f32 %v5703_v10, %v6916_v55 }
 0x242   : > { %4142 = vst.msk [vmem:[%s6801_s21 + $0xe8] sm:$0xff] %vm218_vm1, %v4110_v22  ;;  %v4048_v52 = vmul.f32 %v5705_v11, %v6923_v20 }
 0x243   : > { %v4109_v46 = vadd.f32 %v4077_v4, %v4045_v12 }
 0x244   : > { %v5707_v13 = vpop.eup %5706  ;;  %v4112_v42 = vadd.f32 %v4080_v14, %v4048_v52 }
 0x245   : > { %4141 = vst.msk [vmem:[%s6801_s21 + $0xe0] sm:$0xff] %vm218_vm1, %v4109_v46  ;;  %v4047_v33 = vmul.f32 %v5707_v13, %v6930_v49 }
 0x246   : > { %4144 = vst.msk [vmem:[%s6801_s21 + $0xf8] sm:$0xff] %vm218_vm1, %v4112_v42 }
 0x247   : > { %v4111_v15 = vadd.f32 %v4079_v23, %v4047_v33 }
 0x249   : > { %4143 = vst.msk [vmem:[%s6801_s21 + $0xf0] sm:$0xff] %vm218_vm1, %v4111_v15 }
 0x24a PF: > { %s14_s15 = sadd.s32 1, %s5714_s15  }
 0x24b   : > { %p11_p4 = scmp.ge.s32.totalorder %s14_s15, 4  }
 0x24d   :  { %13 = sbr.rel (!%p11_p4) target bundleno = 1 (0x1), region = 79 }

</bundles_post_ra>
